<compile_context>
chip_gen: v6e
topology: v6e:2x2x1
jax: 0.10.0
libtpu: 0.0.40
codegen_flags: <defaults>
</compile_context>

<pallas_src>
import functools

import numpy as np
import jax
import jax.numpy as jnp
from jax.experimental import pallas as pl
from jax.experimental.pallas import tpu as pltpu

MIN_BIN_WIDTH = 1e-3
MIN_BIN_HEIGHT = 1e-3
MIN_DERIVATIVE = 1e-3

# softplus^-1(1 - min_derivative): constant padded at both spline ends so the
# boundary derivatives are (numerically) 1.0 — same constant as the reference.
_DERIV_CONST = float(np.log(np.exp(1.0 - MIN_DERIVATIVE) - 1.0))
_D_BOUNDARY = float(MIN_DERIVATIVE + np.log1p(np.exp(_DERIV_CONST)))  # ~= 1.0


# ----------------------------------------------------------------------------
# Fused kernel: FCNN psi + module-level softmax/softplus + unconstrained RQS
# ----------------------------------------------------------------------------
def _nsf_cl_kernel(lower_ref, upper_ref,
                   w1_ref, b1_ref, w2_ref, b2_ref,
                   w3w_ref, b3w_ref, w3h_ref, b3h_ref, w3d_ref, b3d_ref,
                   y_ref, ld_ref, *, K, U, B):
    """One batch tile.  Layout is (features, batch_tile): batch on lanes.

      lower_ref       : (in_dim, TB)  masked coords   -> FCNN input
      upper_ref       : (U, TB)       unmasked coords -> spline input (U % 8 == 0)
      w1/w2 (+biases) : transposed FCNN weights, VMEM resident
      w3w/w3h/w3d     : psi last layer split per parameter head
                        (rows k-major, u-minor; W/H: K*U rows, D: (K-1)*U rows)
      y_ref           : (U, TB)       transformed unmasked coords
      ld_ref          : (1, TB)       sum over U of log|det|
    """
    f32 = jnp.float32
    hp = jax.lax.Precision.HIGHEST
    left = -B
    right = B
    two_b = 2.0 * B
    cW = 1.0 - MIN_BIN_WIDTH * K
    cH = 1.0 - MIN_BIN_HEIGHT * K

    # ---------------- FCNN psi hidden layers (tiny MXU work) ----------------
    h = jnp.tanh(jnp.dot(w1_ref[...], lower_ref[...], precision=hp,
                         preferred_element_type=f32) + b1_ref[...])
    h = jnp.tanh(jnp.dot(w2_ref[...], h, precision=hp,
                         preferred_element_type=f32) + b2_ref[...])

    x = upper_ref[...]                                     # (U, TB)
    xc = jnp.clip(x, left, right)
    inside = (x >= left) & (x <= right)

    # ------------- per-head matmul + double softmax (exp lists) -------------
    # Each head is fully consumed before the next matmul, so only the K
    # unnormalized second-stage exps (+ 1/sum) stay live per head.
    skip_max2 = two_b < 60.0       # second softmax input lies in [0, 2B]

    def head_exps(w_ref, b_ref):
        out = jnp.dot(w_ref[...], h, precision=hp,
                      preferred_element_type=f32) + b_ref[...]   # (K*U, TB)
        blk = [out[k * U:(k + 1) * U, :] for k in range(K)]
        m = blk[0]
        for v in blk[1:]:
            m = jnp.maximum(m, v)
        e1 = [jnp.exp(v - m) for v in blk]
        s1 = e1[0]
        for e in e1[1:]:
            s1 = s1 + e
        scale = two_b / s1          # folds the 2B scaling into normalization
        if skip_max2:
            e2 = [jnp.exp(e * scale) for e in e1]
        else:
            z = [e * scale for e in e1]
            m2 = z[0]
            for v in z[1:]:
                m2 = jnp.maximum(m2, v)
            e2 = [jnp.exp(v - m2) for v in z]
        s2 = e2[0]
        for e in e2[1:]:
            s2 = s2 + e
        # exact reciprocal on purpose: widths/heights feed the log-det sum.
        return e2, 1.0 / s2

    e2w, inv_sw = head_exps(w3w_ref, b3w_ref)
    e2h, inv_sh = head_exps(w3h_ref, b3h_ref)

    # derivative head: raw matmul kept; double-softplus applied lazily per bin
    out_d = jnp.dot(w3d_ref[...], h, precision=hp,
                    preferred_element_type=f32) + b3d_ref[...]   # ((K-1)*U, TB)

    # ---------- fused prefix-sum / bin-search / select loop over k ----------
    cum_w = jnp.zeros_like(xc)
    cum_h = jnp.zeros_like(xc)
    prev_right = left              # left knot of bin k == right knot of k-1
    prev_top = left
    prev_d = _D_BOUNDARY           # derivative at the bin's left knot
    sel_cw = sel_bw = sel_ch = sel_bh = sel_d = sel_d1 = None

    for k in range(K):
        w_k = MIN_BIN_WIDTH + cW * (e2w[k] * inv_sw)
        h_k = MIN_BIN_HEIGHT + cH * (e2h[k] * inv_sh)
        cum_w = cum_w + w_k
        cum_h = cum_h + h_k
        x_left = prev_right
        y_bot = prev_top
        if k == K - 1:             # pin the last knot exactly (matches ref)
            x_right = right
            y_top = right
        else:
            x_right = left + two_b * cum_w
            y_top = left + two_b * cum_h
        bw_k = x_right - x_left
        bh_k = y_top - y_bot
        if k < K - 1:
            d_right = MIN_DERIVATIVE + jax.nn.softplus(
                jax.nn.softplus(out_d[k * U:(k + 1) * U, :]))
        else:
            d_right = _D_BOUNDARY
        if k == 0:
            # bin 0 seeds the accumulators; later bins overwrite where owned.
            sel_cw, sel_bw, sel_ch, sel_bh = x_left, bw_k, y_bot, bh_k
            sel_d, sel_d1 = prev_d, d_right
        else:
            m_k = xc >= x_left
            if k < K - 1:
                m_k = m_k & (xc < x_right)
            sel_cw = jnp.where(m_k, x_left, sel_cw)
            sel_bw = jnp.where(m_k, bw_k, sel_bw)
            sel_ch = jnp.where(m_k, y_bot, sel_ch)
            sel_bh = jnp.where(m_k, bh_k, sel_bh)
            sel_d = jnp.where(m_k, prev_d, sel_d)
            sel_d1 = jnp.where(m_k, d_right, sel_d1)
        prev_right = x_right
        prev_top = y_top
        prev_d = d_right

    # ---------------- rational-quadratic transform + log|det| ---------------
    inv_bw = 1.0 / sel_bw                    # shared by in_delta and theta
    in_delta = sel_bh * inv_bw
    theta = (xc - sel_cw) * inv_bw
    om = 1.0 - theta
    tt = theta * om
    th2 = theta * theta
    numerator = sel_bh * (in_delta * th2 + sel_d * tt)
    denominator = in_delta + (sel_d + sel_d1 - 2.0 * in_delta) * tt
    inv_den = 1.0 / denominator              # exact: feeds the log-det
    y_spl = sel_ch + numerator * inv_den
    dnum = (in_delta * in_delta) * (sel_d1 * th2 + 2.0 * in_delta * tt
                                    + sel_d * om * om)
    ld_spl = jnp.log(dnum * (inv_den * inv_den))

    y_ref[...] = jnp.where(inside, y_spl, x)
    ld_ref[...] = jnp.sum(jnp.where(inside, ld_spl, 0.0), axis=0, keepdims=True)


def _nsf_cl_call(lower_t, upper_t, weights_t, *, K, U, B, block_batch):
    (w1t, b1t, w2t, b2t, w3w_t, b3w_t, w3h_t, b3h_t, w3d_t, b3d_t) = weights_t
    in_dim = lower_t.shape[0]
    bpad = lower_t.shape[1]
    grid = (bpad // block_batch,)

    kern = functools.partial(_nsf_cl_kernel, K=K, U=U, B=float(B))
    full = lambda a: pl.BlockSpec(a.shape, lambda i: (0, 0))
    tile = lambda rows: pl.BlockSpec((rows, block_batch), lambda i: (0, i))

    y_t, ld_t = pl.pallas_call(
        kern,
        out_shape=(jax.ShapeDtypeStruct((U, bpad), jnp.float32),
                   jax.ShapeDtypeStruct((1, bpad), jnp.float32)),
        grid=grid,
        in_specs=[tile(in_dim), tile(U),
                  full(w1t), full(b1t), full(w2t), full(b2t),
                  full(w3w_t), full(b3w_t), full(w3h_t), full(b3h_t),
                  full(w3d_t), full(b3d_t)],
        out_specs=(tile(U), tile(1)),
        compiler_params=pltpu.CompilerParams(
            dimension_semantics=("parallel",),
            vmem_limit_bytes=32 * 1024 * 1024),
    )(lower_t, upper_t, w1t, b1t, w2t, b2t,
      w3w_t, b3w_t, w3h_t, b3h_t, w3d_t, b3d_t)
    return y_t, ld_t


def _pick_block_batch(batch):
    """Generation-aware batch-tile width (review: 128 on v5e / small v7x, else 256)."""
    try:
        kind = jax.devices()[0].device_kind.lower()
    except Exception:
        kind = ""
    if any(t in kind for t in ("v2", "v3", "v4", "v5")):
        return 128                      # 128-wide MXU, single vst slot
    padded256 = -(-max(batch, 1) // 256) * 256
    if ("v7" in kind or "7x" in kind) and padded256 < 512:
        return 128                      # give both v7x TensorCores >= 1 tile
    return 256 if batch > 128 else 128


# ----------------------------------------------------------------------------
# NSF_CL forward (thin XLA glue around the fused kernel)
# ----------------------------------------------------------------------------
def nsf_cl_forward(x, params, *, size, dim, K, B, mask, block_batch=None):
    """params = (w1, b1, w2, b2, w3, b3), w_i: (fan_in, fan_out), b_i: (1, fan_out)."""
    assert K >= 2
    w1, b1, w2, b2, w3, b3 = params
    mask = list(mask)
    mask_idx = np.asarray(mask, dtype=np.int32)
    unmask_idx = np.asarray([d for d in range(dim) if d not in mask],
                            dtype=np.int32)
    n_mask, n_un = len(mask_idx), len(unmask_idx)
    batch = x.shape[0]
    U = size * n_un
    Upad = -(-U // 8) * 8               # sublane-align per-k row chunks
    three_k = 3 * K - 1

    x3 = x.reshape(batch, size, dim)
    lower = x3[:, :, mask_idx].reshape(batch, size * n_mask)
    upper = x3[:, :, unmask_idx].reshape(batch, U)

    # --- split psi's last layer per head; rows k-major, u-minor, u padded ---
    def head_cols(offset, k_count):
        cols = np.full(k_count * Upad, -1, dtype=np.int32)
        for k in range(k_count):
            for u in range(U):
                cols[k * Upad + u] = u * three_k + offset + k
        return cols

    b3f = jnp.reshape(b3, (-1,))

    def head_weights(cols):
        valid = cols >= 0
        safe = np.where(valid, cols, 0)
        w_sel = w3[:, safe]
        b_sel = b3f[safe]
        if not valid.all():             # zero out the padded-u rows
            vmask = jnp.asarray(valid.astype(np.float32))
            w_sel = w_sel * vmask[None, :]
            b_sel = b_sel * vmask
        return jnp.transpose(w_sel), b_sel.reshape(-1, 1)

    w3w_t, b3w_t = head_weights(head_cols(0, K))
    w3h_t, b3h_t = head_weights(head_cols(K, K))
    w3d_t, b3d_t = head_weights(head_cols(2 * K, K - 1))

    weights_t = (jnp.transpose(w1), jnp.reshape(b1, (-1, 1)),
                 jnp.transpose(w2), jnp.reshape(b2, (-1, 1)),
                 w3w_t, b3w_t, w3h_t, b3h_t, w3d_t, b3d_t)

    if block_batch is None:
        block_batch = _pick_block_batch(batch)

    # transpose activations to (features, batch) and pad batch to the lane tile.
    pad_b = (-batch) % block_batch
    lower_t = jnp.pad(jnp.transpose(lower), ((0, 0), (0, pad_b)))
    # padded rows / lanes of `upper` use B+1 (> tail bound) so they hit the
    # identity tail: zero log-det contribution, finite everywhere (clip -> B).
    upper_t = jnp.pad(jnp.transpose(upper), ((0, Upad - U), (0, pad_b)),
                      constant_values=float(B) + 1.0)

    y_t, ld_t = _nsf_cl_call(lower_t, upper_t, weights_t,
                             K=K, U=Upad, B=B, block_batch=block_batch)

    upper_new = jnp.transpose(y_t[:U, :batch])            # (batch, U)
    log_det = ld_t[0, :batch]                             # (batch,)

    out_full = jnp.concatenate(
        [lower.reshape(batch, size, n_mask),
         upper_new.reshape(batch, size, n_un)], axis=2).reshape(batch, -1)
    return out_full, log_det
    # TODO(synk): NSF_CL.inverse (the analytic RQS inverse) is not implemented.


# ----------------------------------------------------------------------------
# Pure-JAX reference (mirrors the PyTorch module) for correctness checking
# ----------------------------------------------------------------------------
def _ref_rqs(x, Wraw, Hraw, Draw, K, B):
    Wm = 2.0 * B * jax.nn.softmax(Wraw, axis=-1)
    Hm = 2.0 * B * jax.nn.softmax(Hraw, axis=-1)
    Dm = jax.nn.softplus(Draw)
    left = bottom = -B
    right = top = B
    R = x.shape[0]
    inside = (x >= left) & (x <= right)
    xc = jnp.clip(x, left, right)

    widths = jax.nn.softmax(Wm, axis=-1)
    widths = MIN_BIN_WIDTH + (1.0 - MIN_BIN_WIDTH * K) * widths
    cw = jnp.pad(jnp.cumsum(widths, axis=-1), ((0, 0), (1, 0)))
    cw = (right - left) * cw + left
    cw = cw.at[:, 0].set(left).at[:, -1].set(right)
    widths_f = cw[:, 1:] - cw[:, :-1]

    const = float(np.log(np.exp(1.0 - MIN_DERIVATIVE) - 1.0))
    dpad = jnp.concatenate([jnp.full((R, 1), const, jnp.float32), Dm,
                            jnp.full((R, 1), const, jnp.float32)], axis=-1)
    derivs = MIN_DERIVATIVE + jax.nn.softplus(dpad)

    heights = jax.nn.softmax(Hm, axis=-1)
    heights = MIN_BIN_HEIGHT + (1.0 - MIN_BIN_HEIGHT * K) * heights
    ch = jnp.pad(jnp.cumsum(heights, axis=-1), ((0, 0), (1, 0)))
    ch = (top - bottom) * ch + bottom
    ch = ch.at[:, 0].set(bottom).at[:, -1].set(top)
    heights_f = ch[:, 1:] - ch[:, :-1]

    bl = cw.at[:, -1].add(1e-6)
    bin_idx = jnp.sum((xc[:, None] >= bl).astype(jnp.int32), axis=-1) - 1
    bin_idx = jnp.clip(bin_idx, 0, K - 1)

    g = lambda a: jnp.take_along_axis(a, bin_idx[:, None], axis=-1)[:, 0]
    in_cw, in_bw, in_ch = g(cw[:, :K]), g(widths_f), g(ch[:, :K])
    in_delta = g(heights_f / widths_f)
    in_d, in_d1, in_h = g(derivs[:, :K]), g(derivs[:, 1:]), g(heights_f)

    theta = (xc - in_cw) / in_bw
    tt = theta * (1.0 - theta)
    num = in_h * (in_delta * theta ** 2 + in_d * tt)
    den = in_delta + (in_d + in_d1 - 2.0 * in_delta) * tt
    y = in_ch + num / den
    dnum = in_delta ** 2 * (in_d1 * theta ** 2 + 2.0 * in_delta * tt
                            + in_d * (1.0 - theta) ** 2)
    ld = jnp.log(dnum) - 2.0 * jnp.log(den)
    return jnp.where(inside, y, x), jnp.where(inside, ld, 0.0)


def reference_forward(x, params, *, size, dim, K, B, mask):
    w1, b1, w2, b2, w3, b3 = params
    mask_idx = np.asarray(mask, dtype=np.int32)
    unmask_idx = np.asarray([d for d in range(dim) if d not in list(mask)],
                            dtype=np.int32)
    batch = x.shape[0]
    x3 = x.reshape(batch, size, dim)
    lower = x3[:, :, mask_idx].reshape(batch, -1)
    upper = x3[:, :, unmask_idx].reshape(batch, -1)
    hp = jax.lax.Precision.HIGHEST
    h = jnp.tanh(jnp.dot(lower, w1, precision=hp) + b1)
    h = jnp.tanh(jnp.dot(h, w2, precision=hp) + b2)
    out = jnp.dot(h, w3, precision=hp) + b3
    U = size * len(unmask_idx)
    out = out.reshape(batch * U, 3 * K - 1)
    Wr, Hr, Dr = out[:, :K], out[:, K:2 * K], out[:, 2 * K:]
    y, ld = _ref_rqs(upper.reshape(batch * U), Wr, Hr, Dr, K, float(B))
    upper_new = y.reshape(batch, U)
    log_det = jnp.sum(ld.reshape(batch, U), axis=1)
    out_full = jnp.concatenate(
        [lower.reshape(batch, size, len(mask_idx)),
         upper_new.reshape(batch, size, len(unmask_idx))], axis=2
    ).reshape(batch, -1)
    return out_full, log_det


# ----------------------------------------------------------------------------
if __name__ == "__main__":
    size, dim, K, B_bound, hidden = 8, 3, 8, 3.0, 32
    mask = [1]
    batch = 200  # not a multiple of the batch tile -> exercises padding

    in_dim = len(mask) * size
    out_dim = (3 * K - 1) * (dim - len(mask)) * size

    key = jax.random.PRNGKey(0)
    k1, k2, k3, kx = jax.random.split(key, 4)

    def lin_init(k, fan_in, fan_out):
        bound = 1.0 / np.sqrt(fan_in)
        kw, kb = jax.random.split(k)
        W = jax.random.uniform(kw, (fan_in, fan_out), jnp.float32, -bound, bound)
        b = jax.random.uniform(kb, (1, fan_out), jnp.float32, -bound, bound)
        return W, b

    w1, b1 = lin_init(k1, in_dim, hidden)
    w2, b2 = lin_init(k2, hidden, hidden)
    w3, b3 = lin_init(k3, hidden, out_dim)
    params = (w1, b1, w2, b2, w3, b3)

    # some values fall outside [-B, B] to exercise the identity-tail branch
    x = 2.0 * jax.random.normal(kx, (batch, size * dim), jnp.float32)

    fwd = jax.jit(functools.partial(nsf_cl_forward, size=size, dim=dim, K=K,
                                    B=B_bound, mask=tuple(mask)))
    y, log_det = fwd(x, params)
    jax.block_until_ready((y, log_det))

    y_ref, ld_ref = reference_forward(x, params, size=size, dim=dim, K=K,
                                      B=B_bound, mask=mask)
    assert y.shape == (batch, size * dim) and log_det.shape == (batch,)
    # matmuls now use explicit HIGHEST precision; errors are ~1e-5, tolerance
    # kept loose on purpose (EUP transcendental approximations).
    assert np.allclose(np.asarray(y), np.asarray(y_ref), atol=1e-2, rtol=1e-2)
    assert np.allclose(np.asarray(log_det), np.asarray(ld_ref), atol=1e-2, rtol=1e-2)

    print("KERNEL_OK")
</pallas_src>

<mosaic_0001>
module attributes {stable_mosaic.version = 11 : i64} {
  func.func @_nsf_cl_kernel(%arg0: i32, %arg1: memref<8x256xf32, #tpu.memory_space<vmem>>, %arg2: memref<16x256xf32, #tpu.memory_space<vmem>>, %arg3: memref<32x8xf32, #tpu.memory_space<vmem>>, %arg4: memref<32x1xf32, #tpu.memory_space<vmem>>, %arg5: memref<32x32xf32, #tpu.memory_space<vmem>>, %arg6: memref<32x1xf32, #tpu.memory_space<vmem>>, %arg7: memref<128x32xf32, #tpu.memory_space<vmem>>, %arg8: memref<128x1xf32, #tpu.memory_space<vmem>>, %arg9: memref<128x32xf32, #tpu.memory_space<vmem>>, %arg10: memref<128x1xf32, #tpu.memory_space<vmem>>, %arg11: memref<112x32xf32, #tpu.memory_space<vmem>>, %arg12: memref<112x1xf32, #tpu.memory_space<vmem>>, %arg13: memref<16x256xf32, #tpu.memory_space<vmem>>, %arg14: memref<1x256xf32, #tpu.memory_space<vmem>>) attributes {dimension_semantics = [#tpu.dimension_semantics<parallel>], iteration_bounds = array<i64: 1>, scalar_prefetch = 0 : i64, scratch_operands = 0 : i64, tpu.core_type = #tpu.core_type<tc>, window_params = [{transform_indices = @transform_0, window_bounds = array<i64: 8, 256>}, {transform_indices = @transform_1, window_bounds = array<i64: 16, 256>}, {pipeline_mode = #tpu.pipeline_mode<synchronous>, transform_indices = @transform_2, window_bounds = array<i64: 32, 8>}, {pipeline_mode = #tpu.pipeline_mode<synchronous>, transform_indices = @transform_3, window_bounds = array<i64: 32, 1>}, {pipeline_mode = #tpu.pipeline_mode<synchronous>, transform_indices = @transform_4, window_bounds = array<i64: 32, 32>}, {pipeline_mode = #tpu.pipeline_mode<synchronous>, transform_indices = @transform_5, window_bounds = array<i64: 32, 1>}, {pipeline_mode = #tpu.pipeline_mode<synchronous>, transform_indices = @transform_6, window_bounds = array<i64: 128, 32>}, {pipeline_mode = #tpu.pipeline_mode<synchronous>, transform_indices = @transform_7, window_bounds = array<i64: 128, 1>}, {pipeline_mode = #tpu.pipeline_mode<synchronous>, transform_indices = @transform_8, window_bounds = array<i64: 128, 32>}, {pipeline_mode = #tpu.pipeline_mode<synchronous>, transform_indices = @transform_9, window_bounds = array<i64: 128, 1>}, {pipeline_mode = #tpu.pipeline_mode<synchronous>, transform_indices = @transform_10, window_bounds = array<i64: 112, 32>}, {pipeline_mode = #tpu.pipeline_mode<synchronous>, transform_indices = @transform_11, window_bounds = array<i64: 112, 1>}, {transform_indices = @transform_12, window_bounds = array<i64: 16, 256>}, {transform_indices = @transform_13, window_bounds = array<i64: 1, 256>}]} {
    %c0 = arith.constant 0 : index
    %c0_0 = arith.constant 0 : index
    %0 = vector.load %arg3[%c0, %c0_0] : memref<32x8xf32, #tpu.memory_space<vmem>>, vector<32x8xf32>
    %c0_1 = arith.constant 0 : index
    %c0_2 = arith.constant 0 : index
    %1 = vector.load %arg1[%c0_1, %c0_2] : memref<8x256xf32, #tpu.memory_space<vmem>>, vector<8x256xf32>
    %cst = arith.constant dense<0.000000e+00> : vector<32x256xf32>
    %2 = tpu.matmul %0, %1, %cst {dimension_numbers = #tpu.dot_dimension_numbers<[1], [0], [0], [1], [0, 0, 1, 1], [], []>, precision = #tpu.contract_precision<fp32>} : vector<32x8xf32>, vector<8x256xf32>, vector<32x256xf32> -> vector<32x256xf32>
    %c0_3 = arith.constant 0 : index
    %c0_4 = arith.constant 0 : index
    %3 = vector.load %arg4[%c0_3, %c0_4] : memref<32x1xf32, #tpu.memory_space<vmem>>, vector<32x1xf32>
    %4 = vector.broadcast %3 : vector<32x1xf32> to vector<32x256xf32>
    %5 = arith.addf %2, %4 : vector<32x256xf32>
    %6 = math.tanh %5 : vector<32x256xf32>
    %c0_5 = arith.constant 0 : index
    %c0_6 = arith.constant 0 : index
    %7 = vector.load %arg5[%c0_5, %c0_6] : memref<32x32xf32, #tpu.memory_space<vmem>>, vector<32x32xf32>
    %cst_7 = arith.constant dense<0.000000e+00> : vector<32x256xf32>
    %8 = tpu.matmul %7, %6, %cst_7 {dimension_numbers = #tpu.dot_dimension_numbers<[1], [0], [0], [1], [0, 0, 1, 1], [], []>, precision = #tpu.contract_precision<fp32>} : vector<32x32xf32>, vector<32x256xf32>, vector<32x256xf32> -> vector<32x256xf32>
    %c0_8 = arith.constant 0 : index
    %c0_9 = arith.constant 0 : index
    %9 = vector.load %arg6[%c0_8, %c0_9] : memref<32x1xf32, #tpu.memory_space<vmem>>, vector<32x1xf32>
    %10 = vector.broadcast %9 : vector<32x1xf32> to vector<32x256xf32>
    %11 = arith.addf %8, %10 : vector<32x256xf32>
    %12 = math.tanh %11 : vector<32x256xf32>
    %c0_10 = arith.constant 0 : index
    %c0_11 = arith.constant 0 : index
    %13 = vector.load %arg2[%c0_10, %c0_11] : memref<16x256xf32, #tpu.memory_space<vmem>>, vector<16x256xf32>
    %cst_12 = arith.constant -3.000000e+00 : f32
    %cst_13 = arith.constant 3.000000e+00 : f32
    %14 = vector.broadcast %cst_12 : f32 to vector<16x256xf32>
    %15 = arith.maximumf %14, %13 : vector<16x256xf32>
    %16 = vector.broadcast %cst_13 : f32 to vector<16x256xf32>
    %17 = arith.minimumf %16, %15 : vector<16x256xf32>
    %cst_14 = arith.constant -3.000000e+00 : f32
    %18 = vector.broadcast %cst_14 : f32 to vector<16x256xf32>
    %19 = arith.cmpf oge, %13, %18 : vector<16x256xf32>
    %cst_15 = arith.constant 3.000000e+00 : f32
    %20 = vector.broadcast %cst_15 : f32 to vector<16x256xf32>
    %21 = arith.cmpf ole, %13, %20 : vector<16x256xf32>
    %22 = arith.andi %19, %21 : vector<16x256xi1>
    %c0_16 = arith.constant 0 : index
    %c0_17 = arith.constant 0 : index
    %23 = vector.load %arg7[%c0_16, %c0_17] : memref<128x32xf32, #tpu.memory_space<vmem>>, vector<128x32xf32>
    %cst_18 = arith.constant dense<0.000000e+00> : vector<128x256xf32>
    %24 = tpu.matmul %23, %12, %cst_18 {dimension_numbers = #tpu.dot_dimension_numbers<[1], [0], [0], [1], [0, 0, 1, 1], [], []>, precision = #tpu.contract_precision<fp32>} : vector<128x32xf32>, vector<32x256xf32>, vector<128x256xf32> -> vector<128x256xf32>
    %c0_19 = arith.constant 0 : index
    %c0_20 = arith.constant 0 : index
    %25 = vector.load %arg8[%c0_19, %c0_20] : memref<128x1xf32, #tpu.memory_space<vmem>>, vector<128x1xf32>
    %26 = vector.broadcast %25 : vector<128x1xf32> to vector<128x256xf32>
    %27 = arith.addf %24, %26 : vector<128x256xf32>
    %28 = vector.extract_strided_slice %27 {offsets = [0, 0], sizes = [16, 256], strides = [1, 1]} : vector<128x256xf32> to vector<16x256xf32>
    %29 = vector.extract_strided_slice %27 {offsets = [16, 0], sizes = [16, 256], strides = [1, 1]} : vector<128x256xf32> to vector<16x256xf32>
    %30 = vector.extract_strided_slice %27 {offsets = [32, 0], sizes = [16, 256], strides = [1, 1]} : vector<128x256xf32> to vector<16x256xf32>
    %31 = vector.extract_strided_slice %27 {offsets = [48, 0], sizes = [16, 256], strides = [1, 1]} : vector<128x256xf32> to vector<16x256xf32>
    %32 = vector.extract_strided_slice %27 {offsets = [64, 0], sizes = [16, 256], strides = [1, 1]} : vector<128x256xf32> to vector<16x256xf32>
    %33 = vector.extract_strided_slice %27 {offsets = [80, 0], sizes = [16, 256], strides = [1, 1]} : vector<128x256xf32> to vector<16x256xf32>
    %34 = vector.extract_strided_slice %27 {offsets = [96, 0], sizes = [16, 256], strides = [1, 1]} : vector<128x256xf32> to vector<16x256xf32>
    %35 = vector.extract_strided_slice %27 {offsets = [112, 0], sizes = [16, 256], strides = [1, 1]} : vector<128x256xf32> to vector<16x256xf32>
    %36 = arith.maximumf %28, %29 : vector<16x256xf32>
    %37 = arith.maximumf %36, %30 : vector<16x256xf32>
    %38 = arith.maximumf %37, %31 : vector<16x256xf32>
    %39 = arith.maximumf %38, %32 : vector<16x256xf32>
    %40 = arith.maximumf %39, %33 : vector<16x256xf32>
    %41 = arith.maximumf %40, %34 : vector<16x256xf32>
    %42 = arith.maximumf %41, %35 : vector<16x256xf32>
    %43 = arith.subf %28, %42 : vector<16x256xf32>
    %44 = math.exp %43 : vector<16x256xf32>
    %45 = arith.subf %29, %42 : vector<16x256xf32>
    %46 = math.exp %45 : vector<16x256xf32>
    %47 = arith.subf %30, %42 : vector<16x256xf32>
    %48 = math.exp %47 : vector<16x256xf32>
    %49 = arith.subf %31, %42 : vector<16x256xf32>
    %50 = math.exp %49 : vector<16x256xf32>
    %51 = arith.subf %32, %42 : vector<16x256xf32>
    %52 = math.exp %51 : vector<16x256xf32>
    %53 = arith.subf %33, %42 : vector<16x256xf32>
    %54 = math.exp %53 : vector<16x256xf32>
    %55 = arith.subf %34, %42 : vector<16x256xf32>
    %56 = math.exp %55 : vector<16x256xf32>
    %57 = arith.subf %35, %42 : vector<16x256xf32>
    %58 = math.exp %57 : vector<16x256xf32>
    %59 = arith.addf %44, %46 : vector<16x256xf32>
    %60 = arith.addf %59, %48 : vector<16x256xf32>
    %61 = arith.addf %60, %50 : vector<16x256xf32>
    %62 = arith.addf %61, %52 : vector<16x256xf32>
    %63 = arith.addf %62, %54 : vector<16x256xf32>
    %64 = arith.addf %63, %56 : vector<16x256xf32>
    %65 = arith.addf %64, %58 : vector<16x256xf32>
    %cst_21 = arith.constant 6.000000e+00 : f32
    %66 = vector.broadcast %cst_21 : f32 to vector<16x256xf32>
    %67 = arith.divf %66, %65 : vector<16x256xf32>
    %68 = arith.mulf %44, %67 : vector<16x256xf32>
    %69 = math.exp %68 : vector<16x256xf32>
    %70 = arith.mulf %46, %67 : vector<16x256xf32>
    %71 = math.exp %70 : vector<16x256xf32>
    %72 = arith.mulf %48, %67 : vector<16x256xf32>
    %73 = math.exp %72 : vector<16x256xf32>
    %74 = arith.mulf %50, %67 : vector<16x256xf32>
    %75 = math.exp %74 : vector<16x256xf32>
    %76 = arith.mulf %52, %67 : vector<16x256xf32>
    %77 = math.exp %76 : vector<16x256xf32>
    %78 = arith.mulf %54, %67 : vector<16x256xf32>
    %79 = math.exp %78 : vector<16x256xf32>
    %80 = arith.mulf %56, %67 : vector<16x256xf32>
    %81 = math.exp %80 : vector<16x256xf32>
    %82 = arith.mulf %58, %67 : vector<16x256xf32>
    %83 = math.exp %82 : vector<16x256xf32>
    %84 = arith.addf %69, %71 : vector<16x256xf32>
    %85 = arith.addf %84, %73 : vector<16x256xf32>
    %86 = arith.addf %85, %75 : vector<16x256xf32>
    %87 = arith.addf %86, %77 : vector<16x256xf32>
    %88 = arith.addf %87, %79 : vector<16x256xf32>
    %89 = arith.addf %88, %81 : vector<16x256xf32>
    %90 = arith.addf %89, %83 : vector<16x256xf32>
    %cst_22 = arith.constant 1.000000e+00 : f32
    %91 = vector.broadcast %cst_22 : f32 to vector<16x256xf32>
    %92 = arith.divf %91, %90 : vector<16x256xf32>
    %c0_23 = arith.constant 0 : index
    %c0_24 = arith.constant 0 : index
    %93 = vector.load %arg9[%c0_23, %c0_24] : memref<128x32xf32, #tpu.memory_space<vmem>>, vector<128x32xf32>
    %cst_25 = arith.constant dense<0.000000e+00> : vector<128x256xf32>
    %94 = tpu.matmul %93, %12, %cst_25 {dimension_numbers = #tpu.dot_dimension_numbers<[1], [0], [0], [1], [0, 0, 1, 1], [], []>, precision = #tpu.contract_precision<fp32>} : vector<128x32xf32>, vector<32x256xf32>, vector<128x256xf32> -> vector<128x256xf32>
    %c0_26 = arith.constant 0 : index
    %c0_27 = arith.constant 0 : index
    %95 = vector.load %arg10[%c0_26, %c0_27] : memref<128x1xf32, #tpu.memory_space<vmem>>, vector<128x1xf32>
    %96 = vector.broadcast %95 : vector<128x1xf32> to vector<128x256xf32>
    %97 = arith.addf %94, %96 : vector<128x256xf32>
    %98 = vector.extract_strided_slice %97 {offsets = [0, 0], sizes = [16, 256], strides = [1, 1]} : vector<128x256xf32> to vector<16x256xf32>
    %99 = vector.extract_strided_slice %97 {offsets = [16, 0], sizes = [16, 256], strides = [1, 1]} : vector<128x256xf32> to vector<16x256xf32>
    %100 = vector.extract_strided_slice %97 {offsets = [32, 0], sizes = [16, 256], strides = [1, 1]} : vector<128x256xf32> to vector<16x256xf32>
    %101 = vector.extract_strided_slice %97 {offsets = [48, 0], sizes = [16, 256], strides = [1, 1]} : vector<128x256xf32> to vector<16x256xf32>
    %102 = vector.extract_strided_slice %97 {offsets = [64, 0], sizes = [16, 256], strides = [1, 1]} : vector<128x256xf32> to vector<16x256xf32>
    %103 = vector.extract_strided_slice %97 {offsets = [80, 0], sizes = [16, 256], strides = [1, 1]} : vector<128x256xf32> to vector<16x256xf32>
    %104 = vector.extract_strided_slice %97 {offsets = [96, 0], sizes = [16, 256], strides = [1, 1]} : vector<128x256xf32> to vector<16x256xf32>
    %105 = vector.extract_strided_slice %97 {offsets = [112, 0], sizes = [16, 256], strides = [1, 1]} : vector<128x256xf32> to vector<16x256xf32>
    %106 = arith.maximumf %98, %99 : vector<16x256xf32>
    %107 = arith.maximumf %106, %100 : vector<16x256xf32>
    %108 = arith.maximumf %107, %101 : vector<16x256xf32>
    %109 = arith.maximumf %108, %102 : vector<16x256xf32>
    %110 = arith.maximumf %109, %103 : vector<16x256xf32>
    %111 = arith.maximumf %110, %104 : vector<16x256xf32>
    %112 = arith.maximumf %111, %105 : vector<16x256xf32>
    %113 = arith.subf %98, %112 : vector<16x256xf32>
    %114 = math.exp %113 : vector<16x256xf32>
    %115 = arith.subf %99, %112 : vector<16x256xf32>
    %116 = math.exp %115 : vector<16x256xf32>
    %117 = arith.subf %100, %112 : vector<16x256xf32>
    %118 = math.exp %117 : vector<16x256xf32>
    %119 = arith.subf %101, %112 : vector<16x256xf32>
    %120 = math.exp %119 : vector<16x256xf32>
    %121 = arith.subf %102, %112 : vector<16x256xf32>
    %122 = math.exp %121 : vector<16x256xf32>
    %123 = arith.subf %103, %112 : vector<16x256xf32>
    %124 = math.exp %123 : vector<16x256xf32>
    %125 = arith.subf %104, %112 : vector<16x256xf32>
    %126 = math.exp %125 : vector<16x256xf32>
    %127 = arith.subf %105, %112 : vector<16x256xf32>
    %128 = math.exp %127 : vector<16x256xf32>
    %129 = arith.addf %114, %116 : vector<16x256xf32>
    %130 = arith.addf %129, %118 : vector<16x256xf32>
    %131 = arith.addf %130, %120 : vector<16x256xf32>
    %132 = arith.addf %131, %122 : vector<16x256xf32>
    %133 = arith.addf %132, %124 : vector<16x256xf32>
    %134 = arith.addf %133, %126 : vector<16x256xf32>
    %135 = arith.addf %134, %128 : vector<16x256xf32>
    %cst_28 = arith.constant 6.000000e+00 : f32
    %136 = vector.broadcast %cst_28 : f32 to vector<16x256xf32>
    %137 = arith.divf %136, %135 : vector<16x256xf32>
    %138 = arith.mulf %114, %137 : vector<16x256xf32>
    %139 = math.exp %138 : vector<16x256xf32>
    %140 = arith.mulf %116, %137 : vector<16x256xf32>
    %141 = math.exp %140 : vector<16x256xf32>
    %142 = arith.mulf %118, %137 : vector<16x256xf32>
    %143 = math.exp %142 : vector<16x256xf32>
    %144 = arith.mulf %120, %137 : vector<16x256xf32>
    %145 = math.exp %144 : vector<16x256xf32>
    %146 = arith.mulf %122, %137 : vector<16x256xf32>
    %147 = math.exp %146 : vector<16x256xf32>
    %148 = arith.mulf %124, %137 : vector<16x256xf32>
    %149 = math.exp %148 : vector<16x256xf32>
    %150 = arith.mulf %126, %137 : vector<16x256xf32>
    %151 = math.exp %150 : vector<16x256xf32>
    %152 = arith.mulf %128, %137 : vector<16x256xf32>
    %153 = math.exp %152 : vector<16x256xf32>
    %154 = arith.addf %139, %141 : vector<16x256xf32>
    %155 = arith.addf %154, %143 : vector<16x256xf32>
    %156 = arith.addf %155, %145 : vector<16x256xf32>
    %157 = arith.addf %156, %147 : vector<16x256xf32>
    %158 = arith.addf %157, %149 : vector<16x256xf32>
    %159 = arith.addf %158, %151 : vector<16x256xf32>
    %160 = arith.addf %159, %153 : vector<16x256xf32>
    %cst_29 = arith.constant 1.000000e+00 : f32
    %161 = vector.broadcast %cst_29 : f32 to vector<16x256xf32>
    %162 = arith.divf %161, %160 : vector<16x256xf32>
    %c0_30 = arith.constant 0 : index
    %c0_31 = arith.constant 0 : index
    %163 = vector.load %arg11[%c0_30, %c0_31] : memref<112x32xf32, #tpu.memory_space<vmem>>, vector<112x32xf32>
    %cst_32 = arith.constant dense<0.000000e+00> : vector<112x256xf32>
    %164 = tpu.matmul %163, %12, %cst_32 {dimension_numbers = #tpu.dot_dimension_numbers<[1], [0], [0], [1], [0, 0, 1, 1], [], []>, precision = #tpu.contract_precision<fp32>} : vector<112x32xf32>, vector<32x256xf32>, vector<112x256xf32> -> vector<112x256xf32>
    %c0_33 = arith.constant 0 : index
    %c0_34 = arith.constant 0 : index
    %165 = vector.load %arg12[%c0_33, %c0_34] : memref<112x1xf32, #tpu.memory_space<vmem>>, vector<112x1xf32>
    %166 = vector.broadcast %165 : vector<112x1xf32> to vector<112x256xf32>
    %167 = arith.addf %164, %166 : vector<112x256xf32>
    %cst_35 = arith.constant 0.000000e+00 : f32
    %168 = vector.broadcast %cst_35 : f32 to vector<16x256xf32>
    %cst_36 = arith.constant 0.000000e+00 : f32
    %169 = vector.broadcast %cst_36 : f32 to vector<16x256xf32>
    %170 = arith.mulf %69, %92 : vector<16x256xf32>
    %cst_37 = arith.constant 0.991999983 : f32
    %171 = vector.broadcast %cst_37 : f32 to vector<16x256xf32>
    %172 = arith.mulf %171, %170 : vector<16x256xf32>
    %cst_38 = arith.constant 1.000000e-03 : f32
    %173 = vector.broadcast %cst_38 : f32 to vector<16x256xf32>
    %174 = arith.addf %173, %172 : vector<16x256xf32>
    %175 = arith.mulf %139, %162 : vector<16x256xf32>
    %cst_39 = arith.constant 0.991999983 : f32
    %176 = vector.broadcast %cst_39 : f32 to vector<16x256xf32>
    %177 = arith.mulf %176, %175 : vector<16x256xf32>
    %cst_40 = arith.constant 1.000000e-03 : f32
    %178 = vector.broadcast %cst_40 : f32 to vector<16x256xf32>
    %179 = arith.addf %178, %177 : vector<16x256xf32>
    %180 = arith.addf %168, %174 : vector<16x256xf32>
    %181 = arith.addf %169, %179 : vector<16x256xf32>
    %cst_41 = arith.constant 6.000000e+00 : f32
    %182 = vector.broadcast %cst_41 : f32 to vector<16x256xf32>
    %183 = arith.mulf %182, %180 : vector<16x256xf32>
    %cst_42 = arith.constant -3.000000e+00 : f32
    %184 = vector.broadcast %cst_42 : f32 to vector<16x256xf32>
    %185 = arith.addf %184, %183 : vector<16x256xf32>
    %cst_43 = arith.constant 6.000000e+00 : f32
    %186 = vector.broadcast %cst_43 : f32 to vector<16x256xf32>
    %187 = arith.mulf %186, %181 : vector<16x256xf32>
    %cst_44 = arith.constant -3.000000e+00 : f32
    %188 = vector.broadcast %cst_44 : f32 to vector<16x256xf32>
    %189 = arith.addf %188, %187 : vector<16x256xf32>
    %cst_45 = arith.constant -3.000000e+00 : f32
    %190 = vector.broadcast %cst_45 : f32 to vector<16x256xf32>
    %191 = arith.subf %185, %190 : vector<16x256xf32>
    %cst_46 = arith.constant -3.000000e+00 : f32
    %192 = vector.broadcast %cst_46 : f32 to vector<16x256xf32>
    %193 = arith.subf %189, %192 : vector<16x256xf32>
    %194 = vector.extract_strided_slice %167 {offsets = [0, 0], sizes = [16, 256], strides = [1, 1]} : vector<112x256xf32> to vector<16x256xf32>
    %cst_47 = arith.constant 0.000000e+00 : f32
    %195 = vector.broadcast %cst_47 : f32 to vector<16x256xf32>
    %196 = arith.maximumf %194, %195 : vector<16x256xf32>
    %197 = vector.broadcast %cst_47 : f32 to vector<16x256xf32>
    %198 = arith.subf %194, %197 : vector<16x256xf32>
    %199 = arith.cmpf one, %198, %198 : vector<16x256xf32>
    %200 = vector.broadcast %cst_47 : f32 to vector<16x256xf32>
    %201 = arith.addf %194, %200 : vector<16x256xf32>
    %202 = math.absf %198 : vector<16x256xf32>
    %cst_48 = arith.constant 0.000000e+00 : f32
    %203 = vector.broadcast %cst_48 : f32 to vector<16x256xf32>
    %204 = arith.subf %203, %202 : vector<16x256xf32>
    %205 = math.exp %204 : vector<16x256xf32>
    %206 = math.log1p %205 : vector<16x256xf32>
    %207 = arith.addf %196, %206 : vector<16x256xf32>
    %208 = arith.select %199, %201, %207 : vector<16x256xi1>, vector<16x256xf32>
    %cst_49 = arith.constant 0.000000e+00 : f32
    %209 = vector.broadcast %cst_49 : f32 to vector<16x256xf32>
    %210 = arith.maximumf %208, %209 : vector<16x256xf32>
    %211 = vector.broadcast %cst_49 : f32 to vector<16x256xf32>
    %212 = arith.subf %208, %211 : vector<16x256xf32>
    %213 = arith.cmpf one, %212, %212 : vector<16x256xf32>
    %214 = vector.broadcast %cst_49 : f32 to vector<16x256xf32>
    %215 = arith.addf %208, %214 : vector<16x256xf32>
    %216 = math.absf %212 : vector<16x256xf32>
    %cst_50 = arith.constant 0.000000e+00 : f32
    %217 = vector.broadcast %cst_50 : f32 to vector<16x256xf32>
    %218 = arith.subf %217, %216 : vector<16x256xf32>
    %219 = math.exp %218 : vector<16x256xf32>
    %220 = math.log1p %219 : vector<16x256xf32>
    %221 = arith.addf %210, %220 : vector<16x256xf32>
    %222 = arith.select %213, %215, %221 : vector<16x256xi1>, vector<16x256xf32>
    %cst_51 = arith.constant 1.000000e-03 : f32
    %223 = vector.broadcast %cst_51 : f32 to vector<16x256xf32>
    %224 = arith.addf %223, %222 : vector<16x256xf32>
    %225 = arith.mulf %71, %92 : vector<16x256xf32>
    %cst_52 = arith.constant 0.991999983 : f32
    %226 = vector.broadcast %cst_52 : f32 to vector<16x256xf32>
    %227 = arith.mulf %226, %225 : vector<16x256xf32>
    %cst_53 = arith.constant 1.000000e-03 : f32
    %228 = vector.broadcast %cst_53 : f32 to vector<16x256xf32>
    %229 = arith.addf %228, %227 : vector<16x256xf32>
    %230 = arith.mulf %141, %162 : vector<16x256xf32>
    %cst_54 = arith.constant 0.991999983 : f32
    %231 = vector.broadcast %cst_54 : f32 to vector<16x256xf32>
    %232 = arith.mulf %231, %230 : vector<16x256xf32>
    %cst_55 = arith.constant 1.000000e-03 : f32
    %233 = vector.broadcast %cst_55 : f32 to vector<16x256xf32>
    %234 = arith.addf %233, %232 : vector<16x256xf32>
    %235 = arith.addf %180, %229 : vector<16x256xf32>
    %236 = arith.addf %181, %234 : vector<16x256xf32>
    %cst_56 = arith.constant 6.000000e+00 : f32
    %237 = vector.broadcast %cst_56 : f32 to vector<16x256xf32>
    %238 = arith.mulf %237, %235 : vector<16x256xf32>
    %cst_57 = arith.constant -3.000000e+00 : f32
    %239 = vector.broadcast %cst_57 : f32 to vector<16x256xf32>
    %240 = arith.addf %239, %238 : vector<16x256xf32>
    %cst_58 = arith.constant 6.000000e+00 : f32
    %241 = vector.broadcast %cst_58 : f32 to vector<16x256xf32>
    %242 = arith.mulf %241, %236 : vector<16x256xf32>
    %cst_59 = arith.constant -3.000000e+00 : f32
    %243 = vector.broadcast %cst_59 : f32 to vector<16x256xf32>
    %244 = arith.addf %243, %242 : vector<16x256xf32>
    %245 = arith.subf %240, %185 : vector<16x256xf32>
    %246 = arith.subf %244, %189 : vector<16x256xf32>
    %247 = vector.extract_strided_slice %167 {offsets = [16, 0], sizes = [16, 256], strides = [1, 1]} : vector<112x256xf32> to vector<16x256xf32>
    %cst_60 = arith.constant 0.000000e+00 : f32
    %248 = vector.broadcast %cst_60 : f32 to vector<16x256xf32>
    %249 = arith.maximumf %247, %248 : vector<16x256xf32>
    %250 = vector.broadcast %cst_60 : f32 to vector<16x256xf32>
    %251 = arith.subf %247, %250 : vector<16x256xf32>
    %252 = arith.cmpf one, %251, %251 : vector<16x256xf32>
    %253 = vector.broadcast %cst_60 : f32 to vector<16x256xf32>
    %254 = arith.addf %247, %253 : vector<16x256xf32>
    %255 = math.absf %251 : vector<16x256xf32>
    %cst_61 = arith.constant 0.000000e+00 : f32
    %256 = vector.broadcast %cst_61 : f32 to vector<16x256xf32>
    %257 = arith.subf %256, %255 : vector<16x256xf32>
    %258 = math.exp %257 : vector<16x256xf32>
    %259 = math.log1p %258 : vector<16x256xf32>
    %260 = arith.addf %249, %259 : vector<16x256xf32>
    %261 = arith.select %252, %254, %260 : vector<16x256xi1>, vector<16x256xf32>
    %cst_62 = arith.constant 0.000000e+00 : f32
    %262 = vector.broadcast %cst_62 : f32 to vector<16x256xf32>
    %263 = arith.maximumf %261, %262 : vector<16x256xf32>
    %264 = vector.broadcast %cst_62 : f32 to vector<16x256xf32>
    %265 = arith.subf %261, %264 : vector<16x256xf32>
    %266 = arith.cmpf one, %265, %265 : vector<16x256xf32>
    %267 = vector.broadcast %cst_62 : f32 to vector<16x256xf32>
    %268 = arith.addf %261, %267 : vector<16x256xf32>
    %269 = math.absf %265 : vector<16x256xf32>
    %cst_63 = arith.constant 0.000000e+00 : f32
    %270 = vector.broadcast %cst_63 : f32 to vector<16x256xf32>
    %271 = arith.subf %270, %269 : vector<16x256xf32>
    %272 = math.exp %271 : vector<16x256xf32>
    %273 = math.log1p %272 : vector<16x256xf32>
    %274 = arith.addf %263, %273 : vector<16x256xf32>
    %275 = arith.select %266, %268, %274 : vector<16x256xi1>, vector<16x256xf32>
    %cst_64 = arith.constant 1.000000e-03 : f32
    %276 = vector.broadcast %cst_64 : f32 to vector<16x256xf32>
    %277 = arith.addf %276, %275 : vector<16x256xf32>
    %278 = arith.cmpf oge, %17, %185 : vector<16x256xf32>
    %279 = arith.cmpf olt, %17, %240 : vector<16x256xf32>
    %280 = arith.andi %278, %279 : vector<16x256xi1>
    %cst_65 = arith.constant -3.000000e+00 : f32
    %281 = vector.broadcast %cst_65 : f32 to vector<16x256xf32>
    %282 = arith.select %280, %185, %281 : vector<16x256xi1>, vector<16x256xf32>
    %283 = arith.select %280, %245, %191 : vector<16x256xi1>, vector<16x256xf32>
    %cst_66 = arith.constant -3.000000e+00 : f32
    %284 = vector.broadcast %cst_66 : f32 to vector<16x256xf32>
    %285 = arith.select %280, %189, %284 : vector<16x256xi1>, vector<16x256xf32>
    %286 = arith.select %280, %246, %193 : vector<16x256xi1>, vector<16x256xf32>
    %cst_67 = arith.constant 1.000000e+00 : f32
    %287 = vector.broadcast %cst_67 : f32 to vector<16x256xf32>
    %288 = arith.select %280, %224, %287 : vector<16x256xi1>, vector<16x256xf32>
    %289 = arith.select %280, %277, %224 : vector<16x256xi1>, vector<16x256xf32>
    %290 = arith.mulf %73, %92 : vector<16x256xf32>
    %cst_68 = arith.constant 0.991999983 : f32
    %291 = vector.broadcast %cst_68 : f32 to vector<16x256xf32>
    %292 = arith.mulf %291, %290 : vector<16x256xf32>
    %cst_69 = arith.constant 1.000000e-03 : f32
    %293 = vector.broadcast %cst_69 : f32 to vector<16x256xf32>
    %294 = arith.addf %293, %292 : vector<16x256xf32>
    %295 = arith.mulf %143, %162 : vector<16x256xf32>
    %cst_70 = arith.constant 0.991999983 : f32
    %296 = vector.broadcast %cst_70 : f32 to vector<16x256xf32>
    %297 = arith.mulf %296, %295 : vector<16x256xf32>
    %cst_71 = arith.constant 1.000000e-03 : f32
    %298 = vector.broadcast %cst_71 : f32 to vector<16x256xf32>
    %299 = arith.addf %298, %297 : vector<16x256xf32>
    %300 = arith.addf %235, %294 : vector<16x256xf32>
    %301 = arith.addf %236, %299 : vector<16x256xf32>
    %cst_72 = arith.constant 6.000000e+00 : f32
    %302 = vector.broadcast %cst_72 : f32 to vector<16x256xf32>
    %303 = arith.mulf %302, %300 : vector<16x256xf32>
    %cst_73 = arith.constant -3.000000e+00 : f32
    %304 = vector.broadcast %cst_73 : f32 to vector<16x256xf32>
    %305 = arith.addf %304, %303 : vector<16x256xf32>
    %cst_74 = arith.constant 6.000000e+00 : f32
    %306 = vector.broadcast %cst_74 : f32 to vector<16x256xf32>
    %307 = arith.mulf %306, %301 : vector<16x256xf32>
    %cst_75 = arith.constant -3.000000e+00 : f32
    %308 = vector.broadcast %cst_75 : f32 to vector<16x256xf32>
    %309 = arith.addf %308, %307 : vector<16x256xf32>
    %310 = arith.subf %305, %240 : vector<16x256xf32>
    %311 = arith.subf %309, %244 : vector<16x256xf32>
    %312 = vector.extract_strided_slice %167 {offsets = [32, 0], sizes = [16, 256], strides = [1, 1]} : vector<112x256xf32> to vector<16x256xf32>
    %cst_76 = arith.constant 0.000000e+00 : f32
    %313 = vector.broadcast %cst_76 : f32 to vector<16x256xf32>
    %314 = arith.maximumf %312, %313 : vector<16x256xf32>
    %315 = vector.broadcast %cst_76 : f32 to vector<16x256xf32>
    %316 = arith.subf %312, %315 : vector<16x256xf32>
    %317 = arith.cmpf one, %316, %316 : vector<16x256xf32>
    %318 = vector.broadcast %cst_76 : f32 to vector<16x256xf32>
    %319 = arith.addf %312, %318 : vector<16x256xf32>
    %320 = math.absf %316 : vector<16x256xf32>
    %cst_77 = arith.constant 0.000000e+00 : f32
    %321 = vector.broadcast %cst_77 : f32 to vector<16x256xf32>
    %322 = arith.subf %321, %320 : vector<16x256xf32>
    %323 = math.exp %322 : vector<16x256xf32>
    %324 = math.log1p %323 : vector<16x256xf32>
    %325 = arith.addf %314, %324 : vector<16x256xf32>
    %326 = arith.select %317, %319, %325 : vector<16x256xi1>, vector<16x256xf32>
    %cst_78 = arith.constant 0.000000e+00 : f32
    %327 = vector.broadcast %cst_78 : f32 to vector<16x256xf32>
    %328 = arith.maximumf %326, %327 : vector<16x256xf32>
    %329 = vector.broadcast %cst_78 : f32 to vector<16x256xf32>
    %330 = arith.subf %326, %329 : vector<16x256xf32>
    %331 = arith.cmpf one, %330, %330 : vector<16x256xf32>
    %332 = vector.broadcast %cst_78 : f32 to vector<16x256xf32>
    %333 = arith.addf %326, %332 : vector<16x256xf32>
    %334 = math.absf %330 : vector<16x256xf32>
    %cst_79 = arith.constant 0.000000e+00 : f32
    %335 = vector.broadcast %cst_79 : f32 to vector<16x256xf32>
    %336 = arith.subf %335, %334 : vector<16x256xf32>
    %337 = math.exp %336 : vector<16x256xf32>
    %338 = math.log1p %337 : vector<16x256xf32>
    %339 = arith.addf %328, %338 : vector<16x256xf32>
    %340 = arith.select %331, %333, %339 : vector<16x256xi1>, vector<16x256xf32>
    %cst_80 = arith.constant 1.000000e-03 : f32
    %341 = vector.broadcast %cst_80 : f32 to vector<16x256xf32>
    %342 = arith.addf %341, %340 : vector<16x256xf32>
    %343 = arith.cmpf oge, %17, %240 : vector<16x256xf32>
    %344 = arith.cmpf olt, %17, %305 : vector<16x256xf32>
    %345 = arith.andi %343, %344 : vector<16x256xi1>
    %346 = arith.select %345, %240, %282 : vector<16x256xi1>, vector<16x256xf32>
    %347 = arith.select %345, %310, %283 : vector<16x256xi1>, vector<16x256xf32>
    %348 = arith.select %345, %244, %285 : vector<16x256xi1>, vector<16x256xf32>
    %349 = arith.select %345, %311, %286 : vector<16x256xi1>, vector<16x256xf32>
    %350 = arith.select %345, %277, %288 : vector<16x256xi1>, vector<16x256xf32>
    %351 = arith.select %345, %342, %289 : vector<16x256xi1>, vector<16x256xf32>
    %352 = arith.mulf %75, %92 : vector<16x256xf32>
    %cst_81 = arith.constant 0.991999983 : f32
    %353 = vector.broadcast %cst_81 : f32 to vector<16x256xf32>
    %354 = arith.mulf %353, %352 : vector<16x256xf32>
    %cst_82 = arith.constant 1.000000e-03 : f32
    %355 = vector.broadcast %cst_82 : f32 to vector<16x256xf32>
    %356 = arith.addf %355, %354 : vector<16x256xf32>
    %357 = arith.mulf %145, %162 : vector<16x256xf32>
    %cst_83 = arith.constant 0.991999983 : f32
    %358 = vector.broadcast %cst_83 : f32 to vector<16x256xf32>
    %359 = arith.mulf %358, %357 : vector<16x256xf32>
    %cst_84 = arith.constant 1.000000e-03 : f32
    %360 = vector.broadcast %cst_84 : f32 to vector<16x256xf32>
    %361 = arith.addf %360, %359 : vector<16x256xf32>
    %362 = arith.addf %300, %356 : vector<16x256xf32>
    %363 = arith.addf %301, %361 : vector<16x256xf32>
    %cst_85 = arith.constant 6.000000e+00 : f32
    %364 = vector.broadcast %cst_85 : f32 to vector<16x256xf32>
    %365 = arith.mulf %364, %362 : vector<16x256xf32>
    %cst_86 = arith.constant -3.000000e+00 : f32
    %366 = vector.broadcast %cst_86 : f32 to vector<16x256xf32>
    %367 = arith.addf %366, %365 : vector<16x256xf32>
    %cst_87 = arith.constant 6.000000e+00 : f32
    %368 = vector.broadcast %cst_87 : f32 to vector<16x256xf32>
    %369 = arith.mulf %368, %363 : vector<16x256xf32>
    %cst_88 = arith.constant -3.000000e+00 : f32
    %370 = vector.broadcast %cst_88 : f32 to vector<16x256xf32>
    %371 = arith.addf %370, %369 : vector<16x256xf32>
    %372 = arith.subf %367, %305 : vector<16x256xf32>
    %373 = arith.subf %371, %309 : vector<16x256xf32>
    %374 = vector.extract_strided_slice %167 {offsets = [48, 0], sizes = [16, 256], strides = [1, 1]} : vector<112x256xf32> to vector<16x256xf32>
    %cst_89 = arith.constant 0.000000e+00 : f32
    %375 = vector.broadcast %cst_89 : f32 to vector<16x256xf32>
    %376 = arith.maximumf %374, %375 : vector<16x256xf32>
    %377 = vector.broadcast %cst_89 : f32 to vector<16x256xf32>
    %378 = arith.subf %374, %377 : vector<16x256xf32>
    %379 = arith.cmpf one, %378, %378 : vector<16x256xf32>
    %380 = vector.broadcast %cst_89 : f32 to vector<16x256xf32>
    %381 = arith.addf %374, %380 : vector<16x256xf32>
    %382 = math.absf %378 : vector<16x256xf32>
    %cst_90 = arith.constant 0.000000e+00 : f32
    %383 = vector.broadcast %cst_90 : f32 to vector<16x256xf32>
    %384 = arith.subf %383, %382 : vector<16x256xf32>
    %385 = math.exp %384 : vector<16x256xf32>
    %386 = math.log1p %385 : vector<16x256xf32>
    %387 = arith.addf %376, %386 : vector<16x256xf32>
    %388 = arith.select %379, %381, %387 : vector<16x256xi1>, vector<16x256xf32>
    %cst_91 = arith.constant 0.000000e+00 : f32
    %389 = vector.broadcast %cst_91 : f32 to vector<16x256xf32>
    %390 = arith.maximumf %388, %389 : vector<16x256xf32>
    %391 = vector.broadcast %cst_91 : f32 to vector<16x256xf32>
    %392 = arith.subf %388, %391 : vector<16x256xf32>
    %393 = arith.cmpf one, %392, %392 : vector<16x256xf32>
    %394 = vector.broadcast %cst_91 : f32 to vector<16x256xf32>
    %395 = arith.addf %388, %394 : vector<16x256xf32>
    %396 = math.absf %392 : vector<16x256xf32>
    %cst_92 = arith.constant 0.000000e+00 : f32
    %397 = vector.broadcast %cst_92 : f32 to vector<16x256xf32>
    %398 = arith.subf %397, %396 : vector<16x256xf32>
    %399 = math.exp %398 : vector<16x256xf32>
    %400 = math.log1p %399 : vector<16x256xf32>
    %401 = arith.addf %390, %400 : vector<16x256xf32>
    %402 = arith.select %393, %395, %401 : vector<16x256xi1>, vector<16x256xf32>
    %cst_93 = arith.constant 1.000000e-03 : f32
    %403 = vector.broadcast %cst_93 : f32 to vector<16x256xf32>
    %404 = arith.addf %403, %402 : vector<16x256xf32>
    %405 = arith.cmpf oge, %17, %305 : vector<16x256xf32>
    %406 = arith.cmpf olt, %17, %367 : vector<16x256xf32>
    %407 = arith.andi %405, %406 : vector<16x256xi1>
    %408 = arith.select %407, %305, %346 : vector<16x256xi1>, vector<16x256xf32>
    %409 = arith.select %407, %372, %347 : vector<16x256xi1>, vector<16x256xf32>
    %410 = arith.select %407, %309, %348 : vector<16x256xi1>, vector<16x256xf32>
    %411 = arith.select %407, %373, %349 : vector<16x256xi1>, vector<16x256xf32>
    %412 = arith.select %407, %342, %350 : vector<16x256xi1>, vector<16x256xf32>
    %413 = arith.select %407, %404, %351 : vector<16x256xi1>, vector<16x256xf32>
    %414 = arith.mulf %77, %92 : vector<16x256xf32>
    %cst_94 = arith.constant 0.991999983 : f32
    %415 = vector.broadcast %cst_94 : f32 to vector<16x256xf32>
    %416 = arith.mulf %415, %414 : vector<16x256xf32>
    %cst_95 = arith.constant 1.000000e-03 : f32
    %417 = vector.broadcast %cst_95 : f32 to vector<16x256xf32>
    %418 = arith.addf %417, %416 : vector<16x256xf32>
    %419 = arith.mulf %147, %162 : vector<16x256xf32>
    %cst_96 = arith.constant 0.991999983 : f32
    %420 = vector.broadcast %cst_96 : f32 to vector<16x256xf32>
    %421 = arith.mulf %420, %419 : vector<16x256xf32>
    %cst_97 = arith.constant 1.000000e-03 : f32
    %422 = vector.broadcast %cst_97 : f32 to vector<16x256xf32>
    %423 = arith.addf %422, %421 : vector<16x256xf32>
    %424 = arith.addf %362, %418 : vector<16x256xf32>
    %425 = arith.addf %363, %423 : vector<16x256xf32>
    %cst_98 = arith.constant 6.000000e+00 : f32
    %426 = vector.broadcast %cst_98 : f32 to vector<16x256xf32>
    %427 = arith.mulf %426, %424 : vector<16x256xf32>
    %cst_99 = arith.constant -3.000000e+00 : f32
    %428 = vector.broadcast %cst_99 : f32 to vector<16x256xf32>
    %429 = arith.addf %428, %427 : vector<16x256xf32>
    %cst_100 = arith.constant 6.000000e+00 : f32
    %430 = vector.broadcast %cst_100 : f32 to vector<16x256xf32>
    %431 = arith.mulf %430, %425 : vector<16x256xf32>
    %cst_101 = arith.constant -3.000000e+00 : f32
    %432 = vector.broadcast %cst_101 : f32 to vector<16x256xf32>
    %433 = arith.addf %432, %431 : vector<16x256xf32>
    %434 = arith.subf %429, %367 : vector<16x256xf32>
    %435 = arith.subf %433, %371 : vector<16x256xf32>
    %436 = vector.extract_strided_slice %167 {offsets = [64, 0], sizes = [16, 256], strides = [1, 1]} : vector<112x256xf32> to vector<16x256xf32>
    %cst_102 = arith.constant 0.000000e+00 : f32
    %437 = vector.broadcast %cst_102 : f32 to vector<16x256xf32>
    %438 = arith.maximumf %436, %437 : vector<16x256xf32>
    %439 = vector.broadcast %cst_102 : f32 to vector<16x256xf32>
    %440 = arith.subf %436, %439 : vector<16x256xf32>
    %441 = arith.cmpf one, %440, %440 : vector<16x256xf32>
    %442 = vector.broadcast %cst_102 : f32 to vector<16x256xf32>
    %443 = arith.addf %436, %442 : vector<16x256xf32>
    %444 = math.absf %440 : vector<16x256xf32>
    %cst_103 = arith.constant 0.000000e+00 : f32
    %445 = vector.broadcast %cst_103 : f32 to vector<16x256xf32>
    %446 = arith.subf %445, %444 : vector<16x256xf32>
    %447 = math.exp %446 : vector<16x256xf32>
    %448 = math.log1p %447 : vector<16x256xf32>
    %449 = arith.addf %438, %448 : vector<16x256xf32>
    %450 = arith.select %441, %443, %449 : vector<16x256xi1>, vector<16x256xf32>
    %cst_104 = arith.constant 0.000000e+00 : f32
    %451 = vector.broadcast %cst_104 : f32 to vector<16x256xf32>
    %452 = arith.maximumf %450, %451 : vector<16x256xf32>
    %453 = vector.broadcast %cst_104 : f32 to vector<16x256xf32>
    %454 = arith.subf %450, %453 : vector<16x256xf32>
    %455 = arith.cmpf one, %454, %454 : vector<16x256xf32>
    %456 = vector.broadcast %cst_104 : f32 to vector<16x256xf32>
    %457 = arith.addf %450, %456 : vector<16x256xf32>
    %458 = math.absf %454 : vector<16x256xf32>
    %cst_105 = arith.constant 0.000000e+00 : f32
    %459 = vector.broadcast %cst_105 : f32 to vector<16x256xf32>
    %460 = arith.subf %459, %458 : vector<16x256xf32>
    %461 = math.exp %460 : vector<16x256xf32>
    %462 = math.log1p %461 : vector<16x256xf32>
    %463 = arith.addf %452, %462 : vector<16x256xf32>
    %464 = arith.select %455, %457, %463 : vector<16x256xi1>, vector<16x256xf32>
    %cst_106 = arith.constant 1.000000e-03 : f32
    %465 = vector.broadcast %cst_106 : f32 to vector<16x256xf32>
    %466 = arith.addf %465, %464 : vector<16x256xf32>
    %467 = arith.cmpf oge, %17, %367 : vector<16x256xf32>
    %468 = arith.cmpf olt, %17, %429 : vector<16x256xf32>
    %469 = arith.andi %467, %468 : vector<16x256xi1>
    %470 = arith.select %469, %367, %408 : vector<16x256xi1>, vector<16x256xf32>
    %471 = arith.select %469, %434, %409 : vector<16x256xi1>, vector<16x256xf32>
    %472 = arith.select %469, %371, %410 : vector<16x256xi1>, vector<16x256xf32>
    %473 = arith.select %469, %435, %411 : vector<16x256xi1>, vector<16x256xf32>
    %474 = arith.select %469, %404, %412 : vector<16x256xi1>, vector<16x256xf32>
    %475 = arith.select %469, %466, %413 : vector<16x256xi1>, vector<16x256xf32>
    %476 = arith.mulf %79, %92 : vector<16x256xf32>
    %cst_107 = arith.constant 0.991999983 : f32
    %477 = vector.broadcast %cst_107 : f32 to vector<16x256xf32>
    %478 = arith.mulf %477, %476 : vector<16x256xf32>
    %cst_108 = arith.constant 1.000000e-03 : f32
    %479 = vector.broadcast %cst_108 : f32 to vector<16x256xf32>
    %480 = arith.addf %479, %478 : vector<16x256xf32>
    %481 = arith.mulf %149, %162 : vector<16x256xf32>
    %cst_109 = arith.constant 0.991999983 : f32
    %482 = vector.broadcast %cst_109 : f32 to vector<16x256xf32>
    %483 = arith.mulf %482, %481 : vector<16x256xf32>
    %cst_110 = arith.constant 1.000000e-03 : f32
    %484 = vector.broadcast %cst_110 : f32 to vector<16x256xf32>
    %485 = arith.addf %484, %483 : vector<16x256xf32>
    %486 = arith.addf %424, %480 : vector<16x256xf32>
    %487 = arith.addf %425, %485 : vector<16x256xf32>
    %cst_111 = arith.constant 6.000000e+00 : f32
    %488 = vector.broadcast %cst_111 : f32 to vector<16x256xf32>
    %489 = arith.mulf %488, %486 : vector<16x256xf32>
    %cst_112 = arith.constant -3.000000e+00 : f32
    %490 = vector.broadcast %cst_112 : f32 to vector<16x256xf32>
    %491 = arith.addf %490, %489 : vector<16x256xf32>
    %cst_113 = arith.constant 6.000000e+00 : f32
    %492 = vector.broadcast %cst_113 : f32 to vector<16x256xf32>
    %493 = arith.mulf %492, %487 : vector<16x256xf32>
    %cst_114 = arith.constant -3.000000e+00 : f32
    %494 = vector.broadcast %cst_114 : f32 to vector<16x256xf32>
    %495 = arith.addf %494, %493 : vector<16x256xf32>
    %496 = arith.subf %491, %429 : vector<16x256xf32>
    %497 = arith.subf %495, %433 : vector<16x256xf32>
    %498 = vector.extract_strided_slice %167 {offsets = [80, 0], sizes = [16, 256], strides = [1, 1]} : vector<112x256xf32> to vector<16x256xf32>
    %cst_115 = arith.constant 0.000000e+00 : f32
    %499 = vector.broadcast %cst_115 : f32 to vector<16x256xf32>
    %500 = arith.maximumf %498, %499 : vector<16x256xf32>
    %501 = vector.broadcast %cst_115 : f32 to vector<16x256xf32>
    %502 = arith.subf %498, %501 : vector<16x256xf32>
    %503 = arith.cmpf one, %502, %502 : vector<16x256xf32>
    %504 = vector.broadcast %cst_115 : f32 to vector<16x256xf32>
    %505 = arith.addf %498, %504 : vector<16x256xf32>
    %506 = math.absf %502 : vector<16x256xf32>
    %cst_116 = arith.constant 0.000000e+00 : f32
    %507 = vector.broadcast %cst_116 : f32 to vector<16x256xf32>
    %508 = arith.subf %507, %506 : vector<16x256xf32>
    %509 = math.exp %508 : vector<16x256xf32>
    %510 = math.log1p %509 : vector<16x256xf32>
    %511 = arith.addf %500, %510 : vector<16x256xf32>
    %512 = arith.select %503, %505, %511 : vector<16x256xi1>, vector<16x256xf32>
    %cst_117 = arith.constant 0.000000e+00 : f32
    %513 = vector.broadcast %cst_117 : f32 to vector<16x256xf32>
    %514 = arith.maximumf %512, %513 : vector<16x256xf32>
    %515 = vector.broadcast %cst_117 : f32 to vector<16x256xf32>
    %516 = arith.subf %512, %515 : vector<16x256xf32>
    %517 = arith.cmpf one, %516, %516 : vector<16x256xf32>
    %518 = vector.broadcast %cst_117 : f32 to vector<16x256xf32>
    %519 = arith.addf %512, %518 : vector<16x256xf32>
    %520 = math.absf %516 : vector<16x256xf32>
    %cst_118 = arith.constant 0.000000e+00 : f32
    %521 = vector.broadcast %cst_118 : f32 to vector<16x256xf32>
    %522 = arith.subf %521, %520 : vector<16x256xf32>
    %523 = math.exp %522 : vector<16x256xf32>
    %524 = math.log1p %523 : vector<16x256xf32>
    %525 = arith.addf %514, %524 : vector<16x256xf32>
    %526 = arith.select %517, %519, %525 : vector<16x256xi1>, vector<16x256xf32>
    %cst_119 = arith.constant 1.000000e-03 : f32
    %527 = vector.broadcast %cst_119 : f32 to vector<16x256xf32>
    %528 = arith.addf %527, %526 : vector<16x256xf32>
    %529 = arith.cmpf oge, %17, %429 : vector<16x256xf32>
    %530 = arith.cmpf olt, %17, %491 : vector<16x256xf32>
    %531 = arith.andi %529, %530 : vector<16x256xi1>
    %532 = arith.select %531, %429, %470 : vector<16x256xi1>, vector<16x256xf32>
    %533 = arith.select %531, %496, %471 : vector<16x256xi1>, vector<16x256xf32>
    %534 = arith.select %531, %433, %472 : vector<16x256xi1>, vector<16x256xf32>
    %535 = arith.select %531, %497, %473 : vector<16x256xi1>, vector<16x256xf32>
    %536 = arith.select %531, %466, %474 : vector<16x256xi1>, vector<16x256xf32>
    %537 = arith.select %531, %528, %475 : vector<16x256xi1>, vector<16x256xf32>
    %538 = arith.mulf %81, %92 : vector<16x256xf32>
    %cst_120 = arith.constant 0.991999983 : f32
    %539 = vector.broadcast %cst_120 : f32 to vector<16x256xf32>
    %540 = arith.mulf %539, %538 : vector<16x256xf32>
    %cst_121 = arith.constant 1.000000e-03 : f32
    %541 = vector.broadcast %cst_121 : f32 to vector<16x256xf32>
    %542 = arith.addf %541, %540 : vector<16x256xf32>
    %543 = arith.mulf %151, %162 : vector<16x256xf32>
    %cst_122 = arith.constant 0.991999983 : f32
    %544 = vector.broadcast %cst_122 : f32 to vector<16x256xf32>
    %545 = arith.mulf %544, %543 : vector<16x256xf32>
    %cst_123 = arith.constant 1.000000e-03 : f32
    %546 = vector.broadcast %cst_123 : f32 to vector<16x256xf32>
    %547 = arith.addf %546, %545 : vector<16x256xf32>
    %548 = arith.addf %486, %542 : vector<16x256xf32>
    %549 = arith.addf %487, %547 : vector<16x256xf32>
    %cst_124 = arith.constant 6.000000e+00 : f32
    %550 = vector.broadcast %cst_124 : f32 to vector<16x256xf32>
    %551 = arith.mulf %550, %548 : vector<16x256xf32>
    %cst_125 = arith.constant -3.000000e+00 : f32
    %552 = vector.broadcast %cst_125 : f32 to vector<16x256xf32>
    %553 = arith.addf %552, %551 : vector<16x256xf32>
    %cst_126 = arith.constant 6.000000e+00 : f32
    %554 = vector.broadcast %cst_126 : f32 to vector<16x256xf32>
    %555 = arith.mulf %554, %549 : vector<16x256xf32>
    %cst_127 = arith.constant -3.000000e+00 : f32
    %556 = vector.broadcast %cst_127 : f32 to vector<16x256xf32>
    %557 = arith.addf %556, %555 : vector<16x256xf32>
    %558 = arith.subf %553, %491 : vector<16x256xf32>
    %559 = arith.subf %557, %495 : vector<16x256xf32>
    %560 = vector.extract_strided_slice %167 {offsets = [96, 0], sizes = [16, 256], strides = [1, 1]} : vector<112x256xf32> to vector<16x256xf32>
    %cst_128 = arith.constant 0.000000e+00 : f32
    %561 = vector.broadcast %cst_128 : f32 to vector<16x256xf32>
    %562 = arith.maximumf %560, %561 : vector<16x256xf32>
    %563 = vector.broadcast %cst_128 : f32 to vector<16x256xf32>
    %564 = arith.subf %560, %563 : vector<16x256xf32>
    %565 = arith.cmpf one, %564, %564 : vector<16x256xf32>
    %566 = vector.broadcast %cst_128 : f32 to vector<16x256xf32>
    %567 = arith.addf %560, %566 : vector<16x256xf32>
    %568 = math.absf %564 : vector<16x256xf32>
    %cst_129 = arith.constant 0.000000e+00 : f32
    %569 = vector.broadcast %cst_129 : f32 to vector<16x256xf32>
    %570 = arith.subf %569, %568 : vector<16x256xf32>
    %571 = math.exp %570 : vector<16x256xf32>
    %572 = math.log1p %571 : vector<16x256xf32>
    %573 = arith.addf %562, %572 : vector<16x256xf32>
    %574 = arith.select %565, %567, %573 : vector<16x256xi1>, vector<16x256xf32>
    %cst_130 = arith.constant 0.000000e+00 : f32
    %575 = vector.broadcast %cst_130 : f32 to vector<16x256xf32>
    %576 = arith.maximumf %574, %575 : vector<16x256xf32>
    %577 = vector.broadcast %cst_130 : f32 to vector<16x256xf32>
    %578 = arith.subf %574, %577 : vector<16x256xf32>
    %579 = arith.cmpf one, %578, %578 : vector<16x256xf32>
    %580 = vector.broadcast %cst_130 : f32 to vector<16x256xf32>
    %581 = arith.addf %574, %580 : vector<16x256xf32>
    %582 = math.absf %578 : vector<16x256xf32>
    %cst_131 = arith.constant 0.000000e+00 : f32
    %583 = vector.broadcast %cst_131 : f32 to vector<16x256xf32>
    %584 = arith.subf %583, %582 : vector<16x256xf32>
    %585 = math.exp %584 : vector<16x256xf32>
    %586 = math.log1p %585 : vector<16x256xf32>
    %587 = arith.addf %576, %586 : vector<16x256xf32>
    %588 = arith.select %579, %581, %587 : vector<16x256xi1>, vector<16x256xf32>
    %cst_132 = arith.constant 1.000000e-03 : f32
    %589 = vector.broadcast %cst_132 : f32 to vector<16x256xf32>
    %590 = arith.addf %589, %588 : vector<16x256xf32>
    %591 = arith.cmpf oge, %17, %491 : vector<16x256xf32>
    %592 = arith.cmpf olt, %17, %553 : vector<16x256xf32>
    %593 = arith.andi %591, %592 : vector<16x256xi1>
    %594 = arith.select %593, %491, %532 : vector<16x256xi1>, vector<16x256xf32>
    %595 = arith.select %593, %558, %533 : vector<16x256xi1>, vector<16x256xf32>
    %596 = arith.select %593, %495, %534 : vector<16x256xi1>, vector<16x256xf32>
    %597 = arith.select %593, %559, %535 : vector<16x256xi1>, vector<16x256xf32>
    %598 = arith.select %593, %528, %536 : vector<16x256xi1>, vector<16x256xf32>
    %599 = arith.select %593, %590, %537 : vector<16x256xi1>, vector<16x256xf32>
    %cst_133 = arith.constant 3.000000e+00 : f32
    %600 = vector.broadcast %cst_133 : f32 to vector<16x256xf32>
    %601 = arith.subf %600, %553 : vector<16x256xf32>
    %cst_134 = arith.constant 3.000000e+00 : f32
    %602 = vector.broadcast %cst_134 : f32 to vector<16x256xf32>
    %603 = arith.subf %602, %557 : vector<16x256xf32>
    %604 = arith.cmpf oge, %17, %553 : vector<16x256xf32>
    %605 = arith.select %604, %553, %594 : vector<16x256xi1>, vector<16x256xf32>
    %606 = arith.select %604, %601, %595 : vector<16x256xi1>, vector<16x256xf32>
    %607 = arith.select %604, %557, %596 : vector<16x256xi1>, vector<16x256xf32>
    %608 = arith.select %604, %603, %597 : vector<16x256xi1>, vector<16x256xf32>
    %609 = arith.select %604, %590, %598 : vector<16x256xi1>, vector<16x256xf32>
    %cst_135 = arith.constant 1.000000e+00 : f32
    %610 = vector.broadcast %cst_135 : f32 to vector<16x256xf32>
    %611 = arith.select %604, %610, %599 : vector<16x256xi1>, vector<16x256xf32>
    %cst_136 = arith.constant 1.000000e+00 : f32
    %612 = vector.broadcast %cst_136 : f32 to vector<16x256xf32>
    %613 = arith.divf %612, %606 : vector<16x256xf32>
    %614 = arith.mulf %608, %613 : vector<16x256xf32>
    %615 = arith.subf %17, %605 : vector<16x256xf32>
    %616 = arith.mulf %615, %613 : vector<16x256xf32>
    %cst_137 = arith.constant 1.000000e+00 : f32
    %617 = vector.broadcast %cst_137 : f32 to vector<16x256xf32>
    %618 = arith.subf %617, %616 : vector<16x256xf32>
    %619 = arith.mulf %616, %618 : vector<16x256xf32>
    %620 = arith.mulf %616, %616 : vector<16x256xf32>
    %621 = arith.mulf %614, %620 : vector<16x256xf32>
    %622 = arith.mulf %609, %619 : vector<16x256xf32>
    %623 = arith.addf %621, %622 : vector<16x256xf32>
    %624 = arith.mulf %608, %623 : vector<16x256xf32>
    %625 = arith.addf %609, %611 : vector<16x256xf32>
    %cst_138 = arith.constant 2.000000e+00 : f32
    %626 = vector.broadcast %cst_138 : f32 to vector<16x256xf32>
    %627 = arith.mulf %626, %614 : vector<16x256xf32>
    %628 = arith.subf %625, %627 : vector<16x256xf32>
    %629 = arith.mulf %628, %619 : vector<16x256xf32>
    %630 = arith.addf %614, %629 : vector<16x256xf32>
    %cst_139 = arith.constant 1.000000e+00 : f32
    %631 = vector.broadcast %cst_139 : f32 to vector<16x256xf32>
    %632 = arith.divf %631, %630 : vector<16x256xf32>
    %633 = arith.mulf %624, %632 : vector<16x256xf32>
    %634 = arith.addf %607, %633 : vector<16x256xf32>
    %635 = arith.mulf %614, %614 : vector<16x256xf32>
    %636 = arith.mulf %611, %620 : vector<16x256xf32>
    %cst_140 = arith.constant 2.000000e+00 : f32
    %637 = vector.broadcast %cst_140 : f32 to vector<16x256xf32>
    %638 = arith.mulf %637, %614 : vector<16x256xf32>
    %639 = arith.mulf %638, %619 : vector<16x256xf32>
    %640 = arith.addf %636, %639 : vector<16x256xf32>
    %641 = arith.mulf %609, %618 : vector<16x256xf32>
    %642 = arith.mulf %641, %618 : vector<16x256xf32>
    %643 = arith.addf %640, %642 : vector<16x256xf32>
    %644 = arith.mulf %635, %643 : vector<16x256xf32>
    %645 = arith.mulf %632, %632 : vector<16x256xf32>
    %646 = arith.mulf %644, %645 : vector<16x256xf32>
    %647 = math.log %646 : vector<16x256xf32>
    %648 = arith.select %22, %634, %13 : vector<16x256xi1>, vector<16x256xf32>
    %c0_141 = arith.constant 0 : index
    %c0_142 = arith.constant 0 : index
    %649 = vector.load %arg13[%c0_141, %c0_142] : memref<16x256xf32, #tpu.memory_space<vmem>>, vector<16x256xf32>
    tpu.vector_store %arg13[%c0_141, %c0_142], %648 {strides = array<i32>} : memref<16x256xf32, #tpu.memory_space<vmem>>, vector<16x256xf32>,
    %cst_143 = arith.constant 0.000000e+00 : f32
    %650 = vector.broadcast %cst_143 : f32 to vector<16x256xf32>
    %651 = arith.select %22, %647, %650 : vector<16x256xi1>, vector<16x256xf32>
    %cst_144 = arith.constant dense<0.000000e+00> : vector<256xf32>
    %652 = vector.multi_reduction <add>, %651, %cst_144 [0] : vector<16x256xf32> to vector<256xf32>
    %653 = vector.shape_cast %652 : vector<256xf32> to vector<1x256xf32>
    %c0_145 = arith.constant 0 : index
    %c0_146 = arith.constant 0 : index
    %654 = vector.load %arg14[%c0_145, %c0_146] : memref<1x256xf32, #tpu.memory_space<vmem>>, vector<1x256xf32>
    tpu.vector_store %arg14[%c0_145, %c0_146], %653 {strides = array<i32>} : memref<1x256xf32, #tpu.memory_space<vmem>>, vector<1x256xf32>,
    return
  }
  func.func @transform_0(%arg0: i32) -> (i32, i32) {
    %c0_i32 = arith.constant 0 : i32
    %c0_i32_0 = arith.constant 0 : i32
    return %c0_i32, %arg0 : i32, i32
  }
  func.func @transform_1(%arg0: i32) -> (i32, i32) {
    %c0_i32 = arith.constant 0 : i32
    %c0_i32_0 = arith.constant 0 : i32
    return %c0_i32, %arg0 : i32, i32
  }
  func.func @transform_2(%arg0: i32) -> (i32, i32) {
    %c0_i32 = arith.constant 0 : i32
    %c0_i32_0 = arith.constant 0 : i32
    %c0_i32_1 = arith.constant 0 : i32
    return %c0_i32, %c0_i32_0 : i32, i32
  }
  func.func @transform_3(%arg0: i32) -> (i32, i32) {
    %c0_i32 = arith.constant 0 : i32
    %c0_i32_0 = arith.constant 0 : i32
    %c0_i32_1 = arith.constant 0 : i32
    return %c0_i32, %c0_i32_0 : i32, i32
  }
  func.func @transform_4(%arg0: i32) -> (i32, i32) {
    %c0_i32 = arith.constant 0 : i32
    %c0_i32_0 = arith.constant 0 : i32
    %c0_i32_1 = arith.constant 0 : i32
    return %c0_i32, %c0_i32_0 : i32, i32
  }
  func.func @transform_5(%arg0: i32) -> (i32, i32) {
    %c0_i32 = arith.constant 0 : i32
    %c0_i32_0 = arith.constant 0 : i32
    %c0_i32_1 = arith.constant 0 : i32
    return %c0_i32, %c0_i32_0 : i32, i32
  }
  func.func @transform_6(%arg0: i32) -> (i32, i32) {
    %c0_i32 = arith.constant 0 : i32
    %c0_i32_0 = arith.constant 0 : i32
    %c0_i32_1 = arith.constant 0 : i32
    return %c0_i32, %c0_i32_0 : i32, i32
  }
  func.func @transform_7(%arg0: i32) -> (i32, i32) {
    %c0_i32 = arith.constant 0 : i32
    %c0_i32_0 = arith.constant 0 : i32
    %c0_i32_1 = arith.constant 0 : i32
    return %c0_i32, %c0_i32_0 : i32, i32
  }
  func.func @transform_8(%arg0: i32) -> (i32, i32) {
    %c0_i32 = arith.constant 0 : i32
    %c0_i32_0 = arith.constant 0 : i32
    %c0_i32_1 = arith.constant 0 : i32
    return %c0_i32, %c0_i32_0 : i32, i32
  }
  func.func @transform_9(%arg0: i32) -> (i32, i32) {
    %c0_i32 = arith.constant 0 : i32
    %c0_i32_0 = arith.constant 0 : i32
    %c0_i32_1 = arith.constant 0 : i32
    return %c0_i32, %c0_i32_0 : i32, i32
  }
  func.func @transform_10(%arg0: i32) -> (i32, i32) {
    %c0_i32 = arith.constant 0 : i32
    %c0_i32_0 = arith.constant 0 : i32
    %c0_i32_1 = arith.constant 0 : i32
    return %c0_i32, %c0_i32_0 : i32, i32
  }
  func.func @transform_11(%arg0: i32) -> (i32, i32) {
    %c0_i32 = arith.constant 0 : i32
    %c0_i32_0 = arith.constant 0 : i32
    %c0_i32_1 = arith.constant 0 : i32
    return %c0_i32, %c0_i32_0 : i32, i32
  }
  func.func @transform_12(%arg0: i32) -> (i32, i32) {
    %c0_i32 = arith.constant 0 : i32
    %c0_i32_0 = arith.constant 0 : i32
    return %c0_i32, %arg0 : i32, i32
  }
  func.func @transform_13(%arg0: i32) -> (i32, i32) {
    %c0_i32 = arith.constant 0 : i32
    %c0_i32_0 = arith.constant 0 : i32
    return %c0_i32, %arg0 : i32, i32
  }
}

</mosaic_0001>

<bundles_post_ra>
// kernel: nsf_cl_forward.1
= control target key start
LH: loop header
LB: loop body
LE: loop exit
PB: predicated region body
PF: predicated region fallthrough
CT: control target
= control target key end

     0   :  { %vm74_vm0 = vcmask 64512   ;;  %v15289_v5 = vmov 0.0   ;;  %v8742_v9 = vmov 0   ;;  %s15239_s0 = inlined_call_operand.vmem [shape: f32[8,256], index: 0, kind: input, shape index: {}]   ;;  %s15240_s1 = inlined_call_operand.vmem [shape: f32[16,256], index: 1, kind: input, shape index: {}]   ;;  %s15241_s2 = inlined_call_operand.vmem [shape: f32[32,8], index: 2, kind: input, shape index: {}]   ;;  %s15242_s3 = inlined_call_operand.vmem [shape: f32[32,1], index: 3, kind: input, shape index: {}]   ;;  %s15243_s4 = inlined_call_operand.vmem [shape: f32[32,32], index: 4, kind: input, shape index: {}]   ;;  %s15244_s5 = inlined_call_operand.vmem [shape: f32[32,1], index: 5, kind: input, shape index: {}]   ;;  %s15245_s6 = inlined_call_operand.vmem [shape: f32[128,32], index: 6, kind: input, shape index: {}]   ;;  %s15246_s7 = inlined_call_operand.vmem [shape: f32[128,1], index: 7, kind: input, shape index: {}]   ;;  %s15247_s8 = inlined_call_operand.vmem [shape: f32[128,32], index: 8, kind: input, shape index: {}]   ;;  %s15248_s9 = inlined_call_operand.vmem [shape: f32[128,1], index: 9, kind: input, shape index: {}]   ;;  %s15249_s10 = inlined_call_operand.vmem [shape: f32[112,32], index: 10, kind: input, shape index: {}]   ;;  %s15250_s11 = inlined_call_operand.vmem [shape: f32[112,1], index: 11, kind: input, shape index: {}]   ;;  %s15251_s12 = inlined_call_operand.vmem [shape: f32[16,256], index: 12, kind: output, shape index: {0}]   ;;  %s15252_s13 = inlined_call_operand.hbm [shape: f32[1,256], index: 13, kind: output, shape index: {1}]  }
   0x1   :  { %v49_v0 = vld [vmem:[%s15239_s0 + $0x8] sm:$0xff]  ;;  %v48_v1 = vld [vmem:[%s15239_s0] sm:$0xff]  ;;  %153 = vmatprep.mubr.f32.mxu0 %v15289_v5  ;;  %272 = vmatprep.mubr.f32.mxu1 %v15289_v5  ;;  %v53_v7 = vld [vmem:[%s15242_s3 + $0x18] sm:$0xff] }
   0x2   :  { %v44_v2 = vld [vmem:[%s15241_s2] sm:$0xff]  ;;  %v8824_v3 = vand.u32 4294901760, %v49_v0  ;;  %v8826_v4 = vand.u32 4294901760, %v48_v1  ;;  %v45_v8 = vld [vmem:[%s15241_s2 + $0x8] sm:$0xff]  ;;  %8145 = vset.pattern.permute.xlu0 %v8742_v9  ;;  %8146 = vset.pattern.permute.xlu1 %v8742_v9  ;;  %v46_v13 = vld [vmem:[%s15241_s2 + $0x10] sm:$0xff] }
   0x3   :  { %v76_v6 = vsel %vm74_vm0, %v44_v2, 0  ;;  %v79_v11 = vsel %vm74_vm0, %v45_v8, 0  ;;  %v51_v12 = vld [vmem:[%s15242_s3 + $0x8] sm:$0xff]  ;;  %71 = vperm.xlu0 %8145, %v53_v7   ;;  %v82_v17 = vsel %vm74_vm0, %v46_v13, 0  ;;  %v47_v18 = vld [vmem:[%s15241_s2 + $0x18] sm:$0xff]  ;;  %v52_v20 = vld [vmem:[%s15242_s3 + $0x10] sm:$0xff] }
   0x4   :  { %v8837_v10 = vand.u32 4294901760, %v76_v6  ;;  %118 = vmatprep.subr.mxu0 %v8824_v3  ;;  %v229_v14 = vsub.f32 %v49_v0, %v8824_v3  ;;  %v8849_v15 = vsub.f32 %v48_v1, %v8826_v4  ;;  %v8851_v16 = vand.u32 4294901760, %v79_v11  ;;  %61 = vperm.xlu1 %8146, %v51_v12   ;;  %v50_v26 = vld [vmem:[%s15242_s3] sm:$0xff]  ;;  %v714_v35 = vld [vmem:[%s15244_s5 + $0x18] sm:$0xff]  ;;  %v712_v44 = vld [vmem:[%s15244_s5 + $0x8] sm:$0xff] }
   0x5   :  { %120 = vmatpush1.msra.mxu0 %v8826_v4  ;;  %v8864_v21 = vand.u32 4294901760, %v82_v17  ;;  %v85_v22 = vsel %vm74_vm0, %v47_v18, 0  ;;  %v713_v45 = vld [vmem:[%s15244_s5 + $0x10] sm:$0xff]  ;;  %v1486_v48 = vld [vmem:[%s15246_s7] sm:$0xff] }
   0x6   :  { %v8859_v19 = vsub.f32 %v76_v6, %v8837_v10  ;;  %v230_v23 = vand.u32 4294901760, %v229_v14  ;;  %v236_v24 = vand.u32 4294901760, %v8849_v15  ;;  %v8869_v25 = vsub.f32 %v79_v11, %v8851_v16  ;;  %333 = vmatprep.subr.mxu0 %v229_v14  ;;  %v711_v49 = vld [vmem:[%s15244_s5] sm:$0xff]  ;;  %v1488_v51 = vld [vmem:[%s15246_s7 + $0x10] sm:$0xff] }
   0x7   :  { %v8874_v27 = vand.u32 4294901760, %v85_v22  ;;  %v8878_v29 = vsub.f32 %v82_v17, %v8864_v21  ;;  %66 = vperm.xlu0 %8145, %v52_v20  }
   0x8   :  { %v156_v28 = vand.u32 4294901760, %v8859_v19  ;;  %v231_v30 = vsub.f32 %v229_v14, %v230_v23  ;;  %v237_v31 = vsub.f32 %v8849_v15, %v236_v24  ;;  %v167_v32 = vand.u32 4294901760, %v8869_v25  ;;  %56 = vperm.xlu1 %8146, %v50_v26  }
   0x9   :  { %v178_v34 = vand.u32 4294901760, %v8878_v29  ;;  %v8890_v36 = vsub.f32 %v85_v22, %v8874_v27 }
   0xa   :  { %v157_v33 = vsub.f32 %v8859_v19, %v156_v28  ;;  %v232_v37 = vand.u32 4294901760, %v231_v30  ;;  %v238_v38 = vand.u32 4294901760, %v237_v31  ;;  %v168_v39 = vsub.f32 %v8869_v25, %v167_v32 }
   0xb   :  { %732 = vperm.xlu0 %8145, %v714_v35   ;;  %v179_v42 = vsub.f32 %v8878_v29, %v178_v34  ;;  %v189_v43 = vand.u32 4294901760, %v8890_v36 }
   0xc   :  { %v158_v40 = vand.u32 4294901760, %v157_v33  ;;  %233 = vmatprep.subr.mxu1 %v232_v37  ;;  %v169_v41 = vand.u32 4294901760, %v168_v39  ;;  %727 = vperm.xlu1 %8146, %v713_v45  }
   0xd   :  { %239 = vmatpush1.msra.mxu1 %v238_v38  ;;  %v180_v46 = vand.u32 4294901760, %v179_v42  ;;  %v190_v47 = vsub.f32 %v8890_v36, %v189_v43 }
   0xe   :  { %159 = vmatmul.mubr.f32.vlgmr.msra.gmra.mxu0 %v158_v40  ;;  %274 = vmatmul.mubr.f32.vlgmr.msra.gmra.mxu1 %v8837_v10 }
   0xf   :  { %164 = vmatprep.mubr.f32.mxu0 %v15289_v5  ;;  %279 = vmatprep.mubr.f32.mxu1 %v15289_v5  ;;  %v191_v50 = vand.u32 4294901760, %v190_v47 }
  0x10   :  { %336 = vmatpush1.msra.mxu0 %v8849_v15  ;;  %433 = vmatprep.subr.mxu1 %v8824_v3 }
  0x11   :  { %722 = vperm.xlu0 %8145, %v712_v44   ;;  %435 = vmatpush1.msra.mxu1 %v8826_v4 }
  0x12   :  { %170 = vmatmul.mubr.f32.gmra.mxu0 %v169_v41  ;;  %281 = vmatmul.mubr.f32.gmra.mxu1 %v8851_v16 }
  0x13   :  { %175 = vmatprep.mubr.f32.mxu0 %v15289_v5  ;;  %286 = vmatprep.mubr.f32.mxu1 %v15289_v5 }
  0x14   :  { %538 = vmatprep.subr.mxu0 %v230_v23  ;;  %635 = vmatprep.subr.mxu1 %v8824_v3 }
  0x15   :  { %1504 = vperm.xlu0 %8145, %v1486_v48  }
  0x16   :  { %181 = vmatmul.mubr.f32.gmra.mxu0 %v180_v46 }
  0x17   :  { %19 = vsyncpa [#allocation3], 0  ;;  %288 = vmatmul.mubr.f32.gmra.mxu1 %v8864_v21  ;;  %186 = vmatprep.mubr.f32.mxu0 %v15289_v5  ;;  %v1487_v52 = vld [vmem:[%s15246_s7 + $0x8] sm:$0xff]  ;;  %v1490_v53 = vld [vmem:[%s15246_s7 + $0x20] sm:$0xff]  ;;  %vm735_vm1 = vcmask 261120  }
  0x18   :  { %293 = vmatprep.mubr.f32.mxu1 %v15289_v5  ;;  %717 = vperm.xlu1 %8146, %v711_v49   ;;  %v1489_v54 = vld [vmem:[%s15246_s7 + $0x18] sm:$0xff]  ;;  %v1492_v55 = vld [vmem:[%s15246_s7 + $0x30] sm:$0xff]  ;;  %v1491_v56 = vld [vmem:[%s15246_s7 + $0x28] sm:$0xff] }
  0x19   :  { %1514 = vperm.xlu0 %8145, %v1488_v51   ;;  %v1494_v57 = vld [vmem:[%s15246_s7 + $0x40] sm:$0xff]  ;;  %v1493_v58 = vld [vmem:[%s15246_s7 + $0x38] sm:$0xff]  ;;  %v1496_v59 = vld [vmem:[%s15246_s7 + $0x50] sm:$0xff] }
  0x1a   :  { %192 = vmatmul.mubr.f32.gmra.mxu0 %v191_v50  ;;  %v1495_v60 = vld [vmem:[%s15246_s7 + $0x48] sm:$0xff]  ;;  %v1498_v61 = vld [vmem:[%s15246_s7 + $0x60] sm:$0xff]  ;;  %v1497_v62 = vld [vmem:[%s15246_s7 + $0x58] sm:$0xff] }
  0x1b   :  { %295 = vmatmul.mubr.f32.gmra.mxu1 %v8874_v27  ;;  %369 = vmatprep.mubr.f32.mxu0 %v15289_v5  ;;  %v1500_v63 = vld [vmem:[%s15246_s7 + $0x70] sm:$0xff]  ;;  %v1499_v0 = vld [vmem:[%s15246_s7 + $0x68] sm:$0xff]  ;;  %v3216_v1 = vld [vmem:[%s15248_s9] sm:$0xff] }
  0x1c   :  { %468 = vmatprep.mubr.f32.mxu1 %v15289_v5  ;;  %1509 = vperm.xlu1 %8146, %v1487_v52   ;;  %v1501_v2 = vld [vmem:[%s15246_s7 + $0x78] sm:$0xff]  ;;  %v3218_v3 = vld [vmem:[%s15248_s9 + $0x10] sm:$0xff]  ;;  %v3220_v6 = vld [vmem:[%s15248_s9 + $0x20] sm:$0xff] }
  0x1d   :  { %1524 = vperm.xlu0 %8145, %v1490_v53   ;;  %v3219_v7 = vld [vmem:[%s15248_s9 + $0x18] sm:$0xff]  ;;  %v3222_v8 = vld [vmem:[%s15248_s9 + $0x30] sm:$0xff]  ;;  %v3221_v9 = vld [vmem:[%s15248_s9 + $0x28] sm:$0xff] }
  0x1e   :  { %372 = vmatmul.mubr.f32.vlgmr.msra.gmra.mxu0 %v8859_v19  ;;  %v3223_v11 = vld [vmem:[%s15248_s9 + $0x38] sm:$0xff]  ;;  %v3226_v12 = vld [vmem:[%s15248_s9 + $0x50] sm:$0xff]  ;;  %v3225_v13 = vld [vmem:[%s15248_s9 + $0x48] sm:$0xff] }
  0x1f   :  { %472 = vmatmul.mubr.f32.vlgmr.msra.gmra.mxu1 %v156_v28  ;;  %377 = vmatprep.mubr.f32.mxu0 %v15289_v5  ;;  %v3228_v14 = vld [vmem:[%s15248_s9 + $0x60] sm:$0xff]  ;;  %v3227_v15 = vld [vmem:[%s15248_s9 + $0x58] sm:$0xff]  ;;  %v3229_v17 = vld [vmem:[%s15248_s9 + $0x68] sm:$0xff] }
  0x20   :  { %477 = vmatprep.mubr.f32.mxu1 %v15289_v5  ;;  %1519 = vperm.xlu1 %8146, %v1489_v54   ;;  %v4944_v18 = vld [vmem:[%s15250_s11] sm:$0xff]  ;;  %v3231_v19 = vld [vmem:[%s15248_s9 + $0x78] sm:$0xff]  ;;  %v4946_v20 = vld [vmem:[%s15250_s11 + $0x10] sm:$0xff] }
  0x21   :  { %542 = vmatpush1.msra.mxu0 %v236_v24  ;;  %637 = vmatpush1.msra.mxu1 %v8826_v4  ;;  %v3217_v4 = vld [vmem:[%s15248_s9 + $0x8] sm:$0xff]  ;;  %v4948_v22 = vld [vmem:[%s15250_s11 + $0x20] sm:$0xff]  ;;  %v4947_v23 = vld [vmem:[%s15250_s11 + $0x18] sm:$0xff] }
  0x22   :  { %380 = vmatmul.mubr.f32.gmra.mxu0 %v8869_v25  ;;  %1534 = vperm.xlu0 %8145, %v1492_v55   ;;  %v4950_v24 = vld [vmem:[%s15250_s11 + $0x30] sm:$0xff]  ;;  %v4949_v25 = vld [vmem:[%s15250_s11 + $0x28] sm:$0xff]  ;;  %v4952_v26 = vld [vmem:[%s15250_s11 + $0x40] sm:$0xff] }
  0x23   :  { %481 = vmatmul.mubr.f32.gmra.mxu1 %v167_v32  ;;  %385 = vmatprep.mubr.f32.mxu0 %v15289_v5  ;;  %v4954_v28 = vld [vmem:[%s15250_s11 + $0x50] sm:$0xff]  ;;  %v4956_v30 = vld [vmem:[%s15250_s11 + $0x60] sm:$0xff]  ;;  %v4955_v31 = vld [vmem:[%s15250_s11 + $0x58] sm:$0xff] }
  0x24   :  { %486 = vmatprep.mubr.f32.mxu1 %v15289_v5  ;;  %1529 = vperm.xlu1 %8146, %v1491_v56   ;;  %v4957_v32 = vld [vmem:[%s15250_s11 + $0x68] sm:$0xff] }
  0x26   :  { %388 = vmatmul.mubr.f32.gmra.mxu0 %v8878_v29  ;;  %1544 = vperm.xlu0 %8145, %v1494_v57   ;;  %v4953_v29 = vld [vmem:[%s15250_s11 + $0x48] sm:$0xff] }
  0x27   :  { %490 = vmatmul.mubr.f32.gmra.mxu1 %v178_v34  ;;  %393 = vmatprep.mubr.f32.mxu0 %v15289_v5 }
  0x28   :  { %495 = vmatprep.mubr.f32.mxu1 %v15289_v5  ;;  %1539 = vperm.xlu1 %8146, %v1493_v58  }
  0x2a   :  { %396 = vmatmul.mubr.f32.gmra.mxu0 %v8890_v36  ;;  %1554 = vperm.xlu0 %8145, %v1496_v59  }
  0x2b   :  { %499 = vmatmul.mubr.f32.gmra.mxu1 %v189_v43  ;;  %575 = vmatprep.mubr.f32.mxu0 %v15289_v5 }
  0x2c   :  { %670 = vmatprep.mubr.f32.mxu1 %v15289_v5  ;;  %1549 = vperm.xlu1 %8146, %v1495_v60  }
  0x2e   :  { %577 = vmatmul.mubr.f32.vlgmr.msra.gmra.mxu0 %v8837_v10  ;;  %1564 = vperm.xlu0 %8145, %v1498_v61  }
  0x2f   :  { %672 = vmatmul.mubr.f32.vlgmr.msra.gmra.mxu1 %v8837_v10  ;;  %582 = vmatprep.mubr.f32.mxu0 %v15289_v5  ;;  %v3224_v10 = vld [vmem:[%s15248_s9 + $0x40] sm:$0xff] }
  0x30   :  { %677 = vmatprep.mubr.f32.mxu1 %v15289_v5  ;;  %1559 = vperm.xlu1 %8146, %v1497_v62  }
  0x32   :  { %584 = vmatmul.mubr.f32.gmra.mxu0 %v8851_v16  ;;  %1574 = vperm.xlu0 %8145, %v1500_v63  }
  0x33   :  { %679 = vmatmul.mubr.f32.gmra.mxu1 %v8851_v16  ;;  %589 = vmatprep.mubr.f32.mxu0 %v15289_v5  ;;  %v3230_v16 = vld [vmem:[%s15248_s9 + $0x70] sm:$0xff] }
  0x34   :  { %684 = vmatprep.mubr.f32.mxu1 %v15289_v5  ;;  %1569 = vperm.xlu1 %8146, %v1499_v0  }
  0x36   :  { %591 = vmatmul.mubr.f32.gmra.mxu0 %v8864_v21  ;;  %3234 = vperm.xlu0 %8145, %v3216_v1  }
  0x37   :  { %686 = vmatmul.mubr.f32.gmra.mxu1 %v8864_v21  ;;  %596 = vmatprep.mubr.f32.mxu0 %v15289_v5  ;;  %v4945_v21 = vld [vmem:[%s15250_s11 + $0x8] sm:$0xff] }
  0x38   :  { %691 = vmatprep.mubr.f32.mxu1 %v15289_v5  ;;  %1579 = vperm.xlu1 %8146, %v1501_v2  }
  0x3a   :  { %598 = vmatmul.mubr.f32.gmra.mxu0 %v8874_v27  ;;  %3244 = vperm.xlu0 %8145, %v3218_v3  }
  0x3b   :  { %693 = vmatmul.mubr.f32.gmra.mxu1 %v8874_v27  ;;  %820 = vmatprep.mubr.f32.mxu0 %v15289_v5  ;;  %v4951_v27 = vld [vmem:[%s15250_s11 + $0x38] sm:$0xff] }
  0x3c   :  { %3239 = vperm.xlu1 %8146, %v3217_v4   ;;  %969 = vmatprep.mubr.f32.mxu1 %v15289_v5 }
  0x3e   :  { %3254 = vperm.xlu0 %8145, %v3220_v6  }
  0x40   :  { %3249 = vperm.xlu1 %8146, %v3219_v7  }
  0x42   :  { %3264 = vperm.xlu0 %8145, %v3222_v8  }
  0x44   :  { %3259 = vperm.xlu1 %8146, %v3221_v9  }
  0x46   :  { %3274 = vperm.xlu0 %8145, %v3224_v10  }
  0x48   :  { %3269 = vperm.xlu1 %8146, %v3223_v11  }
  0x4a   :  { %3284 = vperm.xlu0 %8145, %v3226_v12  }
  0x4c   :  { %3279 = vperm.xlu1 %8146, %v3225_v13  }
  0x4e   :  { %3294 = vperm.xlu0 %8145, %v3228_v14  }
  0x50   :  { %3289 = vperm.xlu1 %8146, %v3227_v15  }
  0x52   :  { %3304 = vperm.xlu0 %8145, %v3230_v16  }
  0x54   :  { %3299 = vperm.xlu1 %8146, %v3229_v17  }
  0x56   :  { %4960 = vperm.xlu0 %8145, %v4944_v18  }
  0x58   :  { %3309 = vperm.xlu1 %8146, %v3231_v19  }
  0x5a   :  { %4970 = vperm.xlu0 %8145, %v4946_v20  }
  0x5c   :  { %4965 = vperm.xlu1 %8146, %v4945_v21  }
  0x5e   :  { %4980 = vperm.xlu0 %8145, %v4948_v22  }
  0x60   :  { %4975 = vperm.xlu1 %8146, %v4947_v23  }
  0x62   :  { %4990 = vperm.xlu0 %8145, %v4950_v24  }
  0x64   :  { %4985 = vperm.xlu1 %8146, %v4949_v25  }
  0x66   :  { %5000 = vperm.xlu0 %8145, %v4952_v26  }
  0x68   :  { %4995 = vperm.xlu1 %8146, %v4951_v27  }
  0x6a   :  { %5010 = vperm.xlu0 %8145, %v4954_v28  }
  0x6c   :  { %5005 = vperm.xlu1 %8146, %v4953_v29  }
  0x6e   :  { %5020 = vperm.xlu0 %8145, %v4956_v30  }
  0x70   :  { %5015 = vperm.xlu1 %8146, %v4955_v31  }
  0x74   :  { %5025 = vperm.xlu1 %8146, %v4957_v32  }
  0x7e   :  { %v72_v56 = vpop.permute.xlu0 %71 }
  0x7f   :  { %v62_v54 = vpop.permute.xlu1 %61 }
  0x82   :  { %v67_v2 = vpop.permute.xlu0 %66 }
  0x83   :  { %v57_v63 = vpop.permute.xlu1 %56 }
  0xce   :  { %v160_v33 = vpop.f32.mrf.mxu0  ;;  %v275_v34 = vpop.f32.mrf.mxu1 }
  0xcf   :  { %v161_v9 = vadd.f32 %v160_v33, %v57_v63 }
  0xd0   :  { %v162_v35 = vpop.f32.mrf.mxu0  ;;  %v277_v36 = vpop.f32.mrf.mxu1 }
  0xd1   :  { %v163_v3 = vadd.f32 %v162_v35, %v57_v63  ;;  %v276_v21 = vadd.f32 %v275_v34, %v161_v9 }
  0xd2   :  { %v171_v37 = vpop.f32.mrf.mxu0  ;;  %v282_v38 = vpop.f32.mrf.mxu1 }
  0xd3   :  { %v172_v60 = vadd.f32 %v171_v37, %v62_v54  ;;  %v278_v15 = vadd.f32 %v277_v36, %v163_v3 }
  0xd4   :  { %v173_v39 = vpop.f32.mrf.mxu0  ;;  %v284_v40 = vpop.f32.mrf.mxu1 }
  0xd5   :  { %v174_v0 = vadd.f32 %v173_v39, %v62_v54  ;;  %v283_v6 = vadd.f32 %v282_v38, %v172_v60 }
  0xd6   :  { %v182_v41 = vpop.f32.mrf.mxu0 }
  0xd7   :  { %v289_v42 = vpop.f32.mrf.mxu1  ;;  %v183_v7 = vadd.f32 %v182_v41, %v67_v2  ;;  %v285_v11 = vadd.f32 %v284_v40, %v174_v0 }
  0xd8   :  { %v184_v43 = vpop.f32.mrf.mxu0 }
  0xd9   :  { %v291_v44 = vpop.f32.mrf.mxu1  ;;  %v185_v12 = vadd.f32 %v184_v43, %v67_v2  ;;  %v290_v17 = vadd.f32 %v289_v42, %v183_v7 }
  0xda   :  { %v193_v45 = vpop.f32.mrf.mxu0 }
  0xdb   :  { %v296_v46 = vpop.f32.mrf.mxu1  ;;  %v194_v18 = vadd.f32 %v193_v45, %v72_v56  ;;  %v292_v24 = vadd.f32 %v291_v44, %v185_v12 }
  0xdc   :  { %v195_v47 = vpop.f32.mrf.mxu0 }
  0xdd   :  { %v298_v48 = vpop.f32.mrf.mxu1  ;;  %v196_v25 = vadd.f32 %v195_v47, %v72_v56  ;;  %v297_v31 = vadd.f32 %v296_v46, %v194_v18 }
  0xde   :  { %v373_v49 = vpop.f32.mrf.mxu0 }
  0xdf   :  { %v473_v50 = vpop.f32.mrf.mxu1  ;;  %v374_v29 = vadd.f32 %v373_v49, %v276_v21  ;;  %v299_v39 = vadd.f32 %v298_v48, %v196_v25 }
  0xe0   :  { %v375_v51 = vpop.f32.mrf.mxu0 }
  0xe1   :  { %v475_v52 = vpop.f32.mrf.mxu1  ;;  %v376_v22 = vadd.f32 %v375_v51, %v278_v15  ;;  %v474_v43 = vadd.f32 %v473_v50, %v374_v29 }
  0xe2   :  { %v381_v53 = vpop.f32.mrf.mxu0 }
  0xe3   :  { %v482_v55 = vpop.f32.mrf.mxu1  ;;  %v382_v13 = vadd.f32 %v381_v53, %v283_v6  ;;  %v476_v37 = vadd.f32 %v475_v52, %v376_v22  ;;  %v707_v6 = vld [vmem:[%s15243_s4] sm:$0xff] }
  0xe4   :  { %v383_v57 = vpop.f32.mrf.mxu0 }
  0xe5   :  { %v484_v58 = vpop.f32.mrf.mxu1  ;;  %v384_v19 = vadd.f32 %v383_v57, %v285_v11  ;;  %v483_v26 = vadd.f32 %v482_v55, %v382_v13 }
  0xe6   :  { %v389_v59 = vpop.f32.mrf.mxu0 }
  0xe7   :  { %v491_v61 = vpop.f32.mrf.mxu1  ;;  %v390_v27 = vadd.f32 %v389_v59, %v290_v17  ;;  %v485_v32 = vadd.f32 %v484_v58, %v384_v19 }
  0xe8   :  { %v391_v62 = vpop.f32.mrf.mxu0 }
  0xe9   :  { %v493_v1 = vpop.f32.mrf.mxu1  ;;  %v392_v33 = vadd.f32 %v391_v62, %v292_v24  ;;  %v492_v40 = vadd.f32 %v491_v61, %v390_v27 }
  0xea   :  { %v397_v4 = vpop.f32.mrf.mxu0 }
  0xeb   :  { %v500_v8 = vpop.f32.mrf.mxu1  ;;  %v398_v41 = vadd.f32 %v397_v4, %v297_v31  ;;  %v494_v51 = vadd.f32 %v493_v1, %v392_v33 }
  0xec   :  { %v399_v10 = vpop.f32.mrf.mxu0 }
  0xed   :  { %v502_v14 = vpop.f32.mrf.mxu1  ;;  %v400_v53 = vadd.f32 %v399_v10, %v299_v39  ;;  %v501_v57 = vadd.f32 %v500_v8, %v398_v41  ;;  %v737_v8 = vsel %vm735_vm1, %v707_v6, 0  ;;  %v708_v10 = vld [vmem:[%s15243_s4 + $0x8] sm:$0xff] }
  0xee   :  { %v578_v16 = vpop.f32.mrf.mxu0  ;;  %v9106_v9 = vand.u32 4294901760, %v737_v8  ;;  %v740_v12 = vsel %vm735_vm1, %v708_v10, 0 }
  0xef   :  { %v673_v20 = vpop.f32.mrf.mxu1  ;;  %v579_v46 = vadd.f32 %v578_v16, %v474_v43  ;;  %v503_v61 = vadd.f32 %v502_v14, %v400_v53  ;;  %v709_v16 = vld [vmem:[%s15243_s4 + $0x10] sm:$0xff]  ;;  %v9118_v18 = vand.u32 4294901760, %v740_v12 }
  0xf0   :  { %v580_v23 = vpop.f32.mrf.mxu0  ;;  %v9113_v14 = vsub.f32 %v737_v8, %v9106_v9  ;;  %v743_v25 = vsel %vm735_vm1, %v709_v16, 0 }
  0xf1   :  { %v675_v28 = vpop.f32.mrf.mxu1  ;;  %v581_v44 = vadd.f32 %v580_v23, %v476_v37  ;;  %v674_v0 = vadd.f32 %v673_v20, %v579_v46  ;;  %v9141_v33 = vsub.f32 %v740_v12, %v9118_v18 }
  0xf2   :  { %v585_v30 = vpop.f32.mrf.mxu0  ;;  %v823_v24 = vand.u32 4294901760, %v9113_v14 }
  0xf3   :  { %v586_v35 = vadd.f32 %v585_v30, %v483_v26  ;;  %v680_v36 = vpop.f32.mrf.mxu1  ;;  %v676_v48 = vadd.f32 %v675_v28, %v581_v44  ;;  %v710_v30 = vld [vmem:[%s15243_s4 + $0x18] sm:$0xff] }
  0xf4   :  { %v587_v38 = vpop.f32.mrf.mxu0 }
  0xf5   :  { %v588_v34 = vadd.f32 %v587_v38, %v485_v32  ;;  %v682_v42 = vpop.f32.mrf.mxu1  ;;  %v681_v45 = vadd.f32 %v680_v36, %v586_v35  ;;  %v9151_v38 = vand.u32 4294901760, %v743_v25 }
  0xf6   :  { %v592_v47 = vpop.f32.mrf.mxu0 }
  0xf7   :  { %v593_v49 = vadd.f32 %v592_v47, %v492_v40  ;;  %v687_v54 = vpop.f32.mrf.mxu1  ;;  %v683_v55 = vadd.f32 %v682_v42, %v588_v34  ;;  %8147 = vtanh.f32 %v681_v45  ;;  %v824_v40 = vsub.f32 %v9113_v14, %v823_v24 }
  0xf8   :  { %v594_v56 = vpop.f32.mrf.mxu0  ;;  %v746_v34 = vsel %vm735_vm1, %v710_v30, 0  ;;  %v834_v47 = vand.u32 4294901760, %v9141_v33 }
  0xf9   :  { %v688_v58 = vadd.f32 %v687_v54, %v593_v49  ;;  %v595_v52 = vadd.f32 %v594_v56, %v494_v51  ;;  %v689_v59 = vpop.f32.mrf.mxu1  ;;  %v9180_v54 = vsub.f32 %v743_v25, %v9151_v38  ;;  %v9182_v46 = vand.u32 4294901760, %v746_v34 }
  0xfa   :  { %v599_v60 = vpop.f32.mrf.mxu0 }
  0xfb   :  { %8149 = vtanh.f32 %v688_v58  ;;  %v690_v50 = vadd.f32 %v689_v59, %v595_v52  ;;  %v600_v62 = vadd.f32 %v599_v60, %v501_v57  ;;  %v694_v63 = vpop.f32.mrf.mxu1  ;;  %v825_v58 = vand.u32 4294901760, %v824_v40 }
  0xfc   :  { %8151 = vtanh.f32 %v683_v55  ;;  %v601_v1 = vpop.f32.mrf.mxu0  ;;  %v835_v60 = vsub.f32 %v9141_v33, %v834_v47 }
  0xfd   :  { %8153 = vtanh.f32 %v690_v50  ;;  %v695_v2 = vadd.f32 %v694_v63, %v600_v62  ;;  %v602_v3 = vadd.f32 %v601_v1, %v503_v61  ;;  %v696_v4 = vpop.f32.mrf.mxu1  ;;  %v845_v63 = vand.u32 4294901760, %v9180_v54 }
  0xfe   :  { %8155 = vtanh.f32 %v676_v48 }
  0xff   :  { %8157 = vtanh.f32 %v695_v2  ;;  %v697_v7 = vadd.f32 %v696_v4, %v602_v3 }
 0x100   :  { %8159 = vtanh.f32 %v674_v0  ;;  %v9209_v0 = vsub.f32 %v746_v34, %v9182_v46 }
 0x101   :  { %8161 = vtanh.f32 %v697_v7  ;;  %v836_v7 = vand.u32 4294901760, %v835_v60 }
 0x102   :  { %v856_v12 = vand.u32 4294901760, %v9209_v0 }
 0x104   :  { %v8148_v11 = vpop.eup %8147 }
 0x105   :  { %v9130_v28 = vand.u32 4294901760, %v8148_v11 }
 0x107   :  { %v9169_v45 = vsub.f32 %v8148_v11, %v9130_v28  ;;  %v846_v11 = vsub.f32 %v9180_v54, %v845_v63 }
 0x108   :  { %v8150_v13 = vpop.eup %8149 }
 0x109   :  { %v8152_v15 = vpop.eup %8151  ;;  %v9122_v21 = vand.u32 4294901760, %v8150_v13  ;;  %v921_v48 = vand.u32 4294901760, %v9169_v45 }
 0x10a   :  { %v8154_v17 = vpop.eup %8153  ;;  %v9124_v23 = vand.u32 4294901760, %v8152_v15 }
 0x10b   :  { %v8156_v19 = vpop.eup %8155  ;;  %v9120_v20 = vand.u32 4294901760, %v8154_v17  ;;  %v9149_v37 = vsub.f32 %v8150_v13, %v9122_v21  ;;  %v922_v6 = vsub.f32 %v9169_v45, %v921_v48 }
 0x10c   :  { %v8158_v22 = vpop.eup %8157  ;;  %v9138_v32 = vand.u32 4294901760, %v8156_v19  ;;  %v9159_v41 = vsub.f32 %v8152_v15, %v9124_v23 }
 0x10d   :  { %v8160_v26 = vpop.eup %8159  ;;  %v9128_v27 = vand.u32 4294901760, %v8158_v22  ;;  %v9133_v29 = vsub.f32 %v8154_v17, %v9120_v20  ;;  %v909_v49 = vand.u32 4294901760, %v9149_v37  ;;  %v923_v16 = vand.u32 4294901760, %v922_v6 }
 0x10e   :  { %v8162_v31 = vpop.eup %8161  ;;  %v9153_v39 = vand.u32 4294901760, %v8160_v26  ;;  %v9174_v51 = vsub.f32 %v8156_v19, %v9138_v32  ;;  %v915_v56 = vand.u32 4294901760, %v9159_v41  ;;  %v847_v19 = vand.u32 4294901760, %v846_v11 }
 0x10f   :  { %v9143_v35 = vand.u32 4294901760, %v8162_v31  ;;  %v9146_v36 = vsub.f32 %v8158_v22, %v9128_v27  ;;  %v903_v44 = vand.u32 4294901760, %v9133_v29  ;;  %v910_v62 = vsub.f32 %v9149_v37, %v909_v49 }
 0x110   :  { %v9190_v57 = vsub.f32 %v8160_v26, %v9153_v39  ;;  %v927_v61 = vand.u32 4294901760, %v9174_v51  ;;  %v916_v2 = vsub.f32 %v9159_v41, %v915_v56  ;;  %v857_v22 = vsub.f32 %v9209_v0, %v856_v12 }
 0x111   :  { %773 = vmatprep.subr.mxu0 %v9143_v35  ;;  %v9164_v42 = vsub.f32 %v8162_v31, %v9143_v35  ;;  %v897_v43 = vand.u32 4294901760, %v9146_v36  ;;  %v904_v59 = vsub.f32 %v9133_v29, %v903_v44  ;;  %v911_v10 = vand.u32 4294901760, %v910_v62 }
 0x112   :  { %775 = vmatpush1.msra.mxu0 %v9128_v27  ;;  %v933_v3 = vand.u32 4294901760, %v9190_v57  ;;  %v928_v8 = vsub.f32 %v9174_v51, %v927_v61  ;;  %v917_v13 = vand.u32 4294901760, %v916_v2  ;;  %v858_v26 = vand.u32 4294901760, %v857_v22 }
 0x113   :  { %777 = vmatprep.subr.mxu0 %v9120_v20  ;;  %v891_v53 = vand.u32 4294901760, %v9164_v42  ;;  %v898_v55 = vsub.f32 %v9146_v36, %v897_v43  ;;  %v905_v4 = vand.u32 4294901760, %v904_v59 }
 0x114   :  { %779 = vmatpush1.msra.mxu0 %v9122_v21  ;;  %v934_v15 = vsub.f32 %v9190_v57, %v933_v3  ;;  %v929_v17 = vand.u32 4294901760, %v928_v8 }
 0x115   :  { %781 = vmatprep.subr.mxu0 %v9124_v23  ;;  %v892_v52 = vsub.f32 %v9164_v42, %v891_v53  ;;  %v899_v1 = vand.u32 4294901760, %v898_v55 }
 0x116   :  { %783 = vmatpush1.msra.mxu0 %v9130_v28  ;;  %v935_v25 = vand.u32 4294901760, %v934_v15 }
 0x117   :  { %785 = vmatprep.subr.mxu0 %v9138_v32  ;;  %v893_v50 = vand.u32 4294901760, %v892_v52 }
 0x118   :  { %787 = vmatpush1.msra.mxu0 %v9153_v39 }
 0x119   :  { %826 = vmatmul.mubr.f32.vlgmr.msra.gmra.mxu0 %v825_v58  ;;  %894 = vmatprep.subr.mxu1 %v893_v50 }
 0x11a   :  { %1024 = vmatprep.subr.mxu0 %v9164_v42  ;;  %900 = vmatpush1.msra.mxu1 %v899_v1 }
 0x11b   :  { %1027 = vmatpush1.msra.mxu0 %v9146_v36  ;;  %906 = vmatprep.subr.mxu1 %v905_v4 }
 0x11c   :  { %1030 = vmatprep.subr.mxu0 %v9133_v29  ;;  %831 = vmatprep.mubr.f32.mxu0 %v15289_v5 }
 0x11d   :  { %912 = vmatpush1.msra.mxu1 %v911_v10  ;;  %1033 = vmatpush1.msra.mxu0 %v9149_v37 }
 0x11e   :  { %837 = vmatmul.mubr.f32.gmra.mxu0 %v836_v7  ;;  %918 = vmatprep.subr.mxu1 %v917_v13 }
 0x11f   :  { %1036 = vmatprep.subr.mxu0 %v9159_v41  ;;  %924 = vmatpush1.msra.mxu1 %v923_v16 }
 0x120   :  { %1039 = vmatpush1.msra.mxu0 %v9169_v45  ;;  %930 = vmatprep.subr.mxu1 %v929_v17 }
 0x121   :  { %1042 = vmatprep.subr.mxu0 %v9174_v51  ;;  %842 = vmatprep.mubr.f32.mxu0 %v15289_v5 }
 0x122   :  { %936 = vmatpush1.msra.mxu1 %v935_v25  ;;  %1045 = vmatpush1.msra.mxu0 %v9190_v57 }
 0x123   :  { %848 = vmatmul.mubr.f32.gmra.mxu0 %v847_v19  ;;  %971 = vmatmul.mubr.f32.vlgmr.msra.gmra.mxu1 %v9106_v9 }
 0x124   :  { %1136 = vmatprep.subr.mxu1 %v9143_v35  ;;  %1247 = vmatprep.subr.mxu0 %v891_v53 }
 0x125   :  { %1138 = vmatpush1.msra.mxu1 %v9128_v27  ;;  %853 = vmatprep.mubr.f32.mxu0 %v15289_v5 }
 0x126   :  { %1140 = vmatprep.subr.mxu1 %v9120_v20  ;;  %976 = vmatprep.mubr.f32.mxu1 %v15289_v5 }
 0x127   :  { %1142 = vmatpush1.msra.mxu1 %v9122_v21  ;;  %859 = vmatmul.mubr.f32.gmra.mxu0 %v858_v26 }
 0x128   :  { %978 = vmatmul.mubr.f32.gmra.mxu1 %v9118_v18  ;;  %1144 = vmatprep.subr.mxu1 %v9124_v23 }
 0x129   :  { %1146 = vmatpush1.msra.mxu1 %v9130_v28  ;;  %983 = vmatprep.mubr.f32.mxu1 %v15289_v5 }
 0x12a   :  { %1148 = vmatprep.subr.mxu1 %v9138_v32  ;;  %1078 = vmatprep.mubr.f32.mxu0 %v15289_v5 }
 0x12b   :  { %1150 = vmatpush1.msra.mxu1 %v9153_v39  ;;  %1081 = vmatmul.mubr.f32.vlgmr.msra.gmra.mxu0 %v9113_v14 }
 0x12c   :  { %985 = vmatmul.mubr.f32.gmra.mxu1 %v9151_v38  ;;  %1251 = vmatpush1.msra.mxu0 %v897_v43 }
 0x12d   :  { %1362 = vmatprep.subr.mxu1 %v9143_v35  ;;  %1255 = vmatprep.subr.mxu0 %v903_v44 }
 0x12e   :  { %1259 = vmatpush1.msra.mxu0 %v909_v49  ;;  %990 = vmatprep.mubr.f32.mxu1 %v15289_v5 }
 0x12f   :  { %1086 = vmatprep.mubr.f32.mxu0 %v15289_v5  ;;  %1263 = vmatprep.subr.mxu0 %v915_v56 }
 0x130   :  { %992 = vmatmul.mubr.f32.gmra.mxu1 %v9182_v46  ;;  %1089 = vmatmul.mubr.f32.gmra.mxu0 %v9141_v33 }
 0x131   :  { %1267 = vmatpush1.msra.mxu0 %v921_v48  ;;  %1094 = vmatprep.mubr.f32.mxu0 %v15289_v5 }
 0x132   :  { %1271 = vmatprep.subr.mxu0 %v927_v61  ;;  %1183 = vmatprep.mubr.f32.mxu1 %v15289_v5 }
 0x133   :  { %1275 = vmatpush1.msra.mxu0 %v933_v3 }
 0x134   :  { %1097 = vmatmul.mubr.f32.gmra.mxu0 %v9180_v54  ;;  %1187 = vmatmul.mubr.f32.vlgmr.msra.gmra.mxu1 %v823_v24 }
 0x135   :  { %1364 = vmatpush1.msra.mxu1 %v9128_v27  ;;  %1102 = vmatprep.mubr.f32.mxu0 %v15289_v5 }
 0x136   :  { %1366 = vmatprep.subr.mxu1 %v9120_v20  ;;  %1192 = vmatprep.mubr.f32.mxu1 %v15289_v5 }
 0x137   :  { %1368 = vmatpush1.msra.mxu1 %v9122_v21 }
 0x138   :  { %1370 = vmatprep.subr.mxu1 %v9124_v23  ;;  %1105 = vmatmul.mubr.f32.gmra.mxu0 %v9209_v0 }
 0x139   :  { %1196 = vmatmul.mubr.f32.gmra.mxu1 %v834_v47  ;;  %1308 = vmatprep.mubr.f32.mxu0 %v15289_v5  ;;  %v733_v47 = vpop.permute.xlu0 %732 }
 0x13a   :  { %1372 = vmatpush1.msra.mxu1 %v9130_v28  ;;  %1201 = vmatprep.mubr.f32.mxu1 %v15289_v5 }
 0x13b   :  { %1374 = vmatprep.subr.mxu1 %v9138_v32 }
 0x13c   :  { %1376 = vmatpush1.msra.mxu1 %v9153_v39  ;;  %1310 = vmatmul.mubr.f32.vlgmr.msra.gmra.mxu0 %v9106_v9 }
 0x13d   :  { %1205 = vmatmul.mubr.f32.gmra.mxu1 %v845_v63  ;;  %1315 = vmatprep.mubr.f32.mxu0 %v15289_v5  ;;  %v723_v57 = vpop.permute.xlu0 %722 }
 0x13e   :  { %1210 = vmatprep.mubr.f32.mxu1 %v15289_v5 }
 0x140   :  { %1317 = vmatmul.mubr.f32.gmra.mxu0 %v9118_v18 }
 0x141   :  { %1214 = vmatmul.mubr.f32.gmra.mxu1 %v856_v12  ;;  %1322 = vmatprep.mubr.f32.mxu0 %v15289_v5 }
 0x142   :  { %1409 = vmatprep.mubr.f32.mxu1 %v15289_v5 }
 0x144   :  { %1324 = vmatmul.mubr.f32.gmra.mxu0 %v9151_v38 }
 0x145   :  { %1411 = vmatmul.mubr.f32.vlgmr.msra.gmra.mxu1 %v9106_v9  ;;  %1329 = vmatprep.mubr.f32.mxu0 %v15289_v5 }
 0x146   :  { %1416 = vmatprep.mubr.f32.mxu1 %v15289_v5 }
 0x148   :  { %1331 = vmatmul.mubr.f32.gmra.mxu0 %v9182_v46 }
 0x149   :  { %1418 = vmatmul.mubr.f32.gmra.mxu1 %v9118_v18  ;;  %1702 = vmatprep.mubr.f32.mxu0 %v15289_v5 }
 0x14a   :  { %1423 = vmatprep.mubr.f32.mxu1 %v15289_v5 }
 0x14d   :  { %1425 = vmatmul.mubr.f32.gmra.mxu1 %v9151_v38 }
 0x14e   :  { %1430 = vmatprep.mubr.f32.mxu1 %v15289_v5 }
 0x151   :  { %1432 = vmatmul.mubr.f32.gmra.mxu1 %v9182_v46  ;;  %v728_v46 = vpop.permute.xlu1 %727 }
 0x152   :  { %1983 = vmatprep.mubr.f32.mxu1 %v15289_v5 }
 0x155   :  { %v718_v62 = vpop.permute.xlu1 %717 }
 0x1d9   :  { %v827_v9 = vpop.f32.mrf.mxu0 }
 0x1da   :  { %v828_v8 = vadd.f32 %v827_v9, %v718_v62 }
 0x1db   :  { %v829_v14 = vpop.f32.mrf.mxu0 }
 0x1dc   :  { %v830_v1 = vadd.f32 %v829_v14, %v718_v62 }
 0x1de   :  { %v838_v20 = vpop.f32.mrf.mxu0 }
 0x1df   :  { %v839_v52 = vadd.f32 %v838_v20, %v723_v57 }
 0x1e0   :  { %v840_v21 = vpop.f32.mrf.mxu0 }
 0x1e1   :  { %v841_v60 = vadd.f32 %v840_v21, %v723_v57 }
 0x1e3   :  { %v849_v23 = vpop.f32.mrf.mxu0  ;;  %v972_v24 = vpop.f32.mrf.mxu1 }
 0x1e4   :  { %v850_v63 = vadd.f32 %v849_v23, %v728_v46  ;;  %v973_v22 = vadd.f32 %v972_v24, %v828_v8 }
 0x1e5   :  { %v851_v27 = vpop.f32.mrf.mxu0  ;;  %v974_v18 = vpop.f32.mrf.mxu1 }
 0x1e6   :  { %v852_v6 = vadd.f32 %v851_v27, %v728_v46  ;;  %v975_v10 = vadd.f32 %v974_v18, %v830_v1  ;;  %v1472_v1 = vld [vmem:[%s15245_s6 + $0x10] sm:$0xff] }
 0x1e7   :  { %v860_v28 = vpop.f32.mrf.mxu0 }
 0x1e8   :  { %v979_v29 = vpop.f32.mrf.mxu1  ;;  %v861_v16 = vadd.f32 %v860_v28, %v733_v47 }
 0x1e9   :  { %v862_v30 = vpop.f32.mrf.mxu0  ;;  %v980_v61 = vadd.f32 %v979_v29, %v839_v52 }
 0x1ea   :  { %v981_v31 = vpop.f32.mrf.mxu1  ;;  %v863_v14 = vadd.f32 %v862_v30, %v733_v47 }
 0x1eb   :  { %v1082_v32 = vpop.f32.mrf.mxu0  ;;  %v982_v2 = vadd.f32 %v981_v31, %v841_v60 }
 0x1ec   :  { %v986_v33 = vpop.f32.mrf.mxu1  ;;  %v1083_v27 = vadd.f32 %v1082_v32, %v973_v22 }
 0x1ed   :  { %v1084_v35 = vpop.f32.mrf.mxu0  ;;  %v987_v7 = vadd.f32 %v986_v33, %v850_v63 }
 0x1ee   :  { %v988_v36 = vpop.f32.mrf.mxu1  ;;  %v1085_v25 = vadd.f32 %v1084_v35, %v975_v10  ;;  %v1589_v10 = vsel %vm735_vm1, %v1472_v1, 0 }
 0x1ef   :  { %v989_v17 = vadd.f32 %v988_v36, %v852_v6 }
 0x1f0   :  { %v993_v37 = vpop.f32.mrf.mxu1  ;;  %v1090_v38 = vpop.f32.mrf.mxu0 }
 0x1f1   :  { %v1091_v3 = vadd.f32 %v1090_v38, %v980_v61  ;;  %v994_v23 = vadd.f32 %v993_v37, %v861_v16  ;;  %v1471_v61 = vld [vmem:[%s15245_s6 + $0x8] sm:$0xff] }
 0x1f2   :  { %v995_v39 = vpop.f32.mrf.mxu1  ;;  %v1092_v40 = vpop.f32.mrf.mxu0  ;;  %v1586_v62 = vsel %vm735_vm1, %v1471_v61, 0 }
 0x1f3   :  { %v1093_v11 = vadd.f32 %v1092_v40, %v982_v2 }
 0x1f4   :  { %v1098_v41 = vpop.f32.mrf.mxu0  ;;  %v1188_v34 = vpop.f32.mrf.mxu1 }
 0x1f5   :  { %v1099_v19 = vadd.f32 %v1098_v41, %v987_v7  ;;  %v1189_v41 = vadd.f32 %v1188_v34, %v1083_v27 }
 0x1f6   :  { %v1100_v42 = vpop.f32.mrf.mxu0  ;;  %v1190_v43 = vpop.f32.mrf.mxu1 }
 0x1f7   :  { %v1101_v29 = vadd.f32 %v1100_v42, %v989_v17  ;;  %v1191_v33 = vadd.f32 %v1190_v43, %v1085_v25 }
 0x1f8   :  { %v1106_v44 = vpop.f32.mrf.mxu0 }
 0x1f9   :  { %v1197_v45 = vpop.f32.mrf.mxu1  ;;  %v1107_v46 = vadd.f32 %v1106_v44, %v994_v23 }
 0x1fa   :  { %v1108_v51 = vpop.f32.mrf.mxu0  ;;  %v1198_v12 = vadd.f32 %v1197_v45, %v1091_v3  ;;  %v996_v45 = vadd.f32 %v995_v39, %v863_v14 }
 0x1fb   :  { %v1199_v53 = vpop.f32.mrf.mxu1 }
 0x1fc   :  { %v1311_v49 = vpop.f32.mrf.mxu0  ;;  %v1200_v26 = vadd.f32 %v1199_v53, %v1093_v11  ;;  %v1109_v57 = vadd.f32 %v1108_v51, %v996_v45 }
 0x1fd   :  { %v1206_v54 = vpop.f32.mrf.mxu1  ;;  %v1312_v42 = vadd.f32 %v1311_v49, %v1189_v41  ;;  %v1470_v49 = vld [vmem:[%s15245_s6] sm:$0xff] }
 0x1fe   :  { %v1313_v55 = vpop.f32.mrf.mxu0  ;;  %v1207_v31 = vadd.f32 %v1206_v54, %v1099_v19 }
 0x1ff   :  { %v1208_v56 = vpop.f32.mrf.mxu1  ;;  %v1314_v24 = vadd.f32 %v1313_v55, %v1191_v33 }
 0x200   :  { %v1318_v58 = vpop.f32.mrf.mxu0  ;;  %v1209_v28 = vadd.f32 %v1208_v56, %v1101_v29 }
 0x201   :  { %v1215_v59 = vpop.f32.mrf.mxu1  ;;  %v1319_v20 = vadd.f32 %v1318_v58, %v1198_v12 }
 0x202   :  { %v1320_v48 = vpop.f32.mrf.mxu0  ;;  %v1216_v58 = vadd.f32 %v1215_v59, %v1107_v46  ;;  %v1474_v46 = vld [vmem:[%s15245_s6 + $0x20] sm:$0xff] }
 0x203   :  { %v1217_v50 = vpop.f32.mrf.mxu1  ;;  %v1321_v9 = vadd.f32 %v1320_v48, %v1200_v26  ;;  %v1583_v48 = vsel %vm735_vm1, %v1470_v49, 0 }
 0x204   :  { %v1325_v0 = vpop.f32.mrf.mxu0  ;;  %v1218_v54 = vadd.f32 %v1217_v50, %v1109_v57  ;;  %v9322_v60 = vand.u32 4294901760, %v1583_v48 }
 0x205   :  { %v1412_v4 = vpop.f32.mrf.mxu1  ;;  %v1326_v36 = vadd.f32 %v1325_v0, %v1207_v31 }
 0x206   :  { %v1327_v13 = vpop.f32.mrf.mxu0  ;;  %v1413_v44 = vadd.f32 %v1412_v4, %v1312_v42  ;;  %v9329_v0 = vsub.f32 %v1583_v48, %v9322_v60  ;;  %v9334_v4 = vand.u32 4294901760, %v1586_v62 }
 0x207   :  { %v1414_v15 = vpop.f32.mrf.mxu1  ;;  %v1328_v30 = vadd.f32 %v1327_v13, %v1209_v28 }
 0x208   :  { %v1332_v18 = vpop.f32.mrf.mxu0  ;;  %v1415_v47 = vadd.f32 %v1414_v15, %v1314_v24  ;;  %v15259_v13 = vand.u32 4294901760, %v9329_v0  ;;  %v1473_v15 = vld [vmem:[%s15245_s6 + $0x18] sm:$0xff] }
 0x209   :  { %v1419_v21 = vpop.f32.mrf.mxu1  ;;  %v1333_v52 = vadd.f32 %v1332_v18, %v1216_v58  ;;  %v1592_v31 = vsel %vm735_vm1, %v1473_v15, 0 }
 0x20a   :  { %v1420_v38 = vadd.f32 %v1419_v21, %v1319_v20  ;;  %v1334_v32 = vpop.f32.mrf.mxu0  ;;  %v9357_v20 = vsub.f32 %v1586_v62, %v9334_v4  ;;  %v9359_v21 = vand.u32 4294901760, %v1589_v10  ;;  %v9402_v24 = vand.u32 4294901760, %v1592_v31 }
 0x20b   :  { %v1421_v40 = vpop.f32.mrf.mxu1  ;;  %v1335_v34 = vadd.f32 %v1334_v32, %v1218_v54  ;;  %v1475_v54 = vld [vmem:[%s15245_s6 + $0x28] sm:$0xff] }
 0x20c   :  { %v1422_v35 = vadd.f32 %v1421_v40, %v1321_v9  ;;  %8163 = vtanh.f32 %v1420_v38  ;;  %v1706_v9 = vsub.f32 %v9329_v0, %v15259_v13  ;;  %v9400_v41 = vsub.f32 %v1589_v10, %v9359_v21 }
 0x20d   :  { %v1426_v53 = vpop.f32.mrf.mxu1  ;;  %v1598_v61 = vsel %vm735_vm1, %v1475_v54, 0 }
 0x20e   :  { %v1427_v37 = vadd.f32 %v1426_v53, %v1326_v36  ;;  %v15258_v36 = vand.u32 4294901760, %v9357_v20  ;;  %v1707_v42 = vand.u32 4294901760, %v1706_v9  ;;  %v9482_v15 = vand.u32 4294901760, %v1598_v61  ;;  %v1477_v9 = vld [vmem:[%s15245_s6 + $0x38] sm:$0xff] }
 0x20f   :  { %v1428_v43 = vpop.f32.mrf.mxu1 }
 0x210   :  { %8165 = vtanh.f32 %v1427_v37  ;;  %v1429_v39 = vadd.f32 %v1428_v43, %v1328_v30  ;;  %v1595_v37 = vsel %vm735_vm1, %v1474_v46, 0  ;;  %v9510_v54 = vsub.f32 %v1598_v61, %v9482_v15 }
 0x211   :  { %8167 = vtanh.f32 %v1422_v35  ;;  %v1433_v56 = vpop.f32.mrf.mxu1 }
 0x212   :  { %8169 = vtanh.f32 %v1429_v39  ;;  %v1434_v55 = vadd.f32 %v1433_v56, %v1333_v52  ;;  %v1717_v52 = vsub.f32 %v9357_v20, %v15258_v36  ;;  %v9441_v56 = vsub.f32 %v1592_v31, %v9402_v24 }
 0x213   :  { %8171 = vtanh.f32 %v1415_v47  ;;  %v1435_v51 = vpop.f32.mrf.mxu1 }
 0x214   :  { %8173 = vtanh.f32 %v1434_v55  ;;  %v1436_v59 = vadd.f32 %v1435_v51, %v1335_v34  ;;  %v9448_v51 = vand.u32 4294901760, %v1595_v37  ;;  %v1718_v1 = vand.u32 4294901760, %v1717_v52 }
 0x215   :  { %8175 = vtanh.f32 %v1413_v44  ;;  %v15256_v44 = vand.u32 4294901760, %v9400_v41  ;;  %v1604_v52 = vsel %vm735_vm1, %v1477_v9, 0 }
 0x216   :  { %8177 = vtanh.f32 %v1436_v59 }
 0x219   :  { %v8164_v50 = vpop.eup %8163 }
 0x21a   :  { %v9347_v17 = vand.u32 4294901760, %v8164_v50 }
 0x21c   :  { %15689 = vst [vmem:[#allocation8_spill] sm:$0xff] %v9347_v17  ;;  %v9379_v18 = vsub.f32 %v8164_v50, %v9347_v17  ;;  %v1476_v50 = vld [vmem:[%s15245_s6 + $0x30] sm:$0xff] }
 0x21d   :  { %v8166_v63 = vpop.eup %8165 }
 0x21e   :  { %v8168_v2 = vpop.eup %8167  ;;  %v9336_v7 = vand.u32 4294901760, %v8166_v63  ;;  %15698 = vst [vmem:[#allocation17_spill] sm:$0xff] %v9379_v18  ;;  %v9427_v43 = vand.u32 4294901760, %v9379_v18 }
 0x21f   :  { %v8170_v3 = vpop.eup %8169  ;;  %v9341_v12 = vand.u32 4294901760, %v8168_v2 }
 0x220   :  { %v8172_v6 = vpop.eup %8171  ;;  %15686 = vst [vmem:[#allocation5_spill] sm:$0xff] %v9336_v7  ;;  %v9338_v8 = vand.u32 4294901760, %v8170_v3  ;;  %v9362_v14 = vsub.f32 %v8166_v63, %v9336_v7  ;;  %15707 = vst [vmem:[#allocation26_spill] sm:$0xff] %v9427_v43  ;;  %v1936_v63 = vsub.f32 %v9379_v18, %v9427_v43 }
 0x221   :  { %v8174_v11 = vpop.eup %8173  ;;  %15688 = vst [vmem:[#allocation7_spill] sm:$0xff] %v9341_v12  ;;  %v9354_v26 = vand.u32 4294901760, %v8172_v6  ;;  %v9373_v33 = vsub.f32 %v8168_v2, %v9341_v12 }
 0x222   :  { %15687 = vst [vmem:[#allocation6_spill] sm:$0xff] %v9338_v8  ;;  %v8176_v16 = vpop.eup %8175  ;;  %v9350_v19 = vsub.f32 %v8170_v3, %v9338_v8  ;;  %v9352_v22 = vand.u32 4294901760, %v8174_v11  ;;  %15693 = vst [vmem:[#allocation12_spill] sm:$0xff] %v9362_v14  ;;  %v9409_v53 = vand.u32 4294901760, %v9362_v14  ;;  %v1728_v3 = vsub.f32 %v9400_v41, %v15256_v44 }
 0x223   :  { %v8178_v25 = vpop.eup %8177  ;;  %15692 = vst [vmem:[#allocation11_spill] sm:$0xff] %v9354_v26  ;;  %v9370_v27 = vand.u32 4294901760, %v8176_v16  ;;  %15697 = vst [vmem:[#allocation16_spill] sm:$0xff] %v9373_v33  ;;  %v9395_v28 = vsub.f32 %v8172_v6, %v9354_v26  ;;  %v9418_v30 = vand.u32 4294901760, %v9373_v33  ;;  %v15255_v6 = vand.u32 4294901760, %v9441_v56 }
 0x224   :  { %15690 = vst [vmem:[#allocation9_spill] sm:$0xff] %v9350_v19  ;;  %15691 = vst [vmem:[#allocation10_spill] sm:$0xff] %v9352_v22  ;;  %v9365_v23 = vsub.f32 %v8174_v11, %v9352_v22  ;;  %v9367_v29 = vand.u32 4294901760, %v8178_v25  ;;  %v9389_v45 = vand.u32 4294901760, %v9350_v19  ;;  %v1924_v55 = vsub.f32 %v9362_v14, %v9409_v53 }
 0x225   :  { %15696 = vst [vmem:[#allocation15_spill] sm:$0xff] %v9370_v27  ;;  %15702 = vst [vmem:[#allocation21_spill] sm:$0xff] %v9395_v28  ;;  %v9412_v57 = vsub.f32 %v8176_v16, %v9370_v27  ;;  %v9437_v39 = vand.u32 4294901760, %v9395_v28  ;;  %v1930_v59 = vsub.f32 %v9373_v33, %v9418_v30  ;;  %v9480_v11 = vsub.f32 %v1595_v37, %v9448_v51 }
 0x226   :  { %15694 = vst [vmem:[#allocation13_spill] sm:$0xff] %v9365_v23  ;;  %15695 = vst [vmem:[#allocation14_spill] sm:$0xff] %v9367_v29  ;;  %v9382_v38 = vsub.f32 %v8178_v25, %v9367_v29  ;;  %1655 = vmatprep.subr.mxu0 %v9367_v29  ;;  %v9386_v40 = vand.u32 4294901760, %v9365_v23  ;;  %v1918_v32 = vsub.f32 %v9350_v19, %v9389_v45  ;;  %v9477_v10 = vand.u32 4294901760, %v1924_v55 }
 0x227   :  { %15701 = vst [vmem:[#allocation20_spill] sm:$0xff] %v9389_v45  ;;  %1657 = vmatpush1.msra.mxu0 %v9352_v22  ;;  %15704 = vst [vmem:[#allocation23_spill] sm:$0xff] %v9409_v53  ;;  %v9456_v48 = vand.u32 4294901760, %v9412_v57  ;;  %v1942_v2 = vsub.f32 %v9395_v28, %v9437_v39  ;;  %v1601_v16 = vsel %vm735_vm1, %v1476_v50, 0  ;;  %v9487_v25 = vand.u32 4294901760, %v1930_v59  ;;  %v1478_v59 = vld [vmem:[%s15245_s6 + $0x40] sm:$0xff] }
 0x228   :  { %15699 = vst [vmem:[#allocation18_spill] sm:$0xff] %v9382_v38  ;;  %15700 = vst [vmem:[#allocation19_spill] sm:$0xff] %v9386_v40  ;;  %1659 = vmatprep.subr.mxu0 %v9338_v8  ;;  %v9406_v35 = vand.u32 4294901760, %v9382_v38  ;;  %v1912_v58 = vsub.f32 %v9365_v23, %v9386_v40  ;;  %v9463_v62 = vand.u32 4294901760, %v1918_v32  ;;  %v9496_v46 = vand.u32 4294901760, %v1936_v63 }
 0x229   :  { %15705 = vst [vmem:[#allocation24_spill] sm:$0xff] %v9412_v57  ;;  %1661 = vmatpush1.msra.mxu0 %v9336_v7  ;;  %15706 = vst [vmem:[#allocation25_spill] sm:$0xff] %v9418_v30  ;;  %v1948_v31 = vsub.f32 %v9412_v57, %v9456_v48  ;;  %v1729_v37 = vand.u32 4294901760, %v1728_v3  ;;  %v15253_v32 = vand.u32 4294901760, %v9480_v11  ;;  %v9527_v50 = vand.u32 4294901760, %v1604_v52 }
 0x22a   :  { %15703 = vst [vmem:[#allocation22_spill] sm:$0xff] %v9406_v35  ;;  %1663 = vmatprep.subr.mxu0 %v9341_v12  ;;  %v1906_v47 = vsub.f32 %v9382_v38, %v9406_v35  ;;  %15708 = vst [vmem:[#allocation27_spill] sm:$0xff] %v9437_v39  ;;  %v9451_v49 = vand.u32 4294901760, %v1912_v58  ;;  %v9499_v58 = vand.u32 4294901760, %v1942_v2  ;;  %v15254_v2 = vand.u32 4294901760, %v9510_v54 }
 0x22b   :  { %1665 = vmatpush1.msra.mxu0 %v9347_v17  ;;  %15710 = vst [vmem:[#allocation29_spill] sm:$0xff] %v9456_v48  ;;  %15711 = vst [vmem:[#allocation30_spill] sm:$0xff] %v9463_v62  ;;  %v9515_v55 = vand.u32 4294901760, %v1948_v31  ;;  %v1607_v3 = vsel %vm735_vm1, %v1478_v59, 0  ;;  %v9546_v9 = vsub.f32 %v1604_v52, %v9527_v50  ;;  %v1480_v52 = vld [vmem:[%s15245_s6 + $0x50] sm:$0xff] }
 0x22c   :  { %1667 = vmatprep.subr.mxu0 %v9354_v26  ;;  %v9444_v34 = vand.u32 4294901760, %v1906_v47  ;;  %15709 = vst [vmem:[#allocation28_spill] sm:$0xff] %v9451_v49  ;;  %15712 = vst [vmem:[#allocation31_spill] sm:$0xff] %v9477_v10  ;;  %v1739_v47 = vsub.f32 %v9441_v56, %v15255_v6  ;;  %v9552_v59 = vand.u32 4294901760, %v1607_v3  ;;  %v1613_v44 = vsel %vm735_vm1, %v1480_v52, 0 }
 0x22d   :  { %1669 = vmatpush1.msra.mxu0 %v9370_v27  ;;  %15713 = vst [vmem:[#allocation32_spill] sm:$0xff] %v9487_v25  ;;  %15714 = vst [vmem:[#allocation33_spill] sm:$0xff] %v9496_v46  ;;  %v9589_v52 = vand.u32 4294901760, %v1613_v44 }
 0x22e   :  { %1708 = vmatmul.mubr.f32.vlgmr.msra.gmra.mxu0 %v1707_v42  ;;  %1908 = vmatprep.subr.mxu1 %v9444_v34  ;;  %15715 = vst [vmem:[#allocation34_spill] sm:$0xff] %v9499_v58  ;;  %v9501_v42 = vand.u32 4294901760, %v1601_v16  ;;  %15717 = vst [vmem:[#allocation36_spill] sm:$0xff] %v9515_v55  ;;  %v1740_v63 = vand.u32 4294901760, %v1739_v47  ;;  %v1761_v47 = vsub.f32 %v9510_v54, %v15254_v2 }
 0x22f   :  { %2122 = vmatprep.subr.mxu0 %v9382_v38  ;;  %1914 = vmatpush1.msra.mxu1 %v9451_v49  ;;  %v9570_v2 = vsub.f32 %v1607_v3, %v9552_v59 }
 0x230   :  { %2125 = vmatpush1.msra.mxu0 %v9365_v23  ;;  %1920 = vmatprep.subr.mxu1 %v9463_v62  ;;  %15716 = vst [vmem:[#allocation35_spill] sm:$0xff] %v9501_v42  ;;  %v9525_v61 = vsub.f32 %v1601_v16, %v9501_v42  ;;  %v1479_v16 = vld [vmem:[%s15245_s6 + $0x48] sm:$0xff] }
 0x231   :  { %2128 = vmatprep.subr.mxu0 %v9350_v19  ;;  %1713 = vmatprep.mubr.f32.mxu0 %v15289_v5 }
 0x232   :  { %1926 = vmatpush1.msra.mxu1 %v9477_v10  ;;  %2131 = vmatpush1.msra.mxu0 %v9362_v14  ;;  %v15257_v31 = vand.u32 4294901760, %v9525_v61 }
 0x233   :  { %1719 = vmatmul.mubr.f32.gmra.mxu0 %v1718_v1  ;;  %1932 = vmatprep.subr.mxu1 %v9487_v25  ;;  %v1750_v1 = vsub.f32 %v9480_v11, %v15253_v32  ;;  %v1610_v32 = vsel %vm735_vm1, %v1479_v16, 0  ;;  %v1762_v16 = vand.u32 4294901760, %v1761_v47  ;;  %v15265_v47 = vand.u32 4294901760, %v9570_v2 }
 0x234   :  { %2134 = vmatprep.subr.mxu0 %v9373_v33  ;;  %1938 = vmatpush1.msra.mxu1 %v9496_v46  ;;  %v9572_v6 = vand.u32 4294901760, %v1610_v32 }
 0x235   :  { %2137 = vmatpush1.msra.mxu0 %v9379_v18  ;;  %1944 = vmatprep.subr.mxu1 %v9499_v58 }
 0x236   :  { %2140 = vmatprep.subr.mxu0 %v9395_v28  ;;  %1724 = vmatprep.mubr.f32.mxu0 %v15289_v5  ;;  %v9587_v36 = vsub.f32 %v1610_v32, %v9572_v6  ;;  %v1794_v32 = vsub.f32 %v9570_v2, %v15265_v47 }
 0x237   :  { %1950 = vmatpush1.msra.mxu1 %v9515_v55  ;;  %2143 = vmatpush1.msra.mxu0 %v9412_v57 }
 0x238   :  { %1730 = vmatmul.mubr.f32.gmra.mxu0 %v1729_v37  ;;  %1985 = vmatmul.mubr.f32.vlgmr.msra.gmra.mxu1 %v9322_v60  ;;  %v1751_v37 = vand.u32 4294901760, %v1750_v1  ;;  %v15260_v1 = vand.u32 4294901760, %v9546_v9  ;;  %v1795_v47 = vand.u32 4294901760, %v1794_v32 }
 0x239   :  { %2330 = vmatprep.subr.mxu1 %v9367_v29  ;;  %2549 = vmatprep.subr.mxu0 %v9406_v35  ;;  %v9605_v35 = vsub.f32 %v1613_v44, %v9589_v52 }
 0x23a   :  { %2332 = vmatpush1.msra.mxu1 %v9352_v22  ;;  %1735 = vmatprep.mubr.f32.mxu0 %v15289_v5  ;;  %v1783_v3 = vsub.f32 %v9546_v9, %v15260_v1 }
 0x23b   :  { %2334 = vmatprep.subr.mxu1 %v9338_v8  ;;  %1990 = vmatprep.mubr.f32.mxu1 %v15289_v5  ;;  %v15275_v28 = vand.u32 4294901760, %v9605_v35 }
 0x23c   :  { %2336 = vmatpush1.msra.mxu1 %v9336_v7  ;;  %1741 = vmatmul.mubr.f32.gmra.mxu0 %v1740_v63  ;;  %v1772_v63 = vsub.f32 %v9525_v61, %v15257_v31  ;;  %v1481_v31 = vld [vmem:[%s15245_s6 + $0x58] sm:$0xff]  ;;  %v1784_v1 = vand.u32 4294901760, %v1783_v3 }
 0x23d   :  { %1992 = vmatmul.mubr.f32.gmra.mxu1 %v9334_v4  ;;  %2338 = vmatprep.subr.mxu1 %v9341_v12  ;;  %v1616_v13 = vsel %vm735_vm1, %v1481_v31, 0  ;;  %v15270_v31 = vand.u32 4294901760, %v9587_v36 }
 0x23e   :  { %2340 = vmatpush1.msra.mxu1 %v9347_v17  ;;  %1746 = vmatprep.mubr.f32.mxu0 %v15289_v5 }
 0x23f   :  { %2342 = vmatprep.subr.mxu1 %v9354_v26  ;;  %1997 = vmatprep.mubr.f32.mxu1 %v15289_v5  ;;  %v1805_v44 = vsub.f32 %v9587_v36, %v15270_v31  ;;  %v1816_v31 = vsub.f32 %v9605_v35, %v15275_v28 }
 0x240   :  { %2344 = vmatpush1.msra.mxu1 %v9370_v27  ;;  %1752 = vmatmul.mubr.f32.gmra.mxu0 %v1751_v37  ;;  %v1773_v37 = vand.u32 4294901760, %v1772_v63  ;;  %v1482_v63 = vld [vmem:[%s15245_s6 + $0x60] sm:$0xff] }
 0x241   :  { %1999 = vmatmul.mubr.f32.gmra.mxu1 %v9359_v21  ;;  %2748 = vmatprep.subr.mxu1 %v9367_v29  ;;  %v1619_v57 = vsel %vm735_vm1, %v1482_v63, 0  ;;  %v1806_v32 = vand.u32 4294901760, %v1805_v44 }
 0x242   :  { %1757 = vmatprep.mubr.f32.mxu0 %v15289_v5  ;;  %2004 = vmatprep.mubr.f32.mxu1 %v15289_v5  ;;  %v9621_v18 = vand.u32 4294901760, %v1619_v57 }
 0x244   :  { %1763 = vmatmul.mubr.f32.gmra.mxu0 %v1762_v16  ;;  %v9598_v16 = vand.u32 4294901760, %v1616_v13  ;;  %v9635_v33 = vsub.f32 %v1619_v57, %v9621_v18  ;;  %v1817_v57 = vand.u32 4294901760, %v1816_v31 }
 0x245   :  { %2006 = vmatmul.mubr.f32.gmra.mxu1 %v9402_v24  ;;  %1768 = vmatprep.mubr.f32.mxu0 %v15289_v5 }
 0x246   :  { %2011 = vmatprep.mubr.f32.mxu1 %v15289_v5  ;;  %v9615_v3 = vsub.f32 %v1616_v13, %v9598_v16  ;;  %v1484_v13 = vld [vmem:[%s15245_s6 + $0x70] sm:$0xff]  ;;  %v15283_v28 = vand.u32 4294901760, %v9635_v33 }
 0x248   :  { %1774 = vmatmul.mubr.f32.gmra.mxu0 %v1773_v37  ;;  %v1483_v37 = vld [vmem:[%s15245_s6 + $0x68] sm:$0xff]  ;;  %v1838_v31 = vsub.f32 %v9635_v33, %v15283_v28 }
 0x249   :  { %2013 = vmatmul.mubr.f32.gmra.mxu1 %v9448_v51  ;;  %1779 = vmatprep.mubr.f32.mxu0 %v15289_v5  ;;  %v1622_v63 = vsel %vm735_vm1, %v1483_v37, 0  ;;  %v1625_v37 = vsel %vm735_vm1, %v1484_v13, 0 }
 0x24a   :  { %2018 = vmatprep.mubr.f32.mxu1 %v15289_v5  ;;  %v9637_v14 = vand.u32 4294901760, %v1622_v63  ;;  %v9653_v23 = vand.u32 4294901760, %v1625_v37 }
 0x24c   :  { %1785 = vmatmul.mubr.f32.gmra.mxu0 %v1784_v1  ;;  %v15282_v1 = vand.u32 4294901760, %v9615_v3  ;;  %v9651_v19 = vsub.f32 %v1622_v63, %v9637_v14  ;;  %v9664_v63 = vsub.f32 %v1625_v37, %v9653_v23 }
 0x24d   :  { %2020 = vmatmul.mubr.f32.gmra.mxu1 %v9482_v15  ;;  %1790 = vmatprep.mubr.f32.mxu0 %v15289_v5 }
 0x24e   :  { %2025 = vmatprep.mubr.f32.mxu1 %v15289_v5  ;;  %v1827_v44 = vsub.f32 %v9615_v3, %v15282_v1 }
 0x250   :  { %1796 = vmatmul.mubr.f32.gmra.mxu0 %v1795_v47  ;;  %v1485_v47 = vld [vmem:[%s15245_s6 + $0x78] sm:$0xff] }
 0x251   :  { %2027 = vmatmul.mubr.f32.gmra.mxu1 %v9501_v42  ;;  %1801 = vmatprep.mubr.f32.mxu0 %v15289_v5  ;;  %v1628_v13 = vsel %vm735_vm1, %v1485_v47, 0  ;;  %v1828_v42 = vand.u32 4294901760, %v1827_v44  ;;  %v1839_v47 = vand.u32 4294901760, %v1838_v31 }
 0x252   :  { %2032 = vmatprep.mubr.f32.mxu1 %v15289_v5  ;;  %v9666_v1 = vand.u32 4294901760, %v1628_v13 }
 0x254   :  { %1807 = vmatmul.mubr.f32.gmra.mxu0 %v1806_v32  ;;  %v15284_v32 = vand.u32 4294901760, %v9651_v19  ;;  %v9676_v28 = vsub.f32 %v1628_v13, %v9666_v1 }
 0x255   :  { %2034 = vmatmul.mubr.f32.gmra.mxu1 %v9527_v50  ;;  %1812 = vmatprep.mubr.f32.mxu0 %v15289_v5 }
 0x256   :  { %2039 = vmatprep.mubr.f32.mxu1 %v15289_v5  ;;  %v1849_v44 = vsub.f32 %v9651_v19, %v15284_v32  ;;  %v1870_v31 = vand.u32 4294901760, %v9676_v28 }
 0x258   :  { %1818 = vmatmul.mubr.f32.gmra.mxu0 %v1817_v57  ;;  %v1859_v57 = vand.u32 4294901760, %v9664_v63  ;;  %v1850_v37 = vand.u32 4294901760, %v1849_v44  ;;  %v1871_v32 = vsub.f32 %v9676_v28, %v1870_v31  ;;  %v15719_v44 = vand.u32 4294901760, %v9357_v20 }
 0x259   :  { %2041 = vmatmul.mubr.f32.gmra.mxu1 %v9552_v59  ;;  %1823 = vmatprep.mubr.f32.mxu0 %v15289_v5 }
 0x25a   :  { %2046 = vmatprep.mubr.f32.mxu1 %v15289_v5 }
 0x25c   :  { %1829 = vmatmul.mubr.f32.gmra.mxu0 %v1828_v42  ;;  %v1860_v42 = vsub.f32 %v9664_v63, %v1859_v57 }
 0x25d   :  { %2048 = vmatmul.mubr.f32.gmra.mxu1 %v9572_v6  ;;  %1834 = vmatprep.mubr.f32.mxu0 %v15289_v5 }
 0x25e   :  { %2053 = vmatprep.mubr.f32.mxu1 %v15289_v5  ;;  %v1861_v13 = vand.u32 4294901760, %v1860_v42 }
 0x260   :  { %1840 = vmatmul.mubr.f32.gmra.mxu0 %v1839_v47  ;;  %v1872_v47 = vand.u32 4294901760, %v1871_v32  ;;  %v15718_v32 = vand.u32 4294901760, %v9329_v0 }
 0x261   :  { %2055 = vmatmul.mubr.f32.gmra.mxu1 %v9589_v52  ;;  %1845 = vmatprep.mubr.f32.mxu0 %v15289_v5 }
 0x262   :  { %2060 = vmatprep.mubr.f32.mxu1 %v15289_v5 }
 0x264   :  { %1851 = vmatmul.mubr.f32.gmra.mxu0 %v1850_v37  ;;  %v15722_v37 = vand.u32 4294901760, %v9480_v11 }
 0x265   :  { %2062 = vmatmul.mubr.f32.gmra.mxu1 %v9598_v16  ;;  %1856 = vmatprep.mubr.f32.mxu0 %v15289_v5 }
 0x266   :  { %2067 = vmatprep.mubr.f32.mxu1 %v15289_v5 }
 0x268   :  { %1862 = vmatmul.mubr.f32.gmra.mxu0 %v1861_v13 }
 0x269   :  { %2069 = vmatmul.mubr.f32.gmra.mxu1 %v9621_v18  ;;  %1867 = vmatprep.mubr.f32.mxu0 %v15289_v5 }
 0x26a   :  { %2074 = vmatprep.mubr.f32.mxu1 %v15289_v5 }
 0x26c   :  { %1873 = vmatmul.mubr.f32.gmra.mxu0 %v1872_v47 }
 0x26d   :  { %2076 = vmatmul.mubr.f32.gmra.mxu1 %v9637_v14  ;;  %2176 = vmatprep.mubr.f32.mxu0 %v15289_v5 }
 0x26e   :  { %2081 = vmatprep.mubr.f32.mxu1 %v15289_v5 }
 0x270   :  { %2179 = vmatmul.mubr.f32.vlgmr.msra.gmra.mxu0 %v9329_v0  ;;  %v15720_v0 = vand.u32 4294901760, %v9400_v41 }
 0x271   :  { %2083 = vmatmul.mubr.f32.gmra.mxu1 %v9653_v23  ;;  %2553 = vmatpush1.msra.mxu0 %v9386_v40 }
 0x272   :  { %2557 = vmatprep.subr.mxu0 %v9389_v45  ;;  %2088 = vmatprep.mubr.f32.mxu1 %v15289_v5 }
 0x273   :  { %2561 = vmatpush1.msra.mxu0 %v9409_v53  ;;  %2184 = vmatprep.mubr.f32.mxu0 %v15289_v5 }
 0x274   :  { %2565 = vmatprep.subr.mxu0 %v9418_v30  ;;  %2187 = vmatmul.mubr.f32.gmra.mxu0 %v9357_v20  ;;  %v15721_v20 = vand.u32 4294901760, %v9441_v56 }
 0x275   :  { %2090 = vmatmul.mubr.f32.gmra.mxu1 %v9666_v1  ;;  %2569 = vmatpush1.msra.mxu0 %v9427_v43 }
 0x276   :  { %2573 = vmatprep.subr.mxu0 %v9437_v39  ;;  %2192 = vmatprep.mubr.f32.mxu0 %v15289_v5 }
 0x277   :  { %2577 = vmatpush1.msra.mxu0 %v9456_v48  ;;  %2377 = vmatprep.mubr.f32.mxu1 %v15289_v5 }
 0x278   :  { %3385 = vmatprep.subr.mxu0 %v9367_v29  ;;  %2195 = vmatmul.mubr.f32.gmra.mxu0 %v9400_v41  ;;  %v15723_v41 = vand.u32 4294901760, %v9510_v54 }
 0x279   :  { %2381 = vmatmul.mubr.f32.vlgmr.msra.gmra.mxu1 %v15718_v32  ;;  %2200 = vmatprep.mubr.f32.mxu0 %v15289_v5  ;;  %v3205_v32 = vld [vmem:[%s15247_s8 + $0x28] sm:$0xff] }
 0x27a   :  { %2750 = vmatpush1.msra.mxu1 %v9352_v22  ;;  %2386 = vmatprep.mubr.f32.mxu1 %v15289_v5 }
 0x27b   :  { %2752 = vmatprep.subr.mxu1 %v9338_v8 }
 0x27c   :  { %2754 = vmatpush1.msra.mxu1 %v9336_v7  ;;  %2203 = vmatmul.mubr.f32.gmra.mxu0 %v9441_v56  ;;  %v15724_v56 = vand.u32 4294901760, %v9525_v61 }
 0x27d   :  { %2756 = vmatprep.subr.mxu1 %v9341_v12  ;;  %2390 = vmatmul.mubr.f32.gmra.mxu1 %v15719_v44 }
 0x27e   :  { %2758 = vmatpush1.msra.mxu1 %v9347_v17  ;;  %2208 = vmatprep.mubr.f32.mxu0 %v15289_v5 }
 0x27f   :  { %2760 = vmatprep.subr.mxu1 %v9354_v26  ;;  %2395 = vmatprep.mubr.f32.mxu1 %v15289_v5 }
 0x280   :  { %2762 = vmatpush1.msra.mxu1 %v9370_v27  ;;  %2211 = vmatmul.mubr.f32.gmra.mxu0 %v9480_v11  ;;  %v15725_v11 = vand.u32 4294901760, %v9546_v9 }
 0x281   :  { %3638 = vmatprep.subr.mxu1 %v9444_v34  ;;  %2399 = vmatmul.mubr.f32.gmra.mxu1 %v15720_v0 }
 0x282   :  { %2216 = vmatprep.mubr.f32.mxu0 %v15289_v5  ;;  %2404 = vmatprep.mubr.f32.mxu1 %v15289_v5 }
 0x284   :  { %2219 = vmatmul.mubr.f32.gmra.mxu0 %v9510_v54  ;;  %v15726_v54 = vand.u32 4294901760, %v9570_v2 }
 0x285   :  { %2408 = vmatmul.mubr.f32.gmra.mxu1 %v15721_v20  ;;  %2224 = vmatprep.mubr.f32.mxu0 %v15289_v5 }
 0x286   :  { %2413 = vmatprep.mubr.f32.mxu1 %v15289_v5 }
 0x288   :  { %2227 = vmatmul.mubr.f32.gmra.mxu0 %v9525_v61  ;;  %v15727_v61 = vand.u32 4294901760, %v9587_v36 }
 0x289   :  { %2417 = vmatmul.mubr.f32.gmra.mxu1 %v15722_v37  ;;  %2232 = vmatprep.mubr.f32.mxu0 %v15289_v5 }
 0x28a   :  { %2422 = vmatprep.mubr.f32.mxu1 %v15289_v5 }
 0x28c   :  { %2235 = vmatmul.mubr.f32.gmra.mxu0 %v9546_v9  ;;  %v15728_v9 = vand.u32 4294901760, %v9605_v35 }
 0x28d   :  { %2426 = vmatmul.mubr.f32.gmra.mxu1 %v15723_v41  ;;  %2240 = vmatprep.mubr.f32.mxu0 %v15289_v5  ;;  %v3328_v41 = vsel %vm735_vm1, %v3205_v32, 0 }
 0x28e   :  { %2431 = vmatprep.mubr.f32.mxu1 %v15289_v5 }
 0x290   :  { %2243 = vmatmul.mubr.f32.gmra.mxu0 %v9570_v2  ;;  %v15729_v2 = vand.u32 4294901760, %v9615_v3 }
 0x291   :  { %2435 = vmatmul.mubr.f32.gmra.mxu1 %v15724_v56  ;;  %2248 = vmatprep.mubr.f32.mxu0 %v15289_v5  ;;  %v3206_v56 = vld [vmem:[%s15247_s8 + $0x30] sm:$0xff] }
 0x292   :  { %2440 = vmatprep.mubr.f32.mxu1 %v15289_v5 }
 0x294   :  { %2251 = vmatmul.mubr.f32.gmra.mxu0 %v9587_v36  ;;  %v15730_v36 = vand.u32 4294901760, %v9635_v33 }
 0x295   :  { %2444 = vmatmul.mubr.f32.gmra.mxu1 %v15725_v11  ;;  %2256 = vmatprep.mubr.f32.mxu0 %v15289_v5 }
 0x296   :  { %2449 = vmatprep.mubr.f32.mxu1 %v15289_v5 }
 0x298   :  { %2259 = vmatmul.mubr.f32.gmra.mxu0 %v9605_v35  ;;  %v15731_v35 = vand.u32 4294901760, %v9651_v19 }
 0x299   :  { %2453 = vmatmul.mubr.f32.gmra.mxu1 %v15726_v54  ;;  %2264 = vmatprep.mubr.f32.mxu0 %v15289_v5 }
 0x29a   :  { %2458 = vmatprep.mubr.f32.mxu1 %v15289_v5 }
 0x29c   :  { %2267 = vmatmul.mubr.f32.gmra.mxu0 %v9615_v3 }
 0x29d   :  { %2462 = vmatmul.mubr.f32.gmra.mxu1 %v15727_v61  ;;  %2272 = vmatprep.mubr.f32.mxu0 %v15289_v5 }
 0x29e   :  { %2467 = vmatprep.mubr.f32.mxu1 %v15289_v5 }
 0x2a0   :  { %2275 = vmatmul.mubr.f32.gmra.mxu0 %v9635_v33 }
 0x2a1   :  { %2471 = vmatmul.mubr.f32.gmra.mxu1 %v15728_v9  ;;  %2280 = vmatprep.mubr.f32.mxu0 %v15289_v5 }
 0x2a2   :  { %2476 = vmatprep.mubr.f32.mxu1 %v15289_v5 }
 0x2a4   :  { %2283 = vmatmul.mubr.f32.gmra.mxu0 %v9651_v19 }
 0x2a5   :  { %2480 = vmatmul.mubr.f32.gmra.mxu1 %v15729_v2  ;;  %2288 = vmatprep.mubr.f32.mxu0 %v15289_v5 }
 0x2a6   :  { %2485 = vmatprep.mubr.f32.mxu1 %v15289_v5 }
 0x2a8   :  { %2291 = vmatmul.mubr.f32.gmra.mxu0 %v9664_v63 }
 0x2a9   :  { %2489 = vmatmul.mubr.f32.gmra.mxu1 %v15730_v36  ;;  %2296 = vmatprep.mubr.f32.mxu0 %v15289_v5  ;;  %v9941_v36 = vand.u32 4294901760, %v3328_v41 }
 0x2aa   :  { %2494 = vmatprep.mubr.f32.mxu1 %v15289_v5 }
 0x2ab   :  { %15738 = vst [vmem:[#allocation41_spill] sm:$0xff] %v9941_v36 }
 0x2ac   :  { %2299 = vmatmul.mubr.f32.gmra.mxu0 %v9676_v28 }
 0x2ad   :  { %2498 = vmatmul.mubr.f32.gmra.mxu1 %v15731_v35  ;;  %2610 = vmatprep.mubr.f32.mxu0 %v15289_v5  ;;  %v3331_v35 = vsel %vm735_vm1, %v3206_v56, 0  ;;  %v15746_v56 = vld [vmem:[#allocation21_spill] sm:$0xff] }
 0x2ae   :  { %2503 = vmatprep.mubr.f32.mxu1 %v15289_v5 }
 0x2b0   :  { %2612 = vmatmul.mubr.f32.vlgmr.msra.gmra.mxu0 %v9322_v60 }
 0x2b1   :  { %2507 = vmatmul.mubr.f32.gmra.mxu1 %v1859_v57  ;;  %3387 = vmatpush1.msra.mxu0 %v9352_v22  ;;  %v3204_v57 = vld [vmem:[%s15247_s8 + $0x20] sm:$0xff] }
 0x2b2   :  { %3389 = vmatprep.subr.mxu0 %v9338_v8  ;;  %2512 = vmatprep.mubr.f32.mxu1 %v15289_v5  ;;  %v3325_v47 = vsel %vm735_vm1, %v3204_v57, 0  ;;  %v9961_v57 = vsub.f32 %v3328_v41, %v9941_v36 }
 0x2b3   :  { %3391 = vmatpush1.msra.mxu0 %v9336_v7  ;;  %2617 = vmatprep.mubr.f32.mxu0 %v15289_v5  ;;  %v9925_v37 = vand.u32 4294901760, %v3325_v47 }
 0x2b4   :  { %3393 = vmatprep.subr.mxu0 %v9341_v12  ;;  %2619 = vmatmul.mubr.f32.gmra.mxu0 %v9334_v4  ;;  %15744 = vst [vmem:[#allocation43_spill] sm:$0xff] %v9961_v57 }
 0x2b5   :  { %2516 = vmatmul.mubr.f32.gmra.mxu1 %v1870_v31  ;;  %3395 = vmatpush1.msra.mxu0 %v9347_v17  ;;  %15737 = vst [vmem:[#allocation40_spill] sm:$0xff] %v9925_v37  ;;  %v9939_v2 = vsub.f32 %v3325_v47, %v9925_v37  ;;  %v15745_v47 = vld [vmem:[#allocation17_spill] sm:$0xff] }
 0x2b6   :  { %3397 = vmatprep.subr.mxu0 %v9354_v26  ;;  %2624 = vmatprep.mubr.f32.mxu0 %v15289_v5 }
 0x2b7   :  { %3399 = vmatpush1.msra.mxu0 %v9370_v27  ;;  %2795 = vmatprep.mubr.f32.mxu1 %v15289_v5 }
 0x2b8   :  { %3852 = vmatprep.subr.mxu0 %v9382_v38  ;;  %2626 = vmatmul.mubr.f32.gmra.mxu0 %v9359_v21 }
 0x2b9   :  { %2797 = vmatmul.mubr.f32.vlgmr.msra.gmra.mxu1 %v9322_v60  ;;  %2631 = vmatprep.mubr.f32.mxu0 %v15289_v5  ;;  %v15732_v60 = vld [vmem:[#allocation35_spill] sm:$0xff] }
 0x2ba   :  { %3644 = vmatpush1.msra.mxu1 %v9451_v49  ;;  %2802 = vmatprep.mubr.f32.mxu1 %v15289_v5 }
 0x2bb   :  { %3650 = vmatprep.subr.mxu1 %v9463_v62 }
 0x2bc   :  { %3656 = vmatpush1.msra.mxu1 %v9477_v10  ;;  %2633 = vmatmul.mubr.f32.gmra.mxu0 %v9402_v24 }
 0x2bd   :  { %3662 = vmatprep.subr.mxu1 %v9487_v25  ;;  %2804 = vmatmul.mubr.f32.gmra.mxu1 %v9334_v4  ;;  %v3200_v4 = vld [vmem:[%s15247_s8] sm:$0xff] }
 0x2be   :  { %3668 = vmatpush1.msra.mxu1 %v9496_v46  ;;  %2638 = vmatprep.mubr.f32.mxu0 %v15289_v5  ;;  %v3313_v19 = vsel %vm735_vm1, %v3200_v4, 0  ;;  %v3207_v4 = vld [vmem:[%s15247_s8 + $0x38] sm:$0xff] }
 0x2bf   :  { %3674 = vmatprep.subr.mxu1 %v9499_v58  ;;  %2809 = vmatprep.mubr.f32.mxu1 %v15289_v5  ;;  %v9864_v33 = vand.u32 4294901760, %v3313_v19 }
 0x2c0   :  { %3680 = vmatpush1.msra.mxu1 %v9515_v55  ;;  %2640 = vmatmul.mubr.f32.gmra.mxu0 %v9448_v51 }
 0x2c1   :  { %4060 = vmatprep.subr.mxu1 %v9367_v29  ;;  %2811 = vmatmul.mubr.f32.gmra.mxu1 %v9359_v21  ;;  %v3201_v21 = vld [vmem:[%s15247_s8 + $0x8] sm:$0xff]  ;;  %15733 = vst [vmem:[#allocation35_spill] sm:$0xff] %v9864_v33 }
 0x2c2   :  { %2645 = vmatprep.mubr.f32.mxu0 %v15289_v5  ;;  %2816 = vmatprep.mubr.f32.mxu1 %v15289_v5  ;;  %v3316_v28 = vsel %vm735_vm1, %v3201_v21, 0  ;;  %v15741_v21 = vld [vmem:[#allocation12_spill] sm:$0xff] }
 0x2c4   :  { %2647 = vmatmul.mubr.f32.gmra.mxu0 %v9482_v15 }
 0x2c5   :  { %2818 = vmatmul.mubr.f32.gmra.mxu1 %v9402_v24  ;;  %2652 = vmatprep.mubr.f32.mxu0 %v15289_v5  ;;  %v3202_v24 = vld [vmem:[%s15247_s8 + $0x10] sm:$0xff] }
 0x2c6   :  { %2823 = vmatprep.mubr.f32.mxu1 %v15289_v5 }
 0x2c8   :  { %2654 = vmatmul.mubr.f32.gmra.mxu0 %v15732_v60 }
 0x2c9   :  { %2825 = vmatmul.mubr.f32.gmra.mxu1 %v9448_v51  ;;  %2659 = vmatprep.mubr.f32.mxu0 %v15289_v5  ;;  %v9873_v51 = vand.u32 4294901760, %v3316_v28 }
 0x2ca   :  { %2830 = vmatprep.mubr.f32.mxu1 %v15289_v5 }
 0x2cb   :  { %15734 = vst [vmem:[#allocation37_spill] sm:$0xff] %v9873_v51 }
 0x2cc   :  { %2661 = vmatmul.mubr.f32.gmra.mxu0 %v9527_v50 }
 0x2cd   :  { %2832 = vmatmul.mubr.f32.gmra.mxu1 %v9482_v15  ;;  %2666 = vmatprep.mubr.f32.mxu0 %v15289_v5  ;;  %v9877_v15 = vsub.f32 %v3313_v19, %v9864_v33  ;;  %v15740_v19 = vld [vmem:[#allocation9_spill] sm:$0xff] }
 0x2ce   :  { %2837 = vmatprep.mubr.f32.mxu1 %v15289_v5 }
 0x2cf   :  { %v15288_v63 = vand.u32 4294901760, %v9877_v15 }
 0x2d0   :  { %2668 = vmatmul.mubr.f32.gmra.mxu0 %v9552_v59 }
 0x2d1   :  { %2839 = vmatmul.mubr.f32.gmra.mxu1 %v15732_v60  ;;  %2673 = vmatprep.mubr.f32.mxu0 %v15289_v5  ;;  %v15739_v60 = vld [vmem:[#allocation13_spill] sm:$0xff] }
 0x2d2   :  { %2844 = vmatprep.mubr.f32.mxu1 %v15289_v5 }
 0x2d4   :  { %2675 = vmatmul.mubr.f32.gmra.mxu0 %v9572_v6 }
 0x2d5   :  { %2846 = vmatmul.mubr.f32.gmra.mxu1 %v9527_v50  ;;  %2680 = vmatprep.mubr.f32.mxu0 %v15289_v5  ;;  %v3319_v50 = vsel %vm735_vm1, %v3202_v24, 0 }
 0x2d6   :  { %2851 = vmatprep.mubr.f32.mxu1 %v15289_v5  ;;  %v9889_v3 = vand.u32 4294901760, %v3319_v50 }
 0x2d8   :  { %2682 = vmatmul.mubr.f32.gmra.mxu0 %v9589_v52  ;;  %15735 = vst [vmem:[#allocation38_spill] sm:$0xff] %v9889_v3  ;;  %v9902_v31 = vsub.f32 %v3319_v50, %v9889_v3  ;;  %v9953_v50 = vand.u32 4294901760, %v3331_v35 }
 0x2d9   :  { %2853 = vmatmul.mubr.f32.gmra.mxu1 %v9552_v59  ;;  %2687 = vmatprep.mubr.f32.mxu0 %v15289_v5  ;;  %v9887_v59 = vsub.f32 %v3316_v28, %v9873_v51 }
 0x2da   :  { %2858 = vmatprep.mubr.f32.mxu1 %v15289_v5  ;;  %v15286_v0 = vand.u32 4294901760, %v9902_v31  ;;  %15742 = vst [vmem:[#allocation42_spill] sm:$0xff] %v9953_v50  ;;  %v9974_v41 = vsub.f32 %v3331_v35, %v9953_v50  ;;  %v15751_v35 = vmov 0.0  }
 0x2db   :  { %v15287_v42 = vand.u32 4294901760, %v9887_v59 }
 0x2dc   :  { %2689 = vmatmul.mubr.f32.gmra.mxu0 %v9598_v16  ;;  %v3458_v61 = vsub.f32 %v9902_v31, %v15286_v0  ;;  %15748 = vst [vmem:[#allocation44_spill] sm:$0xff] %v9974_v41 }
 0x2dd   :  { %2860 = vmatmul.mubr.f32.gmra.mxu1 %v9572_v6  ;;  %2694 = vmatprep.mubr.f32.mxu0 %v15289_v5  ;;  %v3203_v6 = vld [vmem:[%s15247_s8 + $0x18] sm:$0xff]  ;;  %v3447_v44 = vsub.f32 %v9887_v59, %v15287_v42 }
 0x2de   :  { %2865 = vmatprep.mubr.f32.mxu1 %v15289_v5  ;;  %v3459_v24 = vand.u32 4294901760, %v3458_v61  ;;  %v15747_v61 = vld [vmem:[#allocation24_spill] sm:$0xff] }
 0x2df   :  { %v3448_v54 = vand.u32 4294901760, %v3447_v44  ;;  %v3208_v44 = vld [vmem:[%s15247_s8 + $0x40] sm:$0xff] }
 0x2e0   :  { %2696 = vmatmul.mubr.f32.gmra.mxu0 %v9621_v18 }
 0x2e1   :  { %2867 = vmatmul.mubr.f32.gmra.mxu1 %v9589_v52  ;;  %2701 = vmatprep.mubr.f32.mxu0 %v15289_v5  ;;  %v3322_v52 = vsel %vm735_vm1, %v3203_v6, 0  ;;  %v15743_v6 = vld [vmem:[#allocation16_spill] sm:$0xff] }
 0x2e2   :  { %2872 = vmatprep.mubr.f32.mxu1 %v15289_v5  ;;  %v9908_v13 = vand.u32 4294901760, %v3322_v52 }
 0x2e4   :  { %2703 = vmatmul.mubr.f32.gmra.mxu0 %v9637_v14  ;;  %15736 = vst [vmem:[#allocation39_spill] sm:$0xff] %v9908_v13 }
 0x2e5   :  { %2874 = vmatmul.mubr.f32.gmra.mxu1 %v9598_v16  ;;  %2708 = vmatprep.mubr.f32.mxu0 %v15289_v5  ;;  %v3436_v16 = vsub.f32 %v9877_v15, %v15288_v63 }
 0x2e6   :  { %2879 = vmatprep.mubr.f32.mxu1 %v15289_v5 }
 0x2e7   :  { %v3437_v20 = vand.u32 4294901760, %v3436_v16  ;;  %v3334_v16 = vsel %vm735_vm1, %v3207_v4, 0  ;;  %v15750_v4 = vld [vmem:[#allocation22_spill] sm:$0xff] }
 0x2e8   :  { %2710 = vmatmul.mubr.f32.gmra.mxu0 %v9653_v23 }
 0x2e9   :  { %2881 = vmatmul.mubr.f32.gmra.mxu1 %v9621_v18  ;;  %2715 = vmatprep.mubr.f32.mxu0 %v15289_v5  ;;  %v9923_v18 = vsub.f32 %v3322_v52, %v9908_v13  ;;  %v15291_v52 = vand.u32 4294901760, %v9939_v2 }
 0x2ea   :  { %2886 = vmatprep.mubr.f32.mxu1 %v15289_v5 }
 0x2eb   :  { %v3480_v63 = vsub.f32 %v9939_v2, %v15291_v52  ;;  %v1510_v52 = vpop.permute.xlu1 %1509 }
 0x2ec   :  { %2717 = vmatmul.mubr.f32.gmra.mxu0 %v9666_v1 }
 0x2ed   :  { %2888 = vmatmul.mubr.f32.gmra.mxu1 %v9637_v14  ;;  %3432 = vmatprep.mubr.f32.mxu0 %v15289_v5  ;;  %v15285_v14 = vand.u32 4294901760, %v9923_v18 }
 0x2ee   :  { %2893 = vmatprep.mubr.f32.mxu1 %v15289_v5  ;;  %v1709_v11 = vpop.f32.mrf.mxu0 }
 0x2f0   :  { %3438 = vmatmul.mubr.f32.vlgmr.msra.gmra.mxu0 %v3437_v20  ;;  %v1711_v9 = vpop.f32.mrf.mxu0  ;;  %v1505_v20 = vpop.permute.xlu0 %1504 }
 0x2f1   :  { %2895 = vmatmul.mubr.f32.gmra.mxu1 %v9653_v23  ;;  %3855 = vmatpush1.msra.mxu0 %v15739_v60  ;;  %v3469_v23 = vsub.f32 %v9923_v18, %v15285_v14 }
 0x2f2   :  { %3858 = vmatprep.subr.mxu0 %v15740_v19  ;;  %2900 = vmatprep.mubr.f32.mxu1 %v15289_v5 }
 0x2f3   :  { %3861 = vmatpush1.msra.mxu0 %v15741_v21  ;;  %3443 = vmatprep.mubr.f32.mxu0 %v15289_v5  ;;  %v1720_v28 = vpop.f32.mrf.mxu0  ;;  %v3470_v42 = vand.u32 4294901760, %v3469_v23 }
 0x2f4   :  { %3864 = vmatprep.subr.mxu0 %v15743_v6  ;;  %3449 = vmatmul.mubr.f32.gmra.mxu0 %v3448_v54  ;;  %v1710_v54 = vadd.f32 %v1709_v11, %v1505_v20  ;;  %v15754_v6 = vand.u32 4294901760, %v9961_v57 }
 0x2f5   :  { %2902 = vmatmul.mubr.f32.gmra.mxu1 %v9666_v1  ;;  %3867 = vmatpush1.msra.mxu0 %v15745_v47  ;;  %v1722_v32 = vpop.f32.mrf.mxu0  ;;  %v9976_v1 = vand.u32 4294901760, %v3334_v16  ;;  %v3481_v47 = vand.u32 4294901760, %v3480_v63  ;;  %v3210_v63 = vld [vmem:[%s15247_s8 + $0x50] sm:$0xff] }
 0x2f6   :  { %3870 = vmatprep.subr.mxu0 %v15746_v56  ;;  %3454 = vmatprep.mubr.f32.mxu0 %v15289_v5  ;;  %v3491_v21 = vsub.f32 %v9961_v57, %v15754_v6 }
 0x2f7   :  { %3873 = vmatpush1.msra.mxu0 %v15747_v61  ;;  %3713 = vmatprep.mubr.f32.mxu1 %v15289_v5  ;;  %15749 = vst [vmem:[#allocation45_spill] sm:$0xff] %v9976_v1  ;;  %v3337_v61 = vsel %vm735_vm1, %v3208_v44, 0  ;;  %v1712_v5 = vadd.f32 %v1711_v9, %v1505_v20  ;;  %v9998_v44 = vsub.f32 %v3334_v16, %v9976_v1 }
 0x2f8   :  { %4279 = vmatprep.subr.mxu0 %v15750_v4  ;;  %v1731_v14 = vpop.f32.mrf.mxu0  ;;  %v1986_v0 = vpop.f32.mrf.mxu1  ;;  %3460 = vmatmul.mubr.f32.gmra.mxu0 %v3459_v24  ;;  %v3209_v24 = vld [vmem:[%s15247_s8 + $0x48] sm:$0xff]  ;;  %v10000_v20 = vand.u32 4294901760, %v3337_v61  ;;  %v1723_v16 = vadd.f32 %v1722_v32, %v1510_v52  ;;  %v3492_v58 = vand.u32 4294901760, %v3491_v21 }
 0x2f9   :  { %v9984_v56 = vadd.f32 %v1986_v0, %v1710_v54  ;;  %3715 = vmatmul.mubr.f32.vlgmr.msra.gmra.mxu1 %v9864_v33  ;;  %3465 = vmatprep.mubr.f32.mxu0 %v15751_v35  ;;  %15752 = vst [vmem:[#allocation46_spill] sm:$0xff] %v9998_v44  ;;  %v1721_v54 = vadd.f32 %v1720_v28, %v1510_v52  ;;  %v1520_v21 = vpop.permute.xlu1 %1519  ;;  %v15758_v25 = vand.u32 4294901760, %v9998_v44 }
 0x2fa   :  { %4062 = vmatpush1.msra.mxu1 %v9352_v22  ;;  %v1733_v23 = vpop.f32.mrf.mxu0  ;;  %v1988_v4 = vpop.f32.mrf.mxu1  ;;  %3720 = vmatprep.mubr.f32.mxu1 %v15751_v35  ;;  %15753 = vst [vmem:[#allocation47_spill] sm:$0xff] %v10000_v20 }
 0x2fb   :  { %4064 = vmatprep.subr.mxu1 %v9338_v8  ;;  %v9994_v9 = vadd.f32 %v1988_v4, %v1712_v5  ;;  %v3340_v5 = vsel %vm735_vm1, %v3209_v24, 0  ;;  %v15755_v24 = vand.u32 4294901760, %v9974_v41  ;;  %v3513_v10 = vsub.f32 %v9998_v44, %v15758_v25  ;;  %v3212_v25 = vld [vmem:[%s15247_s8 + $0x60] sm:$0xff] }
 0x2fc   :  { %4066 = vmatpush1.msra.mxu1 %v9336_v7  ;;  %v1742_v11 = vpop.f32.mrf.mxu0  ;;  %3471 = vmatmul.mubr.f32.gmra.mxu0 %v3470_v42  ;;  %v1515_v42 = vpop.permute.xlu0 %1514 }
 0x2fd   :  { %4068 = vmatprep.subr.mxu1 %v9341_v12  ;;  %v1993_v4 = vpop.f32.mrf.mxu1  ;;  %3722 = vmatmul.mubr.f32.gmra.mxu1 %v9873_v51  ;;  %v3502_v52 = vsub.f32 %v9974_v41, %v15755_v24  ;;  %v1732_v19 = vadd.f32 %v1731_v14, %v1515_v42  ;;  %v3343_v24 = vsel %vm735_vm1, %v3210_v63, 0  ;;  %v1734_v32 = vadd.f32 %v1733_v23, %v1515_v42 }
 0x2fe   :  { %v10009_v0 = vadd.f32 %v1993_v4, %v1721_v54  ;;  %4070 = vmatpush1.msra.mxu1 %v9347_v17  ;;  %v1744_v28 = vpop.f32.mrf.mxu0  ;;  %3476 = vmatprep.mubr.f32.mxu0 %v15751_v35  ;;  %v10023_v54 = vsub.f32 %v3337_v61, %v10000_v20  ;;  %v10025_v4 = vand.u32 4294901760, %v3340_v5  ;;  %v3211_v61 = vld [vmem:[%s15247_s8 + $0x58] sm:$0xff]  ;;  %v1743_v23 = vadd.f32 %v1742_v11, %v1520_v21 }
 0x2ff   :  { %4072 = vmatprep.subr.mxu1 %v9354_v26  ;;  %v1995_v6 = vpop.f32.mrf.mxu1  ;;  %3727 = vmatprep.mubr.f32.mxu1 %v15751_v35  ;;  %v10049_v42 = vand.u32 4294901760, %v3343_v24  ;;  %v3346_v49 = vsel %vm735_vm1, %v3211_v61, 0 }
 0x300   :  { %15756 = vst [vmem:[#allocation48_spill] sm:$0xff] %v10023_v54  ;;  %15757 = vst [vmem:[#allocation49_spill] sm:$0xff] %v10025_v4  ;;  %v10027_v60 = vadd.f32 %v1995_v6, %v1723_v16  ;;  %4074 = vmatpush1.msra.mxu1 %v9370_v27  ;;  %v1753_v55 = vpop.f32.mrf.mxu0  ;;  %3482 = vmatmul.mubr.f32.gmra.mxu0 %v3481_v47  ;;  %v3503_v6 = vand.u32 4294901760, %v3502_v52  ;;  %v15308_v63 = vand.u32 4294901760, %v10023_v54  ;;  %v10064_v38 = vand.u32 4294901760, %v3346_v49 }
 0x301   :  { %4478 = vmatprep.subr.mxu1 %v9367_v29  ;;  %v2000_v46 = vpop.f32.mrf.mxu1  ;;  %3729 = vmatmul.mubr.f32.gmra.mxu1 %v9889_v3  ;;  %v10045_v62 = vsub.f32 %v3340_v5, %v10025_v4  ;;  %15760 = vst [vmem:[#allocation51_spill] sm:$0xff] %v10049_v42  ;;  %v1745_v5 = vadd.f32 %v1744_v28, %v1520_v21  ;;  %v3349_v21 = vsel %vm735_vm1, %v3212_v25, 0 }
 0x302   :  { %v10036_v14 = vadd.f32 %v2000_v46, %v1732_v19  ;;  %v1755_v16 = vpop.f32.mrf.mxu0  ;;  %3487 = vmatprep.mubr.f32.mxu0 %v15751_v35  ;;  %3734 = vmatprep.mubr.f32.mxu1 %v15751_v35  ;;  %v3524_v61 = vsub.f32 %v10023_v54, %v15308_v63  ;;  %15761 = vst [vmem:[#allocation52_spill] sm:$0xff] %v10064_v38  ;;  %v10086_v54 = vand.u32 4294901760, %v3349_v21 }
 0x303   :  { %v2002_v47 = vpop.f32.mrf.mxu1  ;;  %15759 = vst [vmem:[#allocation50_spill] sm:$0xff] %v10045_v62 }
 0x304   :  { %v10047_v46 = vadd.f32 %v2002_v47, %v1734_v32  ;;  %v1764_v19 = vpop.f32.mrf.mxu0  ;;  %3493 = vmatmul.mubr.f32.gmra.mxu0 %v3492_v58  ;;  %v1525_v58 = vpop.permute.xlu0 %1524  ;;  %v3514_v47 = vand.u32 4294901760, %v3513_v10  ;;  %v3213_v10 = vld [vmem:[%s15247_s8 + $0x68] sm:$0xff]  ;;  %15764 = vst [vmem:[#allocation55_spill] sm:$0xff] %v10086_v54 }
 0x305   :  { %v2007_v3 = vpop.f32.mrf.mxu1  ;;  %3736 = vmatmul.mubr.f32.gmra.mxu1 %v9908_v13  ;;  %3498 = vmatprep.mubr.f32.mxu0 %v15751_v35  ;;  %v15317_v13 = vand.u32 4294901760, %v10045_v62  ;;  %v1754_v51 = vadd.f32 %v1753_v55, %v1525_v58  ;;  %v1756_v63 = vadd.f32 %v1755_v16, %v1525_v58  ;;  %v3352_v58 = vsel %vm735_vm1, %v3213_v10, 0 }
 0x306   :  { %v10057_v52 = vadd.f32 %v2007_v3, %v1743_v23  ;;  %v1766_v11 = vpop.f32.mrf.mxu0  ;;  %3741 = vmatprep.mubr.f32.mxu1 %v15751_v35  ;;  %v10069_v3 = vsub.f32 %v3343_v24, %v10049_v42  ;;  %v10102_v10 = vsub.f32 %v3349_v21, %v10086_v54  ;;  %v10104_v16 = vand.u32 4294901760, %v3352_v58 }
 0x307   :  { %v2009_v32 = vpop.f32.mrf.mxu1  ;;  %v3535_v25 = vsub.f32 %v10045_v62, %v15317_v13 }
 0x308   :  { %v10066_v33 = vadd.f32 %v2009_v32, %v1745_v5  ;;  %v1775_v28 = vpop.f32.mrf.mxu0  ;;  %3504 = vmatmul.mubr.f32.gmra.mxu0 %v3503_v6  ;;  %15762 = vst [vmem:[#allocation53_spill] sm:$0xff] %v10069_v3  ;;  %v1530_v6 = vpop.permute.xlu1 %1529  ;;  %v3525_v32 = vand.u32 4294901760, %v3524_v61  ;;  %15767 = vst [vmem:[#allocation58_spill] sm:$0xff] %v10102_v10 }
 0x309   :  { %v2014_v23 = vpop.f32.mrf.mxu1  ;;  %3743 = vmatmul.mubr.f32.gmra.mxu1 %v9925_v37  ;;  %3509 = vmatprep.mubr.f32.mxu0 %v15751_v35  ;;  %v10084_v37 = vsub.f32 %v3346_v49, %v10064_v38  ;;  %v1765_v44 = vadd.f32 %v1764_v19, %v1530_v6  ;;  %v1767_v61 = vadd.f32 %v1766_v11, %v1530_v6  ;;  %v1535_v19 = vpop.permute.xlu0 %1534  ;;  %v3536_v6 = vand.u32 4294901760, %v3535_v25 }
 0x30a   :  { %v10077_v55 = vadd.f32 %v2014_v23, %v1754_v51  ;;  %v1777_v5 = vpop.f32.mrf.mxu0  ;;  %3748 = vmatprep.mubr.f32.mxu1 %v15751_v35 }
 0x30b   :  { %v2016_v24 = vpop.f32.mrf.mxu1  ;;  %15763 = vst [vmem:[#allocation54_spill] sm:$0xff] %v10084_v37 }
 0x30c   :  { %v10088_v41 = vadd.f32 %v2016_v24, %v1756_v63  ;;  %v1786_v51 = vpop.f32.mrf.mxu0  ;;  %3515 = vmatmul.mubr.f32.gmra.mxu0 %v3514_v47  ;;  %v3214_v63 = vld [vmem:[%s15247_s8 + $0x70] sm:$0xff]  ;;  %v1778_v24 = vadd.f32 %v1777_v5, %v1535_v19  ;;  %v1540_v25 = vpop.permute.xlu1 %1539 }
 0x30d   :  { %v2021_v23 = vpop.f32.mrf.mxu1  ;;  %3750 = vmatmul.mubr.f32.gmra.mxu1 %v9941_v36  ;;  %3520 = vmatprep.mubr.f32.mxu0 %v15751_v35  ;;  %v1776_v36 = vadd.f32 %v1775_v28, %v1535_v19  ;;  %v3355_v21 = vsel %vm735_vm1, %v3214_v63, 0  ;;  %v10125_v63 = vsub.f32 %v3352_v58, %v10104_v16 }
 0x30e   :  { %15765 = vst [vmem:[#allocation56_spill] sm:$0xff] %v10088_v41  ;;  %v10094_v13 = vadd.f32 %v2021_v23, %v1765_v44  ;;  %v1788_v49 = vpop.f32.mrf.mxu0  ;;  %3755 = vmatprep.mubr.f32.mxu1 %v15751_v35  ;;  %v15769_v23 = vand.u32 4294901760, %v10069_v3 }
 0x30f   :  { %v2023_v47 = vpop.f32.mrf.mxu1  ;;  %15772 = vst [vmem:[#allocation61_spill] sm:$0xff] %v10125_v63 }
 0x310   :  { %15766 = vst [vmem:[#allocation57_spill] sm:$0xff] %v10094_v13  ;;  %v10106_v11 = vadd.f32 %v2023_v47, %v1767_v61  ;;  %v1797_v44 = vpop.f32.mrf.mxu0  ;;  %3526 = vmatmul.mubr.f32.gmra.mxu0 %v3525_v32  ;;  %v3546_v62 = vsub.f32 %v10069_v3, %v15769_v23  ;;  %v3215_v32 = vld [vmem:[%s15247_s8 + $0x78] sm:$0xff]  ;;  %v15771_v47 = vand.u32 4294901760, %v10084_v37  ;;  %v10129_v3 = vand.u32 4294901760, %v3355_v21 }
 0x311   :  { %v2028_v13 = vpop.f32.mrf.mxu1  ;;  %3757 = vmatmul.mubr.f32.gmra.mxu1 %v9953_v50  ;;  %3531 = vmatprep.mubr.f32.mxu0 %v15751_v35 }
 0x312   :  { %15768 = vst [vmem:[#allocation59_spill] sm:$0xff] %v10106_v11  ;;  %v10114_v57 = vadd.f32 %v2028_v13, %v1776_v36  ;;  %v1799_v28 = vpop.f32.mrf.mxu0  ;;  %3762 = vmatprep.mubr.f32.mxu1 %v15751_v35  ;;  %v3557_v23 = vsub.f32 %v10084_v37, %v15771_v47  ;;  %v1787_v13 = vadd.f32 %v1786_v51, %v1540_v25  ;;  %v3547_v19 = vand.u32 4294901760, %v3546_v62  ;;  %v1545_v51 = vpop.permute.xlu0 %1544 }
 0x313   :  { %v2030_v61 = vpop.f32.mrf.mxu1  ;;  %v3358_v47 = vsel %vm735_vm1, %v3215_v32, 0  ;;  %v1789_v37 = vadd.f32 %v1788_v49, %v1540_v25  ;;  %v15774_v62 = vand.u32 4294901760, %v10102_v10  ;;  %v1800_v25 = vadd.f32 %v1799_v28, %v1545_v51 }
 0x314   :  { %15770 = vst [vmem:[#allocation60_spill] sm:$0xff] %v10114_v57  ;;  %v10127_v36 = vadd.f32 %v2030_v61, %v1778_v24  ;;  %v1808_v5 = vpop.f32.mrf.mxu0  ;;  %3537 = vmatmul.mubr.f32.gmra.mxu0 %v3536_v6  ;;  %v3558_v61 = vand.u32 4294901760, %v3557_v23  ;;  %v10146_v49 = vand.u32 4294901760, %v3358_v47 }
 0x315   :  { %v2035_v57 = vpop.f32.mrf.mxu1  ;;  %3764 = vmatmul.mubr.f32.gmra.mxu1 %v9976_v1  ;;  %3542 = vmatprep.mubr.f32.mxu0 %v15751_v35  ;;  %v3568_v6 = vsub.f32 %v10102_v10, %v15774_v62  ;;  %v1798_v1 = vadd.f32 %v1797_v44, %v1545_v51 }
 0x316   :  { %15773 = vst [vmem:[#allocation62_spill] sm:$0xff] %v10127_v36  ;;  %v10134_v50 = vadd.f32 %v2035_v57, %v1787_v13  ;;  %v1810_v58 = vpop.f32.mrf.mxu0  ;;  %3769 = vmatprep.mubr.f32.mxu1 %v15751_v35  ;;  %v15336_v36 = vand.u32 4294901760, %v10125_v63  ;;  %v10144_v57 = vsub.f32 %v3355_v21, %v10129_v3 }
 0x317   :  { %v2037_v24 = vpop.f32.mrf.mxu1 }
 0x318   :  { %v10141_v11 = vadd.f32 %v2037_v24, %v1789_v37  ;;  %v1819_v41 = vpop.f32.mrf.mxu0  ;;  %3548 = vmatmul.mubr.f32.gmra.mxu0 %v3547_v19  ;;  %15775 = vst [vmem:[#allocation63_spill] sm:$0xff] %v10144_v57  ;;  %v1550_v37 = vpop.permute.xlu1 %1549  ;;  %v3569_v24 = vand.u32 4294901760, %v3568_v6  ;;  %v3579_v21 = vsub.f32 %v10125_v63, %v15336_v36 }
 0x319   :  { %v2042_v32 = vpop.f32.mrf.mxu1  ;;  %3771 = vmatmul.mubr.f32.gmra.mxu1 %v10000_v20  ;;  %3553 = vmatprep.mubr.f32.mxu0 %v15751_v35  ;;  %v1809_v19 = vadd.f32 %v1808_v5, %v1550_v37  ;;  %v1811_v51 = vadd.f32 %v1810_v58, %v1550_v37  ;;  %v1555_v5 = vpop.permute.xlu0 %1554 }
 0x31a   :  { %v10150_v23 = vadd.f32 %v2042_v32, %v1798_v1  ;;  %v1821_v13 = vpop.f32.mrf.mxu0  ;;  %3776 = vmatprep.mubr.f32.mxu1 %v15751_v35  ;;  %v10160_v1 = vsub.f32 %v3358_v47, %v10146_v49  ;;  %v15777_v47 = vand.u32 4294901760, %v10144_v57 }
 0x31b   :  { %v2044_v44 = vpop.f32.mrf.mxu1  ;;  %v1822_v37 = vadd.f32 %v1821_v13, %v1555_v5 }
 0x31c   :  { %v10156_v62 = vadd.f32 %v2044_v44, %v1800_v25  ;;  %v1830_v10 = vpop.f32.mrf.mxu0  ;;  %3559 = vmatmul.mubr.f32.gmra.mxu0 %v3558_v61  ;;  %15776 = vst [vmem:[#allocation64_spill] sm:$0xff] %v10160_v1  ;;  %v3580_v44 = vand.u32 4294901760, %v3579_v21  ;;  %v1820_v61 = vadd.f32 %v1819_v41, %v1555_v5  ;;  %v15345_v63 = vand.u32 4294901760, %v10160_v1  ;;  %v1560_v41 = vpop.permute.xlu1 %1559 }
 0x31d   :  { %v2049_v28 = vpop.f32.mrf.mxu1  ;;  %3778 = vmatmul.mubr.f32.gmra.mxu1 %v10025_v4  ;;  %3564 = vmatprep.mubr.f32.mxu0 %v15751_v35  ;;  %v3590_v4 = vsub.f32 %v10144_v57, %v15777_v47 }
 0x31e   :  { %v10164_v6 = vadd.f32 %v2049_v28, %v1809_v19  ;;  %v1832_v32 = vpop.f32.mrf.mxu0  ;;  %3783 = vmatprep.mubr.f32.mxu1 %v15751_v35 }
 0x31f   :  { %v2051_v25 = vpop.f32.mrf.mxu1  ;;  %v3591_v47 = vand.u32 4294901760, %v3590_v4  ;;  %v1833_v13 = vadd.f32 %v1832_v32, %v1560_v41 }
 0x320   :  { %v10167_v36 = vadd.f32 %v2051_v25, %v1811_v51  ;;  %v1841_v20 = vpop.f32.mrf.mxu0  ;;  %3570 = vmatmul.mubr.f32.gmra.mxu0 %v3569_v24  ;;  %v1831_v24 = vadd.f32 %v1830_v10, %v1560_v41  ;;  %v1565_v10 = vpop.permute.xlu0 %1564 }
 0x321   :  { %v2056_v58 = vpop.f32.mrf.mxu1  ;;  %3785 = vmatmul.mubr.f32.gmra.mxu1 %v10049_v42  ;;  %3575 = vmatprep.mubr.f32.mxu0 %v15751_v35  ;;  %v3601_v42 = vsub.f32 %v10160_v1, %v15345_v63  ;;  %v1570_v41 = vpop.permute.xlu1 %1569 }
 0x322   :  { %v10175_v19 = vadd.f32 %v2056_v58, %v1820_v61  ;;  %v1843_v21 = vpop.f32.mrf.mxu0  ;;  %3790 = vmatprep.mubr.f32.mxu1 %v15751_v35 }
 0x323   :  { %v2058_v28 = vpop.f32.mrf.mxu1 }
 0x324   :  { %v10178_v51 = vadd.f32 %v2058_v28, %v1822_v37  ;;  %v1852_v25 = vpop.f32.mrf.mxu0  ;;  %3581 = vmatmul.mubr.f32.gmra.mxu0 %v3580_v44  ;;  %v1842_v37 = vadd.f32 %v1841_v20, %v1565_v10  ;;  %v3602_v28 = vand.u32 4294901760, %v3601_v42 }
 0x325   :  { %v2063_v57 = vpop.f32.mrf.mxu1  ;;  %3792 = vmatmul.mubr.f32.gmra.mxu1 %v10064_v38  ;;  %3586 = vmatprep.mubr.f32.mxu0 %v15751_v35  ;;  %v1844_v38 = vadd.f32 %v1843_v21, %v1565_v10  ;;  %v1853_v1 = vadd.f32 %v1852_v25, %v1570_v41  ;;  %v1575_v21 = vpop.permute.xlu0 %1574 }
 0x326   :  { %v10185_v5 = vadd.f32 %v2063_v57, %v1831_v24  ;;  %v1854_v61 = vpop.f32.mrf.mxu0  ;;  %3797 = vmatprep.mubr.f32.mxu1 %v15751_v35 }
 0x327   :  { %v2065_v58 = vpop.f32.mrf.mxu1  ;;  %v1855_v42 = vadd.f32 %v1854_v61, %v1570_v41 }
 0x328   :  { %v10188_v44 = vadd.f32 %v2065_v58, %v1833_v13  ;;  %v1863_v4 = vpop.f32.mrf.mxu0  ;;  %3592 = vmatmul.mubr.f32.gmra.mxu0 %v3591_v47 }
 0x329   :  { %v2070_v63 = vpop.f32.mrf.mxu1  ;;  %3799 = vmatmul.mubr.f32.gmra.mxu1 %v10086_v54  ;;  %3597 = vmatprep.mubr.f32.mxu0 %v15751_v35 }
 0x32a   :  { %v10192_v32 = vadd.f32 %v2070_v63, %v1842_v37  ;;  %v1865_v57 = vpop.f32.mrf.mxu0  ;;  %3804 = vmatprep.mubr.f32.mxu1 %v15751_v35  ;;  %v1864_v37 = vadd.f32 %v1863_v4, %v1575_v21  ;;  %v1580_v4 = vpop.permute.xlu1 %1579 }
 0x32b   :  { %v2072_v24 = vpop.f32.mrf.mxu1 }
 0x32c   :  { %v10195_v20 = vadd.f32 %v2072_v24, %v1844_v38  ;;  %v1874_v13 = vpop.f32.mrf.mxu0  ;;  %3603 = vmatmul.mubr.f32.gmra.mxu0 %v3602_v28 }
 0x32d   :  { %v2077_v47 = vpop.f32.mrf.mxu1  ;;  %3806 = vmatmul.mubr.f32.gmra.mxu1 %v10104_v16  ;;  %3906 = vmatprep.mubr.f32.mxu0 %v15751_v35 }
 0x32e   :  { %v10199_v58 = vadd.f32 %v2077_v47, %v1853_v1  ;;  %v1876_v63 = vpop.f32.mrf.mxu0  ;;  %3811 = vmatprep.mubr.f32.mxu1 %v15751_v35  ;;  %v1866_v1 = vadd.f32 %v1865_v57, %v1575_v21 }
 0x32f   :  { %v2079_v10 = vpop.f32.mrf.mxu1 }
 0x330   :  { %v10202_v54 = vadd.f32 %v2079_v10, %v1855_v42  ;;  %v2180_v38 = vpop.f32.mrf.mxu0  ;;  %3909 = vmatmul.mubr.f32.vlgmr.msra.gmra.mxu0 %v9877_v15 }
 0x331   :  { %v2084_v25 = vpop.f32.mrf.mxu1  ;;  %v2181_v28 = vadd.f32 %v2180_v38, %v9984_v56  ;;  %3813 = vmatmul.mubr.f32.gmra.mxu1 %v10129_v3  ;;  %4283 = vmatpush1.msra.mxu0 %v9386_v40  ;;  %v1875_v56 = vadd.f32 %v1874_v13, %v1580_v4  ;;  %v15834_v40 = vld [vmem:[#allocation47_spill] sm:$0xff] }
 0x332   :  { %v10208_v61 = vadd.f32 %v2084_v25, %v1864_v37  ;;  %4287 = vmatprep.subr.mxu0 %v9389_v45  ;;  %v2182_v41 = vpop.f32.mrf.mxu0  ;;  %3818 = vmatprep.mubr.f32.mxu1 %v15751_v35  ;;  %v15829_v45 = vld [vmem:[#allocation45_spill] sm:$0xff] }
 0x333   :  { %v2086_v24 = vpop.f32.mrf.mxu1  ;;  %v2183_v47 = vadd.f32 %v2182_v41, %v9994_v9  ;;  %4291 = vmatpush1.msra.mxu0 %v9409_v53  ;;  %3914 = vmatprep.mubr.f32.mxu0 %v15751_v35  ;;  %v1877_v9 = vadd.f32 %v1876_v63, %v1580_v4  ;;  %v15778_v4 = vand.u32 4294901760, %v9877_v15 }
 0x334   :  { %v10215_v42 = vadd.f32 %v2086_v24, %v1866_v1  ;;  %4295 = vmatprep.subr.mxu0 %v9418_v30  ;;  %v2188_v57 = vpop.f32.mrf.mxu0  ;;  %3917 = vmatmul.mubr.f32.gmra.mxu0 %v9887_v59 }
 0x335   :  { %v2091_v21 = vpop.f32.mrf.mxu1  ;;  %v2189_v10 = vadd.f32 %v2188_v57, %v10009_v0  ;;  %3820 = vmatmul.mubr.f32.gmra.mxu1 %v10146_v49  ;;  %4299 = vmatpush1.msra.mxu0 %v9427_v43 }
 0x336   :  { %v10222_v37 = vadd.f32 %v2091_v21, %v1875_v56  ;;  %4303 = vmatprep.subr.mxu0 %v9437_v39  ;;  %v2190_v13 = vpop.f32.mrf.mxu0  ;;  %3922 = vmatprep.mubr.f32.mxu0 %v15751_v35 }
 0x337   :  { %v2093_v38 = vpop.f32.mrf.mxu1  ;;  %v2191_v25 = vadd.f32 %v2190_v13, %v10027_v60  ;;  %4307 = vmatpush1.msra.mxu0 %v9456_v48  ;;  %4107 = vmatprep.mubr.f32.mxu1 %v15751_v35  ;;  %v15790_v48 = vld [vmem:[#allocation46_spill] sm:$0xff] }
 0x338   :  { %v10229_v0 = vadd.f32 %v2093_v38, %v1877_v9  ;;  %5095 = vmatprep.subr.mxu0 %v9367_v29  ;;  %v2196_v1 = vpop.f32.mrf.mxu0  ;;  %3925 = vmatmul.mubr.f32.gmra.mxu0 %v9902_v31  ;;  %v15779_v9 = vand.u32 4294901760, %v9887_v59 }
 0x339   :  { %v2197_v63 = vadd.f32 %v2196_v1, %v10036_v14  ;;  %v2382_v41 = vpop.f32.mrf.mxu1  ;;  %4111 = vmatmul.mubr.f32.vlgmr.msra.gmra.mxu1 %v15778_v4  ;;  %3930 = vmatprep.mubr.f32.mxu0 %v15751_v35 }
 0x33a   :  { %v10237_v60 = vadd.f32 %v2382_v41, %v2181_v28  ;;  %4480 = vmatpush1.msra.mxu1 %v9352_v22  ;;  %v2198_v24 = vpop.f32.mrf.mxu0  ;;  %4116 = vmatprep.mubr.f32.mxu1 %v15751_v35  ;;  %v15780_v41 = vand.u32 4294901760, %v9902_v31  ;;  %v15784_v31 = vand.u32 4294901760, %v9923_v18 }
 0x33b   :  { %4482 = vmatprep.subr.mxu1 %v9338_v8  ;;  %v2199_v56 = vadd.f32 %v2198_v24, %v10047_v46  ;;  %v2384_v57 = vpop.f32.mrf.mxu1 }
 0x33c   :  { %v10243_v21 = vadd.f32 %v2384_v57, %v2183_v47  ;;  %4484 = vmatpush1.msra.mxu1 %v9336_v7  ;;  %v2204_v15 = vpop.f32.mrf.mxu0  ;;  %3933 = vmatmul.mubr.f32.gmra.mxu0 %v9923_v18  ;;  %v15788_v18 = vand.u32 4294901760, %v9939_v2 }
 0x33d   :  { %4486 = vmatprep.subr.mxu1 %v9341_v12  ;;  %v2205_v14 = vadd.f32 %v2204_v15, %v10057_v52  ;;  %v2391_v28 = vpop.f32.mrf.mxu1  ;;  %4120 = vmatmul.mubr.f32.gmra.mxu1 %v15779_v9 }
 0x33e   :  { %v10251_v13 = vadd.f32 %v2391_v28, %v2189_v10  ;;  %4488 = vmatpush1.msra.mxu1 %v9347_v17  ;;  %v2206_v46 = vpop.f32.mrf.mxu0  ;;  %3938 = vmatprep.mubr.f32.mxu0 %v15751_v35 }
 0x33f   :  { %4490 = vmatprep.subr.mxu1 %v9354_v26  ;;  %v2207_v47 = vadd.f32 %v2206_v46, %v10066_v33  ;;  %v2393_v38 = vpop.f32.mrf.mxu1  ;;  %4125 = vmatprep.mubr.f32.mxu1 %v15751_v35 }
 0x340   :  { %v10258_v1 = vadd.f32 %v2393_v38, %v2191_v25  ;;  %4492 = vmatpush1.msra.mxu1 %v9370_v27  ;;  %v2212_v59 = vpop.f32.mrf.mxu0  ;;  %3941 = vmatmul.mubr.f32.gmra.mxu0 %v9939_v2  ;;  %v15781_v25 = vld [vmem:[#allocation56_spill] sm:$0xff] }
 0x341   :  { %5326 = vmatprep.subr.mxu1 %v9444_v34  ;;  %v2213_v52 = vadd.f32 %v2212_v59, %v10077_v55  ;;  %v2400_v10 = vpop.f32.mrf.mxu1  ;;  %4129 = vmatmul.mubr.f32.gmra.mxu1 %v15780_v41  ;;  %v15782_v34 = vld [vmem:[#allocation43_spill] sm:$0xff]  ;;  %v15783_v55 = vld [vmem:[#allocation57_spill] sm:$0xff] }
 0x342   :  { %v10266_v4 = vadd.f32 %v2400_v10, %v2197_v63  ;;  %v2214_v33 = vpop.f32.mrf.mxu0  ;;  %3946 = vmatprep.mubr.f32.mxu0 %v15751_v35  ;;  %4134 = vmatprep.mubr.f32.mxu1 %v15751_v35  ;;  %v15785_v59 = vld [vmem:[#allocation59_spill] sm:$0xff]  ;;  %v15791_v2 = vand.u32 4294901760, %v15782_v34 }
 0x343   :  { %v2215_v24 = vadd.f32 %v2214_v33, %v15781_v25  ;;  %v2402_v57 = vpop.f32.mrf.mxu1  ;;  %v15786_v25 = vld [vmem:[#allocation44_spill] sm:$0xff] }
 0x344   :  { %v10271_v15 = vadd.f32 %v2402_v57, %v2199_v56  ;;  %v2220_v28 = vpop.f32.mrf.mxu0  ;;  %3949 = vmatmul.mubr.f32.gmra.mxu0 %v15782_v34  ;;  %v15787_v57 = vld [vmem:[#allocation60_spill] sm:$0xff]  ;;  %v15793_v34 = vand.u32 4294901760, %v15786_v25 }
 0x345   :  { %v2221_v9 = vadd.f32 %v2220_v28, %v15783_v55  ;;  %v2409_v46 = vpop.f32.mrf.mxu1  ;;  %4138 = vmatmul.mubr.f32.gmra.mxu1 %v15784_v31  ;;  %3954 = vmatprep.mubr.f32.mxu0 %v15751_v35  ;;  %v15789_v31 = vld [vmem:[#allocation62_spill] sm:$0xff] }
 0x346   :  { %v10278_v63 = vadd.f32 %v2409_v46, %v2205_v14  ;;  %v2222_v38 = vpop.f32.mrf.mxu0  ;;  %4143 = vmatprep.mubr.f32.mxu1 %v15751_v35 }
 0x347   :  { %v2223_v10 = vadd.f32 %v2222_v38, %v15785_v59  ;;  %v2411_v56 = vpop.f32.mrf.mxu1 }
 0x348   :  { %v10282_v41 = vadd.f32 %v2411_v56, %v2207_v47  ;;  %v2228_v33 = vpop.f32.mrf.mxu0  ;;  %3957 = vmatmul.mubr.f32.gmra.mxu0 %v15786_v25  ;;  %v15795_v25 = vand.u32 4294901760, %v15790_v48 }
 0x349   :  { %v2229_v28 = vadd.f32 %v2228_v33, %v15787_v57  ;;  %v2418_v55 = vpop.f32.mrf.mxu1  ;;  %4147 = vmatmul.mubr.f32.gmra.mxu1 %v15788_v18  ;;  %3962 = vmatprep.mubr.f32.mxu0 %v15751_v35 }
 0x34a   :  { %v10289_v14 = vadd.f32 %v2418_v55, %v2213_v52  ;;  %v2230_v46 = vpop.f32.mrf.mxu0  ;;  %4152 = vmatprep.mubr.f32.mxu1 %v15751_v35 }
 0x34b   :  { %v2231_v38 = vadd.f32 %v2230_v46, %v15789_v31  ;;  %v2420_v47 = vpop.f32.mrf.mxu1 }
 0x34c   :  { %v10293_v59 = vadd.f32 %v2420_v47, %v2215_v24  ;;  %v2236_v56 = vpop.f32.mrf.mxu0  ;;  %3965 = vmatmul.mubr.f32.gmra.mxu0 %v15790_v48  ;;  %v15792_v47 = vld [vmem:[#allocation48_spill] sm:$0xff] }
 0x34d   :  { %v2237_v33 = vadd.f32 %v2236_v56, %v10134_v50  ;;  %v2427_v57 = vpop.f32.mrf.mxu1  ;;  %4156 = vmatmul.mubr.f32.gmra.mxu1 %v15791_v2  ;;  %3970 = vmatprep.mubr.f32.mxu0 %v15751_v35  ;;  %v15797_v48 = vand.u32 4294901760, %v15792_v47 }
 0x34e   :  { %v10300_v52 = vadd.f32 %v2427_v57, %v2221_v9  ;;  %v2238_v55 = vpop.f32.mrf.mxu0  ;;  %4161 = vmatprep.mubr.f32.mxu1 %v15751_v35 }
 0x34f   :  { %v2239_v18 = vadd.f32 %v2238_v55, %v10141_v11  ;;  %v2429_v24 = vpop.f32.mrf.mxu1 }
 0x350   :  { %v10304_v46 = vadd.f32 %v2429_v24, %v2223_v10  ;;  %v2244_v31 = vpop.f32.mrf.mxu0  ;;  %3973 = vmatmul.mubr.f32.gmra.mxu0 %v15792_v47  ;;  %v15794_v24 = vld [vmem:[#allocation50_spill] sm:$0xff] }
 0x351   :  { %v2245_v50 = vadd.f32 %v2244_v31, %v10150_v23  ;;  %v2436_v56 = vpop.f32.mrf.mxu1  ;;  %4165 = vmatmul.mubr.f32.gmra.mxu1 %v15793_v34  ;;  %3978 = vmatprep.mubr.f32.mxu0 %v15751_v35  ;;  %v15799_v47 = vand.u32 4294901760, %v15794_v24 }
 0x352   :  { %v10311_v9 = vadd.f32 %v2436_v56, %v2229_v28  ;;  %v2246_v57 = vpop.f32.mrf.mxu0  ;;  %4170 = vmatprep.mubr.f32.mxu1 %v15751_v35 }
 0x353   :  { %v2247_v11 = vadd.f32 %v2246_v57, %v10156_v62  ;;  %v2438_v10 = vpop.f32.mrf.mxu1 }
 0x354   :  { %v10315_v2 = vadd.f32 %v2438_v10, %v2231_v38  ;;  %v2252_v55 = vpop.f32.mrf.mxu0  ;;  %3981 = vmatmul.mubr.f32.gmra.mxu0 %v15794_v24  ;;  %v15796_v10 = vld [vmem:[#allocation53_spill] sm:$0xff] }
 0x355   :  { %v2253_v23 = vadd.f32 %v2252_v55, %v10164_v6  ;;  %v2445_v31 = vpop.f32.mrf.mxu1  ;;  %4174 = vmatmul.mubr.f32.gmra.mxu1 %v15795_v25  ;;  %3986 = vmatprep.mubr.f32.mxu0 %v15751_v35  ;;  %v15801_v24 = vand.u32 4294901760, %v15796_v10 }
 0x356   :  { %v10322_v28 = vadd.f32 %v2445_v31, %v2237_v33  ;;  %v2254_v56 = vpop.f32.mrf.mxu0  ;;  %4179 = vmatprep.mubr.f32.mxu1 %v15751_v35 }
 0x357   :  { %v2255_v62 = vadd.f32 %v2254_v56, %v10167_v36  ;;  %v2447_v38 = vpop.f32.mrf.mxu1 }
 0x358   :  { %v10326_v34 = vadd.f32 %v2447_v38, %v2239_v18  ;;  %v2260_v57 = vpop.f32.mrf.mxu0  ;;  %3989 = vmatmul.mubr.f32.gmra.mxu0 %v15796_v10  ;;  %v15798_v38 = vld [vmem:[#allocation54_spill] sm:$0xff] }
 0x359   :  { %v2261_v6 = vadd.f32 %v2260_v57, %v10175_v19  ;;  %v2454_v55 = vpop.f32.mrf.mxu1  ;;  %4183 = vmatmul.mubr.f32.gmra.mxu1 %v15797_v48  ;;  %3994 = vmatprep.mubr.f32.mxu0 %v15751_v35  ;;  %v15803_v10 = vand.u32 4294901760, %v15798_v38 }
 0x35a   :  { %v10333_v33 = vadd.f32 %v2454_v55, %v2245_v50  ;;  %v2262_v31 = vpop.f32.mrf.mxu0  ;;  %4188 = vmatprep.mubr.f32.mxu1 %v15751_v35 }
 0x35b   :  { %v2263_v36 = vadd.f32 %v2262_v31, %v10178_v51  ;;  %v2456_v18 = vpop.f32.mrf.mxu1 }
 0x35c   :  { %v10337_v25 = vadd.f32 %v2456_v18, %v2247_v11  ;;  %v2268_v56 = vpop.f32.mrf.mxu0  ;;  %3997 = vmatmul.mubr.f32.gmra.mxu0 %v15798_v38  ;;  %v15800_v18 = vld [vmem:[#allocation58_spill] sm:$0xff] }
 0x35d   :  { %v2269_v19 = vadd.f32 %v2268_v56, %v10185_v5  ;;  %v2463_v57 = vpop.f32.mrf.mxu1  ;;  %4192 = vmatmul.mubr.f32.gmra.mxu1 %v15799_v47  ;;  %4002 = vmatprep.mubr.f32.mxu0 %v15751_v35  ;;  %v15805_v38 = vand.u32 4294901760, %v15800_v18 }
 0x35e   :  { %v10344_v50 = vadd.f32 %v2463_v57, %v2253_v23  ;;  %v2270_v55 = vpop.f32.mrf.mxu0  ;;  %4197 = vmatprep.mubr.f32.mxu1 %v15751_v35 }
 0x35f   :  { %v2271_v51 = vadd.f32 %v2270_v55, %v10188_v44  ;;  %v2465_v11 = vpop.f32.mrf.mxu1 }
 0x360   :  { %v10348_v48 = vadd.f32 %v2465_v11, %v2255_v62  ;;  %v2276_v31 = vpop.f32.mrf.mxu0  ;;  %4005 = vmatmul.mubr.f32.gmra.mxu0 %v15800_v18  ;;  %v15802_v11 = vld [vmem:[#allocation61_spill] sm:$0xff] }
 0x361   :  { %v2277_v5 = vadd.f32 %v2276_v31, %v10192_v32  ;;  %v2472_v56 = vpop.f32.mrf.mxu1  ;;  %4201 = vmatmul.mubr.f32.gmra.mxu1 %v15801_v24  ;;  %4010 = vmatprep.mubr.f32.mxu0 %v15751_v35  ;;  %v15807_v18 = vand.u32 4294901760, %v15802_v11 }
 0x362   :  { %v10355_v23 = vadd.f32 %v2472_v56, %v2261_v6  ;;  %v2278_v57 = vpop.f32.mrf.mxu0  ;;  %4206 = vmatprep.mubr.f32.mxu1 %v15751_v35 }
 0x363   :  { %v2279_v44 = vadd.f32 %v2278_v57, %v10195_v20  ;;  %v2474_v62 = vpop.f32.mrf.mxu1 }
 0x364   :  { %v10359_v47 = vadd.f32 %v2474_v62, %v2263_v36  ;;  %v2284_v55 = vpop.f32.mrf.mxu0  ;;  %4013 = vmatmul.mubr.f32.gmra.mxu0 %v15802_v11  ;;  %v15804_v62 = vld [vmem:[#allocation63_spill] sm:$0xff] }
 0x365   :  { %v2285_v32 = vadd.f32 %v2284_v55, %v10199_v58  ;;  %v2481_v31 = vpop.f32.mrf.mxu1  ;;  %4210 = vmatmul.mubr.f32.gmra.mxu1 %v15803_v10  ;;  %4018 = vmatprep.mubr.f32.mxu0 %v15751_v35  ;;  %v15809_v11 = vand.u32 4294901760, %v15804_v62 }
 0x366   :  { %v10366_v6 = vadd.f32 %v2481_v31, %v2269_v19  ;;  %v2286_v56 = vpop.f32.mrf.mxu0  ;;  %4215 = vmatprep.mubr.f32.mxu1 %v15751_v35 }
 0x367   :  { %v2287_v20 = vadd.f32 %v2286_v56, %v10202_v54  ;;  %v2483_v36 = vpop.f32.mrf.mxu1 }
 0x368   :  { %v10370_v24 = vadd.f32 %v2483_v36, %v2271_v51  ;;  %v2292_v57 = vpop.f32.mrf.mxu0  ;;  %4021 = vmatmul.mubr.f32.gmra.mxu0 %v15804_v62  ;;  %v15806_v36 = vld [vmem:[#allocation64_spill] sm:$0xff] }
 0x369   :  { %v2293_v58 = vadd.f32 %v2292_v57, %v10208_v61  ;;  %v2490_v55 = vpop.f32.mrf.mxu1  ;;  %4219 = vmatmul.mubr.f32.gmra.mxu1 %v15805_v38  ;;  %4026 = vmatprep.mubr.f32.mxu0 %v15751_v35 }
 0x36a   :  { %v10377_v19 = vadd.f32 %v2490_v55, %v2277_v5  ;;  %v2294_v31 = vpop.f32.mrf.mxu0  ;;  %4224 = vmatprep.mubr.f32.mxu1 %v15751_v35 }
 0x36b   :  { %v2295_v54 = vadd.f32 %v2294_v31, %v10215_v42  ;;  %v2492_v51 = vpop.f32.mrf.mxu1 }
 0x36c   :  { %v10381_v10 = vadd.f32 %v2492_v51, %v2279_v44  ;;  %v2300_v56 = vpop.f32.mrf.mxu0  ;;  %4029 = vmatmul.mubr.f32.gmra.mxu0 %v15806_v36  ;;  %v15808_v51 = vld [vmem:[#allocation35_spill] sm:$0xff] }
 0x36d   :  { %v2301_v61 = vadd.f32 %v2300_v56, %v10222_v37  ;;  %v2499_v57 = vpop.f32.mrf.mxu1  ;;  %4228 = vmatmul.mubr.f32.gmra.mxu1 %v15807_v18  ;;  %4340 = vmatprep.mubr.f32.mxu0 %v15751_v35  ;;  %v15810_v18 = vld [vmem:[#allocation37_spill] sm:$0xff] }
 0x36e   :  { %v10388_v5 = vadd.f32 %v2499_v57, %v2285_v32  ;;  %v2302_v55 = vpop.f32.mrf.mxu0  ;;  %4233 = vmatprep.mubr.f32.mxu1 %v15751_v35 }
 0x36f   :  { %v2303_v42 = vadd.f32 %v2302_v55, %v10229_v0  ;;  %v2501_v44 = vpop.f32.mrf.mxu1 }
 0x370   :  { %v10392_v38 = vadd.f32 %v2501_v44, %v2287_v20  ;;  %v2613_v31 = vpop.f32.mrf.mxu0  ;;  %4342 = vmatmul.mubr.f32.vlgmr.msra.gmra.mxu0 %v15808_v51  ;;  %v15811_v44 = vand.u32 4294901760, %v15806_v36  ;;  %v15812_v36 = vld [vmem:[#allocation18_spill] sm:$0xff] }
 0x371   :  { %v2508_v37 = vpop.f32.mrf.mxu1  ;;  %v2614_v56 = vadd.f32 %v2613_v31, %v10237_v60  ;;  %4237 = vmatmul.mubr.f32.gmra.mxu1 %v15809_v11  ;;  %5097 = vmatpush1.msra.mxu0 %v9352_v22 }
 0x372   :  { %v10399_v32 = vadd.f32 %v2508_v37, %v2293_v58  ;;  %5099 = vmatprep.subr.mxu0 %v9338_v8  ;;  %v2615_v57 = vpop.f32.mrf.mxu0  ;;  %4242 = vmatprep.mubr.f32.mxu1 %v15751_v35 }
 0x373   :  { %v2510_v0 = vpop.f32.mrf.mxu1  ;;  %v2616_v20 = vadd.f32 %v2615_v57, %v10243_v21  ;;  %5101 = vmatpush1.msra.mxu0 %v9336_v7  ;;  %4347 = vmatprep.mubr.f32.mxu0 %v15751_v35  ;;  %v15813_v57 = vld [vmem:[#allocation38_spill] sm:$0xff] }
 0x374   :  { %v10406_v60 = vadd.f32 %v2510_v0, %v2295_v54  ;;  %5103 = vmatprep.subr.mxu0 %v9341_v12  ;;  %v2620_v62 = vpop.f32.mrf.mxu0  ;;  %4349 = vmatmul.mubr.f32.gmra.mxu0 %v15810_v18 }
 0x375   :  { %v2517_v58 = vpop.f32.mrf.mxu1  ;;  %v2621_v55 = vadd.f32 %v2620_v62, %v10251_v13  ;;  %4246 = vmatmul.mubr.f32.gmra.mxu1 %v15811_v44  ;;  %5105 = vmatpush1.msra.mxu0 %v9347_v17 }
 0x376   :  { %v10414_v21 = vadd.f32 %v2517_v58, %v2301_v61  ;;  %5107 = vmatprep.subr.mxu0 %v9354_v26  ;;  %v2622_v31 = vpop.f32.mrf.mxu0  ;;  %4354 = vmatprep.mubr.f32.mxu0 %v15751_v35 }
 0x377   :  { %v2519_v54 = vpop.f32.mrf.mxu1  ;;  %v2623_v37 = vadd.f32 %v2622_v31, %v10258_v1  ;;  %5109 = vmatpush1.msra.mxu0 %v9370_v27  ;;  %4525 = vmatprep.mubr.f32.mxu1 %v15751_v35  ;;  %v15814_v1 = vld [vmem:[#allocation28_spill] sm:$0xff] }
 0x378   :  { %v10421_v13 = vadd.f32 %v2519_v54, %v2303_v42  ;;  %5526 = vmatprep.subr.mxu0 %v15812_v36  ;;  %v2627_v11 = vpop.f32.mrf.mxu0  ;;  %4356 = vmatmul.mubr.f32.gmra.mxu0 %v15813_v57  ;;  %v15815_v42 = vld [vmem:[#allocation30_spill] sm:$0xff] }
 0x379   :  { %v2628_v61 = vadd.f32 %v2627_v11, %v10266_v4  ;;  %v2798_v0 = vpop.f32.mrf.mxu1  ;;  %4527 = vmatmul.mubr.f32.vlgmr.msra.gmra.mxu1 %v15808_v51  ;;  %4361 = vmatprep.mubr.f32.mxu0 %v15751_v35  ;;  %v15816_v4 = vld [vmem:[#allocation31_spill] sm:$0xff]  ;;  %v15818_v11 = vld [vmem:[#allocation32_spill] sm:$0xff] }
 0x37a   :  { %v10428_v62 = vadd.f32 %v2798_v0, %v2614_v56  ;;  %5332 = vmatpush1.msra.mxu1 %v15814_v1  ;;  %v2629_v58 = vpop.f32.mrf.mxu0  ;;  %4532 = vmatprep.mubr.f32.mxu1 %v15751_v35  ;;  %v15817_v51 = vld [vmem:[#allocation39_spill] sm:$0xff] }
 0x37b   :  { %5338 = vmatprep.subr.mxu1 %v15815_v42  ;;  %v2630_v44 = vadd.f32 %v2629_v58, %v10271_v15  ;;  %v2800_v31 = vpop.f32.mrf.mxu1  ;;  %v15820_v42 = vld [vmem:[#allocation33_spill] sm:$0xff] }
 0x37c   :  { %v10434_v54 = vadd.f32 %v2800_v31, %v2616_v20  ;;  %5344 = vmatpush1.msra.mxu1 %v15816_v4  ;;  %v2634_v36 = vpop.f32.mrf.mxu0  ;;  %4363 = vmatmul.mubr.f32.gmra.mxu0 %v15817_v51  ;;  %v15821_v20 = vld [vmem:[#allocation34_spill] sm:$0xff] }
 0x37d   :  { %5350 = vmatprep.subr.mxu1 %v15818_v11  ;;  %v2635_v56 = vadd.f32 %v2634_v36, %v10278_v63  ;;  %v2805_v0 = vpop.f32.mrf.mxu1  ;;  %4534 = vmatmul.mubr.f32.gmra.mxu1 %v15810_v18  ;;  %v15823_v63 = vld [vmem:[#allocation36_spill] sm:$0xff] }
 0x37e   :  { %v10441_v1 = vadd.f32 %v2805_v0, %v2621_v55  ;;  %5356 = vmatpush1.msra.mxu1 %v15820_v42  ;;  %v2636_v15 = vpop.f32.mrf.mxu0  ;;  %4368 = vmatprep.mubr.f32.mxu0 %v15751_v35  ;;  %v15824_v18 = vld [vmem:[#allocation40_spill] sm:$0xff] }
 0x37f   :  { %5362 = vmatprep.subr.mxu1 %v15821_v20  ;;  %v2637_v58 = vadd.f32 %v2636_v15, %v10282_v41  ;;  %v2807_v31 = vpop.f32.mrf.mxu1  ;;  %4539 = vmatprep.mubr.f32.mxu1 %v15751_v35 }
 0x380   :  { %15819 = vst [vmem:[#allocation56_spill] sm:$0xff] %v10441_v1  ;;  %v10448_v4 = vadd.f32 %v2807_v31, %v2623_v37  ;;  %5368 = vmatpush1.msra.mxu1 %v15823_v63  ;;  %v2641_v36 = vpop.f32.mrf.mxu0  ;;  %4370 = vmatmul.mubr.f32.gmra.mxu0 %v15824_v18 }
 0x381   :  { %5718 = vmatprep.subr.mxu1 %v9367_v29  ;;  %v2642_v55 = vadd.f32 %v2641_v36, %v10289_v14  ;;  %v2812_v11 = vpop.f32.mrf.mxu1  ;;  %4541 = vmatmul.mubr.f32.gmra.mxu1 %v15813_v57  ;;  %v15825_v14 = vld [vmem:[#allocation41_spill] sm:$0xff] }
 0x382   :  { %15822 = vst [vmem:[#allocation43_spill] sm:$0xff] %v10448_v4  ;;  %v10455_v0 = vadd.f32 %v2812_v11, %v2628_v61  ;;  %v2643_v41 = vpop.f32.mrf.mxu0  ;;  %4375 = vmatprep.mubr.f32.mxu0 %v15751_v35  ;;  %4546 = vmatprep.mubr.f32.mxu1 %v15751_v35 }
 0x383   :  { %v2644_v37 = vadd.f32 %v2643_v41, %v10293_v59  ;;  %v2814_v42 = vpop.f32.mrf.mxu1 }
 0x384   :  { %v2908_v15 = vmax.f32 %v10428_v62, %v10455_v0  ;;  %v10462_v20 = vadd.f32 %v2814_v42, %v2630_v44  ;;  %v2648_v31 = vpop.f32.mrf.mxu0  ;;  %4377 = vmatmul.mubr.f32.gmra.mxu0 %v15825_v14 }
 0x385   :  { %v2649_v57 = vadd.f32 %v2648_v31, %v10300_v52  ;;  %v2819_v61 = vpop.f32.mrf.mxu1  ;;  %4548 = vmatmul.mubr.f32.gmra.mxu1 %v15817_v51  ;;  %4382 = vmatprep.mubr.f32.mxu0 %v15751_v35  ;;  %v4930_v52 = vld [vmem:[%s15249_s10] sm:$0xff]  ;;  %v15828_v31 = vld [vmem:[#allocation42_spill] sm:$0xff] }
 0x386   :  { %v2909_v63 = vmax.f32 %v10434_v54, %v10462_v20  ;;  %v10470_v59 = vadd.f32 %v2819_v61, %v2635_v56  ;;  %v2650_v36 = vpop.f32.mrf.mxu0  ;;  %4553 = vmatprep.mubr.f32.mxu1 %v15751_v35  ;;  %v4931_v56 = vld [vmem:[%s15249_s10 + $0x8] sm:$0xff] }
 0x387   :  { %v2651_v44 = vadd.f32 %v2650_v36, %v10304_v46  ;;  %v2821_v11 = vpop.f32.mrf.mxu1 }
 0x388   :  { %15826 = vst [vmem:[#allocation57_spill] sm:$0xff] %v10470_v59  ;;  %v2910_v51 = vmax.f32 %v10441_v1, %v10470_v59  ;;  %v10479_v41 = vadd.f32 %v2821_v11, %v2637_v58  ;;  %v2655_v42 = vpop.f32.mrf.mxu0  ;;  %4384 = vmatmul.mubr.f32.gmra.mxu0 %v15828_v31  ;;  %v5029_v11 = vsel %vm735_vm1, %v4930_v52, 0  ;;  %v15847_v59 = vld [vmem:[#allocation55_spill] sm:$0xff] }
 0x389   :  { %v2656_v61 = vadd.f32 %v2655_v42, %v10311_v9  ;;  %v2826_v46 = vpop.f32.mrf.mxu1  ;;  %4555 = vmatmul.mubr.f32.gmra.mxu1 %v15824_v18  ;;  %4389 = vmatprep.mubr.f32.mxu0 %v15751_v35  ;;  %v5032_v9 = vsel %vm735_vm1, %v4931_v56, 0  ;;  %v10505_v52 = vand.u32 4294901760, %v5029_v11 }
 0x38a   :  { %15827 = vst [vmem:[#allocation59_spill] sm:$0xff] %v10479_v41  ;;  %v2911_v36 = vmax.f32 %v10448_v4, %v10479_v41  ;;  %v10490_v39 = vadd.f32 %v2826_v46, %v2642_v55  ;;  %v2657_v58 = vpop.f32.mrf.mxu0  ;;  %4560 = vmatprep.mubr.f32.mxu1 %v15751_v35  ;;  %v15837_v4 = vld [vmem:[#allocation49_spill] sm:$0xff] }
 0x38b   :  { %v2658_v43 = vadd.f32 %v2657_v58, %v10315_v2  ;;  %v2828_v30 = vpop.f32.mrf.mxu1  ;;  %15830 = vst [vmem:[#allocation44_spill] sm:$0xff] %v10505_v52 }
 0x38c   :  { %v10497_v42 = vmax.f32 %v2908_v15, %v10490_v39  ;;  %v10499_v18 = vadd.f32 %v2828_v30, %v2644_v37  ;;  %v2662_v53 = vpop.f32.mrf.mxu0  ;;  %4391 = vmatmul.mubr.f32.gmra.mxu0 %v15829_v45  ;;  %v10513_v30 = vand.u32 4294901760, %v5032_v9 }
 0x38d   :  { %v2663_v55 = vadd.f32 %v2662_v53, %v10322_v28  ;;  %v2833_v46 = vpop.f32.mrf.mxu1  ;;  %4562 = vmatmul.mubr.f32.gmra.mxu1 %v15825_v14  ;;  %4396 = vmatprep.mubr.f32.mxu0 %v15751_v35 }
 0x38e   :  { %v10508_v2 = vmax.f32 %v2909_v63, %v10499_v18  ;;  %v10510_v56 = vadd.f32 %v2833_v46, %v2649_v57  ;;  %v2664_v15 = vpop.f32.mrf.mxu0  ;;  %4567 = vmatprep.mubr.f32.mxu1 %v15751_v35  ;;  %15832 = vst [vmem:[#allocation62_spill] sm:$0xff] %v10513_v30  ;;  %v10526_v46 = vsub.f32 %v5029_v11, %v10505_v52 }
 0x38f   :  { %v2665_v37 = vadd.f32 %v2664_v15, %v10326_v34  ;;  %v2835_v53 = vpop.f32.mrf.mxu1  ;;  %v4932_v34 = vld [vmem:[%s15249_s10 + $0x10] sm:$0xff] }
 0x390   :  { %15831 = vst [vmem:[#allocation60_spill] sm:$0xff] %v10510_v56  ;;  %v10517_v28 = vmax.f32 %v2910_v51, %v10510_v56  ;;  %v10519_v14 = vadd.f32 %v2835_v53, %v2651_v44  ;;  %v2669_v58 = vpop.f32.mrf.mxu0  ;;  %4398 = vmatmul.mubr.f32.gmra.mxu0 %v15834_v40  ;;  %15835 = vst [vmem:[#allocation48_spill] sm:$0xff] %v10526_v46 }
 0x391   :  { %v2670_v63 = vadd.f32 %v2669_v58, %v10333_v33  ;;  %v2840_v57 = vpop.f32.mrf.mxu1  ;;  %4569 = vmatmul.mubr.f32.gmra.mxu1 %v15828_v31  ;;  %4403 = vmatprep.mubr.f32.mxu0 %v15751_v35  ;;  %v10538_v33 = vsub.f32 %v5032_v9, %v10513_v30 }
 0x392   :  { %15833 = vst [vmem:[#allocation46_spill] sm:$0xff] %v10519_v14  ;;  %v10532_v44 = vmax.f32 %v2911_v36, %v10519_v14  ;;  %v10534_v51 = vadd.f32 %v2840_v57, %v2656_v61  ;;  %v2671_v15 = vpop.f32.mrf.mxu0  ;;  %4574 = vmatprep.mubr.f32.mxu1 %v15751_v35  ;;  %v5035_v61 = vsel %vm735_vm1, %v4932_v34, 0  ;;  %v15841_v14 = vld [vmem:[#allocation51_spill] sm:$0xff] }
 0x393   :  { %15836 = vst [vmem:[#allocation50_spill] sm:$0xff] %v10538_v33  ;;  %v2672_v31 = vadd.f32 %v2671_v15, %v10337_v25  ;;  %v2842_v53 = vpop.f32.mrf.mxu1  ;;  %v15364_v15 = vand.u32 4294901760, %v10538_v33 }
 0x394   :  { %v2916_v11 = vmax.f32 %v10497_v42, %v10534_v51  ;;  %v10543_v58 = vadd.f32 %v2842_v53, %v2658_v43  ;;  %v2676_v41 = vpop.f32.mrf.mxu0  ;;  %4405 = vmatmul.mubr.f32.gmra.mxu0 %v15837_v4 }
 0x395   :  { %v2677_v36 = vadd.f32 %v2676_v41, %v10344_v50  ;;  %v2847_v57 = vpop.f32.mrf.mxu1  ;;  %4576 = vmatmul.mubr.f32.gmra.mxu1 %v15829_v45  ;;  %4410 = vmatprep.mubr.f32.mxu0 %v15751_v35  ;;  %v10558_v41 = vand.u32 4294901760, %v5035_v61 }
 0x396   :  { %v2917_v9 = vmax.f32 %v10508_v2, %v10543_v58  ;;  %v10553_v42 = vadd.f32 %v2847_v57, %v2663_v55  ;;  %v2678_v43 = vpop.f32.mrf.mxu0  ;;  %4581 = vmatprep.mubr.f32.mxu1 %v15751_v35 }
 0x397   :  { %v2679_v34 = vadd.f32 %v2678_v43, %v10348_v48  ;;  %v2849_v50 = vpop.f32.mrf.mxu1  ;;  %15839 = vst [vmem:[#allocation54_spill] sm:$0xff] %v10558_v41  ;;  %v15842_v48 = vand.u32 4294901760, %v10526_v46 }
 0x398   :  { %15838 = vst [vmem:[#allocation53_spill] sm:$0xff] %v10553_v42  ;;  %v2918_v45 = vmax.f32 %v10517_v28, %v10553_v42  ;;  %v10562_v53 = vadd.f32 %v2849_v50, %v2665_v37  ;;  %v2683_v25 = vpop.f32.mrf.mxu0  ;;  %4412 = vmatmul.mubr.f32.gmra.mxu0 %v15841_v14  ;;  %v10585_v50 = vsub.f32 %v5035_v61, %v10558_v41  ;;  %v4935_v61 = vld [vmem:[%s15249_s10 + $0x28] sm:$0xff] }
 0x399   :  { %v2684_v55 = vadd.f32 %v2683_v25, %v10355_v23  ;;  %v2854_v2 = vpop.f32.mrf.mxu1  ;;  %4583 = vmatmul.mubr.f32.gmra.mxu1 %v15834_v40  ;;  %4417 = vmatprep.mubr.f32.mxu0 %v15751_v35  ;;  %v10571_v57 = vsub.f32 %v10526_v46, %v15842_v48  ;;  %v10581_v23 = vsub.f32 %v10538_v33, %v15364_v15  ;;  %v15844_v46 = vld [vmem:[#allocation52_spill] sm:$0xff]  ;;  %v4939_v41 = vld [vmem:[%s15249_s10 + $0x48] sm:$0xff]  ;;  %v5044_v42 = vsel %vm735_vm1, %v4935_v61, 0 }
 0x39a   :  { %15840 = vst [vmem:[#allocation58_spill] sm:$0xff] %v10562_v53  ;;  %v2919_v28 = vmax.f32 %v10532_v44, %v10562_v53  ;;  %v10575_v37 = vadd.f32 %v2854_v2, %v2670_v63  ;;  %v2685_v43 = vpop.f32.mrf.mxu0  ;;  %4588 = vmatprep.mubr.f32.mxu1 %v15751_v35  ;;  %15843 = vst [vmem:[#allocation61_spill] sm:$0xff] %v10585_v50  ;;  %v4933_v44 = vld [vmem:[%s15249_s10 + $0x18] sm:$0xff]  ;;  %v10658_v1 = vand.u32 4294901760, %v5044_v42  ;;  %v15855_v17 = vand.u32 4294901760, %v10585_v50 }
 0x39b   :  { %v2686_v40 = vadd.f32 %v2685_v43, %v10359_v47  ;;  %v2856_v25 = vpop.f32.mrf.mxu1  ;;  %v4934_v47 = vld [vmem:[%s15249_s10 + $0x20] sm:$0xff] }
 0x39c   :  { %v10591_v63 = vmax.f32 %v2916_v11, %v10575_v37  ;;  %v10593_v2 = vadd.f32 %v2856_v25, %v2672_v31  ;;  %v2690_v48 = vpop.f32.mrf.mxu0  ;;  %4419 = vmatmul.mubr.f32.gmra.mxu0 %v15844_v46  ;;  %v4936_v11 = vld [vmem:[%s15249_s10 + $0x30] sm:$0xff]  ;;  %v4937_v25 = vld [vmem:[%s15249_s10 + $0x38] sm:$0xff]  ;;  %v4938_v31 = vld [vmem:[%s15249_s10 + $0x40] sm:$0xff]  ;;  %15850 = vst [vmem:[#allocation18_spill] sm:$0xff] %v10658_v1 }
 0x39d   :  { %v2691_v43 = vadd.f32 %v2690_v48, %v10366_v6  ;;  %v2861_v15 = vpop.f32.mrf.mxu1  ;;  %4590 = vmatmul.mubr.f32.gmra.mxu1 %v15837_v4  ;;  %4424 = vmatprep.mubr.f32.mxu0 %v15751_v35  ;;  %v5038_v48 = vsel %vm735_vm1, %v4933_v44, 0  ;;  %v4940_v44 = vld [vmem:[%s15249_s10 + $0x50] sm:$0xff] }
 0x39e   :  { %v10613_v33 = vmax.f32 %v2917_v9, %v10593_v2  ;;  %v10615_v53 = vadd.f32 %v2861_v15, %v2677_v36  ;;  %v2692_v6 = vpop.f32.mrf.mxu0  ;;  %4595 = vmatprep.mubr.f32.mxu1 %v15751_v35  ;;  %v5041_v15 = vsel %vm735_vm1, %v4934_v47, 0  ;;  %v10644_v61 = vand.u32 4294901760, %v5038_v48 }
 0x39f   :  { %v2693_v9 = vadd.f32 %v2692_v6, %v10370_v24  ;;  %v2863_v29 = vpop.f32.mrf.mxu1  ;;  %v5047_v24 = vsel %vm735_vm1, %v4936_v11, 0  ;;  %v5050_v6 = vsel %vm735_vm1, %v4937_v25, 0 }
 0x3a0   :  { %15845 = vst [vmem:[#allocation63_spill] sm:$0xff] %v10615_v53  ;;  %v10634_v4 = vmax.f32 %v2918_v45, %v10615_v53  ;;  %v10636_v56 = vadd.f32 %v2863_v29, %v2679_v34  ;;  %v2697_v27 = vpop.f32.mrf.mxu0  ;;  %4426 = vmatmul.mubr.f32.gmra.mxu0 %v15847_v59  ;;  %15848 = vst [vmem:[#allocation35_spill] sm:$0xff] %v10644_v61  ;;  %v5053_v45 = vsel %vm735_vm1, %v4938_v31, 0  ;;  %v5056_v29 = vsel %vm735_vm1, %v4939_v41, 0 }
 0x3a1   :  { %v2698_v47 = vadd.f32 %v2697_v27, %v10377_v19  ;;  %v2868_v36 = vpop.f32.mrf.mxu1  ;;  %4597 = vmatmul.mubr.f32.gmra.mxu1 %v15841_v14  ;;  %4431 = vmatprep.mubr.f32.mxu0 %v15751_v35  ;;  %v10654_v27 = vand.u32 4294901760, %v5041_v15  ;;  %v5059_v19 = vsel %vm735_vm1, %v4940_v44, 0  ;;  %v10660_v31 = vand.u32 4294901760, %v5047_v24 }
 0x3a2   :  { %15846 = vst [vmem:[#allocation64_spill] sm:$0xff] %v10636_v56  ;;  %v10649_v34 = vmax.f32 %v2919_v28, %v10636_v56  ;;  %v10651_v53 = vadd.f32 %v2868_v36, %v2684_v55  ;;  %v2699_v11 = vpop.f32.mrf.mxu0  ;;  %4602 = vmatprep.mubr.f32.mxu1 %v15751_v35  ;;  %v10662_v41 = vand.u32 4294901760, %v5050_v6  ;;  %v4941_v55 = vld [vmem:[%s15249_s10 + $0x58] sm:$0xff]  ;;  %v10674_v44 = vand.u32 4294901760, %v5056_v29 }
 0x3a3   :  { %15849 = vst [vmem:[#allocation37_spill] sm:$0xff] %v10654_v27  ;;  %v2700_v14 = vadd.f32 %v2699_v11, %v10381_v10  ;;  %v2870_v25 = vpop.f32.mrf.mxu1  ;;  %15851 = vst [vmem:[#allocation38_spill] sm:$0xff] %v10660_v31  ;;  %v10672_v10 = vand.u32 4294901760, %v5053_v45 }
 0x3a4   :  { %15852 = vst [vmem:[#allocation28_spill] sm:$0xff] %v10662_v41  ;;  %v2924_v28 = vmax.f32 %v10591_v63, %v10651_v53  ;;  %v10669_v36 = vadd.f32 %v2870_v25, %v2686_v40  ;;  %v2704_v56 = vpop.f32.mrf.mxu0  ;;  %4433 = vmatmul.mubr.f32.gmra.mxu0 %v10104_v16  ;;  %15854 = vst [vmem:[#allocation31_spill] sm:$0xff] %v10674_v44  ;;  %v10682_v63 = vsub.f32 %v10585_v50, %v15855_v17 }
 0x3a5   :  { %15853 = vst [vmem:[#allocation30_spill] sm:$0xff] %v10672_v10  ;;  %v2705_v11 = vadd.f32 %v2704_v56, %v10388_v5  ;;  %v2875_v26 = vpop.f32.mrf.mxu1  ;;  %4604 = vmatmul.mubr.f32.gmra.mxu1 %v15844_v46  ;;  %4438 = vmatprep.mubr.f32.mxu0 %v15751_v35  ;;  %v10685_v40 = vsub.f32 %v5038_v48, %v10644_v61  ;;  %v10687_v25 = vand.u32 4294901760, %v5059_v19  ;;  %v5062_v46 = vsel %vm735_vm1, %v4941_v55, 0 }
 0x3a6   :  { %v2925_v30 = vmax.f32 %v10613_v33, %v10669_v36  ;;  %v10691_v12 = vadd.f32 %v2875_v26, %v2691_v43  ;;  %v2706_v5 = vpop.f32.mrf.mxu0  ;;  %4609 = vmatprep.mubr.f32.mxu1 %v15751_v35  ;;  %v10695_v56 = vsub.f32 %v5041_v15, %v10654_v27  ;;  %v10700_v48 = vsub.f32 %v5044_v42, %v10658_v1  ;;  %v4942_v33 = vld [vmem:[%s15249_s10 + $0x60] sm:$0xff] }
 0x3a7   :  { %15856 = vst [vmem:[#allocation39_spill] sm:$0xff] %v10685_v40  ;;  %15857 = vst [vmem:[#allocation32_spill] sm:$0xff] %v10687_v25  ;;  %v2707_v17 = vadd.f32 %v2706_v5, %v10392_v38  ;;  %v2877_v50 = vpop.f32.mrf.mxu1  ;;  %v10703_v61 = vsub.f32 %v5047_v24, %v10660_v31  ;;  %v10706_v26 = vsub.f32 %v5050_v6, %v10662_v41 }
 0x3a8   :  { %15858 = vst [vmem:[#allocation33_spill] sm:$0xff] %v10695_v56  ;;  %15859 = vst [vmem:[#allocation34_spill] sm:$0xff] %v10700_v48  ;;  %v2926_v43 = vmax.f32 %v10634_v4, %v10691_v12  ;;  %v10713_v15 = vadd.f32 %v2877_v50, %v2693_v9  ;;  %v2711_v38 = vpop.f32.mrf.mxu0  ;;  %4440 = vmatmul.mubr.f32.gmra.mxu0 %v10129_v3  ;;  %v10717_v42 = vsub.f32 %v5053_v45, %v10672_v10 }
 0x3a9   :  { %15860 = vst [vmem:[#allocation36_spill] sm:$0xff] %v10703_v61  ;;  %15861 = vst [vmem:[#allocation40_spill] sm:$0xff] %v10706_v26  ;;  %v10720_v24 = vsub.f32 %v5056_v29, %v10674_v44  ;;  %v2712_v6 = vadd.f32 %v2711_v38, %v10399_v32  ;;  %v2882_v55 = vpop.f32.mrf.mxu1  ;;  %4611 = vmatmul.mubr.f32.gmra.mxu1 %v15847_v59  ;;  %4445 = vmatprep.mubr.f32.mxu0 %v15751_v35  ;;  %v10729_v9 = vand.u32 4294901760, %v5062_v46 }
 0x3aa   :  { %15862 = vst [vmem:[#allocation41_spill] sm:$0xff] %v10717_v42  ;;  %v10727_v50 = vsub.f32 %v5059_v19, %v10687_v25  ;;  %v2927_v45 = vmax.f32 %v10649_v34, %v10713_v15  ;;  %v10733_v5 = vadd.f32 %v2882_v55, %v2698_v47  ;;  %v2713_v29 = vpop.f32.mrf.mxu0  ;;  %4616 = vmatprep.mubr.f32.mxu1 %v15751_v35  ;;  %v5065_v59 = vsel %vm735_vm1, %v4942_v33, 0 }
 0x3ab   :  { %15863 = vst [vmem:[#allocation42_spill] sm:$0xff] %v10720_v24  ;;  %15865 = vst [vmem:[#allocation47_spill] sm:$0xff] %v10729_v9  ;;  %v2714_v38 = vadd.f32 %v2713_v29, %v10406_v60  ;;  %v2884_v4 = vpop.f32.mrf.mxu1  ;;  %v15398_v19 = vand.u32 4294901760, %v10700_v48  ;;  %v15401_v25 = vand.u32 4294901760, %v10703_v61 }
 0x3ac   :  { %15864 = vst [vmem:[#allocation45_spill] sm:$0xff] %v10727_v50  ;;  %v2928_v34 = vmax.f32 %v2924_v28, %v10733_v5  ;;  %v10743_v47 = vadd.f32 %v2884_v4, %v2700_v14  ;;  %v2718_v55 = vpop.f32.mrf.mxu0  ;;  %4447 = vmatmul.mubr.f32.gmra.mxu0 %v10146_v49  ;;  %v10755_v14 = vsub.f32 %v5062_v46, %v10729_v9  ;;  %v10757_v28 = vand.u32 4294901760, %v5065_v59 }
 0x3ad   :  { %v10749_v60 = vadd.f32 %v2718_v55, %v10414_v21  ;;  %v2889_v29 = vpop.f32.mrf.mxu1  ;;  %4618 = vmatmul.mubr.f32.gmra.mxu1 %v10104_v16  ;;  %5142 = vmatprep.mubr.f32.mxu0 %v15751_v35  ;;  %v15868_v21 = vand.u32 4294901760, %v10685_v40  ;;  %v15869_v55 = vand.u32 4294901760, %v10695_v56 }
 0x3ae   :  { %15866 = vst [vmem:[#allocation49_spill] sm:$0xff] %v10755_v14  ;;  %15867 = vst [vmem:[#allocation51_spill] sm:$0xff] %v10757_v28  ;;  %v10760_v4 = vmax.f32 %v2925_v30, %v10743_v47  ;;  %v10762_v32 = vadd.f32 %v2889_v29, %v2705_v11  ;;  %v2720_v33 = vpop.f32.mrf.mxu0  ;;  %4623 = vmatprep.mubr.f32.mxu1 %v15751_v35  ;;  %v10781_v11 = vsub.f32 %v10700_v48, %v15398_v19 }
 0x3af   :  { %v10768_v16 = vsub.f32 %v10685_v40, %v15868_v21  ;;  %v10773_v46 = vsub.f32 %v10695_v56, %v15869_v55  ;;  %v10776_v44 = vadd.f32 %v2720_v33, %v10421_v13  ;;  %v2891_v30 = vpop.f32.mrf.mxu1  ;;  %v10786_v29 = vsub.f32 %v10703_v61, %v15401_v25 }
 0x3b0   :  { %v15870_v21 = vand.u32 4294901760, %v10706_v26  ;;  %v10794_v55 = vmax.f32 %v2926_v43, %v10762_v32  ;;  %v10796_v13 = vadd.f32 %v2891_v30, %v2707_v17  ;;  %v10798_v33 = vpop.f32.mrf.mxu0  ;;  %v15871_v19 = vand.u32 4294901760, %v10571_v57  ;;  %v15874_v17 = vld [vmem:[#allocation13_spill] sm:$0xff] }
 0x3b1   :  { %v15872_v48 = vand.u32 4294901760, %v10717_v42  ;;  %v15873_v61 = vand.u32 4294901760, %v10720_v24  ;;  %4625 = vmatmul.mubr.f32.gmra.mxu1 %v10129_v3  ;;  %v15875_v43 = vand.u32 4294901760, %v10727_v50 }
 0x3b2   :  { %v10791_v40 = vsub.f32 %v10706_v26, %v15870_v21  ;;  %5148 = vmatmul.mubr.f32.vlgmr.msra.gmra.mxu0 %v15871_v19  ;;  %v2896_v26 = vpop.f32.mrf.mxu1  ;;  %v10824_v30 = vmax.f32 %v2927_v45, %v10796_v13  ;;  %v10829_v3 = vpop.f32.mrf.mxu0  ;;  %4630 = vmatprep.mubr.f32.mxu1 %v15751_v35  ;;  %v15881_v45 = vld [vmem:[#allocation17_spill] sm:$0xff] }
 0x3b3   :  { %v10805_v25 = vsub.f32 %v10717_v42, %v15872_v48  ;;  %v10810_v21 = vsub.f32 %v10720_v24, %v15873_v61  ;;  %5529 = vmatpush1.msra.mxu0 %v15874_v17  ;;  %v10817_v57 = vsub.f32 %v10727_v50, %v15875_v43  ;;  %v10821_v48 = vsub.f32 %v5065_v59, %v10757_v28  ;;  %v15877_v24 = vld [vmem:[#allocation9_spill] sm:$0xff]  ;;  %v15878_v50 = vld [vmem:[#allocation12_spill] sm:$0xff] }
 0x3b4   :  { %v10826_v61 = vadd.f32 %v2896_v26, %v2712_v6  ;;  %5532 = vmatprep.subr.mxu0 %v15877_v24  ;;  %v5169_v17 = vand.u32 4294901760, %v10682_v63  ;;  %v4943_v59 = vld [vmem:[%s15249_s10 + $0x68] sm:$0xff]  ;;  %v2898_v19 = vpop.f32.mrf.mxu1  ;;  %5153 = vmatprep.mubr.f32.mxu0 %v15751_v35  ;;  %v15879_v42 = vld [vmem:[#allocation16_spill] sm:$0xff]  ;;  %v10849_v56 = vpop.f32.mrf.mxu0 }
 0x3b5   :  { %15876 = vst [vmem:[#allocation52_spill] sm:$0xff] %v10821_v48  ;;  %5535 = vmatpush1.msra.mxu0 %v15878_v50  ;;  %v10846_v43 = vadd.f32 %v2898_v19, %v2714_v38  ;;  %v15880_v50 = vand.u32 4294901760, %v10581_v23  ;;  %4632 = vmatmul.mubr.f32.gmra.mxu1 %v10146_v49  ;;  %v15882_v38 = vand.u32 4294901760, %v10755_v14  ;;  %v5068_v23 = vsel %vm735_vm1, %v4943_v59, 0  ;;  %v15884_v6 = vld [vmem:[#allocation24_spill] sm:$0xff] }
 0x3b6   :  { %v10844_v63 = vmax.f32 %v2928_v34, %v10826_v61  ;;  %5538 = vmatprep.subr.mxu0 %v15879_v42  ;;  %v2903_v28 = vpop.f32.mrf.mxu1  ;;  %v15883_v34 = vld [vmem:[#allocation21_spill] sm:$0xff]  ;;  %5401 = vmatprep.mubr.f32.mxu1 %v15751_v35 }
 0x3b7   :  { %5159 = vmatmul.mubr.f32.gmra.mxu0 %v15880_v50  ;;  %v10861_v42 = vsub.f32 %v10755_v14, %v15882_v38  ;;  %v10874_v38 = vpop.f32.mrf.mxu0 }
 0x3b8   :  { %5541 = vmatpush1.msra.mxu0 %v15881_v45  ;;  %v2936_v50 = vsub.f32 %v10428_v62, %v10844_v63  ;;  %v2948_v24 = vsub.f32 %v10455_v0, %v10844_v63  ;;  %v2960_v49 = vsub.f32 %v10490_v39, %v10844_v63  ;;  %v2972_v45 = vsub.f32 %v10534_v51, %v10844_v63  ;;  %v2905_v39 = vpop.f32.mrf.mxu1 }
 0x3b9   :  { %5544 = vmatprep.subr.mxu0 %v15883_v34  ;;  %v2984_v26 = vsub.f32 %v10575_v37, %v10844_v63  ;;  %v2996_v59 = vsub.f32 %v10651_v53, %v10844_v63  ;;  %v3008_v62 = vsub.f32 %v10733_v5, %v10844_v63  ;;  %v3020_v0 = vsub.f32 %v10826_v61, %v10844_v63  ;;  %v10891_v53 = vpop.f32.mrf.mxu0  ;;  %v15886_v63 = vld [vmem:[#allocation22_spill] sm:$0xff] }
 0x3ba   :  { %5547 = vmatpush1.msra.mxu0 %v15884_v6  ;;  %v2940_v51 = vmul.f32 1.442695, %v2936_v50  ;;  %v2952_v19 = vmul.f32 1.442695, %v2948_v24  ;;  %v10887_v34 = vmax.f32 %v10760_v4, %v10846_v43  ;;  %5164 = vmatprep.mubr.f32.mxu0 %v15751_v35  ;;  %v10893_v37 = vand.u32 4294901760, %v5068_v23  ;;  %v10899_v6 = vpop.f32.mrf.mxu1 }
 0x3bb   :  { %v2964_v5 = vmul.f32 1.442695, %v2960_v49  ;;  %v10896_v61 = vadd.f32 %v2903_v28, %v10749_v60  ;;  %5919 = vmatprep.subr.mxu0 %v15886_v63  ;;  %5170 = vmatmul.mubr.f32.gmra.mxu0 %v5169_v17  ;;  %v15887_v24 = vand.u32 4294901760, %v10821_v48  ;;  %v2976_v14 = vmul.f32 1.442695, %v2972_v45  ;;  %v10910_v60 = vpop.f32.mrf.mxu0 }
 0x3bc   :  { %15885 = vst [vmem:[#allocation55_spill] sm:$0xff] %v10893_v37  ;;  %8179 = vpow2.f32 %v2940_v51  ;;  %v2988_v9 = vmul.f32 1.442695, %v2984_v26  ;;  %v2937_v49 = vsub.f32 %v10434_v54, %v10887_v34  ;;  %5403 = vmatmul.mubr.f32.vlgmr.msra.gmra.mxu1 %v10505_v52  ;;  %5175 = vmatprep.mubr.f32.mxu0 %v15751_v35  ;;  %v2949_v28 = vsub.f32 %v10462_v20, %v10887_v34  ;;  %v10920_v26 = vpop.f32.mrf.mxu1  ;;  %v3235_v54 = vpop.permute.xlu0 %3234 }
 0x3bd   :  { %v10905_v50 = vsub.f32 %v10821_v48, %v15887_v24  ;;  %8181 = vpow2.f32 %v2952_v19  ;;  %v2961_v17 = vsub.f32 %v10499_v18, %v10887_v34  ;;  %v2973_v45 = vsub.f32 %v10543_v58, %v10887_v34  ;;  %5720 = vmatpush1.msra.mxu1 %v9352_v22  ;;  %5408 = vmatprep.mubr.f32.mxu1 %v15751_v35  ;;  %v10928_v18 = vpop.f32.mrf.mxu0 }
 0x3be   :  { %v3000_v51 = vmul.f32 1.442695, %v2996_v59  ;;  %v2985_v19 = vsub.f32 %v10593_v2, %v10887_v34  ;;  %v2997_v20 = vsub.f32 %v10669_v36, %v10887_v34  ;;  %5722 = vmatprep.subr.mxu1 %v9338_v8  ;;  %v10931_v58 = vsub.f32 %v5068_v23, %v10893_v37  ;;  %v10940_v2 = vpop.f32.mrf.mxu1 }
 0x3bf   :  { %8183 = vpow2.f32 %v2964_v5  ;;  %v3012_v63 = vmul.f32 1.442695, %v3008_v62  ;;  %v10934_v24 = vadd.f32 %v10798_v33, %v3235_v54  ;;  %v10937_v59 = vadd.f32 %v10829_v3, %v3235_v54  ;;  %5724 = vmatpush1.msra.mxu1 %v9336_v7  ;;  %v15890_v62 = vld [vmem:[#allocation7_spill] sm:$0xff]  ;;  %v15891_v33 = vld [vmem:[#allocation62_spill] sm:$0xff]  ;;  %v10948_v5 = vpop.f32.mrf.mxu0  ;;  %v3240_v3 = vpop.permute.xlu1 %3239 }
 0x3c0   :  { %15888 = vst [vmem:[#allocation13_spill] sm:$0xff] %v10931_v58  ;;  %v15889_v36 = vand.u32 4294901760, %v10768_v16  ;;  %8185 = vpow2.f32 %v2976_v14  ;;  %v2942_v4 = vmul.f32 1.442695, %v2937_v49  ;;  %v2954_v52 = vmul.f32 1.442695, %v2949_v28  ;;  %5726 = vmatprep.subr.mxu1 %v15890_v62  ;;  %5410 = vmatmul.mubr.f32.gmra.mxu1 %v15891_v33  ;;  %v3245_v7 = vpop.permute.xlu0 %3244 }
 0x3c1   :  { %v3009_v23 = vsub.f32 %v10743_v47, %v10887_v34  ;;  %8187 = vpow2.f32 %v2988_v9  ;;  %v3021_v54 = vsub.f32 %v10846_v43, %v10887_v34  ;;  %v10954_v16 = vmax.f32 %v10794_v55, %v10896_v61  ;;  %v15892_v49 = vld [vmem:[#allocation8_spill] sm:$0xff]  ;;  %v10960_v47 = vpop.f32.mrf.mxu1  ;;  %v15893_v43 = vld [vmem:[#allocation11_spill] sm:$0xff]  ;;  %5415 = vmatprep.mubr.f32.mxu1 %v15751_v35  ;;  %v10968_v55 = vpop.f32.mrf.mxu0  ;;  %v15895_v33 = vld [vmem:[#allocation57_spill] sm:$0xff] }
 0x3c2   :  { %5181 = vmatmul.mubr.f32.gmra.mxu0 %v15889_v36  ;;  %v10957_v14 = vadd.f32 %v2905_v39, %v10776_v44  ;;  %5728 = vmatpush1.msra.mxu1 %v15892_v49  ;;  %8189 = vpow2.f32 %v3000_v51  ;;  %v3024_v28 = vmul.f32 1.442695, %v3020_v0  ;;  %v2966_v36 = vmul.f32 1.442695, %v2961_v17  ;;  %v15894_v39 = vld [vmem:[#allocation56_spill] sm:$0xff]  ;;  %v15896_v51 = vld [vmem:[#allocation15_spill] sm:$0xff] }
 0x3c3   :  { %5186 = vmatprep.mubr.f32.mxu0 %v15751_v35  ;;  %v10964_v9 = vadd.f32 %v10849_v56, %v3240_v3  ;;  %5730 = vmatprep.subr.mxu1 %v15893_v43  ;;  %8191 = vpow2.f32 %v3012_v63  ;;  %v2978_v44 = vmul.f32 1.442695, %v2973_v45  ;;  %v2938_v34 = vsub.f32 %v15894_v39, %v10954_v16  ;;  %v10975_v0 = vpop.f32.mrf.mxu1  ;;  %v15898_v17 = vld [vmem:[#allocation60_spill] sm:$0xff]  ;;  %v15899_v63 = vld [vmem:[#allocation53_spill] sm:$0xff]  ;;  %v15900_v49 = vld [vmem:[#allocation63_spill] sm:$0xff] }
 0x3c4   :  { %v2950_v48 = vsub.f32 %v15895_v33, %v10954_v16  ;;  %5732 = vmatpush1.msra.mxu1 %v15896_v51  ;;  %v15897_v56 = vand.u32 4294901760, %v10773_v46  ;;  %8193 = vpow2.f32 %v2942_v4  ;;  %v2962_v43 = vsub.f32 %v15898_v17, %v10954_v16  ;;  %v15901_v62 = vld [vmem:[#allocation14_spill] sm:$0xff]  ;;  %v10987_v51 = vpop.f32.mrf.mxu0 }
 0x3c5   :  { %v2974_v45 = vsub.f32 %v15899_v63, %v10954_v16  ;;  %v2986_v39 = vsub.f32 %v15900_v49, %v10954_v16  ;;  %6104 = vmatprep.subr.mxu1 %v15901_v62  ;;  %v15902_v33 = vld [vmem:[#allocation54_spill] sm:$0xff]  ;;  %8195 = vpow2.f32 %v2954_v52  ;;  %v2990_v46 = vmul.f32 1.442695, %v2985_v19  ;;  %v10991_v17 = vpop.f32.mrf.mxu1 }
 0x3c6   :  { %5192 = vmatmul.mubr.f32.gmra.mxu0 %v15897_v56  ;;  %5417 = vmatmul.mubr.f32.gmra.mxu1 %v15902_v33  ;;  %v3002_v56 = vmul.f32 1.442695, %v2997_v20  ;;  %v2998_v4 = vsub.f32 %v10691_v12, %v10954_v16  ;;  %8197 = vpow2.f32 %v3024_v28  ;;  %v3014_v49 = vmul.f32 1.442695, %v3009_v23  ;;  %v11001_v52 = vpop.f32.mrf.mxu0 }
 0x3c7   :  { %5197 = vmatprep.mubr.f32.mxu0 %v15751_v35  ;;  %5422 = vmatprep.mubr.f32.mxu1 %v15751_v35  ;;  %v10996_v62 = vadd.f32 %v10874_v38, %v3240_v3  ;;  %v10999_v63 = vadd.f32 %v10891_v53, %v3245_v7  ;;  %8199 = vpow2.f32 %v2966_v36  ;;  %v3026_v19 = vmul.f32 1.442695, %v3021_v54  ;;  %v11007_v33 = vpop.f32.mrf.mxu1  ;;  %v15905_v54 = vld [vmem:[#allocation35_spill] sm:$0xff] }
 0x3c8   :  { %v3010_v12 = vsub.f32 %v10762_v32, %v10954_v16  ;;  %v3022_v20 = vsub.f32 %v10896_v61, %v10954_v16  ;;  %v15903_v23 = vand.u32 4294901760, %v10781_v11  ;;  %8201 = vpow2.f32 %v2978_v44  ;;  %v11020_v32 = vpop.f32.mrf.mxu0  ;;  %v15909_v44 = vld [vmem:[#allocation59_spill] sm:$0xff] }
 0x3c9   :  { %v2944_v38 = vmul.f32 1.442695, %v2938_v34  ;;  %v11013_v53 = vmax.f32 %v10824_v30, %v10957_v14  ;;  %v11017_v3 = vadd.f32 %v10899_v6, %v10934_v24  ;;  %v11023_v61 = vpop.eup %8179  ;;  %8203 = vpow2.f32 %v2990_v46  ;;  %v11029_v30 = vpop.f32.mrf.mxu1  ;;  %v15908_v24 = vld [vmem:[#allocation43_spill] sm:$0xff] }
 0x3ca   :  { %5203 = vmatmul.mubr.f32.gmra.mxu0 %v15903_v23  ;;  %5424 = vmatmul.mubr.f32.gmra.mxu1 %v15905_v54  ;;  %v2956_v11 = vmul.f32 1.442695, %v2950_v48  ;;  %v2968_v16 = vmul.f32 1.442695, %v2962_v43  ;;  %v11027_v28 = vadd.f32 %v10920_v26, %v10937_v59  ;;  %v11032_v6 = vpop.eup %8181  ;;  %8205 = vpow2.f32 %v3002_v56  ;;  %v15910_v48 = vld [vmem:[#allocation46_spill] sm:$0xff]  ;;  %v11040_v46 = vpop.f32.mrf.mxu0  ;;  %v15912_v56 = vld [vmem:[#allocation64_spill] sm:$0xff] }
 0x3cb   :  { %15904 = vst [vmem:[#allocation9_spill] sm:$0xff] %v11017_v3  ;;  %5208 = vmatprep.mubr.f32.mxu0 %v15751_v35  ;;  %5429 = vmatprep.mubr.f32.mxu1 %v15751_v35  ;;  %15907 = vst [vmem:[#allocation16_spill] sm:$0xff] %v11032_v6  ;;  %v2939_v36 = vsub.f32 %v15908_v24, %v11013_v53  ;;  %v2951_v34 = vsub.f32 %v15909_v44, %v11013_v53  ;;  %v3250_v26 = vpop.permute.xlu1 %3249  ;;  %8207 = vpow2.f32 %v3014_v49  ;;  %v15911_v23 = vld [vmem:[#allocation58_spill] sm:$0xff]  ;;  %v11048_v24 = vpop.f32.mrf.mxu1 }
 0x3cc   :  { %15906 = vst [vmem:[#allocation12_spill] sm:$0xff] %v11027_v28  ;;  %v2963_v43 = vsub.f32 %v15910_v48, %v11013_v53  ;;  %v3032_v59 = vadd.f32 %v11032_v6, %v11023_v61  ;;  %v2975_v54 = vsub.f32 %v15911_v23, %v11013_v53  ;;  %v15913_v44 = vand.u32 4294901760, %v10786_v29  ;;  %v11052_v3 = vpop.eup %8183  ;;  %v11055_v49 = vpop.f32.mrf.mxu0 }
 0x3cd   :  { %15914 = vst [vmem:[#allocation17_spill] sm:$0xff] %v11052_v3  ;;  %8209 = vpow2.f32 %v2944_v38  ;;  %v2980_v48 = vmul.f32 1.442695, %v2974_v45  ;;  %v2992_v8 = vmul.f32 1.442695, %v2986_v39  ;;  %v11058_v23 = vpop.eup %8185  ;;  %v3464_v29 = vadd.f32 %v10910_v60, %v3245_v7  ;;  %v3255_v39 = vpop.permute.xlu0 %3254 }
 0x3ce   :  { %5214 = vmatmul.mubr.f32.gmra.mxu0 %v15913_v44  ;;  %v3004_v22 = vmul.f32 1.442695, %v2998_v4  ;;  %5431 = vmatmul.mubr.f32.gmra.mxu1 %v10654_v27  ;;  %v3036_v28 = vadd.f32 %v11052_v3, %v3032_v59  ;;  %8211 = vpow2.f32 %v2956_v11  ;;  %v3016_v37 = vmul.f32 1.442695, %v3010_v12  ;;  %v11062_v44 = vpop.f32.mrf.mxu1  ;;  %v11065_v45 = vpop.eup %8187 }
 0x3cf   :  { %5219 = vmatprep.mubr.f32.mxu0 %v15751_v35  ;;  %5436 = vmatprep.mubr.f32.mxu1 %v15751_v35  ;;  %8213 = vpow2.f32 %v3026_v19  ;;  %v11073_v12 = vpop.f32.mrf.mxu0  ;;  %v11075_v7 = vpop.eup %8189  ;;  %v3028_v59 = vmul.f32 1.442695, %v3022_v20  ;;  %v11080_v19 = vadd.f32 %v10940_v2, %v10964_v9  ;;  %v15915_v4 = vand.u32 4294901760, %v10791_v40 }
 0x3d0   :  { %v3040_v60 = vadd.f32 %v11058_v23, %v3036_v28  ;;  %8215 = vpow2.f32 %v2968_v16  ;;  %v11082_v27 = vpop.f32.mrf.mxu1  ;;  %v11086_v38 = vpop.eup %8191  ;;  %v2946_v11 = vmul.f32 1.442695, %v2939_v36  ;;  %v2958_v3 = vmul.f32 1.442695, %v2951_v34 }
 0x3d1   :  { %8217 = vpow2.f32 %v2980_v48  ;;  %v2970_v6 = vmul.f32 1.442695, %v2963_v43  ;;  %v11089_v28 = vpop.f32.mrf.mxu0  ;;  %v11092_v20 = vpop.eup %8193  ;;  %v2982_v40 = vmul.f32 1.442695, %v2975_v54  ;;  %v11097_v16 = vadd.f32 %v10960_v47, %v10996_v62 }
 0x3d2   :  { %5225 = vmatmul.mubr.f32.gmra.mxu0 %v15915_v4  ;;  %5438 = vmatmul.mubr.f32.gmra.mxu1 %v10658_v1  ;;  %v3260_v2 = vpop.permute.xlu1 %3259  ;;  %v3044_v9 = vadd.f32 %v11065_v45, %v3040_v60  ;;  %8219 = vpow2.f32 %v2992_v8  ;;  %v3753_v36 = vpop.f32.mrf.mxu1  ;;  %v3473_v43 = vadd.f32 %v10928_v18, %v3250_v26  ;;  %v3475_v48 = vadd.f32 %v10948_v5, %v3250_v26 }
 0x3d3   :  { %5230 = vmatprep.mubr.f32.mxu0 %v15751_v35  ;;  %5443 = vmatprep.mubr.f32.mxu1 %v15751_v35  ;;  %v11100_v34 = vpop.eup %8195  ;;  %8221 = vpow2.f32 %v3004_v22  ;;  %v11106_v4 = vadd.f32 %v10975_v0, %v10999_v63  ;;  %v11108_v8 = vpop.f32.mrf.mxu0  ;;  %v11116_v22 = vadd.f32 %v10991_v17, %v3464_v29  ;;  %v15916_v5 = vand.u32 4294901760, %v10805_v25 }
 0x3d4   :  { %v11110_v54 = vpop.eup %8197  ;;  %v3048_v47 = vadd.f32 %v11075_v7, %v3044_v9  ;;  %v3033_v62 = vadd.f32 %v11100_v34, %v11092_v20  ;;  %8223 = vpow2.f32 %v3016_v37  ;;  %v3758_v18 = vpop.f32.mrf.mxu1  ;;  %v3484_v63 = vadd.f32 %v10968_v55, %v3255_v39 }
 0x3d5   :  { %v11120_v26 = vpop.eup %8199  ;;  %v3265_v0 = vpop.permute.xlu0 %3264  ;;  %8225 = vpow2.f32 %v2946_v11  ;;  %v3486_v60 = vadd.f32 %v10987_v51, %v3255_v39  ;;  %v11125_v9 = vadd.f32 %v11007_v33, %v3473_v43  ;;  %v11134_v11 = vadd.f32 %v11029_v30, %v3475_v48 }
 0x3d6   :  { %5236 = vmatmul.mubr.f32.gmra.mxu0 %v15916_v5  ;;  %5445 = vmatmul.mubr.f32.gmra.mxu1 %v10660_v31  ;;  %v3529_v37 = vpop.f32.mrf.mxu0  ;;  %v11129_v17 = vpop.eup %8201  ;;  %v3052_v25 = vadd.f32 %v11086_v38, %v3048_v47  ;;  %v3037_v29 = vadd.f32 %v11120_v26, %v3033_v62  ;;  %8227 = vpow2.f32 %v2958_v3  ;;  %v3495_v33 = vadd.f32 %v11001_v52, %v3260_v2 }
 0x3d7   :  { %5241 = vmatprep.mubr.f32.mxu0 %v15751_v35  ;;  %v3760_v55 = vpop.f32.mrf.mxu1  ;;  %5450 = vmatprep.mubr.f32.mxu1 %v15751_v35  ;;  %v11137_v51 = vpop.eup %8203  ;;  %8229 = vpow2.f32 %v3028_v59  ;;  %v3497_v39 = vadd.f32 %v11020_v32, %v3260_v2  ;;  %v11142_v43 = vadd.f32 %v11048_v24, %v3484_v63  ;;  %v11149_v62 = vadd.f32 %v11062_v44, %v3486_v60 }
 0x3d8   :  { %v3538_v47 = vpop.f32.mrf.mxu0  ;;  %v11144_v5 = vpop.eup %8205  ;;  %v3056_v30 = vadd.f32 %v11110_v54, %v3052_v25  ;;  %v3041_v48 = vadd.f32 %v11129_v17, %v3037_v29  ;;  %8231 = vpow2.f32 %v2970_v6  ;;  %v15917_v52 = vand.u32 4294901760, %v10810_v21 }
 0x3d9   :  { %v3270_v3 = vpop.permute.xlu1 %3269  ;;  %v3765_v59 = vpop.f32.mrf.mxu1  ;;  %8233 = vpow2.f32 %v2982_v40  ;;  %v3506_v24 = vadd.f32 %v11040_v46, %v3265_v0  ;;  %v3508_v2 = vadd.f32 %v11055_v49, %v3265_v0  ;;  %v11158_v63 = vadd.f32 %v11082_v27, %v3495_v33 }
 0x3da   :  { %5247 = vmatmul.mubr.f32.gmra.mxu0 %v15917_v52  ;;  %v11153_v32 = vpop.eup %8207  ;;  %5452 = vmatmul.mubr.f32.gmra.mxu1 %v10662_v41  ;;  %v3540_v6 = vpop.f32.mrf.mxu0  ;;  %8235 = vrcp.f32 %v3056_v30  ;;  %v3045_v21 = vadd.f32 %v11137_v51, %v3041_v48  ;;  %v15918_v40 = vsub.f32 %v15912_v56, %v11013_v53  ;;  %v11168_v46 = vadd.f32 %v3753_v36, %v3497_v39 }
 0x3db   :  { %5252 = vmatprep.mubr.f32.mxu0 %v15751_v35  ;;  %v11162_v44 = vpop.eup %8209  ;;  %v3767_v49 = vpop.f32.mrf.mxu1  ;;  %5457 = vmatprep.mubr.f32.mxu1 %v15751_v35  ;;  %v3517_v25 = vadd.f32 %v11073_v12, %v3270_v3  ;;  %v3519_v29 = vadd.f32 %v11089_v28, %v3270_v3  ;;  %v11175_v33 = vadd.f32 %v3758_v18, %v3506_v24  ;;  %v15919_v41 = vand.u32 4294901760, %v10817_v57 }
 0x3dc   :  { %v2994_v60 = vmul.f32 1.442695, %v15918_v40  ;;  %v11171_v27 = vpop.eup %8211  ;;  %v3275_v0 = vpop.permute.xlu0 %3274  ;;  %v11177_v30 = vadd.f32 %v3760_v55, %v3508_v2  ;;  %v3049_v56 = vadd.f32 %v11144_v5, %v3045_v21  ;;  %v15920_v18 = vsub.f32 %v10713_v15, %v11013_v53 }
 0x3dd   :  { %v3549_v48 = vpop.f32.mrf.mxu0  ;;  %v11179_v52 = vpop.eup %8213  ;;  %v3034_v36 = vadd.f32 %v11171_v27, %v11162_v44  ;;  %v3528_v39 = vadd.f32 %v11108_v8, %v3275_v0  ;;  %v3530_v3 = vadd.f32 %v3529_v37, %v3275_v0  ;;  %v11193_v24 = vadd.f32 %v3765_v59, %v3517_v25 }
 0x3de   :  { %v3772_v40 = vpop.f32.mrf.mxu1  ;;  %5258 = vmatmul.mubr.f32.gmra.mxu0 %v15919_v41  ;;  %v11188_v28 = vpop.eup %8215  ;;  %v3006_v55 = vmul.f32 1.442695, %v15920_v18  ;;  %v11195_v2 = vadd.f32 %v3767_v49, %v3519_v29  ;;  %5459 = vmatmul.mubr.f32.gmra.mxu1 %v10672_v10  ;;  %v3053_v21 = vadd.f32 %v11153_v32, %v3049_v56  ;;  %8237 = vpow2.f32 %v2994_v60 }
 0x3df   :  { %v3551_v8 = vpop.f32.mrf.mxu0  ;;  %5263 = vmatprep.mubr.f32.mxu0 %v15751_v35  ;;  %v11199_v57 = vpop.eup %8217  ;;  %v3038_v12 = vadd.f32 %v11188_v28, %v3034_v36  ;;  %v11203_v31 = vadd.f32 %v3772_v40, %v3528_v39  ;;  %5464 = vmatprep.mubr.f32.mxu1 %v15751_v35  ;;  %v15923_v59 = vsub.f32 %v10796_v13, %v11013_v53  ;;  %v15925_v40 = vand.u32 4294901760, %v10861_v42 }
 0x3e0   :  { %15921 = vst [vmem:[#allocation21_spill] sm:$0xff] %v11195_v2  ;;  %v3280_v41 = vpop.permute.xlu1 %3279  ;;  %v3774_v15 = vpop.f32.mrf.mxu1  ;;  %v3057_v56 = vadd.f32 %v11179_v52, %v3053_v21  ;;  %v5279_v60 = vand.u32 4294901760, %v10905_v50  ;;  %v15926_v10 = vand.u32 4294901760, %v10931_v58  ;;  %8239 = vpow2.f32 %v3006_v55 }
 0x3e1   :  { %15922 = vst [vmem:[#allocation24_spill] sm:$0xff] %v11203_v31  ;;  %v11206_v37 = vpop.eup %8219  ;;  %v3018_v49 = vmul.f32 1.442695, %v15923_v59  ;;  %v3539_v0 = vadd.f32 %v3538_v47, %v3280_v41  ;;  %v11211_v25 = vadd.f32 %v3774_v15, %v3530_v3  ;;  %v3560_v29 = vpop.f32.mrf.mxu0  ;;  %v3042_v36 = vadd.f32 %v11199_v57, %v3038_v12  ;;  %v15928_v59 = vld [vmem:[#allocation31_spill] sm:$0xff] }
 0x3e2   :  { %v11213_v18 = vpop.eup %8221  ;;  %v3779_v39 = vpop.f32.mrf.mxu1  ;;  %5269 = vmatmul.mubr.f32.gmra.mxu0 %v15925_v40  ;;  %v5289_v13 = vsub.f32 %v10931_v58, %v15926_v10  ;;  %v3541_v3 = vadd.f32 %v3540_v6, %v3280_v41  ;;  %5466 = vmatmul.mubr.f32.gmra.mxu1 %v15928_v59  ;;  %8241 = vrcp.f32 %v3057_v56  ;;  %v15932_v59 = vsub.f32 %v10957_v14, %v11013_v53  ;;  %v15943_v31 = vld [vmem:[#allocation51_spill] sm:$0xff] }
 0x3e3   :  { %15924 = vst [vmem:[#allocation22_spill] sm:$0xff] %v11211_v25  ;;  %v11223_v47 = vpop.eup %8223  ;;  %v11225_v15 = vadd.f32 %v3779_v39, %v3539_v0  ;;  %v3562_v21 = vpop.f32.mrf.mxu0  ;;  %5274 = vmatprep.mubr.f32.mxu0 %v15751_v35  ;;  %v3046_v50 = vadd.f32 %v11206_v37, %v3042_v36  ;;  %5471 = vmatprep.mubr.f32.mxu1 %v15751_v35  ;;  %8243 = vpow2.f32 %v3018_v49 }
 0x3e4   :  { %v11229_v12 = vpop.eup %8225  ;;  %v3285_v42 = vpop.permute.xlu0 %3284  ;;  %v3030_v56 = vmul.f32 1.442695, %v15932_v59  ;;  %v5290_v58 = vand.u32 4294901760, %v5289_v13 }
 0x3e5   :  { %15927 = vst [vmem:[#allocation56_spill] sm:$0xff] %v11225_v15  ;;  %15929 = vst [vmem:[#allocation57_spill] sm:$0xff] %v11229_v12  ;;  %v3781_v40 = vpop.f32.mrf.mxu1  ;;  %v11233_v10 = vpop.eup %8227  ;;  %v3550_v6 = vadd.f32 %v3549_v48, %v3285_v42  ;;  %v3050_v39 = vadd.f32 %v11213_v18, %v3046_v50  ;;  %v3552_v48 = vadd.f32 %v3551_v8, %v3285_v42 }
 0x3e6   :  { %15930 = vst [vmem:[#allocation60_spill] sm:$0xff] %v11233_v10  ;;  %v11235_v55 = vadd.f32 %v3781_v40, %v3541_v3  ;;  %v3571_v41 = vpop.f32.mrf.mxu0  ;;  %v11237_v0 = vpop.eup %8229  ;;  %v3035_v36 = vadd.f32 %v11233_v10, %v11229_v12  ;;  %5280 = vmatmul.mubr.f32.gmra.mxu0 %v5279_v60  ;;  %v15935_v3 = vld [vmem:[#allocation32_spill] sm:$0xff]  ;;  %8245 = vpow2.f32 %v3030_v56 }
 0x3e7   :  { %v3786_v1 = vpop.f32.mrf.mxu1  ;;  %v11245_v15 = vpop.eup %8231  ;;  %5473 = vmatmul.mubr.f32.gmra.mxu1 %v15935_v3  ;;  %5285 = vmatprep.mubr.f32.mxu0 %v15751_v35  ;;  %v3054_v53 = vadd.f32 %v11223_v47, %v3050_v39  ;;  %v15939_v39 = vld [vmem:[#allocation47_spill] sm:$0xff] }
 0x3e8   :  { %15931 = vst [vmem:[#allocation53_spill] sm:$0xff] %v11235_v55  ;;  %15933 = vst [vmem:[#allocation63_spill] sm:$0xff] %v11245_v15  ;;  %v11247_v49 = vadd.f32 %v3786_v1, %v3550_v6  ;;  %v3573_v40 = vpop.f32.mrf.mxu0  ;;  %v11251_v50 = vpop.eup %8233  ;;  %v3039_v59 = vadd.f32 %v11245_v15, %v3035_v36  ;;  %5478 = vmatprep.mubr.f32.mxu1 %v15751_v35  ;;  %v15942_v15 = vld [vmem:[#allocation48_spill] sm:$0xff] }
 0x3e9   :  { %15936 = vst [vmem:[#allocation43_spill] sm:$0xff] %v11251_v50  ;;  %v3290_v14 = vpop.permute.xlu1 %3289  ;;  %v3788_v55 = vpop.f32.mrf.mxu1  ;;  %v3058_v6 = vadd.f32 %v11237_v0, %v3054_v53 }
 0x3ea   :  { %15934 = vst [vmem:[#allocation14_spill] sm:$0xff] %v11247_v49  ;;  %v8236_v60 = vpop.eup %8235  ;;  %v3561_v13 = vadd.f32 %v3560_v29, %v3290_v14  ;;  %v11256_v8 = vadd.f32 %v3788_v55, %v3552_v48  ;;  %v3582_v1 = vpop.f32.mrf.mxu0  ;;  %v3043_v3 = vadd.f32 %v11251_v50, %v3039_v59  ;;  %5291 = vmatmul.mubr.f32.gmra.mxu0 %v5290_v58  ;;  %v15940_v55 = vld [vmem:[#allocation16_spill] sm:$0xff] }
 0x3eb   :  { %v3061_v42 = vmul.f32 6.0, %v8236_v60  ;;  %v3793_v49 = vpop.f32.mrf.mxu1  ;;  %5480 = vmatmul.mubr.f32.gmra.mxu1 %v15939_v39  ;;  %5580 = vmatprep.mubr.f32.mxu0 %v15751_v35  ;;  %8247 = vrcp.f32 %v3058_v6 }
 0x3ec   :  { %15937 = vst [vmem:[#allocation59_spill] sm:$0xff] %v11256_v8  ;;  %v11260_v10 = vadd.f32 %v3793_v49, %v3561_v13  ;;  %v3584_v36 = vpop.f32.mrf.mxu0  ;;  %v15941_v8 = vld [vmem:[#allocation17_spill] sm:$0xff]  ;;  %5485 = vmatprep.mubr.f32.mxu1 %v15751_v35 }
 0x3ed   :  { %v3068_v29 = vmul.f32 %v11023_v61, %v3061_v42  ;;  %v3080_v48 = vmul.f32 %v15940_v55, %v3061_v42  ;;  %v3092_v60 = vmul.f32 %v15941_v8, %v3061_v42  ;;  %v3104_v53 = vmul.f32 %v11058_v23, %v3061_v42  ;;  %v3795_v56 = vpop.f32.mrf.mxu1  ;;  %v11275_v61 = vpop.eup %8237 }
 0x3ee   :  { %15938 = vst [vmem:[#allocation46_spill] sm:$0xff] %v11260_v10  ;;  %v3116_v58 = vmul.f32 %v11065_v45, %v3061_v42  ;;  %v3128_v49 = vmul.f32 %v11075_v7, %v3061_v42  ;;  %v3140_v59 = vmul.f32 %v11086_v38, %v3061_v42  ;;  %v3152_v13 = vmul.f32 %v11110_v54, %v3061_v42  ;;  %v11273_v39 = vpop.f32.mrf.mxu0  ;;  %v3295_v55 = vpop.permute.xlu0 %3294  ;;  %v15944_v54 = vld [vmem:[#allocation19_spill] sm:$0xff] }
 0x3ef   :  { %v3072_v10 = vmul.f32 1.442695, %v3068_v29  ;;  %v3084_v8 = vmul.f32 1.442695, %v3080_v48  ;;  %v3563_v23 = vadd.f32 %v3562_v21, %v3290_v14  ;;  %v3800_v50 = vpop.f32.mrf.mxu1  ;;  %5583 = vmatmul.mubr.f32.vlgmr.msra.gmra.mxu0 %v15942_v15  ;;  %v3300_v12 = vpop.permute.xlu1 %3299  ;;  %v3096_v45 = vmul.f32 1.442695, %v3092_v60  ;;  %5487 = vmatmul.mubr.f32.gmra.mxu1 %v15943_v31 }
 0x3f0   :  { %v3047_v7 = vadd.f32 %v11275_v61, %v3043_v3  ;;  %v3572_v25 = vadd.f32 %v3571_v41, %v3295_v55  ;;  %v3574_v38 = vadd.f32 %v3573_v40, %v3295_v55  ;;  %5923 = vmatpush1.msra.mxu0 %v15944_v54  ;;  %v3595_v42 = vpop.f32.mrf.mxu0  ;;  %v11281_v2 = vpop.eup %8239  ;;  %v3108_v29 = vmul.f32 1.442695, %v3104_v53  ;;  %v15945_v14 = vld [vmem:[#allocation20_spill] sm:$0xff]  ;;  %5492 = vmatprep.mubr.f32.mxu1 %v15751_v35  ;;  %v15947_v55 = vld [vmem:[#allocation23_spill] sm:$0xff]  ;;  %v15948_v31 = vld [vmem:[#allocation25_spill] sm:$0xff] }
 0x3f1   :  { %8249 = vpow2.f32 %v3072_v10  ;;  %v3120_v6 = vmul.f32 1.442695, %v3116_v58  ;;  %v11283_v21 = vadd.f32 %v3582_v1, %v3300_v12  ;;  %5927 = vmatprep.subr.mxu0 %v15945_v14  ;;  %v3802_v48 = vpop.f32.mrf.mxu1  ;;  %v8242_v3 = vpop.eup %8241  ;;  %v3132_v41 = vmul.f32 1.442695, %v3128_v49  ;;  %5588 = vmatprep.mubr.f32.mxu0 %v15751_v35  ;;  %v15949_v49 = vld [vmem:[#allocation50_spill] sm:$0xff] }
 0x3f2   :  { %8251 = vpow2.f32 %v3084_v8  ;;  %v3051_v40 = vadd.f32 %v11281_v2, %v3047_v7  ;;  %v11288_v60 = vadd.f32 %v3795_v56, %v3563_v23  ;;  %5931 = vmatpush1.msra.mxu0 %v15947_v55  ;;  %v3604_v10 = vpop.f32.mrf.mxu0  ;;  %v11292_v53 = vpop.eup %8243  ;;  %v3144_v1 = vmul.f32 1.442695, %v3140_v59  ;;  %v15950_v55 = vld [vmem:[#allocation55_spill] sm:$0xff] }
 0x3f3   :  { %v3156_v58 = vmul.f32 1.442695, %v3152_v13  ;;  %v3063_v54 = vmul.f32 6.0, %v8242_v3  ;;  %v11294_v14 = vadd.f32 %v3800_v50, %v3572_v25  ;;  %5935 = vmatprep.subr.mxu0 %v15948_v31  ;;  %v3807_v8 = vpop.f32.mrf.mxu1  ;;  %5591 = vmatmul.mubr.f32.gmra.mxu0 %v15949_v49  ;;  %8253 = vpow2.f32 %v3096_v45  ;;  %v15952_v13 = vld [vmem:[#allocation27_spill] sm:$0xff] }
 0x3f4   :  { %15946 = vst [vmem:[#allocation58_spill] sm:$0xff] %v11288_v60  ;;  %v3055_v56 = vadd.f32 %v11292_v53, %v3051_v40  ;;  %v3585_v23 = vadd.f32 %v3584_v36, %v3300_v12  ;;  %v11299_v7 = vadd.f32 %v3802_v48, %v3574_v38  ;;  %5494 = vmatmul.mubr.f32.gmra.mxu1 %v15950_v55  ;;  %v15951_v60 = vld [vmem:[#allocation26_spill] sm:$0xff]  ;;  %v3606_v59 = vpop.f32.mrf.mxu0  ;;  %8255 = vpow2.f32 %v3108_v29  ;;  %v3305_v12 = vpop.permute.xlu0 %3304  ;;  %v15953_v29 = vld [vmem:[#allocation29_spill] sm:$0xff] }
 0x3f5   :  { %5939 = vmatpush1.msra.mxu0 %v15951_v60  ;;  %v3069_v25 = vmul.f32 %v11092_v20, %v3063_v54  ;;  %v3081_v50 = vmul.f32 %v11100_v34, %v3063_v54  ;;  %v3093_v31 = vmul.f32 %v11120_v26, %v3063_v54  ;;  %v3809_v45 = vpop.f32.mrf.mxu1  ;;  %5596 = vmatprep.mubr.f32.mxu0 %v15751_v35  ;;  %8257 = vpow2.f32 %v3120_v6  ;;  %v3310_v34 = vpop.permute.xlu1 %3309 }
 0x3f6   :  { %5943 = vmatprep.subr.mxu0 %v15952_v13  ;;  %v3105_v36 = vmul.f32 %v11129_v17, %v3063_v54  ;;  %v3117_v38 = vmul.f32 %v11137_v51, %v3063_v54  ;;  %v3129_v48 = vmul.f32 %v11144_v5, %v3063_v54  ;;  %5765 = vmatprep.mubr.f32.mxu1 %v15751_v35  ;;  %v3910_v20 = vpop.f32.mrf.mxu0  ;;  %8259 = vpow2.f32 %v3132_v41  ;;  %v15954_v13 = vld [vmem:[#allocation61_spill] sm:$0xff]  ;;  %v11315_v6 = vpop.eup %8245 }
 0x3f7   :  { %5947 = vmatpush1.msra.mxu0 %v15953_v29  ;;  %v3074_v26 = vmul.f32 1.442695, %v3069_v25  ;;  %v3086_v3 = vmul.f32 1.442695, %v3081_v50  ;;  %v3594_v40 = vadd.f32 %v11273_v39, %v3305_v12  ;;  %v3814_v60 = vpop.f32.mrf.mxu1  ;;  %8261 = vpow2.f32 %v3144_v1  ;;  %v15956_v50 = vld [vmem:[#allocation10_spill] sm:$0xff] }
 0x3f8   :  { %5599 = vmatmul.mubr.f32.gmra.mxu0 %v15954_v13  ;;  %v3098_v17 = vmul.f32 1.442695, %v3093_v31  ;;  %v3596_v51 = vadd.f32 %v3595_v42, %v3305_v12  ;;  %v3605_v5 = vadd.f32 %v3604_v10, %v3310_v34  ;;  %v15955_v29 = vand.u32 4294901760, %v15942_v15  ;;  %v3912_v55 = vpop.f32.mrf.mxu0  ;;  %v15957_v31 = vld [vmem:[#allocation6_spill] sm:$0xff]  ;;  %v15958_v12 = vld [vmem:[#allocation5_spill] sm:$0xff] }
 0x3f9   :  { %5604 = vmatprep.mubr.f32.mxu0 %v15751_v35  ;;  %8263 = vpow2.f32 %v3074_v26  ;;  %v3141_v41 = vmul.f32 %v11153_v32, %v3063_v54  ;;  %v3153_v39 = vmul.f32 %v11179_v52, %v3063_v54  ;;  %v11323_v25 = vadd.f32 %v11315_v6, %v3055_v56  ;;  %v3816_v1 = vpop.f32.mrf.mxu1 }
 0x3fa   :  { %5769 = vmatmul.mubr.f32.vlgmr.msra.gmra.mxu1 %v15955_v29  ;;  %8265 = vpow2.f32 %v3086_v3  ;;  %v3110_v42 = vmul.f32 1.442695, %v3105_v36  ;;  %v11328_v15 = vadd.f32 %v3807_v8, %v11283_v21  ;;  %v11330_v10 = vadd.f32 %v3809_v45, %v3585_v23  ;;  %v3918_v32 = vpop.f32.mrf.mxu0  ;;  %v15959_v29 = vld [vmem:[#allocation39_spill] sm:$0xff]  ;;  %v8248_v3 = vpop.eup %8247  ;;  %v15960_v36 = vld [vmem:[#allocation9_spill] sm:$0xff]  ;;  %v15961_v23 = vld [vmem:[#allocation12_spill] sm:$0xff] }
 0x3fb   :  { %6106 = vmatpush1.msra.mxu1 %v15956_v50  ;;  %5774 = vmatprep.mubr.f32.mxu1 %v15751_v35  ;;  %8267 = vpow2.f32 %v3156_v58  ;;  %v3122_v52 = vmul.f32 1.442695, %v3117_v38  ;;  %v3607_v54 = vadd.f32 %v3606_v59, %v3310_v34  ;;  %v11333_v56 = vadd.f32 %v3814_v60, %v3594_v40  ;;  %v3821_v26 = vpop.f32.mrf.mxu1  ;;  %v15962_v50 = vld [vmem:[#allocation7_spill] sm:$0xff] }
 0x3fc   :  { %6108 = vmatprep.subr.mxu1 %v15957_v31  ;;  %5607 = vmatmul.mubr.f32.gmra.mxu0 %v15959_v29  ;;  %8269 = vpow2.f32 %v3098_v17  ;;  %v3911_v21 = vadd.f32 %v3910_v20, %v15960_v36  ;;  %v11338_v8 = vadd.f32 %v3816_v1, %v3596_v51  ;;  %v11341_v45 = vadd.f32 %v3912_v55, %v15961_v23  ;;  %v3920_v59 = vpop.f32.mrf.mxu0  ;;  %v15964_v17 = vld [vmem:[#allocation8_spill] sm:$0xff]  ;;  %v15965_v1 = vld [vmem:[#allocation11_spill] sm:$0xff] }
 0x3fd   :  { %6110 = vmatpush1.msra.mxu1 %v15958_v12  ;;  %v15963_v58 = vand.u32 4294901760, %v15949_v49  ;;  %v3134_v38 = vmul.f32 1.442695, %v3129_v48  ;;  %v3065_v34 = vmul.f32 6.0, %v8248_v3  ;;  %v11346_v40 = vadd.f32 %v3821_v26, %v3605_v5  ;;  %v3823_v20 = vpop.f32.mrf.mxu1  ;;  %5612 = vmatprep.mubr.f32.mxu0 %v15751_v35  ;;  %v15967_v3 = vld [vmem:[#allocation33_spill] sm:$0xff] }
 0x3fe   :  { %6112 = vmatprep.subr.mxu1 %v15962_v50  ;;  %v11349_v60 = vadd.f32 %v3918_v32, %v11080_v19  ;;  %v11353_v55 = vpop.eup %8249  ;;  %8271 = vpow2.f32 %v3110_v42  ;;  %v3146_v51 = vmul.f32 1.442695, %v3141_v41  ;;  %v11356_v49 = vadd.f32 %v3823_v20, %v3607_v54  ;;  %v3926_v5 = vpop.f32.mrf.mxu0  ;;  %v15966_v42 = vld [vmem:[#allocation15_spill] sm:$0xff] }
 0x3ff   :  { %5778 = vmatmul.mubr.f32.gmra.mxu1 %v15963_v58  ;;  %v3921_v48 = vadd.f32 %v3920_v59, %v11097_v16  ;;  %v11360_v19 = vpop.eup %8251  ;;  %v3158_v31 = vmul.f32 1.442695, %v3153_v39  ;;  %v3070_v32 = vmul.f32 %v11162_v44, %v3065_v34  ;;  %v3082_v12 = vmul.f32 %v11171_v27, %v3065_v34  ;;  %v4112_v41 = vpop.f32.mrf.mxu1 }
 0x400   :  { %6114 = vmatpush1.msra.mxu1 %v15964_v17  ;;  %5783 = vmatprep.mubr.f32.mxu1 %v15751_v35  ;;  %v3094_v26 = vmul.f32 %v11188_v28, %v3065_v34  ;;  %v3164_v16 = vadd.f32 %v11360_v19, %v11353_v55  ;;  %8273 = vpow2.f32 %v3122_v52  ;;  %v3106_v54 = vmul.f32 %v11199_v57, %v3065_v34  ;;  %v3928_v44 = vpop.f32.mrf.mxu0  ;;  %v11374_v27 = vpop.eup %8253 }
 0x401   :  { %6116 = vmatprep.subr.mxu1 %v15965_v1  ;;  %5615 = vmatmul.mubr.f32.gmra.mxu0 %v15967_v3  ;;  %v3118_v36 = vmul.f32 %v11206_v37, %v3065_v34  ;;  %v15968_v39 = vand.u32 4294901760, %v15954_v13  ;;  %8275 = vpow2.f32 %v3134_v38  ;;  %v3076_v28 = vmul.f32 1.442695, %v3070_v32  ;;  %v4114_v58 = vpop.f32.mrf.mxu1  ;;  %v11378_v52 = vpop.eup %8255  ;;  %v15970_v1 = vld [vmem:[#allocation34_spill] sm:$0xff] }
 0x402   :  { %6118 = vmatpush1.msra.mxu1 %v15966_v42  ;;  %5620 = vmatprep.mubr.f32.mxu0 %v15751_v35  ;;  %v3088_v23 = vmul.f32 1.442695, %v3082_v12  ;;  %v3130_v50 = vmul.f32 %v11213_v18, %v3065_v34  ;;  %v3168_v57 = vadd.f32 %v11374_v27, %v3164_v16  ;;  %8277 = vpow2.f32 %v3146_v51  ;;  %v3934_v59 = vpop.f32.mrf.mxu0  ;;  %v11382_v17 = vpop.eup %8257 }
 0x403   :  { %5787 = vmatmul.mubr.f32.gmra.mxu1 %v15968_v39  ;;  %v3100_v37 = vmul.f32 1.442695, %v3094_v26  ;;  %v3142_v13 = vmul.f32 %v11223_v47, %v3065_v34  ;;  %15969 = vst [vmem:[#allocation64_spill] sm:$0xff] %v11382_v17  ;;  %8279 = vpow2.f32 %v3076_v28  ;;  %v3154_v38 = vmul.f32 %v11237_v0, %v3065_v34  ;;  %v4121_v18 = vpop.f32.mrf.mxu1  ;;  %v11387_v32 = vpop.eup %8259 }
 0x404   :  { %5792 = vmatprep.mubr.f32.mxu1 %v15751_v35  ;;  %v3927_v20 = vadd.f32 %v3926_v5, %v11106_v4  ;;  %15971 = vst [vmem:[#allocation16_spill] sm:$0xff] %v11387_v32  ;;  %v3172_v12 = vadd.f32 %v11378_v52, %v3168_v57  ;;  %8281 = vpow2.f32 %v3088_v23  ;;  %v3112_v51 = vmul.f32 1.442695, %v3106_v54  ;;  %v3936_v42 = vpop.f32.mrf.mxu0  ;;  %v11395_v0 = vpop.eup %8261  ;;  %v15974_v23 = vld [vmem:[#allocation36_spill] sm:$0xff] }
 0x405   :  { %5623 = vmatmul.mubr.f32.gmra.mxu0 %v15970_v1  ;;  %v11390_v26 = vadd.f32 %v4112_v41, %v3911_v21  ;;  %v15972_v47 = vand.u32 4294901760, %v15959_v29  ;;  %15973 = vst [vmem:[#allocation17_spill] sm:$0xff] %v11395_v0  ;;  %8283 = vpow2.f32 %v3158_v31  ;;  %v3124_v4 = vmul.f32 1.442695, %v3118_v36  ;;  %v4123_v16 = vpop.f32.mrf.mxu1 }
 0x406   :  { %5628 = vmatprep.mubr.f32.mxu0 %v15751_v35  ;;  %v3929_v34 = vadd.f32 %v3928_v44, %v11116_v22  ;;  %v11399_v5 = vadd.f32 %v4114_v58, %v11341_v45  ;;  %v11402_v21 = vpop.eup %8263  ;;  %v3176_v29 = vadd.f32 %v11382_v17, %v3172_v12  ;;  %8285 = vpow2.f32 %v3100_v37  ;;  %v3942_v31 = vpop.f32.mrf.mxu0 }
 0x407   :  { %5796 = vmatmul.mubr.f32.gmra.mxu1 %v15972_v47  ;;  %v3935_v41 = vadd.f32 %v3934_v59, %v11125_v9  ;;  %v11407_v54 = vadd.f32 %v4121_v18, %v11349_v60  ;;  %v11409_v36 = vpop.eup %8265  ;;  %v3136_v22 = vmul.f32 1.442695, %v3130_v50  ;;  %v3937_v45 = vadd.f32 %v3936_v42, %v11134_v11  ;;  %v4130_v28 = vpop.f32.mrf.mxu1 }
 0x408   :  { %5801 = vmatprep.mubr.f32.mxu1 %v15751_v35  ;;  %v11412_v39 = vadd.f32 %v4123_v16, %v3921_v48  ;;  %v3943_v44 = vadd.f32 %v3942_v31, %v11142_v43  ;;  %v8268_v58 = vpop.eup %8267  ;;  %v3180_v57 = vadd.f32 %v11387_v32, %v3176_v29  ;;  %v3165_v9 = vadd.f32 %v11409_v36, %v11402_v21  ;;  %v3944_v11 = vpop.f32.mrf.mxu0 }
 0x409   :  { %5631 = vmatmul.mubr.f32.gmra.mxu0 %v15974_v23  ;;  %8287 = vpow2.f32 %v3112_v51  ;;  %v11419_v60 = vadd.f32 %v4130_v28, %v3927_v20  ;;  %v15975_v50 = vand.u32 4294901760, %v15967_v3  ;;  %v11424_v48 = vpop.eup %8269  ;;  %v3148_v43 = vmul.f32 1.442695, %v3142_v13  ;;  %v4132_v59 = vpop.f32.mrf.mxu1 }
 0x40a   :  { %5636 = vmatprep.mubr.f32.mxu0 %v15751_v35  ;;  %v3945_v37 = vadd.f32 %v3944_v11, %v11149_v62  ;;  %v3184_v18 = vadd.f32 %v11395_v0, %v3180_v57  ;;  %v3169_v12 = vadd.f32 %v11424_v48, %v3165_v9  ;;  %8289 = vpow2.f32 %v3124_v4  ;;  %v3950_v3 = vpop.f32.mrf.mxu0  ;;  %v15976_v62 = vld [vmem:[#allocation40_spill] sm:$0xff]  ;;  %v15998_v0 = vld [vmem:[#allocation22_spill] sm:$0xff] }
 0x40b   :  { %5805 = vmatmul.mubr.f32.gmra.mxu1 %v15975_v50  ;;  %v11430_v20 = vadd.f32 %v4132_v59, %v3929_v34  ;;  %v11432_v51 = vpop.eup %8271  ;;  %v3160_v47 = vmul.f32 1.442695, %v3154_v38  ;;  %8291 = vrcp.f32 %v11323_v25  ;;  %v3951_v13 = vadd.f32 %v3950_v3, %v11158_v63  ;;  %v4139_v42 = vpop.f32.mrf.mxu1  ;;  %v15983_v50 = vld [vmem:[#allocation41_spill] sm:$0xff] }
 0x40c   :  { %5810 = vmatprep.mubr.f32.mxu1 %v15751_v35  ;;  %v3188_v16 = vadd.f32 %v8268_v58, %v3184_v18  ;;  %v3173_v29 = vadd.f32 %v11432_v51, %v3169_v12  ;;  %8293 = vpow2.f32 %v3136_v22  ;;  %v11438_v31 = vadd.f32 %v4139_v42, %v3935_v41  ;;  %v3952_v34 = vpop.f32.mrf.mxu0 }
 0x40d   :  { %5639 = vmatmul.mubr.f32.gmra.mxu0 %v15976_v62  ;;  %v15978_v4 = vand.u32 4294901760, %v15970_v1  ;;  %v11443_v38 = vpop.eup %8273  ;;  %v3953_v25 = vadd.f32 %v3952_v34, %v11168_v46  ;;  %v4141_v63 = vpop.f32.mrf.mxu1  ;;  %8295 = vpow2.f32 %v3148_v43  ;;  %v15985_v18 = vand.u32 4294901760, %v15974_v23 }
 0x40e   :  { %15977 = vst [vmem:[#allocation48_spill] sm:$0xff] %v11438_v31  ;;  %5644 = vmatprep.mubr.f32.mxu0 %v15751_v35  ;;  %15979 = vst [vmem:[#allocation19_spill] sm:$0xff] %v11443_v38  ;;  %v11447_v28 = vpop.eup %8275  ;;  %v3177_v58 = vadd.f32 %v11443_v38, %v3173_v29  ;;  %v11450_v41 = vadd.f32 %v4141_v63, %v3937_v45  ;;  %v3958_v22 = vpop.f32.mrf.mxu0  ;;  %8297 = vpow2.f32 %v3160_v47  ;;  %v16007_v38 = vld [vmem:[#allocation43_spill] sm:$0xff]  ;;  %v16011_v31 = vld [vmem:[#allocation52_spill] sm:$0xff] }
 0x40f   :  { %5814 = vmatmul.mubr.f32.gmra.mxu1 %v15978_v4  ;;  %15980 = vst [vmem:[#allocation20_spill] sm:$0xff] %v11447_v28  ;;  %v11452_v1 = vpop.eup %8277  ;;  %v3959_v57 = vadd.f32 %v3958_v22, %v11175_v33  ;;  %v4148_v9 = vpop.f32.mrf.mxu1  ;;  %8299 = vrcp.f32 %v3188_v16  ;;  %v15989_v22 = vand.u32 4294901760, %v15976_v62  ;;  %v1446_v62 = vld [vmem:[%s15240_s1] sm:$0xff] }
 0x410   :  { %5819 = vmatprep.mubr.f32.mxu1 %v15751_v35  ;;  %15981 = vst [vmem:[#allocation23_spill] sm:$0xff] %v11450_v41  ;;  %15982 = vst [vmem:[#allocation25_spill] sm:$0xff] %v11452_v1  ;;  %v11456_v11 = vpop.eup %8279  ;;  %v3181_v46 = vadd.f32 %v11447_v28, %v3177_v58  ;;  %v11459_v59 = vadd.f32 %v4148_v9, %v3943_v44  ;;  %v3960_v45 = vpop.f32.mrf.mxu0 }
 0x411   :  { %5647 = vmatmul.mubr.f32.gmra.mxu0 %v15983_v50  ;;  %v11464_v43 = vpop.eup %8281  ;;  %v3961_v33 = vadd.f32 %v3960_v45, %v11177_v30  ;;  %v4150_v12 = vpop.f32.mrf.mxu1  ;;  %v15987_v30 = vld [vmem:[#allocation42_spill] sm:$0xff] }
 0x412   :  { %15984 = vst [vmem:[#allocation50_spill] sm:$0xff] %v11459_v59  ;;  %5652 = vmatprep.mubr.f32.mxu0 %v15751_v35  ;;  %v8284_v3 = vpop.eup %8283  ;;  %v3185_v42 = vadd.f32 %v11452_v1, %v3181_v46  ;;  %v3166_v44 = vadd.f32 %v11464_v43, %v11456_v11  ;;  %v11471_v47 = vadd.f32 %v4150_v12, %v3945_v37  ;;  %v3966_v23 = vpop.f32.mrf.mxu0  ;;  %v15990_v46 = vld [vmem:[#allocation21_spill] sm:$0xff] }
 0x413   :  { %5823 = vmatmul.mubr.f32.gmra.mxu1 %v15985_v18  ;;  %v11473_v29 = vpop.eup %8285  ;;  %v11476_v4 = vadd.f32 %v3966_v23, %v11193_v24  ;;  %v4157_v34 = vpop.f32.mrf.mxu1 }
 0x414   :  { %5828 = vmatprep.mubr.f32.mxu1 %v15751_v35  ;;  %15986 = vst [vmem:[#allocation26_spill] sm:$0xff] %v11471_v47  ;;  %v3189_v63 = vadd.f32 %v8284_v3, %v3185_v42  ;;  %v3170_v58 = vadd.f32 %v11473_v29, %v3166_v44  ;;  %v11480_v16 = vadd.f32 %v4157_v34, %v3951_v13  ;;  %v3968_v9 = vpop.f32.mrf.mxu0  ;;  %v15993_v42 = vld [vmem:[#allocation24_spill] sm:$0xff]  ;;  %v15994_v34 = vld [vmem:[#allocation45_spill] sm:$0xff] }
 0x415   :  { %5655 = vmatmul.mubr.f32.gmra.mxu0 %v15987_v30  ;;  %v11488_v18 = vadd.f32 %v3968_v9, %v15990_v46  ;;  %v4159_v24 = vpop.f32.mrf.mxu1  ;;  %v16008_v47 = vld [vmem:[#allocation49_spill] sm:$0xff] }
 0x416   :  { %15988 = vst [vmem:[#allocation27_spill] sm:$0xff] %v11480_v16  ;;  %5660 = vmatprep.mubr.f32.mxu0 %v15751_v35  ;;  %v11485_v37 = vpop.eup %8287  ;;  %v11492_v12 = vadd.f32 %v4159_v24, %v3953_v25  ;;  %v3974_v13 = vpop.f32.mrf.mxu0  ;;  %v1448_v25 = vld [vmem:[%s15240_s1 + $0x10] sm:$0xff]  ;;  %8301 = vrcp.f32 %v3189_v63  ;;  %v15996_v24 = vand.u32 4294901760, %v15983_v50 }
 0x417   :  { %5832 = vmatmul.mubr.f32.gmra.mxu1 %v15989_v22  ;;  %v3174_v45 = vadd.f32 %v11485_v37, %v3170_v58  ;;  %v11497_v3 = vpop.eup %8289  ;;  %v11500_v44 = vadd.f32 %v3974_v13, %v15993_v42  ;;  %v4166_v23 = vpop.f32.mrf.mxu1  ;;  %v1447_v22 = vld [vmem:[%s15240_s1 + $0x8] sm:$0xff] }
 0x418   :  { %5837 = vmatprep.mubr.f32.mxu1 %v15751_v35  ;;  %15991 = vst [vmem:[#allocation29_spill] sm:$0xff] %v11492_v12  ;;  %15992 = vst [vmem:[#allocation61_spill] sm:$0xff] %v11497_v3  ;;  %v8292_v58 = vpop.eup %8291  ;;  %v11510_v46 = vadd.f32 %v4166_v23, %v3959_v57  ;;  %v3976_v13 = vpop.f32.mrf.mxu0  ;;  %v11519_v12 = vclamps-f32 %v1446_v62, 3.0  ;;  %v11524_v50 = vclamps-f32 %v1447_v22, 3.0  ;;  %v11526_v23 = vclamps-f32 %v1448_v25, 3.0 }
 0x419   :  { %5663 = vmatmul.mubr.f32.gmra.mxu0 %v15994_v34  ;;  %v3178_v9 = vadd.f32 %v11497_v3, %v3174_v45  ;;  %v11515_v42 = vpop.eup %8293  ;;  %v3067_v1 = vmul.f32 6.0, %v8292_v58  ;;  %v3977_v28 = vadd.f32 %v3976_v13, %v15998_v0  ;;  %v4168_v32 = vpop.f32.mrf.mxu1  ;;  %v16004_v3 = vld [vmem:[#allocation57_spill] sm:$0xff]  ;;  %v16006_v13 = vld [vmem:[#allocation63_spill] sm:$0xff] }
 0x41a   :  { %15995 = vst [vmem:[#allocation10_spill] sm:$0xff] %v11510_v46  ;;  %5668 = vmatprep.mubr.f32.mxu0 %v15751_v35  ;;  %15997 = vst [vmem:[#allocation6_spill] sm:$0xff] %v11515_v42  ;;  %v11522_v57 = vadd.f32 %v4168_v32, %v3961_v33  ;;  %v3982_v45 = vpop.f32.mrf.mxu0  ;;  %v16005_v46 = vld [vmem:[#allocation60_spill] sm:$0xff] }
 0x41b   :  { %5841 = vmatmul.mubr.f32.gmra.mxu1 %v15996_v24  ;;  %15999 = vst [vmem:[#allocation5_spill] sm:$0xff] %v11519_v12  ;;  %v3182_v63 = vadd.f32 %v11515_v42, %v3178_v9  ;;  %16001 = vst [vmem:[#allocation9_spill] sm:$0xff] %v11524_v50  ;;  %v11528_v24 = vpop.eup %8295  ;;  %v3071_v58 = vmul.f32 %v16004_v3, %v3067_v1  ;;  %v3083_v0 = vmul.f32 %v16005_v46, %v3067_v1  ;;  %v4175_v17 = vpop.f32.mrf.mxu1 }
 0x41c   :  { %5846 = vmatprep.mubr.f32.mxu1 %v15751_v35  ;;  %16000 = vst [vmem:[#allocation39_spill] sm:$0xff] %v11522_v57  ;;  %16002 = vst [vmem:[#allocation12_spill] sm:$0xff] %v11526_v23  ;;  %v3095_v16 = vmul.f32 %v16006_v13, %v3067_v1  ;;  %v3107_v62 = vmul.f32 %v16007_v38, %v3067_v1  ;;  %v3119_v33 = vmul.f32 %v11275_v61, %v3067_v1  ;;  %v3984_v3 = vpop.f32.mrf.mxu0  ;;  %v8298_v46 = vpop.eup %8297 }
 0x41d   :  { %16003 = vst [vmem:[#allocation7_spill] sm:$0xff] %v11528_v24  ;;  %5671 = vmatmul.mubr.f32.gmra.mxu0 %v16008_v47  ;;  %v3186_v32 = vadd.f32 %v11528_v24, %v3182_v63  ;;  %v3131_v22 = vmul.f32 %v11281_v2, %v3067_v1  ;;  %v3143_v25 = vmul.f32 %v11292_v53, %v3067_v1  ;;  %v16009_v9 = vand.u32 4294901760, %v15987_v30  ;;  %v4177_v59 = vpop.f32.mrf.mxu1  ;;  %v11544_v41 = vpop.eup %8299 }
 0x41e   :  { %v3078_v42 = vmul.f32 1.442695, %v3071_v58  ;;  %v3090_v13 = vmul.f32 1.442695, %v3083_v0  ;;  %v3102_v57 = vmul.f32 1.442695, %v3095_v16  ;;  %v3155_v38 = vmul.f32 %v11315_v6, %v3067_v1  ;;  %5676 = vmatprep.mubr.f32.mxu0 %v15751_v35  ;;  %v3990_v53 = vpop.f32.mrf.mxu0 }
 0x41f   :  { %5850 = vmatmul.mubr.f32.gmra.mxu1 %v16009_v9  ;;  %v3190_v61 = vadd.f32 %v8298_v46, %v3186_v32  ;;  %v3114_v63 = vmul.f32 1.442695, %v3107_v62  ;;  %v3126_v2 = vmul.f32 1.442695, %v3119_v33  ;;  %v3138_v24 = vmul.f32 1.442695, %v3131_v22  ;;  %v4184_v16 = vpop.f32.mrf.mxu1 }
 0x420   :  { %5855 = vmatprep.mubr.f32.mxu1 %v15751_v35  ;;  %8303 = vpow2.f32 %v3078_v42  ;;  %v3150_v30 = vmul.f32 1.442695, %v3143_v25  ;;  %v3162_v9 = vmul.f32 1.442695, %v3155_v38  ;;  %v16010_v58 = vld [vmem:[#allocation56_spill] sm:$0xff]  ;;  %v11549_v6 = vadd.f32 %v4175_v17, %v11476_v4  ;;  %v16012_v1 = vld [vmem:[#allocation53_spill] sm:$0xff]  ;;  %v3992_v42 = vpop.f32.mrf.mxu0 }
 0x421   :  { %v3983_v0 = vadd.f32 %v3982_v45, %v16010_v58  ;;  %5679 = vmatmul.mubr.f32.gmra.mxu0 %v16011_v31  ;;  %8305 = vrcp.f32 %v3190_v61  ;;  %v3985_v32 = vadd.f32 %v3984_v3, %v16012_v1  ;;  %v11553_v62 = vadd.f32 %v4177_v59, %v11488_v18  ;;  %v16014_v45 = vld [vmem:[#allocation14_spill] sm:$0xff]  ;;  %v16015_v46 = vld [vmem:[#allocation59_spill] sm:$0xff]  ;;  %v4186_v4 = vpop.f32.mrf.mxu1  ;;  %v16017_v61 = vld [vmem:[#allocation13_spill] sm:$0xff] }
 0x422   :  { %v16013_v33 = vand.u32 4294901760, %v15994_v34  ;;  %5684 = vmatprep.mubr.f32.mxu0 %v15751_v35  ;;  %8307 = vpow2.f32 %v3090_v13  ;;  %v3991_v22 = vadd.f32 %v3990_v53, %v16014_v45  ;;  %v11560_v25 = vadd.f32 %v4184_v16, %v11500_v44  ;;  %v3998_v18 = vpop.f32.mrf.mxu0  ;;  %v16016_v13 = vld [vmem:[#allocation46_spill] sm:$0xff] }
 0x423   :  { %v3993_v17 = vadd.f32 %v3992_v42, %v16015_v46  ;;  %8309 = vpow2.f32 %v3102_v57  ;;  %v11564_v59 = vadd.f32 %v4186_v4, %v3977_v28  ;;  %v6250_v34 = vmul.f32 %v11544_v41, %v11353_v55  ;;  %v4193_v44 = vpop.f32.mrf.mxu1  ;;  %v11581_v16 = vpop.eup %8301  ;;  %v16020_v1 = vld [vmem:[#allocation58_spill] sm:$0xff] }
 0x424   :  { %5859 = vmatmul.mubr.f32.gmra.mxu1 %v16013_v33  ;;  %v6454_v3 = vmul.f32 %v11544_v41, %v11360_v19  ;;  %8311 = vpow2.f32 %v3114_v63  ;;  %v3999_v38 = vadd.f32 %v3998_v18, %v16016_v13  ;;  %v6694_v53 = vmul.f32 %v11544_v41, %v11374_v27  ;;  %v4000_v58 = vpop.f32.mrf.mxu0  ;;  %16019 = vst [vmem:[#allocation8_spill] sm:$0xff] %v11581_v16  ;;  %v16021_v18 = vld [vmem:[#allocation44_spill] sm:$0xff] }
 0x425   :  { %5864 = vmatprep.mubr.f32.mxu1 %v15751_v35  ;;  %5687 = vmatmul.mubr.f32.gmra.mxu0 %v16017_v61  ;;  %v6934_v28 = vmul.f32 %v11544_v41, %v11378_v52  ;;  %8313 = vpow2.f32 %v3126_v2  ;;  %v11576_v57 = vadd.f32 %v4193_v44, %v3983_v0  ;;  %v16018_v55 = vand.u32 4294901760, %v16008_v47  ;;  %v4195_v27 = vpop.f32.mrf.mxu1 }
 0x426   :  { %5980 = vmatprep.mubr.f32.mxu0 %v15751_v35  ;;  %v6254_v19 = vmul.f32 0.992, %v6250_v34  ;;  %v6458_v63 = vmul.f32 0.992, %v6454_v3  ;;  %8315 = vpow2.f32 %v3138_v24  ;;  %v4001_v33 = vadd.f32 %v4000_v58, %v16020_v1  ;;  %v4006_v47 = vpop.f32.mrf.mxu0 }
 0x427   :  { %v6698_v52 = vmul.f32 0.992, %v6694_v53  ;;  %v6938_v2 = vmul.f32 0.992, %v6934_v28  ;;  %8317 = vpow2.f32 %v3150_v30  ;;  %v11585_v0 = vadd.f32 %v4195_v27, %v3985_v32  ;;  %v4202_v4 = vpop.f32.mrf.mxu1  ;;  %v16023_v27 = vld [vmem:[#allocation62_spill] sm:$0xff] }
 0x428   :  { %5868 = vmatmul.mubr.f32.gmra.mxu1 %v16018_v55  ;;  %v6258_v42 = vadd.f32 0.001, %v6254_v19  ;;  %v6462_v45 = vadd.f32 0.001, %v6458_v63  ;;  %8319 = vpow2.f32 %v3162_v9  ;;  %v4007_v46 = vadd.f32 %v4006_v47, %v11294_v14  ;;  %v4008_v44 = vpop.f32.mrf.mxu0 }
 0x429   :  { %5873 = vmatprep.mubr.f32.mxu1 %v15751_v35  ;;  %5982 = vmatmul.mubr.f32.vlgmr.msra.gmra.mxu0 %v16021_v18  ;;  %v6702_v24 = vadd.f32 0.001, %v6698_v52  ;;  %v6942_v34 = vadd.f32 0.001, %v6938_v2  ;;  %v11589_v3 = vadd.f32 %v4202_v4, %v3991_v22  ;;  %v16022_v13 = vand.u32 4294901760, %v16011_v31  ;;  %v4204_v53 = vpop.f32.mrf.mxu1 }
 0x42a   :  { %5987 = vmatprep.mubr.f32.mxu0 %v15751_v35  ;;  %v6282_v30 = vmul.f32 6.0, %v6258_v42  ;;  %v6478_v32 = vadd.f32 %v6462_v45, %v6258_v42  ;;  %v6251_v9 = vmul.f32 %v11581_v16, %v11402_v21  ;;  %v4009_v14 = vadd.f32 %v4008_v44, %v11299_v7  ;;  %v4014_v58 = vpop.f32.mrf.mxu0 }
 0x42b   :  { %v6455_v22 = vmul.f32 %v11581_v16, %v11409_v36  ;;  %v6695_v31 = vmul.f32 %v11581_v16, %v11424_v48  ;;  %v6935_v28 = vmul.f32 %v11581_v16, %v11432_v51  ;;  %v11604_v55 = vadd.f32 %v4204_v53, %v3993_v17  ;;  %v4211_v1 = vpop.f32.mrf.mxu1 }
 0x42c   :  { %5877 = vmatmul.mubr.f32.gmra.mxu1 %v16022_v13  ;;  %v11606_v19 = vadd.f32 -3.0, %v6282_v30  ;;  %v6486_v21 = vmul.f32 6.0, %v6478_v32  ;;  %v11608_v63 = vadd.f32 %v6702_v24, %v6478_v32  ;;  %v11611_v7 = vadd.f32 %v4014_v58, %v11328_v15  ;;  %v4016_v47 = vpop.f32.mrf.mxu0  ;;  %v16028_v58 = vld [vmem:[#allocation54_spill] sm:$0xff] }
 0x42d   :  { %5882 = vmatprep.mubr.f32.mxu1 %v15751_v35  ;;  %5989 = vmatmul.mubr.f32.gmra.mxu0 %v16023_v27  ;;  %v6255_v36 = vmul.f32 0.992, %v6251_v9  ;;  %v6459_v52 = vmul.f32 0.992, %v6455_v22  ;;  %v6699_v48 = vmul.f32 0.992, %v6695_v31  ;;  %v11614_v2 = vpop.eup %8303  ;;  %v11616_v51 = vadd.f32 %v4211_v1, %v3999_v38  ;;  %v4213_v24 = vpop.f32.mrf.mxu1 }
 0x42e   :  { %v16025_v17 = vand.u32 4294901760, %v16017_v61  ;;  %5994 = vmatprep.mubr.f32.mxu0 %v15751_v35  ;;  %v8133_v42 = vadd.f32 3.0, %v11606_v19  ;;  %v11622_v15 = vadd.f32 -3.0, %v6486_v21  ;;  %vm6658_vm2 = vcmp.ge.f32.partialorder %v11519_v12, %v11606_v19  ;;  %v11626_v45 = vpop.eup %8305  ;;  %v4022_v32 = vpop.f32.mrf.mxu0 }
 0x42f   :  { %16024 = vst [vmem:[#allocation11_spill] sm:$0xff] %v11616_v51  ;;  %16026 = vst [vmem:[#allocation15_spill] sm:$0xff] %v11626_v45  ;;  %v4017_v4 = vadd.f32 %v4016_v47, %v11330_v10  ;;  %v11631_v38 = vadd.f32 %v6942_v34, %v11608_v63  ;;  %v6259_v61 = vadd.f32 0.001, %v6255_v36  ;;  %v6463_v13 = vadd.f32 0.001, %v6459_v52  ;;  %v11633_v44 = vpop.eup %8307  ;;  %v4220_v31 = vpop.f32.mrf.mxu1 }
 0x430   :  { %5886 = vmatmul.mubr.f32.gmra.mxu1 %v16025_v17  ;;  %v11635_v30 = vadd.f32 %v4213_v24, %v4001_v33  ;;  %v6502_v9 = vsub.f32 %v11622_v15, %v11606_v19  ;;  %vm6662_vm3 = vcmp.lt.f32.partialorder %v11519_v12, %v11622_v15  ;;  %v6703_v10 = vadd.f32 0.001, %v6699_v48  ;;  %v11641_v53 = vpop.eup %8309  ;;  %v4024_v48 = vpop.f32.mrf.mxu0 }
 0x431   :  { %6151 = vmatprep.mubr.f32.mxu1 %v15751_v35  ;;  %v3167_v34 = vadd.f32 %v11633_v44, %v11614_v2  ;;  %v4023_v22 = vadd.f32 %v4022_v32, %v11333_v56  ;;  %5996 = vmatmul.mubr.f32.gmra.mxu0 %v16028_v58  ;;  %vm11650_vm4 = vmand %vm6658_vm2, %vm6662_vm3  ;;  %v16029_v33 = vmov 0  ;;  %v6283_v21 = vmul.f32 6.0, %v6259_v61  ;;  %v11654_v36 = vpop.eup %8311 }
 0x432   :  { %16027 = vst [vmem:[#allocation33_spill] sm:$0xff] %v11635_v30  ;;  %v16030_v33 = vsel %vm11650_vm4, 4294967295, %v16029_v33  ;;  %v6479_v1 = vadd.f32 %v6463_v13, %v6259_v61  ;;  %v11656_v52 = vadd.f32 %v4220_v31, %v4007_v46  ;;  %6001 = vmatprep.mubr.f32.mxu0 %v15751_v35  ;;  %v11665_v17 = vsel %vm11650_vm4, %v6502_v9, %v8133_v42  ;;  %v11667_v24 = vpop.eup %8313  ;;  %v4222_v13 = vpop.f32.mrf.mxu1  ;;  %v16037_v30 = vld [vmem:[#allocation35_spill] sm:$0xff] }
 0x433   :  { %16031 = vst [vmem:[#allocation34_spill] sm:$0xff] %v16030_v33  ;;  %v6939_v47 = vmul.f32 0.992, %v6935_v28  ;;  %16033 = vst [vmem:[#allocation40_spill] sm:$0xff] %v11667_v24  ;;  %v3171_v61 = vadd.f32 %v11641_v53, %v3167_v34  ;;  %v4025_v46 = vadd.f32 %v4024_v48, %v11338_v8  ;;  %v11674_v31 = vpop.eup %8315  ;;  %v11676_v56 = vadd.f32 %v4222_v13, %v4009_v14 }
 0x434   :  { %16032 = vst [vmem:[#allocation36_spill] sm:$0xff] %v11656_v52  ;;  %6153 = vmatmul.mubr.f32.vlgmr.msra.gmra.mxu1 %v16021_v18  ;;  %v11672_v18 = vadd.f32 -3.0, %v6283_v21  ;;  %v6487_v32 = vmul.f32 6.0, %v6479_v1  ;;  %16034 = vst [vmem:[#allocation41_spill] sm:$0xff] %v11674_v31  ;;  %v4030_v52 = vpop.f32.mrf.mxu0  ;;  %v11678_v42 = vadd.f32 %v6703_v10, %v6479_v1  ;;  %v6252_v9 = vmul.f32 %v11626_v45, %v11456_v11  ;;  %v11682_v34 = vpop.eup %8317 }
 0x435   :  { %6158 = vmatprep.mubr.f32.mxu1 %v15751_v35  ;;  %16035 = vst [vmem:[#allocation42_spill] sm:$0xff] %v11676_v56  ;;  %v6943_v28 = vadd.f32 0.001, %v6939_v47  ;;  %16036 = vst [vmem:[#allocation21_spill] sm:$0xff] %v11682_v34  ;;  %v3175_v8 = vadd.f32 %v11654_v36, %v3171_v61  ;;  %v4031_v48 = vadd.f32 %v4030_v52, %v11346_v40  ;;  %v4229_v21 = vpop.f32.mrf.mxu1  ;;  %6003 = vmatmul.mubr.f32.gmra.mxu0 %v16037_v30  ;;  %v8320_v13 = vpop.eup %8319  ;;  %v16043_v56 = vld [vmem:[#allocation37_spill] sm:$0xff]  ;;  %v16082_v33 = vmov 0 }
 0x436   :  { %v8134_v51 = vadd.f32 3.0, %v11672_v18  ;;  %v11688_v14 = vadd.f32 -3.0, %v6487_v32  ;;  %v11691_v10 = vadd.f32 %v4229_v21, %v11611_v7  ;;  %v4032_v11 = vpop.f32.mrf.mxu0  ;;  %6008 = vmatprep.mubr.f32.mxu0 %v15751_v35  ;;  %vm6659_vm5 = vcmp.ge.f32.partialorder %v11524_v50, %v11672_v18 }
 0x437   :  { %v11698_v40 = vadd.f32 %v6943_v28, %v11678_v42  ;;  %v6256_v1 = vmul.f32 0.992, %v6252_v9  ;;  %v3179_v52 = vadd.f32 %v11667_v24, %v3175_v8  ;;  %v4033_v47 = vadd.f32 %v4032_v11, %v11356_v49  ;;  %v4231_v61 = vpop.f32.mrf.mxu1 }
 0x438   :  { %16038 = vst [vmem:[#allocation24_spill] sm:$0xff] %v11691_v10  ;;  %6160 = vmatmul.mubr.f32.gmra.mxu1 %v16023_v27  ;;  %v6503_v7 = vsub.f32 %v11688_v14, %v11672_v18  ;;  %vm6663_vm6 = vcmp.lt.f32.partialorder %v11524_v50, %v11688_v14  ;;  %v11707_v27 = vadd.f32 %v4231_v61, %v4017_v4  ;;  %v4343_v32 = vpop.f32.mrf.mxu0  ;;  %v16040_v28 = vmov 0 }
 0x439   :  { %6165 = vmatprep.mubr.f32.mxu1 %v15751_v35  ;;  %vm11709_vm7 = vmand %vm6659_vm5, %vm6663_vm6  ;;  %v6260_v9 = vadd.f32 0.001, %v6256_v1  ;;  %v6456_v49 = vmul.f32 %v11626_v45, %v11464_v43  ;;  %v6696_v8 = vmul.f32 %v11626_v45, %v11473_v29  ;;  %v3183_v21 = vadd.f32 %v11674_v31, %v3179_v52  ;;  %v4238_v11 = vpop.f32.mrf.mxu1  ;;  %6010 = vmatmul.mubr.f32.gmra.mxu0 %v16043_v56 }
 0x43a   :  { %16039 = vst [vmem:[#allocation45_spill] sm:$0xff] %v11707_v27  ;;  %v16041_v28 = vsel %vm11709_vm7, 4294967295, %v16040_v28  ;;  %v4344_v10 = vadd.f32 %v4343_v32, %v11390_v26  ;;  %v11725_v1 = vsel %vm11709_vm7, %v6503_v7, %v8134_v51  ;;  %v11727_v61 = vadd.f32 %v4238_v11, %v4023_v22  ;;  %v4345_v43 = vpop.f32.mrf.mxu0  ;;  %6015 = vmatprep.mubr.f32.mxu0 %v15751_v35 }
 0x43b   :  { %16042 = vst [vmem:[#allocation22_spill] sm:$0xff] %v16041_v28  ;;  %v6284_v29 = vmul.f32 6.0, %v6260_v9  ;;  %v6460_v52 = vmul.f32 0.992, %v6456_v49  ;;  %v6700_v26 = vmul.f32 0.992, %v6696_v8  ;;  %v3187_v32 = vadd.f32 %v11682_v34, %v3183_v21  ;;  %v4240_v31 = vpop.f32.mrf.mxu1 }
 0x43c   :  { %16044 = vst [vmem:[#allocation57_spill] sm:$0xff] %v11727_v61  ;;  %6167 = vmatmul.mubr.f32.gmra.mxu1 %v16028_v58  ;;  %v4346_v27 = vadd.f32 %v4345_v43, %v11399_v5  ;;  %v6936_v51 = vmul.f32 %v11626_v45, %v11485_v37  ;;  %v6726_v22 = vmul.f32 6.0, %v11608_v63  ;;  %v11737_v7 = vadd.f32 %v4240_v31, %v4025_v46  ;;  %v4350_v58 = vpop.f32.mrf.mxu0  ;;  %v16046_v34 = vld [vmem:[#allocation18_spill] sm:$0xff] }
 0x43d   :  { %6172 = vmatprep.mubr.f32.mxu1 %v15751_v35  ;;  %v11739_v11 = vadd.f32 -3.0, %v6284_v29  ;;  %v6464_v4 = vadd.f32 0.001, %v6460_v52  ;;  %v6704_v49 = vadd.f32 0.001, %v6700_v26  ;;  %v3191_v8 = vadd.f32 %v8320_v13, %v3187_v32  ;;  %v4247_v61 = vpop.f32.mrf.mxu1  ;;  %6017 = vmatmul.mubr.f32.gmra.mxu0 %v16046_v34  ;;  %v16049_v26 = vld [vmem:[#allocation38_spill] sm:$0xff] }
 0x43e   :  { %16045 = vst [vmem:[#allocation60_spill] sm:$0xff] %v11737_v7  ;;  %v4351_v21 = vadd.f32 %v4350_v58, %v11407_v54  ;;  %v6940_v5 = vmul.f32 0.992, %v6936_v51  ;;  %v11743_v43 = vadd.f32 -3.0, %v6726_v22  ;;  %v11745_v24 = vadd.f32 %v4247_v61, %v4031_v48  ;;  %v4352_v37 = vpop.f32.mrf.mxu0  ;;  %6022 = vmatprep.mubr.f32.mxu0 %v15751_v35 }
 0x43f   :  { %v8135_v63 = vadd.f32 3.0, %v11739_v11  ;;  %v6480_v46 = vadd.f32 %v6464_v4, %v6260_v9  ;;  %vm6660_vm8 = vcmp.ge.f32.partialorder %v11526_v23, %v11739_v11  ;;  %8321 = vrcp.f32 %v3191_v8  ;;  %v4249_v54 = vpop.f32.mrf.mxu1 }
 0x440   :  { %16047 = vst [vmem:[#allocation63_spill] sm:$0xff] %v11745_v24  ;;  %6174 = vmatmul.mubr.f32.gmra.mxu1 %v16037_v30  ;;  %v4353_v31 = vadd.f32 %v4352_v37, %v11412_v39  ;;  %v6944_v13 = vadd.f32 0.001, %v6940_v5  ;;  %v6742_v48 = vsub.f32 %v11743_v43, %v11622_v15  ;;  %v11756_v30 = vadd.f32 %v4249_v54, %v4033_v47  ;;  %v4357_v61 = vpop.f32.mrf.mxu0  ;;  %v16056_v54 = vld [vmem:[#allocation48_spill] sm:$0xff] }
 0x441   :  { %6179 = vmatprep.mubr.f32.mxu1 %v15751_v35  ;;  %v6488_v29 = vmul.f32 6.0, %v6480_v46  ;;  %v6720_v52 = vadd.f32 %v6704_v49, %v6480_v46  ;;  %vm6898_vm9 = vcmp.ge.f32.partialorder %v11519_v12, %v11622_v15  ;;  %v4358_v9 = vadd.f32 %v4357_v61, %v11419_v60  ;;  %v4528_v4 = vpop.f32.mrf.mxu1  ;;  %6024 = vmatmul.mubr.f32.gmra.mxu0 %v16049_v26  ;;  %v16057_v61 = vld [vmem:[#allocation28_spill] sm:$0xff] }
 0x442   :  { %16048 = vst [vmem:[#allocation43_spill] sm:$0xff] %v11756_v30  ;;  %vm6902_vm10 = vcmp.lt.f32.partialorder %v11519_v12, %v11743_v43  ;;  %v6727_v39 = vmul.f32 6.0, %v11678_v42  ;;  %vm6899_vm11 = vcmp.ge.f32.partialorder %v11524_v50, %v11688_v14  ;;  %v11767_v47 = vadd.f32 %v4528_v4, %v4344_v10  ;;  %v4359_v32 = vpop.f32.mrf.mxu0  ;;  %6029 = vmatprep.mubr.f32.mxu0 %v15751_v35 }
 0x443   :  { %v6492_v51 = vadd.f32 -3.0, %v6488_v29  ;;  %v11771_v60 = vadd.f32 %v6944_v13, %v6720_v52  ;;  %vm11773_vm12 = vmand %vm6898_vm9, %vm6902_vm10  ;;  %v16051_v22 = vmov 0  ;;  %v6728_v58 = vmul.f32 6.0, %v6720_v52  ;;  %v4530_v49 = vpop.f32.mrf.mxu1 }
 0x444   :  { %16050 = vst [vmem:[#allocation49_spill] sm:$0xff] %v11767_v47  ;;  %6181 = vmatmul.mubr.f32.gmra.mxu1 %v16043_v56  ;;  %v16052_v22 = vsel %vm11773_vm12, 4294967295, %v16051_v22  ;;  %v4360_v42 = vadd.f32 %v4359_v32, %v11430_v20  ;;  %v16054_v56 = vsel %vm11650_vm4, %v11606_v19, -3.0  ;;  %v11791_v8 = vsel %vm11773_vm12, %v6742_v48, %v11665_v17  ;;  %v4364_v37 = vpop.f32.mrf.mxu0  ;;  %v16065_v32 = vld [vmem:[#allocation23_spill] sm:$0xff] }
 0x445   :  { %16053 = vst [vmem:[#allocation56_spill] sm:$0xff] %v16052_v22  ;;  %6186 = vmatprep.mubr.f32.mxu1 %v15751_v35  ;;  %v11786_v10 = vsel %vm11773_vm12, %v11622_v15, %v16054_v56  ;;  %v11793_v5 = vadd.f32 -3.0, %v6727_v39  ;;  %v11795_v20 = vadd.f32 %v4530_v49, %v4346_v27  ;;  %v6504_v46 = vsub.f32 %v6492_v51, %v11739_v11  ;;  %v4535_v15 = vpop.f32.mrf.mxu1  ;;  %v1449_v39 = vld [vmem:[%s15240_s1 + $0x18] sm:$0xff] }
 0x446   :  { %vm6664_vm13 = vcmp.lt.f32.partialorder %v11526_v23, %v6492_v51  ;;  %v11799_v19 = vadd.f32 -3.0, %v6728_v58  ;;  %v4365_v13 = vadd.f32 %v4364_v37, %v16056_v54  ;;  %6031 = vmatmul.mubr.f32.gmra.mxu0 %v16057_v61  ;;  %v16058_v17 = vmov 0  ;;  %v4366_v29 = vpop.f32.mrf.mxu0  ;;  %v16081_v22 = vld [vmem:[#allocation31_spill] sm:$0xff] }
 0x447   :  { %16055 = vst [vmem:[#allocation52_spill] sm:$0xff] %v11795_v20  ;;  %vm11806_vm14 = vmand %vm6660_vm8, %vm6664_vm13  ;;  %v6743_v27 = vsub.f32 %v11793_v5, %v11688_v14  ;;  %vm6903_vm15 = vcmp.lt.f32.partialorder %v11524_v50, %v11793_v5  ;;  %vm6900_vm0 = vcmp.ge.f32.partialorder %v11526_v23, %v6492_v51  ;;  %v11815_v48 = vadd.f32 %v4535_v15, %v4351_v21  ;;  %v4537_v49 = vpop.f32.mrf.mxu1  ;;  %v16071_v15 = vld [vmem:[#allocation50_spill] sm:$0xff] }
 0x448   :  { %v16059_v17 = vsel %vm11806_vm14, 4294967295, %v16058_v17  ;;  %6188 = vmatmul.mubr.f32.gmra.mxu1 %v16046_v34  ;;  %6036 = vmatprep.mubr.f32.mxu0 %v15751_v35  ;;  %v6672_v52 = vsel %vm11806_vm14, %v11739_v11, -3.0  ;;  %v6676_v4 = vsel %vm11806_vm14, %v6504_v46, %v8135_v63  ;;  %vm11830_vm1 = vmand %vm6899_vm11, %vm6903_vm15  ;;  %v16062_v21 = vmov 0  ;;  %v4371_v46 = vpop.f32.mrf.mxu0 }
 0x449   :  { %16060 = vst [vmem:[#allocation53_spill] sm:$0xff] %v16059_v17  ;;  %16061 = vst [vmem:[#allocation14_spill] sm:$0xff] %v11815_v48  ;;  %v16063_v21 = vsel %vm11830_vm1, 4294967295, %v16062_v21  ;;  %v6744_v34 = vsub.f32 %v11799_v19, %v6492_v51  ;;  %v4367_v58 = vadd.f32 %v4366_v29, %v16065_v32  ;;  %6193 = vmatprep.mubr.f32.mxu1 %v15751_v35  ;;  %v16066_v11 = vsel %vm11709_vm7, %v11672_v18, -3.0 }
 0x44a   :  { %16064 = vst [vmem:[#allocation59_spill] sm:$0xff] %v16063_v21  ;;  %v11844_v63 = vsel %vm11830_vm1, %v11688_v14, %v16066_v11  ;;  %v11849_v56 = vsel %vm11830_vm1, %v6743_v27, %v11725_v1  ;;  %vm6904_vm2 = vcmp.lt.f32.partialorder %v11526_v23, %v11799_v19  ;;  %v11853_v37 = vadd.f32 %v4537_v49, %v4353_v31  ;;  %v4542_v1 = vpop.f32.mrf.mxu1  ;;  %v16072_v27 = vld [vmem:[#allocation30_spill] sm:$0xff]  ;;  %v4373_v21 = vpop.f32.mrf.mxu0 }
 0x44b   :  { %vm11857_vm3 = vmand %vm6900_vm0, %vm6904_vm2  ;;  %v16068_v18 = vmov 0  ;;  %v6966_v14 = vmul.f32 6.0, %v11631_v38  ;;  %v6967_v54 = vmul.f32 6.0, %v11698_v40  ;;  %v4372_v29 = vadd.f32 %v4371_v46, %v16071_v15  ;;  %6038 = vmatmul.mubr.f32.gmra.mxu0 %v16072_v27 }
 0x44c   :  { %16067 = vst [vmem:[#allocation46_spill] sm:$0xff] %v11853_v37  ;;  %v16069_v18 = vsel %vm11857_vm3, 4294967295, %v16068_v18  ;;  %v11865_v32 = vclamps-f32 %v1449_v39, 3.0  ;;  %v11869_v31 = vsel %vm11857_vm3, %v6492_v51, %v6672_v52  ;;  %v11873_v49 = vsel %vm11857_vm3, %v6744_v34, %v6676_v4  ;;  %6195 = vmatmul.mubr.f32.gmra.mxu1 %v16049_v26  ;;  %6043 = vmatprep.mubr.f32.mxu0 %v15751_v35  ;;  %v16075_v51 = vld [vmem:[#allocation26_spill] sm:$0xff]  ;;  %v4544_v15 = vpop.f32.mrf.mxu1  ;;  %v16077_v34 = vld [vmem:[#allocation19_spill] sm:$0xff] }
 0x44d   :  { %16070 = vst [vmem:[#allocation13_spill] sm:$0xff] %v16069_v18  ;;  %v11875_v11 = vadd.f32 %v4542_v1, %v4358_v9  ;;  %v11879_v46 = vadd.f32 -3.0, %v6966_v14  ;;  %vm7138_vm5 = vcmp.ge.f32.partialorder %v11519_v12, %v11743_v43  ;;  %v6968_v39 = vmul.f32 6.0, %v11771_v60  ;;  %6200 = vmatprep.mubr.f32.mxu1 %v15751_v35  ;;  %v16076_v9 = vld [vmem:[#allocation64_spill] sm:$0xff]  ;;  %v11896_v1 = vpop.eup %8321 }
 0x44e   :  { %16073 = vst [vmem:[#allocation58_spill] sm:$0xff] %v11865_v32  ;;  %v4374_v52 = vadd.f32 %v4373_v21, %v16075_v51  ;;  %v11886_v4 = vadd.f32 -3.0, %v6967_v54  ;;  %v11890_v26 = vmul.f32 %v11544_v41, %v16076_v9  ;;  %v11894_v14 = vmul.f32 %v11581_v16, %v16077_v34  ;;  %16078 = vst [vmem:[#allocation62_spill] sm:$0xff] %v11896_v1  ;;  %v4378_v21 = vpop.f32.mrf.mxu0  ;;  %v16080_v51 = vld [vmem:[#allocation27_spill] sm:$0xff]  ;;  %v4549_v34 = vpop.f32.mrf.mxu1  ;;  %v16089_v16 = vld [vmem:[#allocation32_spill] sm:$0xff] }
 0x44f   :  { %16074 = vst [vmem:[#allocation44_spill] sm:$0xff] %v11875_v11  ;;  %v4638_v18 = vmax.f32 %v11767_v47, %v11875_v11  ;;  %v11900_v17 = vadd.f32 %v4544_v15, %v4360_v42  ;;  %v6982_v54 = vsub.f32 %v11879_v46, %v11743_v43  ;;  %vm7142_vm6 = vcmp.lt.f32.partialorder %v11519_v12, %v11879_v46  ;;  %v16086_v11 = vld [vmem:[#allocation29_spill] sm:$0xff] }
 0x450   :  { %vm7139_vm8 = vcmp.ge.f32.partialorder %v11524_v50, %v11793_v5  ;;  %v4379_v9 = vadd.f32 %v4378_v21, %v16080_v51  ;;  %6045 = vmatmul.mubr.f32.gmra.mxu0 %v16081_v22  ;;  %v6253_v28 = vmul.f32 %v11896_v1, %v11614_v2  ;;  %v6457_v42 = vmul.f32 %v11896_v1, %v11633_v44  ;;  %vm11919_vm9 = vmand %vm7138_vm5, %vm7142_vm6  ;;  %v4380_v2 = vpop.f32.mrf.mxu0  ;;  %v4551_v30 = vpop.f32.mrf.mxu1 }
 0x451   :  { %16079 = vst [vmem:[#allocation54_spill] sm:$0xff] %v11900_v17  ;;  %v6697_v15 = vmul.f32 %v11896_v1, %v11641_v53  ;;  %v16083_v33 = vsel %vm11919_vm9, 4294967295, %v16082_v33  ;;  %v4639_v21 = vmax.f32 %v11795_v20, %v11900_v17  ;;  %v11925_v51 = vadd.f32 %v4549_v34, %v4365_v13  ;;  %6202 = vmatmul.mubr.f32.gmra.mxu1 %v16057_v61 }
 0x452   :  { %16084 = vst [vmem:[#allocation35_spill] sm:$0xff] %v16083_v33  ;;  %6050 = vmatprep.mubr.f32.mxu0 %v15751_v35  ;;  %v6937_v44 = vmul.f32 %v11896_v1, %v11654_v36  ;;  %v11931_v53 = vadd.f32 -3.0, %v6968_v39  ;;  %v4381_v47 = vadd.f32 %v4380_v2, %v16086_v11  ;;  %6207 = vmatprep.mubr.f32.mxu1 %v15751_v35  ;;  %v6257_v24 = vmul.f32 0.992, %v6253_v28  ;;  %v4385_v34 = vpop.f32.mrf.mxu0  ;;  %v16088_v39 = vld [vmem:[#allocation10_spill] sm:$0xff]  ;;  %v4556_v2 = vpop.f32.mrf.mxu1  ;;  %v16137_v33 = vld [vmem:[#allocation57_spill] sm:$0xff] }
 0x453   :  { %16085 = vst [vmem:[#allocation37_spill] sm:$0xff] %v11925_v51  ;;  %v6461_v7 = vmul.f32 0.992, %v6457_v42  ;;  %v6701_v17 = vmul.f32 0.992, %v6697_v15  ;;  %v4640_v13 = vmax.f32 %v11815_v48, %v11925_v51  ;;  %v11937_v61 = vadd.f32 %v4551_v30, %v4367_v58 }
 0x454   :  { %v6941_v20 = vmul.f32 0.992, %v6937_v44  ;;  %v4386_v11 = vadd.f32 %v4385_v34, %v16088_v39  ;;  %6052 = vmatmul.mubr.f32.gmra.mxu0 %v16089_v16  ;;  %v6261_v28 = vadd.f32 0.001, %v6257_v24  ;;  %v11947_v30 = vadd.f32 %v4556_v2, %v4372_v29  ;;  %v4387_v58 = vpop.f32.mrf.mxu0  ;;  %v16090_v39 = vld [vmem:[#allocation39_spill] sm:$0xff] }
 0x455   :  { %16087 = vst [vmem:[#allocation18_spill] sm:$0xff] %v11937_v61  ;;  %v6465_v42 = vadd.f32 0.001, %v6461_v7  ;;  %v6705_v15 = vadd.f32 0.001, %v6701_v17  ;;  %v4641_v51 = vmax.f32 %v11853_v37, %v11937_v61  ;;  %6209 = vmatmul.mubr.f32.gmra.mxu1 %v16072_v27  ;;  %6057 = vmatprep.mubr.f32.mxu0 %v15751_v35  ;;  %v11954_v34 = vsel %vm11919_vm9, %v6982_v54, %v11791_v8  ;;  %v4558_v7 = vpop.f32.mrf.mxu1 }
 0x456   :  { %v6945_v44 = vadd.f32 0.001, %v6941_v20  ;;  %v4388_v24 = vadd.f32 %v4387_v58, %v16090_v39  ;;  %6214 = vmatprep.mubr.f32.mxu1 %v15751_v35  ;;  %v6285_v17 = vmul.f32 6.0, %v6261_v28  ;;  %v6983_v29 = vsub.f32 %v11886_v4, %v11793_v5  ;;  %v4392_v8 = vpop.f32.mrf.mxu0 }
 0x457   :  { %v6481_v36 = vadd.f32 %v6465_v42, %v6261_v28  ;;  %vm7140_vm10 = vcmp.ge.f32.partialorder %v11526_v23, %v11799_v19  ;;  %v11963_v20 = vmax.f32 %v4638_v18, %v11947_v30  ;;  %v11965_v27 = vadd.f32 %v4558_v7, %v4374_v52  ;;  %v4563_v28 = vpop.f32.mrf.mxu1  ;;  %v16092_v42 = vld [vmem:[#allocation47_spill] sm:$0xff] }
 0x458   :  { %vm7143_vm11 = vcmp.lt.f32.partialorder %v11524_v50, %v11886_v4  ;;  %v6984_v54 = vsub.f32 %v11931_v53, %v11799_v19  ;;  %v4393_v2 = vadd.f32 %v4392_v8, %v11549_v6  ;;  %6059 = vmatmul.mubr.f32.gmra.mxu0 %v16092_v42  ;;  %v6289_v58 = vadd.f32 -3.0, %v6285_v17  ;;  %v4394_v6 = vpop.f32.mrf.mxu0 }
 0x459   :  { %16091 = vst [vmem:[#allocation38_spill] sm:$0xff] %v11965_v27  ;;  %v6489_v39 = vmul.f32 6.0, %v6481_v36  ;;  %v6721_v61 = vadd.f32 %v6705_v15, %v6481_v36  ;;  %vm11976_vm13 = vmand %vm7139_vm8, %vm7143_vm11  ;;  %v16093_v18 = vmov 0  ;;  %v11981_v52 = vmax.f32 %v4639_v21, %v11965_v27  ;;  %6216 = vmatmul.mubr.f32.gmra.mxu1 %v16081_v22  ;;  %6064 = vmatprep.mubr.f32.mxu0 %v15751_v35  ;;  %v4565_v8 = vpop.f32.mrf.mxu1 }
 0x45a   :  { %v16094_v18 = vsel %vm11976_vm13, 4294967295, %v16093_v18  ;;  %v11983_v7 = vadd.f32 %v4563_v28, %v4379_v9  ;;  %v7178_v15 = vmul.f32 0.992, %v11890_v26  ;;  %v4395_v17 = vadd.f32 %v4394_v6, %v11553_v62  ;;  %6221 = vmatprep.mubr.f32.mxu1 %v15751_v35  ;;  %v4399_v37 = vpop.f32.mrf.mxu0  ;;  %v16097_v62 = vld [vmem:[#allocation51_spill] sm:$0xff] }
 0x45b   :  { %16095 = vst [vmem:[#allocation48_spill] sm:$0xff] %v16094_v18  ;;  %v8136_v21 = vadd.f32 3.0, %v6289_v58  ;;  %v6493_v9 = vadd.f32 -3.0, %v6489_v39  ;;  %vm6661_vm15 = vcmp.ge.f32.partialorder %v11865_v32, %v6289_v58  ;;  %v11998_v28 = vadd.f32 %v4565_v8, %v4381_v47  ;;  %v4570_v27 = vpop.f32.mrf.mxu1 }
 0x45c   :  { %v11996_v22 = vmax.f32 %v4640_v13, %v11983_v7  ;;  %v12000_v48 = vadd.f32 %v6945_v44, %v6721_v61  ;;  %v6729_v36 = vmul.f32 6.0, %v6721_v61  ;;  %v4400_v26 = vadd.f32 %v4399_v37, %v11560_v25  ;;  %6066 = vmatmul.mubr.f32.gmra.mxu0 %v16097_v62  ;;  %v4401_v47 = vpop.f32.mrf.mxu0 }
 0x45d   :  { %16096 = vst [vmem:[#allocation28_spill] sm:$0xff] %v11998_v28  ;;  %v6505_v6 = vsub.f32 %v6493_v9, %v6289_v58  ;;  %vm6665_vm0 = vcmp.lt.f32.partialorder %v11865_v32, %v6493_v9  ;;  %vm6901_vm2 = vcmp.ge.f32.partialorder %v11865_v32, %v6493_v9  ;;  %v12007_v39 = vmax.f32 %v4641_v51, %v11998_v28 }
 0x45e   :  { %v12009_v13 = vadd.f32 %v4570_v27, %v4386_v11  ;;  %6223 = vmatmul.mubr.f32.gmra.mxu1 %v16089_v16  ;;  %6071 = vmatprep.mubr.f32.mxu0 %v15751_v35  ;;  %vm12015_vm5 = vmand %vm6661_vm15, %vm6665_vm0  ;;  %v16098_v25 = vmov 0  ;;  %v12019_v37 = vadd.f32 -3.0, %v6729_v36  ;;  %v12024_v51 = vsel %vm11976_vm13, %v6983_v29, %v11849_v56  ;;  %v4572_v11 = vpop.f32.mrf.mxu1  ;;  %v4406_v56 = vpop.f32.mrf.mxu0 }
 0x45f   :  { %v16099_v25 = vsel %vm12015_vm5, 4294967295, %v16098_v25  ;;  %v4402_v61 = vadd.f32 %v4401_v47, %v11564_v59  ;;  %6228 = vmatprep.mubr.f32.mxu1 %v15751_v35  ;;  %v6673_v16 = vsel %vm12015_vm5, %v6289_v58, -3.0  ;;  %v6677_v44 = vsel %vm12015_vm5, %v6505_v6, %v8136_v21  ;;  %v16104_v21 = vld [vmem:[#allocation55_spill] sm:$0xff] }
 0x460   :  { %16100 = vst [vmem:[#allocation23_spill] sm:$0xff] %v16099_v25  ;;  %vm7144_vm6 = vcmp.lt.f32.partialorder %v11526_v23, %v11931_v53  ;;  %v4646_v27 = vmax.f32 %v11963_v20, %v12009_v13  ;;  %v12036_v36 = vadd.f32 %v4572_v11, %v4388_v24  ;;  %v6745_v59 = vsub.f32 %v12019_v37, %v6493_v9  ;;  %v4577_v8 = vpop.f32.mrf.mxu1 }
 0x461   :  { %vm6905_vm8 = vcmp.lt.f32.partialorder %v11865_v32, %v12019_v37  ;;  %vm12044_vm11 = vmand %vm7140_vm10, %vm7144_vm6  ;;  %v16101_v29 = vmov 0  ;;  %v4407_v58 = vadd.f32 %v4406_v56, %v11576_v57  ;;  %6073 = vmatmul.mubr.f32.gmra.mxu0 %v16104_v21  ;;  %v16105_v24 = vmov 0  ;;  %v4408_v56 = vpop.f32.mrf.mxu0 }
 0x462   :  { %v16102_v29 = vsel %vm12044_vm11, 4294967295, %v16101_v29  ;;  %vm12052_vm15 = vmand %vm6901_vm2, %vm6905_vm8  ;;  %v12063_v6 = vsel %vm12044_vm11, %v6984_v54, %v11873_v49  ;;  %v6969_v57 = vmul.f32 6.0, %v12000_v48  ;;  %v4647_v47 = vmax.f32 %v11981_v52, %v12036_v36  ;;  %6230 = vmatmul.mubr.f32.gmra.mxu1 %v16092_v42  ;;  %v4579_v54 = vpop.f32.mrf.mxu1 }
 0x463   :  { %16103 = vst [vmem:[#allocation50_spill] sm:$0xff] %v16102_v29  ;;  %v16106_v24 = vsel %vm12052_vm15, 4294967295, %v16105_v24  ;;  %v12068_v11 = vadd.f32 %v4577_v8, %v4393_v2  ;;  %v12073_v25 = vsel %vm12052_vm15, %v6493_v9, %v6673_v16  ;;  %v6917_v20 = vsel %vm12052_vm15, %v6745_v59, %v6677_v44  ;;  %6235 = vmatprep.mubr.f32.mxu1 %v15751_v35  ;;  %v4413_v8 = vpop.f32.mrf.mxu0 }
 0x464   :  { %16107 = vst [vmem:[#allocation30_spill] sm:$0xff] %v16106_v24  ;;  %v4409_v49 = vadd.f32 %v4408_v56, %v11585_v0  ;;  %v12079_v28 = vadd.f32 -3.0, %v6969_v57  ;;  %v7182_v52 = vadd.f32 0.001, %v7178_v15  ;;  %v12083_v42 = vadd.f32 %v4579_v54, %v4395_v17  ;;  %v4584_v0 = vpop.f32.mrf.mxu1 }
 0x465   :  { %v4648_v2 = vmax.f32 %v11996_v22, %v12068_v11  ;;  %vm7141_vm10 = vcmp.ge.f32.partialorder %v11865_v32, %v12019_v37  ;;  %v7179_v9 = vmul.f32 0.992, %v11894_v14  ;;  %v4414_v16 = vadd.f32 %v4413_v8, %v11589_v3  ;;  %v4415_v14 = vpop.f32.mrf.mxu0 }
 0x466   :  { %16108 = vst [vmem:[#allocation26_spill] sm:$0xff] %v12083_v42  ;;  %v6985_v44 = vsub.f32 %v12079_v28, %v12019_v37  ;;  %vm7145_vm0 = vcmp.lt.f32.partialorder %v11865_v32, %v12079_v28  ;;  %v12094_v15 = vadd.f32 %v7182_v52, %v11631_v38  ;;  %v4649_v17 = vmax.f32 %v12007_v39, %v12083_v42  ;;  %v4586_v38 = vpop.f32.mrf.mxu1 }
 0x467   :  { %v12098_v22 = vadd.f32 %v4584_v0, %v4400_v26  ;;  %6237 = vmatmul.mubr.f32.gmra.mxu1 %v16097_v62  ;;  %vm12101_vm2 = vmand %vm7141_vm10, %vm7145_vm0  ;;  %v16109_v3 = vmov 0  ;;  %vm7378_vm6 = vcmp.ge.f32.partialorder %v11519_v12, %v11879_v46  ;;  %v7183_v59 = vadd.f32 0.001, %v7179_v9  ;;  %v16113_v9 = vld [vmem:[#allocation11_spill] sm:$0xff] }
 0x468   :  { %v16110_v3 = vsel %vm12101_vm2, 4294967295, %v16109_v3  ;;  %v4416_v57 = vadd.f32 %v4415_v14, %v11604_v55  ;;  %6242 = vmatprep.mubr.f32.mxu1 %v15751_v35  ;;  %v12115_v62 = vsel %vm12101_vm2, %v6985_v44, %v6917_v20  ;;  %v7206_v39 = vmul.f32 6.0, %v12094_v15  ;;  %v4420_v55 = vpop.f32.mrf.mxu0  ;;  %v16112_v35 = vld [vmem:[#allocation61_spill] sm:$0xff]  ;;  %v4591_v14 = vpop.f32.mrf.mxu1  ;;  %v16115_v20 = vld [vmem:[#allocation40_spill] sm:$0xff] }
 0x469   :  { %16111 = vst [vmem:[#allocation64_spill] sm:$0xff] %v16110_v3  ;;  %v12119_v56 = vmax.f32 %v4646_v27, %v12098_v22  ;;  %v12121_v54 = vadd.f32 %v4586_v38, %v4402_v61  ;;  %v12124_v52 = vadd.f32 %v7183_v59, %v11698_v40  ;;  %v7176_v8 = vmul.f32 %v11626_v45, %v16112_v35 }
 0x46a   :  { %v4421_v0 = vadd.f32 %v4420_v55, %v16113_v9  ;;  %v12129_v26 = vadd.f32 -3.0, %v7206_v39  ;;  %vm7379_vm8 = vcmp.ge.f32.partialorder %v11524_v50, %v11886_v4  ;;  %v7177_v27 = vmul.f32 %v11896_v1, %v16115_v20  ;;  %v4422_v40 = vpop.f32.mrf.mxu0  ;;  %v16116_v55 = vld [vmem:[#allocation33_spill] sm:$0xff]  ;;  %v4593_v35 = vpop.f32.mrf.mxu1 }
 0x46b   :  { %v12136_v61 = vmax.f32 %v4647_v47, %v12121_v54  ;;  %v12138_v44 = vadd.f32 %v4591_v14, %v4407_v58  ;;  %6244 = vmatmul.mubr.f32.gmra.mxu1 %v16104_v21  ;;  %v7207_v59 = vmul.f32 6.0, %v12124_v52  ;;  %v7180_v38 = vmul.f32 0.992, %v7176_v8 }
 0x46c   :  { %16114 = vst [vmem:[#allocation19_spill] sm:$0xff] %v12129_v26  ;;  %v4423_v39 = vadd.f32 %v4422_v40, %v16116_v55  ;;  %v7222_v9 = vsub.f32 %v12129_v26, %v11879_v46  ;;  %vm7382_vm10 = vcmp.lt.f32.partialorder %v11519_v12, %v12129_v26  ;;  %v7181_v20 = vmul.f32 0.992, %v7177_v27  ;;  %v4427_v21 = vpop.f32.mrf.mxu0  ;;  %v16121_v55 = vld [vmem:[#allocation36_spill] sm:$0xff]  ;;  %v4598_v42 = vpop.f32.mrf.mxu1 }
 0x46d   :  { %v12148_v47 = vmax.f32 %v4648_v2, %v12138_v44  ;;  %v12150_v58 = vadd.f32 %v4593_v35, %v4409_v49  ;;  %vm12155_vm0 = vmand %vm7378_vm6, %vm7382_vm10  ;;  %v16117_v8 = vmov 0  ;;  %v12159_v14 = vadd.f32 -3.0, %v7207_v59 }
 0x46e   :  { %v16118_v8 = vsel %vm12155_vm0, 4294967295, %v16117_v8  ;;  %v7184_v40 = vadd.f32 0.001, %v7180_v38  ;;  %v4428_v24 = vadd.f32 %v4427_v21, %v16121_v55  ;;  %v16122_v49 = vsel %vm11919_vm9, %v11743_v43, %v11786_v10  ;;  %v4429_v21 = vpop.f32.mrf.mxu0  ;;  %v16124_v10 = vld [vmem:[#allocation42_spill] sm:$0xff]  ;;  %v4600_v55 = vpop.f32.mrf.mxu1 }
 0x46f   :  { %16119 = vst [vmem:[#allocation27_spill] sm:$0xff] %v16118_v8  ;;  %16120 = vst [vmem:[#allocation31_spill] sm:$0xff] %v12159_v14  ;;  %v12170_v2 = vsel %vm12155_vm0, %v11879_v46, %v16122_v49  ;;  %v12175_v27 = vsel %vm12155_vm0, %v7222_v9, %v11954_v34  ;;  %v7185_v59 = vadd.f32 0.001, %v7181_v20  ;;  %v12178_v38 = vmax.f32 %v4649_v17, %v12150_v58 }
 0x470   :  { %16123 = vst [vmem:[#allocation29_spill] sm:$0xff] %v12170_v2  ;;  %v12180_v35 = vadd.f32 %v4598_v42, %v4414_v16  ;;  %v7223_v43 = vsub.f32 %v12159_v14, %v11886_v4  ;;  %vm7383_vm6 = vcmp.lt.f32.partialorder %v11524_v50, %v12159_v14  ;;  %v4430_v46 = vadd.f32 %v4429_v21, %v16124_v10  ;;  %v4434_v20 = vpop.f32.mrf.mxu0  ;;  %v16131_v10 = vld [vmem:[#allocation16_spill] sm:$0xff] }
 0x471   :  { %vm12190_vm10 = vmand %vm7379_vm8, %vm7383_vm6  ;;  %v16125_v34 = vmov 0  ;;  %v12195_v42 = vadd.f32 %v7184_v40, %v11771_v60  ;;  %v12198_v16 = vadd.f32 %v7185_v59, %v12000_v48  ;;  %v12202_v9 = vadd.f32 %v4600_v55, %v4416_v57  ;;  %v16130_v48 = vld [vmem:[#allocation24_spill] sm:$0xff]  ;;  %v4605_v57 = vpop.f32.mrf.mxu1 }
 0x472   :  { %v16126_v34 = vsel %vm12190_vm10, 4294967295, %v16125_v34  ;;  %v4654_v17 = vmax.f32 %v12119_v56, %v12180_v35  ;;  %v16128_v49 = vsel %vm11976_vm13, %v11793_v5, %v11844_v63  ;;  %v12217_v60 = vsel %vm12190_vm10, %v7223_v43, %v12024_v51  ;;  %v4436_v55 = vpop.f32.mrf.mxu0  ;;  %v16132_v51 = vld [vmem:[#allocation20_spill] sm:$0xff] }
 0x473   :  { %16127 = vst [vmem:[#allocation10_spill] sm:$0xff] %v16126_v34  ;;  %v12212_v21 = vsel %vm12190_vm10, %v11886_v4, %v16128_v49  ;;  %v4435_v56 = vadd.f32 %v4434_v20, %v16130_v48  ;;  %v7208_v40 = vmul.f32 6.0, %v12195_v42  ;;  %v7209_v59 = vmul.f32 6.0, %v12198_v16  ;;  %v16133_v43 = vld [vmem:[#allocation8_spill] sm:$0xff]  ;;  %v16134_v49 = vld [vmem:[#allocation45_spill] sm:$0xff] }
 0x474   :  { %16129 = vst [vmem:[#allocation32_spill] sm:$0xff] %v12212_v21  ;;  %v7414_v5 = vmul.f32 %v11544_v41, %v16131_v10  ;;  %v4655_v63 = vmax.f32 %v12136_v61, %v12202_v9  ;;  %v12226_v4 = vadd.f32 %v4605_v57, %v4421_v0  ;;  %v7415_v20 = vmul.f32 %v16133_v43, %v16132_v51  ;;  %v4607_v21 = vpop.f32.mrf.mxu1  ;;  %v4441_v57 = vpop.f32.mrf.mxu0 }
 0x475   :  { %v4437_v48 = vadd.f32 %v4436_v55, %v16134_v49  ;;  %v12233_v34 = vadd.f32 -3.0, %v7208_v40  ;;  %v12235_v8 = vadd.f32 -3.0, %v7209_v59  ;;  %v12239_v0 = vadd.f32 %v4607_v21, %v4423_v39  ;;  %v16142_v55 = vld [vmem:[#allocation60_spill] sm:$0xff] }
 0x476   :  { %v7418_v10 = vmul.f32 0.992, %v7414_v5  ;;  %v4656_v61 = vmax.f32 %v12148_v47, %v12226_v4  ;;  %v7419_v18 = vmul.f32 0.992, %v7415_v20  ;;  %v4442_v51 = vadd.f32 %v4441_v57, %v16137_v33  ;;  %v4612_v2 = vpop.f32.mrf.mxu1  ;;  %v4443_v21 = vpop.f32.mrf.mxu0 }
 0x477   :  { %16135 = vst [vmem:[#allocation39_spill] sm:$0xff] %v12233_v34  ;;  %16136 = vst [vmem:[#allocation47_spill] sm:$0xff] %v12235_v8  ;;  %v7224_v40 = vsub.f32 %v12233_v34, %v11931_v53  ;;  %vm7384_vm8 = vcmp.lt.f32.partialorder %v11526_v23, %v12233_v34  ;;  %v7225_v59 = vsub.f32 %v12235_v8, %v12079_v28  ;;  %v16139_v33 = vmov 0 }
 0x478   :  { %v4657_v39 = vmax.f32 %v12178_v38, %v12239_v0  ;;  %v12252_v47 = vadd.f32 %v4612_v2, %v4428_v24  ;;  %vm16138_vm6 = vcmp.ge.f32.partialorder %v11526_v23, %v11931_v53  ;;  %vm7385_vm0 = vcmp.lt.f32.partialorder %v11865_v32, %v12235_v8  ;;  %v4614_v49 = vpop.f32.mrf.mxu1 }
 0x479   :  { %vm12257_vm10 = vmand %vm16138_vm6, %vm7384_vm8  ;;  %v7422_v5 = vadd.f32 0.001, %v7418_v10  ;;  %v4444_v20 = vadd.f32 %v4443_v21, %v16142_v55  ;;  %v16143_v24 = vsel %vm12044_vm11, %v11799_v19, %v11869_v31  ;;  %vm16145_vm8 = vcmp.ge.f32.partialorder %v11865_v32, %v12079_v28  ;;  %v4448_v21 = vpop.f32.mrf.mxu0 }
 0x47a   :  { %v16140_v33 = vsel %vm12257_vm10, 4294967295, %v16139_v33  ;;  %v12272_v2 = vsel %vm12257_vm10, %v11931_v53, %v16143_v24  ;;  %v12277_v38 = vsel %vm12257_vm10, %v7224_v40, %v12063_v6  ;;  %vm12282_vm6 = vmand %vm16145_vm8, %vm7385_vm0  ;;  %v16146_v10 = vmov 0 }
 0x47b   :  { %16141 = vst [vmem:[#allocation51_spill] sm:$0xff] %v16140_v33  ;;  %16144 = vst [vmem:[#allocation55_spill] sm:$0xff] %v12272_v2  ;;  %v16147_v10 = vsel %vm12282_vm6, 4294967295, %v16146_v10  ;;  %v7423_v57 = vadd.f32 0.001, %v7419_v18  ;;  %v4658_v19 = vmax.f32 %v4654_v17, %v12252_v47  ;;  %v12287_v31 = vadd.f32 %v4614_v49, %v4430_v46  ;;  %v16152_v18 = vld [vmem:[#allocation63_spill] sm:$0xff]  ;;  %v4619_v46 = vpop.f32.mrf.mxu1  ;;  %v4961_v33 = vpop.permute.xlu0 %4960 }
 0x47c   :  { %16148 = vst [vmem:[#allocation61_spill] sm:$0xff] %v16147_v10  ;;  %v16149_v53 = vsel %vm12101_vm2, %v12019_v37, %v12073_v25  ;;  %v12302_v40 = vsel %vm12282_vm6, %v7225_v59, %v12115_v62  ;;  %v4449_v17 = vadd.f32 %v4448_v21, %v16152_v18  ;;  %v12306_v55 = vadd.f32 %v7422_v5, %v12094_v15  ;;  %v16154_v25 = vld [vmem:[#allocation6_spill] sm:$0xff]  ;;  %v16156_v59 = vld [vmem:[#allocation43_spill] sm:$0xff] }
 0x47d   :  { %v12297_v6 = vsel %vm12282_vm6, %v12079_v28, %v16149_v53  ;;  %16151 = vst [vmem:[#allocation40_spill] sm:$0xff] %v12302_v40  ;;  %v12309_v49 = vadd.f32 %v7423_v57, %v12124_v52  ;;  %v7416_v37 = vmul.f32 %v11626_v45, %v16154_v25  ;;  %v4659_v28 = vmax.f32 %v4655_v63, %v12287_v31  ;;  %v4450_v53 = vpop.f32.mrf.mxu0  ;;  %v4621_v18 = vpop.f32.mrf.mxu1 }
 0x47e   :  { %16150 = vst [vmem:[#allocation11_spill] sm:$0xff] %v12297_v6  ;;  %v12314_v24 = vadd.f32 %v4619_v46, %v4435_v56  ;;  %v16155_v6 = vld [vmem:[#allocation41_spill] sm:$0xff]  ;;  %v12319_v21 = vadd.f32 %v4450_v53, %v16156_v59  ;;  %v7446_v15 = vmul.f32 6.0, %v12306_v55  ;;  %v12326_v25 = vadd.f32 %v4621_v18, %v4437_v48  ;;  %v4966_v45 = vpop.permute.xlu1 %4965 }
 0x47f   :  { %16153 = vst [vmem:[#allocation33_spill] sm:$0xff] %v12309_v49  ;;  %v7417_v62 = vmul.f32 %v11896_v1, %v16155_v6  ;;  %v7447_v52 = vmul.f32 6.0, %v12309_v49  ;;  %v7420_v5 = vmul.f32 0.992, %v7416_v37  ;;  %v5149_v56 = vpop.f32.mrf.mxu0  ;;  %v4626_v46 = vpop.f32.mrf.mxu1  ;;  %v16159_v59 = vld [vmem:[#allocation17_spill] sm:$0xff]  ;;  %vm16160_vm8 = vcmp.ge.f32.partialorder %v11519_v12, %v12129_v26 }
 0x480   :  { %v12324_v57 = vmax.f32 %v4656_v61, %v12314_v24  ;;  %v12328_v2 = vadd.f32 -3.0, %v7446_v15  ;;  %v12337_v37 = vmax.f32 %v4657_v39, %v12326_v25  ;;  %v4627_v61 = vadd.f32 %v4626_v46, %v4442_v51 }
 0x481   :  { %v7421_v63 = vmul.f32 0.992, %v7417_v62  ;;  %v12332_v6 = vadd.f32 -3.0, %v7447_v52  ;;  %v5151_v53 = vpop.f32.mrf.mxu0  ;;  %v7424_v48 = vadd.f32 0.001, %v7420_v5  ;;  %v7654_v62 = vmul.f32 %v11544_v41, %v16159_v59  ;;  %v4628_v18 = vpop.f32.mrf.mxu1 }
 0x482   :  { %16157 = vst [vmem:[#allocation36_spill] sm:$0xff] %v12328_v2  ;;  %v7462_v15 = vsub.f32 %v12328_v2, %v12129_v26  ;;  %vm7622_vm0 = vcmp.lt.f32.partialorder %v11519_v12, %v12328_v2  ;;  %v4662_v39 = vmax.f32 %v4658_v19, %v4627_v61  ;;  %v12347_v3 = vadd.f32 %v4628_v18, %v4444_v20 }
 0x483   :  { %16158 = vst [vmem:[#allocation42_spill] sm:$0xff] %v12332_v6  ;;  %v7425_v10 = vadd.f32 0.001, %v7421_v63  ;;  %v5160_v51 = vpop.f32.mrf.mxu0  ;;  %vm12352_vm6 = vmand %vm16160_vm8, %vm7622_vm0  ;;  %v16161_v41 = vmov 0  ;;  %vm7623_vm10 = vcmp.lt.f32.partialorder %v11524_v50, %v12332_v6  ;;  %v12359_v5 = vadd.f32 %v7424_v48, %v12195_v42  ;;  %v4633_v20 = vpop.f32.mrf.mxu1 }
 0x484   :  { %v16162_v41 = vsel %vm12352_vm6, 4294967295, %v16161_v41  ;;  %v12361_v46 = vadd.f32 %v5149_v56, %v4961_v33  ;;  %v12363_v63 = vadd.f32 %v5151_v53, %v4961_v33  ;;  %v12368_v19 = vsel %vm12352_vm6, %v7462_v15, %v12175_v27  ;;  %v16171_v56 = vld [vmem:[#allocation49_spill] sm:$0xff]  ;;  %v16172_v33 = vld [vmem:[#allocation44_spill] sm:$0xff] }
 0x485   :  { %16163 = vst [vmem:[#allocation24_spill] sm:$0xff] %v16162_v41  ;;  %16164 = vst [vmem:[#allocation16_spill] sm:$0xff] %v12359_v5  ;;  %vm16166_vm0 = vcmp.ge.f32.partialorder %v11524_v50, %v12159_v14  ;;  %v16167_v59 = vmov 0  ;;  %v12378_v42 = vadd.f32 %v7425_v10, %v12198_v16  ;;  %v4666_v48 = vsub.f32 %v16171_v56, %v4662_v39  ;;  %v5162_v27 = vpop.f32.mrf.mxu0  ;;  %v4635_v1 = vpop.f32.mrf.mxu1 }
 0x486   :  { %16165 = vst [vmem:[#allocation20_spill] sm:$0xff] %v12368_v19  ;;  %vm12373_vm8 = vmand %vm16166_vm0, %vm7623_vm10  ;;  %v4678_v53 = vsub.f32 %v16172_v33, %v4662_v39  ;;  %v4690_v18 = vsub.f32 %v11947_v30, %v4662_v39  ;;  %v4702_v52 = vsub.f32 %v12009_v13, %v4662_v39  ;;  %v4714_v15 = vsub.f32 %v12098_v22, %v4662_v39 }
 0x487   :  { %v16168_v59 = vsel %vm12373_vm8, 4294967295, %v16167_v59  ;;  %16170 = vst [vmem:[#allocation57_spill] sm:$0xff] %v12378_v42  ;;  %v4726_v29 = vsub.f32 %v12180_v35, %v4662_v39  ;;  %v4738_v41 = vsub.f32 %v12252_v47, %v4662_v39  ;;  %v4750_v26 = vsub.f32 %v4627_v61, %v4662_v39  ;;  %v5171_v13 = vpop.f32.mrf.mxu0  ;;  %v16173_v47 = vld [vmem:[#allocation52_spill] sm:$0xff]  ;;  %v5404_v39 = vpop.f32.mrf.mxu1 }
 0x488   :  { %16169 = vst [vmem:[#allocation45_spill] sm:$0xff] %v16168_v59  ;;  %v4670_v16 = vmul.f32 1.442695, %v4666_v48  ;;  %v4682_v10 = vmul.f32 1.442695, %v4678_v53  ;;  %v4663_v56 = vmax.f32 %v4659_v28, %v12347_v3  ;;  %v12388_v50 = vadd.f32 %v4633_v20, %v4449_v17  ;;  %v16174_v48 = vld [vmem:[#allocation54_spill] sm:$0xff] }
 0x489   :  { %v4694_v49 = vmul.f32 1.442695, %v4690_v18  ;;  %v4706_v33 = vmul.f32 1.442695, %v4702_v52  ;;  %v12390_v30 = vadd.f32 %v5160_v51, %v4966_v45  ;;  %v12392_v19 = vmul.f32 0.992, %v7654_v62  ;;  %v5173_v17 = vpop.f32.mrf.mxu0  ;;  %v5406_v20 = vpop.f32.mrf.mxu1 }
 0x48a   :  { %8323 = vpow2.f32 %v4670_v16  ;;  %v4718_v22 = vmul.f32 1.442695, %v4714_v15  ;;  %v4730_v35 = vmul.f32 1.442695, %v4726_v29  ;;  %v4667_v61 = vsub.f32 %v16173_v47, %v4663_v56  ;;  %v16175_v18 = vld [vmem:[#allocation38_spill] sm:$0xff] }
 0x48b   :  { %8325 = vpow2.f32 %v4682_v10  ;;  %v4679_v53 = vsub.f32 %v16174_v48, %v4663_v56  ;;  %v4691_v40 = vsub.f32 %v16175_v18, %v4663_v56  ;;  %v4703_v28 = vsub.f32 %v12036_v36, %v4663_v56  ;;  %v12400_v47 = vpop.f32.mrf.mxu0  ;;  %v12403_v36 = vpop.f32.mrf.mxu1 }
 0x48c   :  { %8327 = vpow2.f32 %v4694_v49  ;;  %v4742_v52 = vmul.f32 1.442695, %v4738_v41  ;;  %v4715_v51 = vsub.f32 %v12121_v54, %v4663_v56  ;;  %v4727_v62 = vsub.f32 %v12202_v9, %v4663_v56 }
 0x48d   :  { %8329 = vpow2.f32 %v4706_v33  ;;  %v4754_v29 = vmul.f32 1.442695, %v4750_v26  ;;  %v4672_v15 = vmul.f32 1.442695, %v4667_v61  ;;  %v4684_v16 = vmul.f32 1.442695, %v4679_v53  ;;  %v12411_v26 = vpop.f32.mrf.mxu0 }
 0x48e   :  { %8331 = vpow2.f32 %v4718_v22  ;;  %v4696_v10 = vmul.f32 1.442695, %v4691_v40  ;;  %v4708_v48 = vmul.f32 1.442695, %v4703_v28  ;;  %v4739_v18 = vsub.f32 %v12287_v31, %v4663_v56  ;;  %v12413_v22 = vpop.f32.mrf.mxu1  ;;  %v16176_v31 = vld [vmem:[#allocation14_spill] sm:$0xff] }
 0x48f   :  { %8333 = vpow2.f32 %v4730_v35  ;;  %v4751_v49 = vsub.f32 %v12347_v3, %v4663_v56  ;;  %v4664_v54 = vmax.f32 %v12324_v57, %v12388_v50  ;;  %v12409_v9 = vadd.f32 %v4635_v1, %v12319_v21  ;;  %v16177_v35 = vld [vmem:[#allocation37_spill] sm:$0xff]  ;;  %v12419_v56 = vpop.f32.mrf.mxu0  ;;  %v4971_v57 = vpop.permute.xlu0 %4970 }
 0x490   :  { %8335 = vpow2.f32 %v4742_v52  ;;  %v4720_v41 = vmul.f32 1.442695, %v4715_v51  ;;  %v4732_v33 = vmul.f32 1.442695, %v4727_v62  ;;  %v4744_v40 = vmul.f32 1.442695, %v4739_v18  ;;  %v12424_v52 = vpop.f32.mrf.mxu1 }
 0x491   :  { %8337 = vpow2.f32 %v4754_v29  ;;  %v4668_v61 = vsub.f32 %v16176_v31, %v4664_v54  ;;  %v4680_v53 = vsub.f32 %v16177_v35, %v4664_v54  ;;  %v12417_v3 = vadd.f32 %v5162_v27, %v4966_v45  ;;  %v12429_v45 = vpop.f32.mrf.mxu0 }
 0x492   :  { %8339 = vpow2.f32 %v4672_v15  ;;  %v4692_v1 = vsub.f32 %v11983_v7, %v4664_v54  ;;  %v4704_v21 = vsub.f32 %v12068_v11, %v4664_v54  ;;  %v4716_v28 = vsub.f32 %v12138_v44, %v4664_v54  ;;  %v12431_v31 = vpop.f32.mrf.mxu1 }
 0x493   :  { %8341 = vpow2.f32 %v4684_v16  ;;  %v4756_v51 = vmul.f32 1.442695, %v4751_v49  ;;  %v4728_v62 = vsub.f32 %v12226_v4, %v4664_v54  ;;  %v12427_v29 = vadd.f32 %v5171_v13, %v4971_v57  ;;  %v12435_v16 = vpop.f32.mrf.mxu0  ;;  %v4981_v43 = vpop.permute.xlu0 %4980 }
 0x494   :  { %8343 = vpow2.f32 %v4696_v10  ;;  %v4674_v27 = vmul.f32 1.442695, %v4668_v61  ;;  %v4686_v18 = vmul.f32 1.442695, %v4680_v53  ;;  %v4698_v15 = vmul.f32 1.442695, %v4692_v1  ;;  %v12442_v49 = vpop.f32.mrf.mxu1 }
 0x495   :  { %8345 = vpow2.f32 %v4708_v48  ;;  %v4710_v7 = vmul.f32 1.442695, %v4704_v21  ;;  %v4740_v11 = vsub.f32 %v12314_v24, %v4664_v54  ;;  %v4752_v44 = vsub.f32 %v12388_v50, %v4664_v54  ;;  %v4976_v48 = vpop.permute.xlu1 %4975  ;;  %v12451_v54 = vpop.f32.mrf.mxu0  ;;  %v16184_v1 = vld [vmem:[#allocation28_spill] sm:$0xff] }
 0x496   :  { %8347 = vpow2.f32 %v4720_v41  ;;  %v4722_v4 = vmul.f32 1.442695, %v4716_v28  ;;  %v4665_v13 = vmax.f32 %v12337_v37, %v12409_v9  ;;  %v12440_v10 = vadd.f32 %v5404_v39, %v12361_v46  ;;  %v16182_v37 = vld [vmem:[#allocation46_spill] sm:$0xff]  ;;  %v12458_v28 = vpop.f32.mrf.mxu1 }
 0x497   :  { %v12444_v61 = vpop.eup %8323  ;;  %8349 = vpow2.f32 %v4732_v33  ;;  %v4734_v35 = vmul.f32 1.442695, %v4728_v62  ;;  %v12446_v24 = vadd.f32 %v5173_v17, %v4971_v57  ;;  %v12449_v50 = vadd.f32 %v5406_v20, %v12363_v63  ;;  %v16183_v39 = vld [vmem:[#allocation18_spill] sm:$0xff]  ;;  %v12466_v62 = vpop.f32.mrf.mxu0 }
 0x498   :  { %16178 = vst [vmem:[#allocation60_spill] sm:$0xff] %v12440_v10  ;;  %16179 = vst [vmem:[#allocation63_spill] sm:$0xff] %v12444_v61  ;;  %v12453_v41 = vpop.eup %8325  ;;  %8351 = vpow2.f32 %v4744_v40  ;;  %v4669_v46 = vsub.f32 %v16182_v37, %v4665_v13  ;;  %v4681_v53 = vsub.f32 %v16183_v39, %v4665_v13  ;;  %v4693_v21 = vsub.f32 %v16184_v1, %v4665_v13  ;;  %v16186_v63 = vld [vmem:[#allocation26_spill] sm:$0xff] }
 0x499   :  { %16180 = vst [vmem:[#allocation6_spill] sm:$0xff] %v12449_v50  ;;  %16181 = vst [vmem:[#allocation41_spill] sm:$0xff] %v12453_v41  ;;  %v12460_v33 = vpop.eup %8327  ;;  %v4762_v17 = vadd.f32 %v12453_v41, %v12444_v61  ;;  %8353 = vpow2.f32 %v4756_v51  ;;  %v4705_v20 = vsub.f32 %v16186_v63, %v4665_v13  ;;  %v4717_v57 = vsub.f32 %v12150_v58, %v4665_v13  ;;  %v12470_v50 = vpop.f32.mrf.mxu1 }
 0x49a   :  { %16185 = vst [vmem:[#allocation43_spill] sm:$0xff] %v12460_v33  ;;  %v12468_v40 = vpop.eup %8329  ;;  %8355 = vpow2.f32 %v4674_v27  ;;  %v4746_v37 = vmul.f32 1.442695, %v4740_v11  ;;  %v4758_v39 = vmul.f32 1.442695, %v4752_v44  ;;  %v12475_v61 = vpop.f32.mrf.mxu0  ;;  %v4729_v27 = vsub.f32 %v12239_v0, %v4665_v13 }
 0x49b   :  { %v4676_v1 = vmul.f32 1.442695, %v4669_v46  ;;  %v12472_v10 = vpop.eup %8331  ;;  %v4766_v41 = vadd.f32 %v12460_v33, %v4762_v17  ;;  %8357 = vpow2.f32 %v4686_v18  ;;  %v4688_v51 = vmul.f32 1.442695, %v4681_v53  ;;  %v5434_v46 = vpop.f32.mrf.mxu1 }
 0x49c   :  { %v4700_v63 = vmul.f32 1.442695, %v4693_v21  ;;  %v12477_v58 = vpop.eup %8333  ;;  %8359 = vpow2.f32 %v4698_v15  ;;  %v4741_v11 = vsub.f32 %v12326_v25, %v4665_v13  ;;  %v4753_v44 = vsub.f32 %v12409_v9, %v4665_v13  ;;  %v4986_v2 = vpop.permute.xlu1 %4985 }
 0x49d   :  { %v12482_v12 = vpop.eup %8335  ;;  %v4770_v17 = vadd.f32 %v12468_v40, %v4766_v41  ;;  %8361 = vpow2.f32 %v4710_v7  ;;  %v4712_v18 = vmul.f32 1.442695, %v4705_v20  ;;  %v12487_v53 = vadd.f32 %v12403_v36, %v12390_v30  ;;  %v5226_v21 = vpop.f32.mrf.mxu0 }
 0x49e   :  { %v12489_v15 = vpop.eup %8337  ;;  %8363 = vpow2.f32 %v4722_v4  ;;  %v4724_v0 = vmul.f32 1.442695, %v4717_v57  ;;  %v12491_v25 = vmul.f32 1.442695, %v4729_v27  ;;  %v5183_v9 = vadd.f32 %v12400_v47, %v4976_v48  ;;  %v5439_v13 = vpop.f32.mrf.mxu1 }
 0x49f   :  { %v12494_v33 = vpop.eup %8339  ;;  %v4774_v41 = vadd.f32 %v12472_v10, %v4770_v17  ;;  %8365 = vpow2.f32 %v4734_v35  ;;  %v12497_v7 = vmul.f32 1.442695, %v4741_v11  ;;  %v12501_v30 = vadd.f32 %v12413_v22, %v12417_v3  ;;  %v5228_v36 = vpop.f32.mrf.mxu0 }
 0x4a0   :  { %v12503_v20 = vpop.eup %8341  ;;  %8367 = vpow2.f32 %v4746_v37  ;;  %v12505_v4 = vmul.f32 1.442695, %v4753_v44  ;;  %v5185_v47 = vadd.f32 %v12411_v26, %v4976_v48  ;;  %v12510_v57 = vadd.f32 %v12424_v52, %v12427_v29  ;;  %v5441_v27 = vpop.f32.mrf.mxu1 }
 0x4a1   :  { %v12512_v35 = vpop.eup %8343  ;;  %v4991_v11 = vpop.permute.xlu0 %4990  ;;  %v4778_v17 = vadd.f32 %v12477_v58, %v4774_v41  ;;  %v4763_v22 = vadd.f32 %v12503_v20, %v12494_v33  ;;  %8369 = vpow2.f32 %v4758_v39  ;;  %v12519_v3 = vadd.f32 %v12431_v31, %v12446_v24 }
 0x4a2   :  { %16187 = vst [vmem:[#allocation17_spill] sm:$0xff] %v12510_v57  ;;  %v5237_v37 = vpop.f32.mrf.mxu0  ;;  %v12521_v26 = vpop.eup %8345  ;;  %8371 = vpow2.f32 %v4676_v1  ;;  %v5194_v52 = vadd.f32 %v12419_v56, %v4981_v43  ;;  %v5196_v29 = vadd.f32 %v12429_v45, %v4981_v43  ;;  %v12526_v48 = vadd.f32 %v12442_v49, %v5183_v9 }
 0x4a3   :  { %16188 = vst [vmem:[#allocation49_spill] sm:$0xff] %v12519_v3  ;;  %v5446_v44 = vpop.f32.mrf.mxu1  ;;  %v12528_v41 = vpop.eup %8347  ;;  %v4782_v39 = vadd.f32 %v12482_v12, %v4778_v17  ;;  %v4767_v31 = vadd.f32 %v12512_v35, %v4763_v22  ;;  %8373 = vpow2.f32 %v4688_v51  ;;  %v12533_v24 = vadd.f32 %v12458_v28, %v5185_v47 }
 0x4a4   :  { %v4996_v57 = vpop.permute.xlu1 %4995  ;;  %v5239_v1 = vpop.f32.mrf.mxu0  ;;  %8375 = vpow2.f32 %v4700_v63  ;;  %v5205_v43 = vadd.f32 %v12435_v16, %v4986_v2  ;;  %v5207_v56 = vadd.f32 %v12451_v54, %v4986_v2  ;;  %v12540_v45 = vadd.f32 %v12470_v50, %v5194_v52 }
 0x4a5   :  { %v12535_v3 = vpop.eup %8349  ;;  %v5448_v49 = vpop.f32.mrf.mxu1  ;;  %v4786_v17 = vadd.f32 %v12489_v15, %v4782_v39  ;;  %v4771_v51 = vadd.f32 %v12521_v26, %v4767_v31  ;;  %8377 = vpow2.f32 %v4712_v18  ;;  %v12546_v28 = vadd.f32 %v5434_v46, %v5196_v29 }
 0x4a6   :  { %v12542_v9 = vpop.eup %8351  ;;  %v5248_v47 = vpop.f32.mrf.mxu0  ;;  %8379 = vpow2.f32 %v4724_v0  ;;  %v5216_v16 = vadd.f32 %v12466_v62, %v4991_v11  ;;  %v5218_v2 = vadd.f32 %v12475_v61, %v4991_v11  ;;  %v12552_v50 = vadd.f32 %v5439_v13, %v5205_v43 }
 0x4a7   :  { %16189 = vst [vmem:[#allocation44_spill] sm:$0xff] %v12546_v28  ;;  %v12548_v22 = vpop.eup %8353  ;;  %v5453_v54 = vpop.f32.mrf.mxu1  ;;  %8381 = vrcp.f32 %v4786_v17  ;;  %v4775_v39 = vadd.f32 %v12528_v41, %v4771_v51  ;;  %v5227_v18 = vadd.f32 %v5226_v21, %v4996_v57  ;;  %v12557_v46 = vadd.f32 %v5441_v27, %v5207_v56 }
 0x4a8   :  { %v12554_v63 = vpop.eup %8355  ;;  %v5001_v52 = vpop.permute.xlu0 %5000  ;;  %v5229_v0 = vadd.f32 %v5228_v36, %v4996_v57  ;;  %v12561_v62 = vadd.f32 %v5446_v44, %v5216_v16  ;;  %v12563_v61 = vadd.f32 %v5448_v49, %v5218_v2  ;;  %vm7620_vm10 = vcmp.ge.f32.partialorder %v11526_v23, %v12233_v34 }
 0x4a9   :  { %v5250_v29 = vpop.f32.mrf.mxu0  ;;  %v12559_v31 = vpop.eup %8357  ;;  %v5238_v28 = vadd.f32 %v5237_v37, %v5001_v52  ;;  %v4779_v21 = vadd.f32 %v12535_v3, %v4775_v39  ;;  %8383 = vpow2.f32 %v12491_v25  ;;  %v5240_v36 = vadd.f32 %v5239_v1, %v5001_v52 }
 0x4aa   :  { %16190 = vst [vmem:[#allocation52_spill] sm:$0xff] %v12561_v62  ;;  %16191 = vst [vmem:[#allocation54_spill] sm:$0xff] %v12563_v61  ;;  %v5455_v13 = vpop.f32.mrf.mxu1  ;;  %v12567_v11 = vpop.eup %8359  ;;  %v4764_v27 = vadd.f32 %v12559_v31, %v12554_v63  ;;  %8385 = vpow2.f32 %v12497_v7  ;;  %v12578_v56 = vadd.f32 %v5453_v54, %v5227_v18  ;;  %v16195_v54 = vsub.f32 %v12332_v6, %v12159_v14 }
 0x4ab   :  { %v5006_v43 = vpop.permute.xlu1 %5005  ;;  %v5259_v57 = vpop.f32.mrf.mxu0  ;;  %v12580_v49 = vadd.f32 %v5455_v13, %v5229_v0  ;;  %v4783_v16 = vadd.f32 %v12542_v9, %v4779_v21  ;;  %8387 = vpow2.f32 %v12505_v4  ;;  %v7448_v18 = vmul.f32 6.0, %v12359_v5 }
 0x4ac   :  { %v12575_v37 = vpop.eup %8361  ;;  %v5249_v44 = vadd.f32 %v5248_v47, %v5006_v43  ;;  %16192 = vst [vmem:[#allocation38_spill] sm:$0xff] %v12578_v56  ;;  %v5460_v17 = vpop.f32.mrf.mxu1  ;;  %v4768_v25 = vadd.f32 %v12567_v11, %v4764_v27  ;;  %v5251_v7 = vadd.f32 %v5250_v29, %v5006_v43  ;;  %v12597_v39 = vsel %vm12373_vm8, %v16195_v54, %v12217_v60 }
 0x4ad   :  { %16193 = vst [vmem:[#allocation14_spill] sm:$0xff] %v12580_v49  ;;  %v12582_v51 = vpop.eup %8363  ;;  %v12587_v1 = vadd.f32 %v5460_v17, %v5238_v28  ;;  %v5261_v2 = vpop.f32.mrf.mxu0  ;;  %16196 = vst [vmem:[#allocation46_spill] sm:$0xff] %v12597_v39  ;;  %v7449_v0 = vmul.f32 6.0, %v12378_v42  ;;  %v4787_v13 = vadd.f32 %v12548_v22, %v4783_v16  ;;  %v7662_v27 = vadd.f32 0.001, %v12392_v19 }
 0x4ae   :  { %v12589_v52 = vpop.eup %8365  ;;  %v5462_v47 = vpop.f32.mrf.mxu1  ;;  %v4772_v29 = vadd.f32 %v12575_v37, %v4768_v25  ;;  %v12610_v59 = vadd.f32 -3.0, %v7448_v18  ;;  %vm16210_vm11 = vcmp.ge.f32.partialorder %v11865_v32, %v12235_v8 }
 0x4af   :  { %16194 = vst [vmem:[#allocation37_spill] sm:$0xff] %v12587_v1  ;;  %v12601_v4 = vpop.eup %8367  ;;  %v5011_v28 = vpop.permute.xlu0 %5010  ;;  %v12605_v43 = vadd.f32 %v5462_v47, %v5240_v36  ;;  %v12612_v42 = vadd.f32 -3.0, %v7449_v0  ;;  %8389 = vrcp.f32 %v4787_v13  ;;  %v7678_v19 = vadd.f32 %v7662_v27, %v12306_v55 }
 0x4b0   :  { %v5270_v21 = vpop.f32.mrf.mxu0  ;;  %v12608_v17 = vpop.eup %8369  ;;  %v5260_v60 = vadd.f32 %v5259_v57, %v5011_v28  ;;  %v5262_v54 = vadd.f32 %v5261_v2, %v5011_v28  ;;  %16198 = vst [vmem:[#allocation28_spill] sm:$0xff] %v12610_v59  ;;  %v4776_v16 = vadd.f32 %v12582_v51, %v4772_v29  ;;  %v7464_v18 = vsub.f32 %v12610_v59, %v12233_v34  ;;  %v16214_v34 = vld [vmem:[#allocation36_spill] sm:$0xff] }
 0x4b1   :  { %16197 = vst [vmem:[#allocation18_spill] sm:$0xff] %v12605_v43  ;;  %v5467_v14 = vpop.f32.mrf.mxu1  ;;  %16199 = vst [vmem:[#allocation26_spill] sm:$0xff] %v12612_v42  ;;  %v12614_v39 = vpop.eup %8371  ;;  %vm7624_vm0 = vcmp.lt.f32.partialorder %v11526_v23, %v12610_v59  ;;  %v7465_v0 = vsub.f32 %v12612_v42, %v12235_v8  ;;  %v16205_v29 = vmov 0  ;;  %vm7625_vm2 = vcmp.lt.f32.partialorder %v11865_v32, %v12612_v42  ;;  %v16217_v42 = vld [vmem:[#allocation8_spill] sm:$0xff] }
 0x4b2   :  { %16200 = vst [vmem:[#allocation65_spill] sm:$0xff] %v12614_v39  ;;  %v5016_v1 = vpop.permute.xlu1 %5015  ;;  %v12617_v36 = vadd.f32 %v5467_v14, %v5249_v44  ;;  %v5272_v25 = vpop.f32.mrf.mxu0  ;;  %v4780_v14 = vadd.f32 %v12589_v52, %v4776_v16  ;;  %vm12640_vm8 = vmand %vm7620_vm10, %vm7624_vm0  ;;  %v16219_v32 = vld [vmem:[#allocation40_spill] sm:$0xff] }
 0x4b3   :  { %v12620_v47 = vpop.eup %8373  ;;  %v12622_v57 = vadd.f32 %v5270_v21, %v5016_v1  ;;  %v5469_v2 = vpop.f32.mrf.mxu1  ;;  %v16206_v29 = vsel %vm12640_vm8, 4294967295, %v16205_v29  ;;  %v12651_v16 = vsel %vm12640_vm8, %v7464_v18, %v12277_v38  ;;  %vm12656_vm13 = vmand %vm16210_vm11, %vm7625_vm2  ;;  %v5273_v5 = vadd.f32 %v5272_v25, %v5016_v1 }
 0x4b4   :  { %16201 = vst [vmem:[#allocation66_spill] sm:$0xff] %v12617_v36  ;;  %16202 = vst [vmem:[#allocation67_spill] sm:$0xff] %v12620_v47  ;;  %v12630_v28 = vpop.eup %8375  ;;  %v4765_v55 = vadd.f32 %v12620_v47, %v12614_v39  ;;  %v12635_v44 = vadd.f32 %v5469_v2, %v5251_v7  ;;  %v5281_v13 = vpop.f32.mrf.mxu0  ;;  %v16211_v7 = vmov 0  ;;  %v7686_v2 = vmul.f32 6.0, %v7678_v19  ;;  %v16215_v47 = vld [vmem:[#allocation5_spill] sm:$0xff] }
 0x4b5   :  { %16203 = vst [vmem:[#allocation68_spill] sm:$0xff] %v12630_v28  ;;  %16207 = vst [vmem:[#allocation70_spill] sm:$0xff] %v16206_v29  ;;  %v12646_v21 = vpop.eup %8377  ;;  %v5474_v27 = vpop.f32.mrf.mxu1  ;;  %v16212_v7 = vsel %vm12656_vm13, 4294967295, %v16211_v7  ;;  %vm7858_vm10 = vcmp.ge.f32.partialorder %v16215_v47, %v16214_v34  ;;  %v16216_v39 = vld [vmem:[#allocation25_spill] sm:$0xff]  ;;  %v4784_v38 = vadd.f32 %v12601_v4, %v4780_v14  ;;  %v12673_v19 = vsel %vm12656_vm13, %v7465_v0, %v16219_v32  ;;  %v16223_v0 = vld [vmem:[#allocation63_spill] sm:$0xff] }
 0x4b6   :  { %16204 = vst [vmem:[#allocation69_spill] sm:$0xff] %v12635_v44  ;;  %16208 = vst [vmem:[#allocation71_spill] sm:$0xff] %v12646_v21  ;;  %v7655_v44 = vmul.f32 %v16217_v42, %v16216_v39  ;;  %v12664_v36 = vpop.eup %8379  ;;  %v5021_v43 = vpop.permute.xlu0 %5020  ;;  %v4769_v18 = vadd.f32 %v12630_v28, %v4765_v55  ;;  %v12668_v29 = vadd.f32 %v5474_v27, %v5260_v60  ;;  %v12675_v39 = vadd.f32 -3.0, %v7686_v2  ;;  %v16225_v2 = vld [vmem:[#allocation43_spill] sm:$0xff] }
 0x4b7   :  { %16209 = vst [vmem:[#allocation72_spill] sm:$0xff] %v12651_v16  ;;  %16213 = vst [vmem:[#allocation73_spill] sm:$0xff] %v16212_v7  ;;  %v5283_v8 = vpop.f32.mrf.mxu0  ;;  %v8382_v16 = vpop.eup %8381  ;;  %v5282_v23 = vadd.f32 %v5281_v13, %v5021_v43  ;;  %v4788_v55 = vadd.f32 %v12608_v17, %v4784_v38 }
 0x4b8   :  { %16218 = vst [vmem:[#allocation36_spill] sm:$0xff] %v12668_v29  ;;  %16220 = vst [vmem:[#allocation25_spill] sm:$0xff] %v12673_v19  ;;  %v5284_v59 = vadd.f32 %v5283_v8, %v5021_v43  ;;  %v5476_v42 = vpop.f32.mrf.mxu1  ;;  %v12677_v49 = vpop.permute.xlu1 %5025  ;;  %v4791_v14 = vmul.f32 6.0, %v8382_v16  ;;  %v4773_v60 = vadd.f32 %v12646_v21, %v4769_v18  ;;  %vm7862_vm11 = vcmp.lt.f32.partialorder %v16215_v47, %v12675_v39 }
 0x4b9   :  { %16221 = vst [vmem:[#allocation8_spill] sm:$0xff] %v12675_v39  ;;  %v12681_v27 = vadd.f32 %v5476_v42, %v5262_v54  ;;  %v5292_v29 = vpop.f32.mrf.mxu0  ;;  %v12683_v7 = vpop.eup %8383  ;;  %v7659_v43 = vmul.f32 0.992, %v7655_v44  ;;  %v16224_v54 = vld [vmem:[#allocation41_spill] sm:$0xff]  ;;  %vm12701_vm2 = vmand %vm7858_vm10, %vm7862_vm11  ;;  %v16226_v42 = vmov 0  ;;  %8391 = vrcp.f32 %v4788_v55 }
 0x4ba   :  { %v12686_v32 = vadd.f32 %v5292_v29, %v12677_v49  ;;  %v5481_v1 = vpop.f32.mrf.mxu1  ;;  %v12692_v25 = vpop.eup %8385  ;;  %v4798_v13 = vmul.f32 %v16223_v0, %v4791_v14  ;;  %v4810_v16 = vmul.f32 %v16224_v54, %v4791_v14  ;;  %v4822_v38 = vmul.f32 %v16225_v2, %v4791_v14 }
 0x4bb   :  { %16222 = vst [vmem:[#allocation40_spill] sm:$0xff] %v12681_v27  ;;  %v4834_v18 = vmul.f32 %v12468_v40, %v4791_v14  ;;  %v5294_v29 = vpop.f32.mrf.mxu0  ;;  %v16227_v42 = vsel %vm12701_vm2, 4294967295, %v16226_v42  ;;  %v12705_v8 = vpop.eup %8387  ;;  %v4846_v44 = vmul.f32 %v12472_v10, %v4791_v14  ;;  %v4858_v0 = vmul.f32 %v12477_v58, %v4791_v14 }
 0x4bc   :  { %16228 = vst [vmem:[#allocation63_spill] sm:$0xff] %v16227_v42  ;;  %v4870_v54 = vmul.f32 %v12482_v12, %v4791_v14  ;;  %v4882_v2 = vmul.f32 %v12489_v15, %v4791_v14  ;;  %v5483_v19 = vpop.f32.mrf.mxu1  ;;  %v4802_v40 = vmul.f32 1.442695, %v4798_v13  ;;  %v4814_v21 = vmul.f32 1.442695, %v4810_v16  ;;  %v8390_v14 = vpop.eup %8389 }
 0x4bd   :  { %v4826_v28 = vmul.f32 1.442695, %v4822_v38  ;;  %v5584_v27 = vpop.f32.mrf.mxu0  ;;  %v4838_v47 = vmul.f32 1.442695, %v4834_v18  ;;  %v4850_v56 = vmul.f32 1.442695, %v4846_v44  ;;  %v4777_v61 = vadd.f32 %v12664_v36, %v4773_v60 }
 0x4be   :  { %v5488_v62 = vpop.f32.mrf.mxu1  ;;  %v12712_v6 = vadd.f32 0.001, %v7659_v43  ;;  %8393 = vpow2.f32 %v4802_v40  ;;  %v4862_v10 = vmul.f32 1.442695, %v4858_v0  ;;  %v4874_v58 = vmul.f32 1.442695, %v4870_v54 }
 0x4bf   :  { %v12715_v12 = vadd.f32 %v5481_v1, %v12622_v57  ;;  %v5586_v15 = vpop.f32.mrf.mxu0  ;;  %8395 = vpow2.f32 %v4814_v21  ;;  %v4886_v13 = vmul.f32 1.442695, %v4882_v2  ;;  %v4781_v55 = vadd.f32 %v12683_v7, %v4777_v61  ;;  %v16230_v43 = vld [vmem:[#allocation60_spill] sm:$0xff]  ;;  %v16231_v54 = vld [vmem:[#allocation6_spill] sm:$0xff] }
 0x4c0   :  { %v12718_v16 = vadd.f32 %v5483_v19, %v5273_v5  ;;  %v5490_v38 = vpop.f32.mrf.mxu1  ;;  %8397 = vpow2.f32 %v4826_v28  ;;  %v4793_v60 = vmul.f32 6.0, %v8390_v14  ;;  %v12720_v18 = vadd.f32 %v5488_v62, %v5282_v23 }
 0x4c1   :  { %v5585_v44 = vadd.f32 %v5584_v27, %v16230_v43  ;;  %v5592_v0 = vpop.f32.mrf.mxu0  ;;  %8399 = vpow2.f32 %v4838_v47  ;;  %v4785_v57 = vadd.f32 %v12692_v25, %v4781_v55  ;;  %v12724_v1 = vadd.f32 %v5490_v38, %v5284_v59 }
 0x4c2   :  { %16229 = vst [vmem:[#allocation41_spill] sm:$0xff] %v12720_v18  ;;  %v5587_v21 = vadd.f32 %v5586_v15, %v16231_v54  ;;  %v5495_v2 = vpop.f32.mrf.mxu1  ;;  %8401 = vpow2.f32 %v4850_v56  ;;  %v4799_v5 = vmul.f32 %v12494_v33, %v4793_v60  ;;  %v4811_v61 = vmul.f32 %v12503_v20, %v4793_v60 }
 0x4c3   :  { %v4823_v28 = vmul.f32 %v12512_v35, %v4793_v60  ;;  %v5594_v23 = vpop.f32.mrf.mxu0  ;;  %8403 = vpow2.f32 %v4862_v10  ;;  %v4835_v62 = vmul.f32 %v12521_v26, %v4793_v60  ;;  %v4847_v47 = vmul.f32 %v12528_v41, %v4793_v60 }
 0x4c4   :  { %v4859_v19 = vmul.f32 %v12535_v3, %v4793_v60  ;;  %v5497_v59 = vpop.f32.mrf.mxu1  ;;  %8405 = vpow2.f32 %v4874_v58  ;;  %v4804_v27 = vmul.f32 1.442695, %v4799_v5  ;;  %v4816_v40 = vmul.f32 1.442695, %v4811_v61  ;;  %v16233_v61 = vld [vmem:[#allocation49_spill] sm:$0xff] }
 0x4c5   :  { %v4828_v15 = vmul.f32 1.442695, %v4823_v28  ;;  %v5600_v56 = vpop.f32.mrf.mxu0  ;;  %8407 = vpow2.f32 %v4886_v13  ;;  %v4840_v33 = vmul.f32 1.442695, %v4835_v62  ;;  %v4852_v14 = vmul.f32 1.442695, %v4847_v47 }
 0x4c6   :  { %v5295_v20 = vadd.f32 %v5294_v29, %v12677_v49  ;;  %v5770_v35 = vpop.f32.mrf.mxu1  ;;  %8409 = vpow2.f32 %v4804_v27  ;;  %v4871_v10 = vmul.f32 %v12542_v9, %v4793_v60  ;;  %v4883_v26 = vmul.f32 %v12548_v22, %v4793_v60  ;;  %v8392_v22 = vpop.eup %8391 }
 0x4c7   :  { %v12737_v41 = vadd.f32 %v12705_v8, %v4785_v57  ;;  %v5602_v3 = vpop.f32.mrf.mxu0  ;;  %8411 = vpow2.f32 %v4816_v40  ;;  %v12740_v58 = vadd.f32 %v5495_v2, %v12686_v32  ;;  %v5593_v13 = vadd.f32 %v5592_v0, %v12487_v53  ;;  %v16232_v57 = vld [vmem:[#allocation17_spill] sm:$0xff] }
 0x4c8   :  { %v12743_v55 = vadd.f32 %v5497_v59, %v5295_v20  ;;  %v5772_v38 = vpop.f32.mrf.mxu1  ;;  %8413 = vpow2.f32 %v4828_v15  ;;  %v4864_v49 = vmul.f32 1.442695, %v4859_v19  ;;  %v4876_v29 = vmul.f32 1.442695, %v4871_v10 }
 0x4c9   :  { %v5595_v9 = vadd.f32 %v5594_v23, %v12501_v30  ;;  %v5608_v43 = vpop.f32.mrf.mxu0  ;;  %v4888_v60 = vmul.f32 1.442695, %v4883_v26  ;;  %v5601_v54 = vadd.f32 %v5600_v56, %v16232_v57  ;;  %v12747_v5 = vadd.f32 %v5770_v35, %v5585_v44  ;;  %v16234_v44 = vld [vmem:[#allocation20_spill] sm:$0xff] }
 0x4ca   :  { %v5603_v32 = vadd.f32 %v5602_v3, %v16233_v61  ;;  %v5779_v2 = vpop.f32.mrf.mxu1  ;;  %8415 = vpow2.f32 %v4840_v33  ;;  %v4795_v53 = vmul.f32 6.0, %v8392_v22  ;;  %v12750_v0 = vadd.f32 %v5772_v38, %v5587_v21 }
 0x4cb   :  { %v5609_v28 = vadd.f32 %v5608_v43, %v12526_v48  ;;  %v5610_v62 = vpop.f32.mrf.mxu0  ;;  %v12753_v47 = vpop.eup %8393  ;;  %8417 = vpow2.f32 %v4852_v14  ;;  %v12755_v30 = vadd.f32 %v5779_v2, %v5593_v13  ;;  %v16235_v59 = vsub.f32 %v12675_v39, %v16214_v34 }
 0x4cc   :  { %v5611_v23 = vadd.f32 %v5610_v62, %v12533_v24  ;;  %v5781_v19 = vpop.f32.mrf.mxu1  ;;  %v12766_v21 = vpop.eup %8395  ;;  %8419 = vpow2.f32 %v4864_v49  ;;  %v4800_v48 = vmul.f32 %v12554_v63, %v4795_v53  ;;  %v4812_v40 = vmul.f32 %v12559_v31, %v4795_v53 }
 0x4cd   :  { %v12764_v27 = vsel %vm12701_vm2, %v16235_v59, %v16234_v44  ;;  %v4824_v15 = vmul.f32 %v12567_v11, %v4795_v53  ;;  %v5616_v56 = vpop.f32.mrf.mxu0  ;;  %v12771_v24 = vpop.eup %8397  ;;  %v4894_v33 = vadd.f32 %v12766_v21, %v12753_v47  ;;  %8421 = vpow2.f32 %v4876_v29 }
 0x4ce   :  { %v4836_v14 = vmul.f32 %v12575_v37, %v4795_v53  ;;  %v4848_v20 = vmul.f32 %v12582_v51, %v4795_v53  ;;  %v5788_v35 = vpop.f32.mrf.mxu1  ;;  %v12777_v10 = vpop.eup %8399  ;;  %v4806_v26 = vmul.f32 1.442695, %v4800_v48  ;;  %v4818_v63 = vmul.f32 1.442695, %v4812_v40  ;;  %v16240_v40 = vld [vmem:[#allocation44_spill] sm:$0xff] }
 0x4cf   :  { %16236 = vst [vmem:[#allocation43_spill] sm:$0xff] %v12777_v10  ;;  %v4830_v3 = vmul.f32 1.442695, %v4824_v15  ;;  %v4860_v31 = vmul.f32 %v12589_v52, %v4795_v53  ;;  %v5618_v11 = vpop.f32.mrf.mxu0  ;;  %v12780_v13 = vpop.eup %8401  ;;  %v4898_v38 = vadd.f32 %v12771_v24, %v4894_v33  ;;  %8423 = vpow2.f32 %v4888_v60 }
 0x4d0   :  { %16237 = vst [vmem:[#allocation60_spill] sm:$0xff] %v12780_v13  ;;  %v4842_v49 = vmul.f32 1.442695, %v4836_v14  ;;  %v4872_v29 = vmul.f32 %v12601_v4, %v4795_v53  ;;  %v5790_v37 = vpop.f32.mrf.mxu1  ;;  %v12784_v43 = vpop.eup %8403  ;;  %8425 = vpow2.f32 %v4806_v26  ;;  %v4854_v51 = vmul.f32 1.442695, %v4848_v20 }
 0x4d1   :  { %16238 = vst [vmem:[#allocation6_spill] sm:$0xff] %v12784_v43  ;;  %v4884_v22 = vmul.f32 %v12608_v17, %v4795_v53  ;;  %v12787_v57 = vadd.f32 %v5781_v19, %v5595_v9  ;;  %v5624_v61 = vpop.f32.mrf.mxu0  ;;  %v12789_v52 = vpop.eup %8405  ;;  %v4902_v2 = vadd.f32 %v12777_v10, %v4898_v38  ;;  %8427 = vpow2.f32 %v4818_v63  ;;  %v16241_v63 = vld [vmem:[#allocation42_spill] sm:$0xff] }
 0x4d2   :  { %16239 = vst [vmem:[#allocation17_spill] sm:$0xff] %v12789_v52  ;;  %v4866_v62 = vmul.f32 1.442695, %v4860_v31  ;;  %v5617_v60 = vadd.f32 %v5616_v56, %v12540_v45  ;;  %v5797_v44 = vpop.f32.mrf.mxu1  ;;  %v8408_v4 = vpop.eup %8407  ;;  %8429 = vpow2.f32 %v4830_v3  ;;  %v4878_v59 = vmul.f32 1.442695, %v4872_v29  ;;  %v16242_v3 = vld [vmem:[#allocation9_spill] sm:$0xff] }
 0x4d3   :  { %v12793_v48 = vadd.f32 %v5788_v35, %v5601_v54  ;;  %v5619_v15 = vadd.f32 %v5618_v11, %v16240_v40  ;;  %v5626_v17 = vpop.f32.mrf.mxu0  ;;  %v12796_v9 = vpop.eup %8409  ;;  %v4906_v53 = vadd.f32 %v12780_v13, %v4902_v2  ;;  %v4890_v19 = vmul.f32 1.442695, %v4884_v22  ;;  %v16243_v11 = vld [vmem:[#allocation52_spill] sm:$0xff]  ;;  %v16246_v22 = vld [vmem:[#allocation15_spill] sm:$0xff] }
 0x4d4   :  { %v12799_v33 = vadd.f32 %v5790_v37, %v5603_v32  ;;  %v5625_v14 = vadd.f32 %v5624_v61, %v12552_v50  ;;  %v5799_v20 = vpop.f32.mrf.mxu1  ;;  %v12802_v45 = vpop.eup %8411  ;;  %8431 = vpow2.f32 %v4842_v49  ;;  %v12804_v56 = vadd.f32 %v5797_v44, %v5609_v28  ;;  %v16245_v37 = vld [vmem:[#allocation7_spill] sm:$0xff] }
 0x4d5   :  { %v5627_v54 = vadd.f32 %v5626_v17, %v12557_v46  ;;  %v12807_v35 = vadd.f32 %v5799_v20, %v5611_v23  ;;  %v5632_v26 = vpop.f32.mrf.mxu0  ;;  %vm7859_vm0 = vcmp.ge.f32.partialorder %v16242_v3, %v16241_v63  ;;  %v12811_v31 = vpop.eup %8413  ;;  %v4910_v32 = vadd.f32 %v12784_v43, %v4906_v53  ;;  %v16244_v23 = vld [vmem:[#allocation33_spill] sm:$0xff] }
 0x4d6   :  { %v4895_v50 = vadd.f32 %v12802_v45, %v12796_v9  ;;  %8433 = vpow2.f32 %v4854_v51  ;;  %v5633_v38 = vadd.f32 %v5632_v26, %v16243_v11  ;;  %v5806_v28 = vpop.f32.mrf.mxu1  ;;  %v7679_v29 = vadd.f32 %v12712_v6, %v16244_v23  ;;  %v16248_v51 = vld [vmem:[#allocation54_spill] sm:$0xff] }
 0x4d7   :  { %8435 = vpow2.f32 %v4866_v62  ;;  %v12817_v49 = vadd.f32 %v5806_v28, %v5617_v60  ;;  %v5634_v46 = vpop.f32.mrf.mxu0  ;;  %v7656_v61 = vmul.f32 %v16246_v22, %v16245_v37  ;;  %v12823_v2 = vpop.eup %8415  ;;  %v4914_v44 = vadd.f32 %v12789_v52, %v4910_v32 }
 0x4d8   :  { %16247 = vst [vmem:[#allocation49_spill] sm:$0xff] %v12823_v2  ;;  %v4899_v40 = vadd.f32 %v12811_v31, %v4895_v50  ;;  %8437 = vpow2.f32 %v4878_v59  ;;  %v5635_v17 = vadd.f32 %v5634_v46, %v16248_v51  ;;  %v5808_v53 = vpop.f32.mrf.mxu1  ;;  %v12828_v62 = vpop.eup %8417  ;;  %v7687_v20 = vmul.f32 6.0, %v7679_v29  ;;  %v16251_v50 = vld [vmem:[#allocation38_spill] sm:$0xff]  ;;  %v16254_v51 = vld [vmem:[#allocation21_spill] sm:$0xff] }
 0x4d9   :  { %16249 = vst [vmem:[#allocation20_spill] sm:$0xff] %v12828_v62  ;;  %8439 = vrcp.f32 %v12737_v41  ;;  %v12831_v60 = vadd.f32 %v5808_v53, %v5619_v15  ;;  %v5640_v6 = vpop.f32.mrf.mxu0  ;;  %v7660_v26 = vmul.f32 0.992, %v7656_v61  ;;  %v12833_v11 = vpop.eup %8419  ;;  %v4918_v28 = vadd.f32 %v8408_v4, %v4914_v44  ;;  %v16255_v29 = vld [vmem:[#allocation62_spill] sm:$0xff]  ;;  %v16257_v53 = vld [vmem:[#allocation28_spill] sm:$0xff] }
 0x4da   :  { %16250 = vst [vmem:[#allocation44_spill] sm:$0xff] %v12833_v11  ;;  %v4903_v32 = vadd.f32 %v12823_v2, %v4899_v40  ;;  %8441 = vpow2.f32 %v4890_v19  ;;  %v5641_v59 = vadd.f32 %v5640_v6, %v16251_v50  ;;  %v5815_v23 = vpop.f32.mrf.mxu1  ;;  %v12837_v46 = vpop.eup %8421  ;;  %v12841_v41 = vadd.f32 -3.0, %v7687_v20  ;;  %v16256_v44 = vld [vmem:[#allocation14_spill] sm:$0xff]  ;;  %v16258_v6 = vld [vmem:[#allocation12_spill] sm:$0xff] }
 0x4db   :  { %16252 = vst [vmem:[#allocation52_spill] sm:$0xff] %v12837_v46  ;;  %v12839_v37 = vadd.f32 %v5815_v23, %v5625_v14  ;;  %v5642_v22 = vpop.f32.mrf.mxu0  ;;  %v7664_v15 = vadd.f32 0.001, %v7660_v26  ;;  %v7657_v61 = vmul.f32 %v16255_v29, %v16254_v51  ;;  %8443 = vrcp.f32 %v4918_v28  ;;  %v16259_v26 = vld [vmem:[#allocation16_spill] sm:$0xff] }
 0x4dc   :  { %16253 = vst [vmem:[#allocation33_spill] sm:$0xff] %v12841_v41  ;;  %v4907_v4 = vadd.f32 %v12828_v62, %v4903_v32  ;;  %v5643_v40 = vadd.f32 %v5642_v22, %v16256_v44  ;;  %v5817_v19 = vpop.f32.mrf.mxu1  ;;  %v8424_v50 = vpop.eup %8423  ;;  %v7703_v20 = vsub.f32 %v12841_v41, %v16241_v63  ;;  %vm7863_vm11 = vcmp.lt.f32.partialorder %v16242_v3, %v12841_v41  ;;  %v16260_v22 = vld [vmem:[#allocation37_spill] sm:$0xff]  ;;  %v16265_v62 = vld [vmem:[#allocation19_spill] sm:$0xff] }
 0x4dd   :  { %v12849_v2 = vadd.f32 %v5817_v19, %v5627_v54  ;;  %v5648_v14 = vpop.f32.mrf.mxu0  ;;  %v7680_v28 = vadd.f32 %v7664_v15, %v16259_v26  ;;  %v12856_v23 = vpop.eup %8425  ;;  %vm12863_vm10 = vmand %vm7859_vm0, %vm7863_vm11  ;;  %v16261_v54 = vmov 0  ;;  %v7661_v44 = vmul.f32 0.992, %v7657_v61  ;;  %v16264_v19 = vld [vmem:[#allocation29_spill] sm:$0xff] }
 0x4de   :  { %v4911_v32 = vadd.f32 %v12833_v11, %v4907_v4  ;;  %v5649_v51 = vadd.f32 %v5648_v14, %v16260_v22  ;;  %v5824_v29 = vpop.f32.mrf.mxu1  ;;  %v16262_v54 = vsel %vm12863_vm10, 4294967295, %v16261_v54  ;;  %v7630_v15 = vsel %vm12352_vm6, %v16265_v62, %v16264_v19  ;;  %v12871_v26 = vpop.eup %8427  ;;  %v16267_v14 = vld [vmem:[#allocation46_spill] sm:$0xff] }
 0x4df   :  { %16263 = vst [vmem:[#allocation7_spill] sm:$0xff] %v16262_v54  ;;  %v12873_v52 = vadd.f32 %v5824_v29, %v5633_v38  ;;  %v5650_v4 = vpop.f32.mrf.mxu0  ;;  %v12878_v22 = vsel %vm12863_vm10, %v7703_v20, %v16267_v14  ;;  %v7688_v3 = vmul.f32 6.0, %v7680_v28  ;;  %v12883_v61 = vsel %vm12701_vm2, %v16214_v34, %v7630_v15  ;;  %v12885_v63 = vpop.eup %8429  ;;  %v16270_v29 = vld [vmem:[#allocation18_spill] sm:$0xff]  ;;  %v16272_v15 = vld [vmem:[#allocation5_spill] sm:$0xff] }
 0x4e0   :  { %16268 = vst [vmem:[#allocation15_spill] sm:$0xff] %v12878_v22  ;;  %16269 = vst [vmem:[#allocation54_spill] sm:$0xff] %v12883_v61  ;;  %v4915_v62 = vadd.f32 %v12837_v46, %v4911_v32  ;;  %v4896_v38 = vadd.f32 %v12871_v26, %v12856_v23  ;;  %v12891_v19 = vadd.f32 %v5650_v4, %v16270_v29  ;;  %v5826_v11 = vpop.f32.mrf.mxu1  ;;  %v7665_v54 = vadd.f32 0.001, %v7661_v44  ;;  %v16277_v29 = vld [vmem:[#allocation66_spill] sm:$0xff] }
 0x4e1   :  { %v12893_v20 = vadd.f32 %v5826_v11, %v5635_v17  ;;  %v5656_v28 = vpop.f32.mrf.mxu0  ;;  %v12895_v14 = vadd.f32 -3.0, %v7688_v3  ;;  %v7894_v34 = vsub.f32 3.0, %v12675_v39  ;;  %vm12900_vm0 = vcmp.ge.f32.partialorder %v16272_v15, %v12675_v39  ;;  %v12904_v32 = vpop.eup %8431  ;;  %v16278_v11 = vld [vmem:[#allocation57_spill] sm:$0xff]  ;;  %v16293_v39 = vld [vmem:[#allocation26_spill] sm:$0xff] }
 0x4e2   :  { %v16273_v22 = vmov 0  ;;  %16276 = vst [vmem:[#allocation62_spill] sm:$0xff] %v12904_v32  ;;  %v4919_v46 = vadd.f32 %v8424_v50, %v4915_v62  ;;  %v4900_v4 = vadd.f32 %v12885_v63, %v4896_v38  ;;  %v5657_v44 = vadd.f32 %v5656_v28, %v16277_v29  ;;  %v5833_v17 = vpop.f32.mrf.mxu1  ;;  %v16281_v38 = vld [vmem:[#allocation69_spill] sm:$0xff] }
 0x4e3   :  { %16271 = vst [vmem:[#allocation38_spill] sm:$0xff] %v12895_v14  ;;  %v16274_v22 = vsel %vm12900_vm0, 4294967295, %v16273_v22  ;;  %v7681_v42 = vadd.f32 %v7665_v54, %v16278_v11  ;;  %v12909_v3 = vpop.eup %8433  ;;  %v12911_v41 = vadd.f32 %v5833_v17, %v5641_v59  ;;  %v5658_v43 = vpop.f32.mrf.mxu0  ;;  %v7704_v15 = vsub.f32 %v12895_v14, %v16257_v53 }
 0x4e4   :  { %16275 = vst [vmem:[#allocation21_spill] sm:$0xff] %v16274_v22  ;;  %16279 = vst [vmem:[#allocation14_spill] sm:$0xff] %v12909_v3  ;;  %vm7864_vm11 = vcmp.lt.f32.partialorder %v16258_v6, %v12895_v14  ;;  %v12921_v62 = vpop.eup %8435  ;;  %8445 = vrcp.f32 %v4919_v46  ;;  %v4904_v54 = vadd.f32 %v12904_v32, %v4900_v4  ;;  %v5659_v59 = vadd.f32 %v5658_v43, %v16281_v38  ;;  %v5835_v28 = vpop.f32.mrf.mxu1  ;;  %v16288_v46 = vld [vmem:[#allocation72_spill] sm:$0xff] }
 0x4e5   :  { %16280 = vst [vmem:[#allocation16_spill] sm:$0xff] %v12921_v62  ;;  %vm16282_vm10 = vcmp.ge.f32.partialorder %v16258_v6, %v16257_v53  ;;  %v16283_v29 = vmov 0  ;;  %v7689_v17 = vmul.f32 6.0, %v7681_v42  ;;  %v12932_v11 = vpop.eup %8437  ;;  %v12934_v14 = vadd.f32 %v5835_v28, %v5643_v40  ;;  %v12936_v50 = vpop.f32.mrf.mxu0 }
 0x4e6   :  { %vm12928_vm13 = vmand %vm16282_vm10, %vm7864_vm11  ;;  %16286 = vst [vmem:[#allocation29_spill] sm:$0xff] %v12932_v11  ;;  %v12946_v43 = vsel %vm12900_vm0, %v7894_v34, %v12764_v27  ;;  %v8440_v38 = vpop.eup %8439  ;;  %v4908_v6 = vadd.f32 %v12909_v3, %v4904_v54  ;;  %v5842_v42 = vpop.f32.mrf.mxu1  ;;  %v16299_v3 = vld [vmem:[#allocation68_spill] sm:$0xff] }
 0x4e7   :  { %v16284_v29 = vsel %vm12928_vm13, 4294967295, %v16283_v29  ;;  %16287 = vst [vmem:[#allocation19_spill] sm:$0xff] %v12936_v50  ;;  %v12941_v4 = vsel %vm12928_vm13, %v7704_v15, %v16288_v46  ;;  %16290 = vst [vmem:[#allocation18_spill] sm:$0xff] %v12946_v43  ;;  %v12949_v53 = vadd.f32 -3.0, %v7689_v17  ;;  %v8442_v40 = vpop.eup %8441  ;;  %v4797_v28 = vmul.f32 6.0, %v8440_v38  ;;  %v5666_v61 = vpop.f32.mrf.mxu0  ;;  %v16295_v46 = vld [vmem:[#allocation40_spill] sm:$0xff] }
 0x4e8   :  { %16285 = vst [vmem:[#allocation37_spill] sm:$0xff] %v16284_v29  ;;  %16289 = vst [vmem:[#allocation46_spill] sm:$0xff] %v12941_v4  ;;  %v12951_v32 = vadd.f32 %v5842_v42, %v5649_v51  ;;  %v16294_v29 = vld [vmem:[#allocation58_spill] sm:$0xff]  ;;  %v4912_v15 = vadd.f32 %v12921_v62, %v4908_v6  ;;  %v5667_v4 = vadd.f32 %v5666_v61, %v16295_v46  ;;  %v5844_v27 = vpop.f32.mrf.mxu1  ;;  %v12961_v54 = vpop.eup %8443  ;;  %v16297_v17 = vld [vmem:[#allocation65_spill] sm:$0xff]  ;;  %v16301_v61 = vmov 0 }
 0x4e9   :  { %16291 = vst [vmem:[#allocation66_spill] sm:$0xff] %v12949_v53  ;;  %vm7861_vm10 = vcmp.ge.f32.partialorder %v16294_v29, %v16293_v39  ;;  %v7705_v34 = vsub.f32 %v12949_v53, %v16293_v39  ;;  %vm7865_vm11 = vcmp.lt.f32.partialorder %v16294_v29, %v12949_v53  ;;  %16296 = vst [vmem:[#allocation69_spill] sm:$0xff] %v12961_v54  ;;  %v16298_v38 = vld [vmem:[#allocation67_spill] sm:$0xff]  ;;  %v5672_v6 = vpop.f32.mrf.mxu0 }
 0x4ea   :  { %16292 = vst [vmem:[#allocation57_spill] sm:$0xff] %v12951_v32  ;;  %v4801_v51 = vmul.f32 %v16297_v17, %v4797_v28  ;;  %v4813_v42 = vmul.f32 %v16298_v38, %v4797_v28  ;;  %v4825_v22 = vmul.f32 %v16299_v3, %v4797_v28  ;;  %v16300_v43 = vld [vmem:[#allocation71_spill] sm:$0xff]  ;;  %vm12967_vm13 = vmand %vm7861_vm10, %vm7865_vm11  ;;  %v4916_v46 = vadd.f32 %v12932_v11, %v4912_v15  ;;  %v5851_v17 = vpop.f32.mrf.mxu1 }
 0x4eb   :  { %v4837_v13 = vmul.f32 %v16300_v43, %v4797_v28  ;;  %v16302_v61 = vsel %vm12967_vm13, 4294967295, %v16301_v61  ;;  %v4849_v39 = vmul.f32 %v12664_v36, %v4797_v28  ;;  %v4861_v29 = vmul.f32 %v12683_v7, %v4797_v28  ;;  %v5674_v10 = vpop.f32.mrf.mxu0 }
 0x4ec   :  { %16303 = vst [vmem:[#allocation72_spill] sm:$0xff] %v16302_v61  ;;  %v4873_v53 = vmul.f32 %v12692_v25, %v4797_v28  ;;  %v4808_v62 = vmul.f32 1.442695, %v4801_v51  ;;  %v4820_v38 = vmul.f32 1.442695, %v4813_v42  ;;  %v4885_v3 = vmul.f32 %v12705_v8, %v4797_v28  ;;  %v5853_v18 = vpop.f32.mrf.mxu1 }
 0x4ed   :  { %v4920_v43 = vadd.f32 %v8442_v40, %v4916_v46  ;;  %v4832_v50 = vmul.f32 1.442695, %v4825_v22  ;;  %v12977_v32 = vadd.f32 %v5844_v27, %v12891_v19  ;;  %v12979_v15 = vpop.f32.mrf.mxu0  ;;  %v5673_v36 = vadd.f32 %v5672_v6, %v12715_v12 }
 0x4ee   :  { %8447 = vpow2.f32 %v4808_v62  ;;  %v12982_v7 = vadd.f32 %v5851_v17, %v5657_v44  ;;  %v5675_v25 = vadd.f32 %v5674_v10, %v12718_v16  ;;  %v12985_v51 = vpop.f32.mrf.mxu1  ;;  %v4844_v8 = vmul.f32 1.442695, %v4837_v13 }
 0x4ef   :  { %8449 = vrcp.f32 %v4920_v43  ;;  %v4856_v40 = vmul.f32 1.442695, %v4849_v39  ;;  %v12987_v28 = vadd.f32 %v5853_v18, %v5659_v59  ;;  %v5682_v22 = vpop.f32.mrf.mxu0  ;;  %v4868_v62 = vmul.f32 1.442695, %v4861_v29  ;;  %v16306_v18 = vld [vmem:[#allocation25_spill] sm:$0xff] }
 0x4f0   :  { %8451 = vpow2.f32 %v4820_v38  ;;  %v5683_v19 = vadd.f32 %v5682_v22, %v12724_v1  ;;  %v5862_v27 = vpop.f32.mrf.mxu1  ;;  %v6262_v42 = vmul.f32 %v12961_v54, %v12753_v47  ;;  %v6466_v12 = vmul.f32 %v12961_v54, %v12766_v21 }
 0x4f1   :  { %v12994_v44 = vpop.eup %8445  ;;  %8453 = vpow2.f32 %v4832_v50  ;;  %v12996_v16 = vadd.f32 %v5862_v27, %v5667_v4  ;;  %v5688_v10 = vpop.f32.mrf.mxu0  ;;  %v6706_v39 = vmul.f32 %v12961_v54, %v12771_v24  ;;  %v13003_v1 = vsel %vm12967_vm13, %v7705_v34, %v16306_v18 }
 0x4f2   :  { %16304 = vst [vmem:[#allocation40_spill] sm:$0xff] %v12994_v44  ;;  %16307 = vst [vmem:[#allocation67_spill] sm:$0xff] %v13003_v1  ;;  %v4880_v13 = vmul.f32 1.442695, %v4873_v53  ;;  %v5689_v47 = vadd.f32 %v5688_v10, %v12740_v58  ;;  %v5869_v59 = vpop.f32.mrf.mxu1  ;;  %v6266_v29 = vmul.f32 0.992, %v6262_v42  ;;  %8455 = vpow2.f32 %v4844_v8 }
 0x4f3   :  { %16305 = vst [vmem:[#allocation65_spill] sm:$0xff] %v12996_v16  ;;  %v6470_v21 = vmul.f32 0.992, %v6466_v12  ;;  %v13006_v6 = vadd.f32 %v5869_v59, %v5673_v36  ;;  %v5690_v50 = vpop.f32.mrf.mxu0  ;;  %v6263_v4 = vmul.f32 %v12994_v44, %v12796_v9  ;;  %v6467_v24 = vmul.f32 %v12994_v44, %v12802_v45 }
 0x4f4   :  { %v4892_v46 = vmul.f32 1.442695, %v4885_v3  ;;  %v5691_v34 = vadd.f32 %v5690_v50, %v12743_v55  ;;  %v5871_v17 = vpop.f32.mrf.mxu1  ;;  %v6270_v53 = vadd.f32 0.001, %v6266_v29  ;;  %8457 = vpow2.f32 %v4856_v40 }
 0x4f5   :  { %16308 = vst [vmem:[#allocation68_spill] sm:$0xff] %v13006_v6  ;;  %v6474_v38 = vadd.f32 0.001, %v6470_v21  ;;  %v13013_v58 = vadd.f32 %v5871_v17, %v5675_v25  ;;  %v5983_v43 = vpop.f32.mrf.mxu0  ;;  %v6267_v8 = vmul.f32 0.992, %v6263_v4  ;;  %8459 = vpow2.f32 %v4868_v62 }
 0x4f6   :  { %v6471_v36 = vmul.f32 0.992, %v6467_v24  ;;  %v13015_v22 = vpop.f32.mrf.mxu1  ;;  %v6290_v27 = vmul.f32 6.0, %v6270_v53  ;;  %v6710_v42 = vmul.f32 0.992, %v6706_v39  ;;  %8461 = vpow2.f32 %v4880_v13 }
 0x4f7   :  { %16309 = vst [vmem:[#allocation71_spill] sm:$0xff] %v13013_v58  ;;  %v6482_v9 = vadd.f32 %v6474_v38, %v6270_v53  ;;  %v5985_v45 = vpop.f32.mrf.mxu0  ;;  %v6271_v3 = vadd.f32 0.001, %v6267_v8  ;;  %v13019_v55 = vmul.f32 %v12994_v44, %v12811_v31  ;;  %8463 = vpow2.f32 %v4892_v46 }
 0x4f8   :  { %v6475_v12 = vadd.f32 0.001, %v6471_v36  ;;  %v5880_v25 = vpop.f32.mrf.mxu1  ;;  %v5986_v40 = vadd.f32 %v5985_v45, %v12750_v0  ;;  %v6294_v10 = vadd.f32 -3.0, %v6290_v27  ;;  %v6714_v39 = vadd.f32 0.001, %v6710_v42 }
 0x4f9   :  { %v6494_v18 = vmul.f32 6.0, %v6482_v9  ;;  %v13022_v62 = vadd.f32 %v5880_v25, %v5683_v19  ;;  %v5990_v59 = vpop.f32.mrf.mxu0  ;;  %v6291_v29 = vmul.f32 6.0, %v6271_v3  ;;  %v5984_v25 = vadd.f32 %v5983_v43, %v12747_v5 }
 0x4fa   :  { %v13024_v21 = vadd.f32 %v6475_v12, %v6271_v3  ;;  %v5887_v50 = vpop.f32.mrf.mxu1  ;;  %v5991_v4 = vadd.f32 %v5990_v59, %v12755_v30  ;;  %v8137_v31 = vadd.f32 3.0, %v6294_v10  ;;  %v6678_v0 = vsel %vm11650_vm4, %v6294_v10, -3.0 }
 0x4fb   :  { %16310 = vst [vmem:[#allocation25_spill] sm:$0xff] %v13022_v62  ;;  %v13026_v13 = vpop.eup %8447  ;;  %v13029_v24 = vadd.f32 -3.0, %v6494_v18  ;;  %v13035_v19 = vadd.f32 %v5887_v50, %v5689_v47  ;;  %v5992_v53 = vpop.f32.mrf.mxu0  ;;  %v13037_v38 = vadd.f32 -3.0, %v6291_v29  ;;  %v13040_v36 = vadd.f32 %v6714_v39, %v6482_v9 }
 0x4fc   :  { %v13033_v17 = vpop.eup %8449  ;;  %v6495_v8 = vmul.f32 6.0, %v13024_v21  ;;  %v5889_v30 = vpop.f32.mrf.mxu1  ;;  %v5993_v42 = vadd.f32 %v5992_v53, %v12787_v57 }
 0x4fd   :  { %16312 = vst [vmem:[#allocation34_spill] sm:$0xff] %v13033_v17  ;;  %16313 = vst [vmem:[#allocation74_spill] sm:$0xff] %v13035_v19  ;;  %v13042_v27 = vpop.eup %8451  ;;  %v6506_v45 = vsub.f32 %v13029_v24, %v6294_v10  ;;  %v6264_v3 = vmul.f32 %v13033_v17, %v12856_v23  ;;  %v6468_v47 = vmul.f32 %v13033_v17, %v12871_v26  ;;  %v5997_v18 = vpop.f32.mrf.mxu0  ;;  %v6734_v58 = vmul.f32 6.0, %v13040_v36 }
 0x4fe   :  { %16314 = vst [vmem:[#allocation75_spill] sm:$0xff] %v13040_v36  ;;  %v4897_v12 = vadd.f32 %v13042_v27, %v13026_v13  ;;  %v13053_v9 = vadd.f32 %v5889_v30, %v5691_v34  ;;  %v13055_v59 = vadd.f32 -3.0, %v6495_v8  ;;  %v13057_v29 = vpop.eup %8453  ;;  %v6154_v57 = vpop.f32.mrf.mxu1  ;;  %v13077_v26 = vsel %vm11773_vm12, %v13029_v24, %v6678_v0 }
 0x4ff   :  { %v13061_v10 = vsel %vm11650_vm4, %v6506_v45, %v8137_v31  ;;  %v6268_v39 = vmul.f32 0.992, %v6264_v3  ;;  %v13067_v5 = vadd.f32 %v6154_v57, %v5984_v25  ;;  %v5999_v34 = vpop.f32.mrf.mxu0  ;;  %v6472_v53 = vmul.f32 0.992, %v6468_v47  ;;  %v13071_v8 = vpop.eup %8455  ;;  %16319 = vst [vmem:[#allocation56_spill] sm:$0xff] %v13077_v26 }
 0x500   :  { %16315 = vst [vmem:[#allocation76_spill] sm:$0xff] %v13053_v9  ;;  %v4901_v50 = vadd.f32 %v13057_v29, %v4897_v12  ;;  %v6507_v43 = vsub.f32 %v13055_v59, %v13037_v38  ;;  %16317 = vst [vmem:[#allocation22_spill] sm:$0xff] %v13071_v8  ;;  %v6156_v30 = vpop.f32.mrf.mxu1  ;;  %v8138_v31 = vadd.f32 3.0, %v13037_v38 }
 0x501   :  { %v6272_v45 = vadd.f32 0.001, %v6268_v39  ;;  %v6318_v12 = vand.u32 2147483647, %v13067_v5  ;;  %v6004_v25 = vpop.f32.mrf.mxu0  ;;  %v13081_v57 = vpop.eup %8457  ;;  %v13083_v61 = vadd.f32 %v6156_v30, %v5986_v40  ;;  %v6476_v9 = vadd.f32 0.001, %v6472_v53 }
 0x502   :  { %v4905_v3 = vadd.f32 %v13071_v8, %v4901_v50  ;;  %16320 = vst [vmem:[#allocation77_spill] sm:$0xff] %v13081_v57  ;;  %v13087_v47 = vsel %vm11709_vm7, %v6507_v43, %v8138_v31  ;;  %v13090_v39 = vadd.f32 %v6004_v25, %v12804_v56  ;;  %v6161_v11 = vpop.f32.mrf.mxu1  ;;  %v13092_v0 = vpop.eup %8459 }
 0x503   :  { %v6292_v44 = vmul.f32 6.0, %v6272_v45  ;;  %16321 = vst [vmem:[#allocation78_spill] sm:$0xff] %v13092_v0  ;;  %v6322_v26 = vsub.f32 0.0, %v6318_v12  ;;  %v13095_v8 = vadd.f32 %v6161_v11, %v5991_v4  ;;  %v6006_v19 = vpop.f32.mrf.mxu0  ;;  %v13097_v40 = vpop.eup %8461  ;;  %v6319_v30 = vand.u32 2147483647, %v13083_v61 }
 0x504   :  { %v4909_v50 = vadd.f32 %v13081_v57, %v4905_v3  ;;  %16322 = vst [vmem:[#allocation79_spill] sm:$0xff] %v13097_v40  ;;  %v6163_v31 = vpop.f32.mrf.mxu1  ;;  %v8464_v62 = vpop.eup %8463  ;;  %v5998_v3 = vadd.f32 %v5997_v18, %v12793_v48  ;;  %v13106_v53 = vadd.f32 %v6476_v9, %v6272_v45  ;;  %v13119_v45 = vadd.f32 -3.0, %v6734_v58 }
 0x505   :  { %v6296_v43 = vadd.f32 -3.0, %v6292_v44  ;;  %v6326_v25 = vmul.f32 1.442695, %v6322_v26  ;;  %v13101_v54 = vpop.f32.mrf.mxu0  ;;  %v6323_v11 = vsub.f32 0.0, %v6319_v30  ;;  %v6320_v4 = vand.u32 2147483647, %v13095_v8 }
 0x506   :  { %v4913_v56 = vadd.f32 %v13092_v0, %v4909_v50  ;;  %v6168_v12 = vpop.f32.mrf.mxu1  ;;  %v6007_v26 = vadd.f32 %v6006_v19, %v12807_v35  ;;  %v6496_v48 = vmul.f32 6.0, %v13106_v53  ;;  %v13115_v18 = vadd.f32 %v6163_v31, %v5993_v42  ;;  %16324 = vst [vmem:[#allocation53_spill] sm:$0xff] %v13119_v45 }
 0x507   :  { %8465 = vpow2.f32 %v6326_v25  ;;  %v6680_v6 = vsel %vm11806_vm14, %v6296_v43, -3.0  ;;  %v13112_v50 = vpop.f32.mrf.mxu0  ;;  %v6328_v0 = vmul.f32 1.442695, %v6323_v11  ;;  %v6324_v36 = vsub.f32 0.0, %v6320_v4 }
 0x508   :  { %v4917_v57 = vadd.f32 %v13097_v40, %v4913_v56  ;;  %v13117_v9 = vadd.f32 %v6168_v12, %v5998_v3  ;;  %v6170_v56 = vpop.f32.mrf.mxu1  ;;  %v13121_v40 = vadd.f32 -3.0, %v6496_v48  ;;  %v6711_v35 = vmul.f32 0.992, %v13019_v55 }
 0x509   :  { %8467 = vpow2.f32 %v6328_v0  ;;  %v6330_v25 = vmul.f32 1.442695, %v6324_v36  ;;  %v6000_v19 = vadd.f32 %v5999_v34, %v12799_v33  ;;  %v6321_v11 = vand.u32 2147483647, %v13115_v18  ;;  %v6018_v4 = vpop.f32.mrf.mxu0 }
 0x50a   :  { %v4921_v30 = vadd.f32 %v8464_v62, %v4917_v57  ;;  %v8139_v42 = vadd.f32 3.0, %v6296_v43  ;;  %v6508_v62 = vsub.f32 %v13121_v40, %v6296_v43  ;;  %v6522_v58 = vand.u32 2147483647, %v13117_v9  ;;  %v6175_v31 = vpop.f32.mrf.mxu1 }
 0x50b   :  { %v6325_v57 = vsub.f32 0.0, %v6321_v11  ;;  %v6746_v36 = vsub.f32 %v13119_v45, %v13029_v24  ;;  %v13130_v0 = vadd.f32 %v6170_v56, %v6000_v19  ;;  %v6715_v34 = vadd.f32 0.001, %v6711_v35 }
 0x50c   :  { %8469 = vrcp.f32 %v4921_v30  ;;  %v13134_v55 = vsel %vm11806_vm14, %v6508_v62, %v8139_v42  ;;  %v6526_v33 = vsub.f32 0.0, %v6522_v58  ;;  %v16325_v3 = vsel %vm11709_vm7, %v13037_v38, -3.0  ;;  %v6020_v30 = vpop.f32.mrf.mxu0  ;;  %v6177_v62 = vpop.f32.mrf.mxu1 }
 0x50d   :  { %8471 = vpow2.f32 %v6330_v25  ;;  %v13143_v12 = vsel %vm11830_vm1, %v13055_v59, %v16325_v3  ;;  %v6332_v48 = vmul.f32 1.442695, %v6325_v57  ;;  %v13148_v24 = vsel %vm11773_vm12, %v6746_v36, %v13061_v10 }
 0x50e   :  { %16327 = vst [vmem:[#allocation59_spill] sm:$0xff] %v13143_v12  ;;  %16328 = vst [vmem:[#allocation80_spill] sm:$0xff] %v13148_v24  ;;  %v6530_v56 = vmul.f32 1.442695, %v6526_v33  ;;  %v6523_v25 = vand.u32 2147483647, %v13130_v0  ;;  %v13152_v35 = vadd.f32 %v6715_v34, %v13024_v21  ;;  %v13155_v38 = vadd.f32 %v6018_v4, %v12839_v37 }
 0x50f   :  { %8473 = vpow2.f32 %v6332_v48  ;;  %v13158_v19 = vadd.f32 %v6175_v31, %v13090_v39  ;;  %v6708_v11 = vmul.f32 %v13033_v17, %v12885_v63  ;;  %v13165_v42 = vsel %vm11857_vm3, %v13121_v40, %v6680_v6 }
 0x510   :  { %16329 = vst [vmem:[#allocation81_spill] sm:$0xff] %v13152_v35  ;;  %16331 = vst [vmem:[#allocation13_spill] sm:$0xff] %v13165_v42  ;;  %8475 = vpow2.f32 %v6530_v56  ;;  %v6527_v58 = vsub.f32 0.0, %v6523_v25  ;;  %v6735_v21 = vmul.f32 6.0, %v13152_v35  ;;  %v13169_v37 = vadd.f32 %v6020_v30, %v12849_v2 }
 0x511   :  { %v6524_v4 = vand.u32 2147483647, %v13158_v19  ;;  %v13174_v63 = vadd.f32 %v6177_v62, %v6007_v26  ;;  %v6712_v6 = vmul.f32 0.992, %v6708_v11  ;;  %vm6313_vm13 = vcmp.ne.f32.partialorder %v13115_v18, %v13115_v18 }
 0x512   :  { %v6532_v57 = vmul.f32 1.442695, %v6527_v58  ;;  %v13172_v36 = vadd.f32 -3.0, %v6735_v21 }
 0x513   :  { %v6528_v33 = vsub.f32 0.0, %v6524_v4  ;;  %v6716_v62 = vadd.f32 0.001, %v6712_v6 }
 0x514   :  { %v8466_v39 = vpop.eup %8465  ;;  %16332 = vst [vmem:[#allocation82_spill] sm:$0xff] %v13172_v36  ;;  %8477 = vpow2.f32 %v6532_v57  ;;  %v6747_v34 = vsub.f32 %v13172_v36, %v13055_v59 }
 0x515   :  { %v6334_v31 = vadd.f32 1.0, %v8466_v39  ;;  %v6534_v48 = vmul.f32 1.442695, %v6528_v33  ;;  %v6337_v58 = vmul.f32 -0.5, %v8466_v39 }
 0x516   :  { %v8468_v3 = vpop.eup %8467  ;;  %v13184_v26 = vsel %vm11830_vm1, %v6747_v34, %v13087_v47  ;;  %v13193_v47 = vadd.f32 %v6716_v62, %v13106_v53 }
 0x517   :  { %8479 = vlog2.f32 %v6334_v31  ;;  %v6343_v56 = vadd.f32 1.0, %v8468_v3  ;;  %16334 = vst [vmem:[#allocation84_spill] sm:$0xff] %v13184_v26  ;;  %v6346_v57 = vmul.f32 -0.5, %v8468_v3  ;;  %v6338_v31 = vadd.f32 1.0, %v6337_v58 }
 0x518   :  { %8481 = vpow2.f32 %v6534_v48  ;;  %16335 = vst [vmem:[#allocation85_spill] sm:$0xff] %v13193_v47 }
 0x519   :  { %v13178_v2 = vpop.eup %8469  ;;  %8483 = vlog2.f32 %v6343_v56 }
 0x51a   :  { %16333 = vst [vmem:[#allocation83_spill] sm:$0xff] %v13178_v2  ;;  %v8472_v25 = vpop.eup %8471  ;;  %v6265_v11 = vmul.f32 %v13178_v2, %v13026_v13  ;;  %v6469_v59 = vmul.f32 %v13178_v2, %v13042_v27  ;;  %v6012_v27 = vadd.f32 %v13101_v54, %v12817_v49  ;;  %v6709_v53 = vmul.f32 %v13178_v2, %v13057_v29 }
 0x51b   :  { %v6352_v4 = vadd.f32 1.0, %v8472_v25  ;;  %v6355_v6 = vmul.f32 -0.5, %v8472_v25  ;;  %v6358_v54 = vand.u32 2147483647, %v8472_v25  ;;  %v6736_v29 = vmul.f32 6.0, %v13193_v47 }
 0x51c   :  { %v6269_v33 = vmul.f32 0.992, %v6265_v11  ;;  %v6473_v34 = vmul.f32 0.992, %v6469_v59  ;;  %v13200_v30 = vpop.eup %8473  ;;  %v6340_v11 = vand.u32 2147483647, %v8466_v39  ;;  %v6339_v2 = vmul.f32 %v8466_v39, %v6338_v31 }
 0x51d   :  { %8485 = vlog2.f32 %v6352_v4  ;;  %v13204_v62 = vpop.eup %8475  ;;  %v6347_v59 = vadd.f32 1.0, %v6346_v57  ;;  %v6349_v4 = vand.u32 2147483647, %v8468_v3  ;;  %v6361_v49 = vadd.f32 1.0, %v13200_v30  ;;  %v6182_v57 = vpop.f32.mrf.mxu1 }
 0x51e   :  { %v6273_v48 = vadd.f32 0.001, %v6269_v33  ;;  %v6477_v42 = vadd.f32 0.001, %v6473_v34  ;;  %v6538_v56 = vadd.f32 1.0, %v13204_v62  ;;  %v6356_v58 = vadd.f32 1.0, %v6355_v6 }
 0x51f   :  { %8487 = vlog2.f32 %v6361_v49  ;;  %vm13216_vm11 = vcmp.lt.f32.partialorder %v6340_v11, 0.0004427343  ;;  %v6348_v17 = vmul.f32 %v8468_v3, %v6347_v59  ;;  %vm13224_vm10 = vcmp.lt.f32.partialorder %v6349_v4, 0.0004427343 }
 0x520   :  { %v6293_v13 = vmul.f32 6.0, %v6273_v48  ;;  %v13207_v33 = vadd.f32 %v6477_v42, %v6273_v48  ;;  %8489 = vlog2.f32 %v6538_v56  ;;  %v6525_v48 = vand.u32 2147483647, %v13174_v63 }
 0x521   :  { %v13222_v21 = vpop.eup %8477  ;;  %vm13233_vm8 = vcmp.lt.f32.partialorder %v6358_v54, 0.0004427343  ;;  %v13240_v3 = vadd.f32 %v6182_v57, %v6012_v27  ;;  %v6357_v59 = vmul.f32 %v8472_v25, %v6356_v58  ;;  %v6364_v4 = vmul.f32 -0.5, %v13200_v30 }
 0x522   :  { %v13213_v34 = vadd.f32 -3.0, %v6293_v13  ;;  %v6497_v42 = vmul.f32 6.0, %v13207_v33  ;;  %v6547_v39 = vadd.f32 1.0, %v13222_v21  ;;  %v13243_v26 = vadd.f32 -3.0, %v6736_v29 }
 0x523   :  { %v6529_v35 = vsub.f32 0.0, %v6525_v48  ;;  %v6367_v58 = vand.u32 2147483647, %v13200_v30  ;;  %v6541_v29 = vmul.f32 -0.5, %v13204_v62  ;;  %v16351_v56 = vmax.f32 %v13095_v8, 0.0 }
 0x524   :  { %v6681_v11 = vsel %vm12015_vm5, %v13213_v34, -3.0  ;;  %v8480_v49 = vpop.eup %8479  ;;  %v13237_v47 = vadd.f32 -3.0, %v6497_v42  ;;  %v8140_v54 = vadd.f32 3.0, %v13213_v34  ;;  %8491 = vlog2.f32 %v6547_v39 }
 0x525   :  { %v6336_v31 = vmul.f32 0.6931472, %v8480_v49  ;;  %v13245_v36 = vpop.eup %8481  ;;  %v16343_v49 = vmax.f32 %v13067_v5, 0.0  ;;  %v6365_v39 = vadd.f32 1.0, %v6364_v4  ;;  %v6748_v12 = vsub.f32 %v13243_v26, %v13121_v40 }
 0x526   :  { %v6509_v42 = vsub.f32 %v13237_v47, %v13213_v34  ;;  %v8484_v27 = vpop.eup %8483  ;;  %v6556_v57 = vadd.f32 1.0, %v13245_v36  ;;  %v6544_v34 = vand.u32 2147483647, %v13204_v62  ;;  %v16345_v4 = vmax.f32 %v13083_v61, 0.0 }
 0x527   :  { %v6342_v25 = vsel %vm13216_vm11, %v6339_v2, %v6336_v31  ;;  %v6345_v45 = vmul.f32 0.6931472, %v8484_v27  ;;  %v6713_v2 = vmul.f32 0.992, %v6709_v53  ;;  %vm16344_vm11 = vcmp.ne.f32.partialorder %v13067_v5, %v13067_v5 }
 0x528   :  { %v6370_v24 = vadd.f32 %v6342_v25, %v16343_v49  ;;  %v13261_v16 = vsel %vm12015_vm5, %v6509_v42, %v8140_v54  ;;  %8493 = vlog2.f32 %v6556_v57  ;;  %v6536_v42 = vmul.f32 1.442695, %v6529_v35 }
 0x529   :  { %v6351_v27 = vsel %vm13224_vm10, %v6348_v17, %v6345_v45  ;;  %vm13279_vm2 = vcmp.lt.f32.partialorder %v6367_v58, 0.0004427343  ;;  %v6542_v53 = vadd.f32 1.0, %v6541_v29  ;;  %v6550_v45 = vmul.f32 -0.5, %v13222_v21 }
 0x52a   :  { %v8486_v48 = vpop.eup %8485  ;;  %v13270_v31 = vsel %vm16344_vm11, %v13067_v5, %v6370_v24  ;;  %v6371_v57 = vadd.f32 %v6351_v27, %v16345_v4  ;;  %vm13285_vm11 = vcmp.lt.f32.partialorder %v6544_v34, 0.0004427343  ;;  %v13293_v24 = vsel %vm11857_vm3, %v6748_v12, %v13134_v55 }
 0x52b   :  { %v6354_v54 = vmul.f32 0.6931472, %v8486_v48  ;;  %v6390_v25 = vand.u32 2147483647, %v13270_v31  ;;  %vm16350_vm10 = vcmp.ne.f32.partialorder %v13083_v61, %v13083_v61  ;;  %8495 = vpow2.f32 %v6536_v42 }
 0x52c   :  { %v13299_v13 = vsel %vm16350_vm10, %v13083_v61, %v6371_v57  ;;  %v8488_v58 = vpop.eup %8487  ;;  %v6366_v55 = vmul.f32 %v13200_v30, %v6365_v39  ;;  %v6559_v49 = vmul.f32 -0.5, %v13245_v36  ;;  %v6717_v34 = vadd.f32 0.001, %v6713_v2 }
 0x52d   :  { %v6360_v5 = vsel %vm13233_vm8, %v6357_v59, %v6354_v54  ;;  %v6394_v35 = vsub.f32 0.0, %v6390_v25  ;;  %vm6514_vm8 = vcmp.ne.f32.partialorder %v13117_v9, %v13117_v9  ;;  %v6391_v29 = vand.u32 2147483647, %v13299_v13  ;;  %v8490_v48 = vpop.eup %8489 }
 0x52e   :  { %v6372_v59 = vadd.f32 %v6360_v5, %v16351_v56  ;;  %vm16352_vm10 = vcmp.ne.f32.partialorder %v13095_v8, %v13095_v8  ;;  %v6363_v27 = vmul.f32 0.6931472, %v8488_v58  ;;  %v13317_v42 = vsel %vm12052_vm15, %v13237_v47, %v6681_v11 }
 0x52f   :  { %v6398_v12 = vmul.f32 1.442695, %v6394_v35  ;;  %16354 = vst [vmem:[#allocation23_spill] sm:$0xff] %v13317_v42  ;;  %v6395_v25 = vsub.f32 0.0, %v6391_v29  ;;  %v6543_v39 = vmul.f32 %v13204_v62, %v6542_v53  ;;  %v6551_v2 = vadd.f32 1.0, %v6550_v45 }
 0x530   :  { %v13312_v61 = vsel %vm16352_vm10, %v13095_v8, %v6372_v59  ;;  %v6369_v4 = vsel %vm13279_vm2, %v6366_v55, %v6363_v27  ;;  %v6540_v57 = vmul.f32 0.6931472, %v8490_v48  ;;  %v13324_v8 = vadd.f32 %v6717_v34, %v13207_v33 }
 0x531   :  { %v6392_v30 = vand.u32 2147483647, %v13312_v61  ;;  %8497 = vpow2.f32 %v6398_v12  ;;  %v6400_v5 = vmul.f32 1.442695, %v6395_v25  ;;  %v16356_v56 = vmax.f32 %v13115_v18, 0.0  ;;  %v8492_v58 = vpop.eup %8491 }
 0x532   :  { %16355 = vst [vmem:[#allocation30_spill] sm:$0xff] %v13324_v8  ;;  %v6553_v59 = vand.u32 2147483647, %v13222_v21  ;;  %v6546_v62 = vsel %vm13285_vm11, %v6543_v39, %v6540_v57  ;;  %v6560_v53 = vadd.f32 1.0, %v6559_v49  ;;  %v6737_v45 = vmul.f32 6.0, %v13324_v8 }
 0x533   :  { %v6396_v35 = vsub.f32 0.0, %v6392_v30  ;;  %v6373_v11 = vadd.f32 %v6369_v4, %v16356_v56  ;;  %v6762_v40 = vand.u32 2147483647, %v13240_v3  ;;  %8499 = vpow2.f32 %v6400_v5 }
 0x534   :  { %v16357_v55 = vmax.f32 %v13117_v9, 0.0  ;;  %v6549_v17 = vmul.f32 0.6931472, %v8492_v58  ;;  %v6552_v49 = vmul.f32 %v13222_v21, %v6551_v2  ;;  %v6562_v12 = vand.u32 2147483647, %v13245_v36 }
 0x535   :  { %v6402_v29 = vmul.f32 1.442695, %v6396_v35  ;;  %v13337_v33 = vsel %vm6313_vm13, %v13115_v18, %v6373_v11  ;;  %v8494_v27 = vpop.eup %8493  ;;  %v13350_v18 = vadd.f32 -3.0, %v6737_v45  ;;  %v6766_v30 = vsub.f32 0.0, %v6762_v40  ;;  %v6025_v35 = vpop.f32.mrf.mxu0 }
 0x536   :  { %v6574_v34 = vadd.f32 %v6546_v62, %v16357_v55  ;;  %v6393_v48 = vand.u32 2147483647, %v13337_v33  ;;  %vm6554_vm13 = vcmp.lt.f32.partialorder %v6553_v59, 0.0004427343  ;;  %v6561_v57 = vmul.f32 %v13245_v36, %v6560_v53 }
 0x537   :  { %8501 = vpow2.f32 %v6402_v29  ;;  %16358 = vst [vmem:[#allocation86_spill] sm:$0xff] %v13350_v18  ;;  %v6555_v21 = vsel %vm6554_vm13, %v6552_v49, %v6549_v17  ;;  %v6558_v2 = vmul.f32 0.6931472, %v8494_v27  ;;  %v6749_v5 = vsub.f32 %v13350_v18, %v13237_v47 }
 0x538   :  { %v13348_v25 = vsel %vm6514_vm8, %v13117_v9, %v6574_v34  ;;  %v6397_v39 = vsub.f32 0.0, %v6393_v48  ;;  %v6770_v56 = vmul.f32 1.442695, %v6766_v30  ;;  %v16359_v9 = vmax.f32 %v13130_v0, 0.0  ;;  %v13358_v45 = vpop.eup %8495  ;;  %v6027_v48 = vpop.f32.mrf.mxu0 }
 0x539   :  { %v6594_v4 = vand.u32 2147483647, %v13348_v25  ;;  %vm6563_vm2 = vcmp.lt.f32.partialorder %v6562_v12, 0.0004427343  ;;  %vm6515_vm11 = vcmp.ne.f32.partialorder %v13130_v0, %v13130_v0  ;;  %v13365_v36 = vsel %vm12052_vm15, %v6749_v5, %v13261_v16  ;;  %v6184_v12 = vpop.f32.mrf.mxu1 }
 0x53a   :  { %v6404_v11 = vmul.f32 1.442695, %v6397_v39  ;;  %v6575_v62 = vadd.f32 %v6555_v21, %v16359_v9  ;;  %v6564_v59 = vsel %vm6563_vm2, %v6561_v57, %v6558_v2  ;;  %16360 = vst [vmem:[#allocation87_spill] sm:$0xff] %v13365_v36  ;;  %8503 = vpow2.f32 %v6770_v56  ;;  %v6032_v57 = vpop.f32.mrf.mxu0 }
 0x53b   :  { %v6598_v58 = vsub.f32 0.0, %v6594_v4  ;;  %v16361_v40 = vmax.f32 %v13158_v19, 0.0  ;;  %vm6516_vm8 = vcmp.ne.f32.partialorder %v13158_v19, %v13158_v19  ;;  %v6565_v34 = vadd.f32 1.0, %v13358_v45 }
 0x53c   :  { %8505 = vpow2.f32 %v6404_v11  ;;  %v13368_v53 = vsel %vm6515_vm11, %v13130_v0, %v6575_v62  ;;  %v6014_v30 = vadd.f32 %v13112_v50, %v12831_v60  ;;  %vm16376_vm2 = vcmp.ne.f32.partialorder %v13270_v31, %v13270_v31 }
 0x53d   :  { %v6602_v47 = vmul.f32 1.442695, %v6598_v58  ;;  %v6576_v29 = vadd.f32 %v6564_v59, %v16361_v40  ;;  %v6595_v55 = vand.u32 2147483647, %v13368_v53  ;;  %v6568_v40 = vmul.f32 -0.5, %v13358_v45 }
 0x53e   :  { %v8498_v17 = vpop.eup %8497  ;;  %v13388_v5 = vadd.f32 %v6184_v12, %v6014_v30  ;;  %v13403_v12 = vadd.f32 %v6032_v57, %v12911_v41  ;;  %vm6385_vm0 = vcmp.ne.f32.partialorder %v13337_v33, %v13337_v33 }
 0x53f   :  { %8507 = vpow2.f32 %v6602_v47  ;;  %v13377_v16 = vsel %vm6516_vm8, %v13158_v19, %v6576_v29  ;;  %v6599_v49 = vsub.f32 0.0, %v6595_v55  ;;  %v6406_v27 = vadd.f32 1.0, %v8498_v17  ;;  %v6189_v47 = vpop.f32.mrf.mxu1  ;;  %v6034_v29 = vpop.f32.mrf.mxu0 }
 0x540   :  { %v6596_v0 = vand.u32 2147483647, %v13377_v16  ;;  %8509 = vlog2.f32 %v6565_v34  ;;  %v13382_v21 = vpop.eup %8499  ;;  %v13386_v19 = vadd.f32 %v6025_v35, %v12873_v52  ;;  %v6409_v11 = vmul.f32 -0.5, %v8498_v17 }
 0x541   :  { %v6604_v39 = vmul.f32 1.442695, %v6599_v49  ;;  %8511 = vlog2.f32 %v6406_v27  ;;  %v6415_v58 = vadd.f32 1.0, %v13382_v21  ;;  %v6412_v55 = vand.u32 2147483647, %v8498_v17  ;;  %v6191_v35 = vpop.f32.mrf.mxu1 }
 0x542   :  { %v6600_v4 = vsub.f32 0.0, %v6596_v0  ;;  %v6571_v34 = vand.u32 2147483647, %v13358_v45  ;;  %v6763_v49 = vand.u32 2147483647, %v13388_v5  ;;  %v6410_v0 = vadd.f32 1.0, %v6409_v11 }
 0x543   :  { %8513 = vpow2.f32 %v6604_v39  ;;  %v13406_v27 = vadd.f32 %v6189_v47, %v13155_v38  ;;  %v6418_v11 = vmul.f32 -0.5, %v13382_v21  ;;  %v6569_v57 = vadd.f32 1.0, %v6568_v40 }
 0x544   :  { %v13392_v60 = vpop.eup %8501  ;;  %v6606_v62 = vmul.f32 1.442695, %v6600_v4  ;;  %8515 = vlog2.f32 %v6415_v58  ;;  %v13412_v4 = vadd.f32 %v6027_v48, %v12893_v20  ;;  %v6767_v58 = vsub.f32 0.0, %v6763_v49 }
 0x545   :  { %v6424_v52 = vadd.f32 1.0, %v13392_v60  ;;  %v6421_v47 = vand.u32 2147483647, %v13382_v21  ;;  %vm13422_vm10 = vcmp.lt.f32.partialorder %v6571_v34, 0.0004427343  ;;  %v6419_v50 = vadd.f32 1.0, %v6418_v11 }
 0x546   :  { %8517 = vpow2.f32 %v6606_v62  ;;  %v13415_v62 = vadd.f32 %v6034_v29, %v12934_v14  ;;  %v6411_v14 = vmul.f32 %v8498_v17, %v6410_v0  ;;  %vm13428_vm13 = vcmp.lt.f32.partialorder %v6412_v55, 0.0004427343 }
 0x547   :  { %8519 = vlog2.f32 %v6424_v52  ;;  %v13408_v30 = vpop.eup %8503  ;;  %v6427_v52 = vmul.f32 -0.5, %v13392_v60  ;;  %v6772_v40 = vmul.f32 1.442695, %v6767_v58  ;;  %v6430_v17 = vand.u32 2147483647, %v13392_v60 }
 0x548   :  { %v6778_v38 = vadd.f32 1.0, %v13408_v30  ;;  %v6781_v34 = vmul.f32 -0.5, %v13408_v30  ;;  %v6570_v55 = vmul.f32 %v13358_v45, %v6569_v57  ;;  %vm13438_vm11 = vcmp.lt.f32.partialorder %v6421_v47, 0.0004427343 }
 0x549   :  { %v8506_v59 = vpop.eup %8505  ;;  %v6428_v58 = vadd.f32 1.0, %v6427_v52  ;;  %v6784_v56 = vand.u32 2147483647, %v13408_v30  ;;  %v6764_v45 = vand.u32 2147483647, %v13406_v27  ;;  %v13449_v57 = vadd.f32 %v6191_v35, %v13169_v37 }
 0x54a   :  { %v6433_v39 = vadd.f32 1.0, %v8506_v59  ;;  %8521 = vlog2.f32 %v6778_v38  ;;  %v6436_v49 = vmul.f32 -0.5, %v8506_v59  ;;  %v6439_v11 = vand.u32 2147483647, %v8506_v59 }
 0x54b   :  { %v6420_v2 = vmul.f32 %v13382_v21, %v6419_v50  ;;  %vm13458_vm8 = vcmp.lt.f32.partialorder %v6430_v17, 0.0004427343  ;;  %v6429_v20 = vmul.f32 %v13392_v60, %v6428_v58  ;;  %v16370_v21 = vmax.f32 %v13174_v63, 0.0 }
 0x54c   :  { %v13426_v48 = vpop.eup %8507  ;;  %8523 = vlog2.f32 %v6433_v39  ;;  %v16371_v17 = vmax.f32 %v13270_v31, 0.0  ;;  %v6768_v29 = vsub.f32 0.0, %v6764_v45 }
 0x54d   :  { %v6610_v41 = vadd.f32 1.0, %v13426_v48  ;;  %v8510_v9 = vpop.eup %8509  ;;  %8525 = vpow2.f32 %v6772_v40  ;;  %v6613_v37 = vmul.f32 -0.5, %v13426_v48 }
 0x54e   :  { %v6567_v39 = vmul.f32 0.6931472, %v8510_v9  ;;  %v8512_v38 = vpop.eup %8511  ;;  %v6782_v9 = vadd.f32 1.0, %v6781_v34  ;;  %v6616_v34 = vand.u32 2147483647, %v13426_v48 }
 0x54f   :  { %8527 = vlog2.f32 %v6610_v41  ;;  %v6408_v52 = vmul.f32 0.6931472, %v8512_v38  ;;  %v6437_v41 = vadd.f32 1.0, %v6436_v49  ;;  %v6614_v45 = vadd.f32 1.0, %v6613_v37 }
 0x550   :  { %v13451_v47 = vpop.eup %8513  ;;  %v6573_v40 = vsel %vm13422_vm10, %v6570_v55, %v6567_v39  ;;  %vm13474_vm10 = vcmp.lt.f32.partialorder %v6784_v56, 0.0004427343  ;;  %vm13496_vm6 = vcmp.lt.f32.partialorder %v6616_v34, 0.0004427343 }
 0x551   :  { %v6619_v35 = vadd.f32 1.0, %v13451_v47  ;;  %v8516_v36 = vpop.eup %8515  ;;  %v6414_v49 = vsel %vm13428_vm13, %v6411_v14, %v6408_v52  ;;  %v6577_v50 = vadd.f32 %v6573_v40, %v16370_v21  ;;  %v6438_v52 = vmul.f32 %v8506_v59, %v6437_v41 }
 0x552   :  { %v6442_v39 = vadd.f32 %v6414_v49, %v16371_v17  ;;  %v6417_v38 = vmul.f32 0.6931472, %v8516_v36  ;;  %vm13478_vm13 = vcmp.lt.f32.partialorder %v6439_v11, 0.0004427343  ;;  %v6783_v40 = vmul.f32 %v13408_v30, %v6782_v9 }
 0x553   :  { %v13470_v55 = vpop.eup %8517  ;;  %8529 = vlog2.f32 %v6619_v35  ;;  %v16377_v59 = vmax.f32 %v13299_v13, 0.0  ;;  %v6774_v41 = vmul.f32 1.442695, %v6768_v29  ;;  %v6615_v17 = vmul.f32 %v13426_v48, %v6614_v45 }
 0x554   :  { %v8520_v14 = vpop.eup %8519  ;;  %v6628_v58 = vadd.f32 1.0, %v13470_v55  ;;  %v6446_v36 = vsel %vm16376_vm2, %v13270_v31, %v6442_v39  ;;  %v6423_v56 = vsel %vm13438_vm11, %v6420_v2, %v6417_v38  ;;  %v6622_v2 = vmul.f32 -0.5, %v13451_v47 }
 0x555   :  { %v6426_v35 = vmul.f32 0.6931472, %v8520_v14  ;;  %v13490_v49 = vadd.f32 0.001, %v6446_v36  ;;  %v6443_v11 = vadd.f32 %v6423_v56, %v16377_v59  ;;  %vm16380_vm11 = vcmp.ne.f32.partialorder %v13174_v63, %v13174_v63 }
 0x556   :  { %8531 = vlog2.f32 %v6628_v58  ;;  %v13509_v0 = vsel %vm16380_vm11, %v13174_v63, %v6577_v50  ;;  %vm16381_vm2 = vcmp.ne.f32.partialorder %v13299_v13, %v13299_v13  ;;  %v6625_v63 = vand.u32 2147483647, %v13451_v47 }
 0x557   :  { %v6432_v31 = vsel %vm13458_vm8, %v6429_v20, %v6426_v35  ;;  %v8522_v9 = vpop.eup %8521  ;;  %v6686_v37 = vsel %vm11650_vm4, %v13490_v49, 1.0  ;;  %v6447_v42 = vsel %vm16381_vm2, %v13299_v13, %v6443_v11  ;;  %v16382_v20 = vmax.f32 %v13312_v61, 0.0 }
 0x558   :  { %vm6586_vm8 = vcmp.ne.f32.partialorder %v13348_v25, %v13348_v25  ;;  %v13523_v50 = vadd.f32 0.001, %v6447_v42  ;;  %v6631_v39 = vmul.f32 -0.5, %v13470_v55  ;;  %v6597_v38 = vand.u32 2147483647, %v13509_v0 }
 0x559   :  { %v6444_v34 = vadd.f32 %v6432_v31, %v16382_v20  ;;  %v8524_v21 = vpop.eup %8523  ;;  %vm16383_vm2 = vcmp.ne.f32.partialorder %v13312_v61, %v13312_v61  ;;  %v6780_v58 = vmul.f32 0.6931472, %v8522_v9  ;;  %8533 = vpow2.f32 %v6774_v41 }
 0x55a   :  { %v13528_v29 = vpop.eup %8525  ;;  %v6435_v14 = vmul.f32 0.6931472, %v8524_v21  ;;  %v6687_v56 = vsel %vm11709_vm7, %v13523_v50, 1.0  ;;  %v6601_v35 = vsub.f32 0.0, %v6597_v38  ;;  %v6623_v31 = vadd.f32 1.0, %v6622_v2  ;;  %v6196_v38 = vpop.f32.mrf.mxu1 }
 0x55b   :  { %v6448_v13 = vsel %vm16383_vm2, %v13312_v61, %v6444_v34  ;;  %v6787_v45 = vadd.f32 1.0, %v13528_v29  ;;  %v6786_v61 = vsel %vm13474_vm10, %v6783_v40, %v6780_v58  ;;  %v16384_v9 = vmax.f32 %v13337_v33, 0.0 }
 0x55c   :  { %v8528_v36 = vpop.eup %8527  ;;  %v13537_v48 = vadd.f32 0.001, %v6448_v13  ;;  %v6441_v59 = vsel %vm13478_vm13, %v6438_v52, %v6435_v14  ;;  %v6608_v20 = vmul.f32 1.442695, %v6601_v35  ;;  %v16385_v34 = vmax.f32 %v13240_v3, 0.0 }
 0x55d   :  { %v6612_v11 = vmul.f32 0.6931472, %v8528_v36  ;;  %v6445_v42 = vadd.f32 %v6441_v59, %v16384_v9  ;;  %v6632_v60 = vadd.f32 1.0, %v6631_v39  ;;  %v6634_v2 = vand.u32 2147483647, %v13470_v55 }
 0x55e   :  { %v6688_v41 = vsel %vm11806_vm14, %v13537_v48, 1.0  ;;  %v6814_v21 = vadd.f32 %v6786_v61, %v16385_v34  ;;  %8535 = vlog2.f32 %v6787_v45  ;;  %v16386_v40 = vmax.f32 %v13348_v25, 0.0 }
 0x55f   :  { %v6618_v52 = vsel %vm13496_vm6, %v6615_v17, %v6612_v11  ;;  %v6449_v18 = vsel %vm6385_vm0, %v13337_v33, %v6445_v42  ;;  %8537 = vpow2.f32 %v6608_v20  ;;  %vm16387_vm10 = vcmp.ne.f32.partialorder %v13240_v3, %v13240_v3 }
 0x560   :  { %v6646_v13 = vadd.f32 %v6618_v52, %v16386_v40  ;;  %v13564_v14 = vsel %vm16387_vm10, %v13240_v3, %v6814_v21  ;;  %v8530_v30 = vpop.eup %8529  ;;  %v13566_v17 = vadd.f32 0.001, %v6449_v18  ;;  %vm6587_vm6 = vcmp.ne.f32.partialorder %v13368_v53, %v13368_v53 }
 0x561   :  { %v6834_v39 = vand.u32 2147483647, %v13564_v14  ;;  %v13572_v33 = vadd.f32 %v6196_v38, %v13386_v19  ;;  %v6621_v36 = vmul.f32 0.6931472, %v8530_v30  ;;  %v6624_v3 = vmul.f32 %v13451_v47, %v6623_v31 }
 0x562   :  { %v6650_v58 = vsel %vm6586_vm8, %v13348_v25, %v6646_v13  ;;  %vm6626_vm0 = vcmp.lt.f32.partialorder %v6625_v63, 0.0004427343  ;;  %v6689_v35 = vsel %vm12015_vm5, %v13566_v17, 1.0  ;;  %vm13584_vm13 = vcmp.lt.f32.partialorder %v6634_v2, 0.0004427343  ;;  %v6198_v63 = vpop.f32.mrf.mxu1 }
 0x563   :  { %v13582_v45 = vadd.f32 0.001, %v6650_v58  ;;  %v6838_v19 = vsub.f32 0.0, %v6834_v39  ;;  %v8532_v11 = vpop.eup %8531  ;;  %v6627_v61 = vsel %vm6626_vm0, %v6624_v3, %v6621_v36  ;;  %v6633_v9 = vmul.f32 %v13470_v55, %v6632_v60 }
 0x564   :  { %v6790_v25 = vmul.f32 -0.5, %v13528_v29  ;;  %v6765_v47 = vand.u32 2147483647, %v13449_v57  ;;  %v16390_v20 = vmax.f32 %v13368_v53, 0.0  ;;  %v6630_v21 = vmul.f32 0.6931472, %v8532_v11 }
 0x565   :  { %v6690_v31 = vsel %vm11650_vm4, %v13582_v45, %v13490_v49  ;;  %v13598_v42 = vsel %vm11773_vm12, %v13582_v45, %v6686_v37  ;;  %v6584_v55 = vmax.f32 %v13377_v16, 0.0  ;;  %v6842_v38 = vmul.f32 1.442695, %v6838_v19 }
 0x566   :  { %v6647_v34 = vadd.f32 %v6627_v61, %v16390_v20  ;;  %v6769_v52 = vsub.f32 0.0, %v6765_v47  ;;  %v7002_v60 = vand.u32 2147483647, %v13572_v33  ;;  %vm6588_vm11 = vcmp.ne.f32.partialorder %v13377_v16, %v13377_v16  ;;  %v13615_v40 = vpop.eup %8533  ;;  %v6203_v61 = vpop.f32.mrf.mxu1 }
 0x567   :  { %v6636_v37 = vsel %vm13584_vm13, %v6633_v9, %v6630_v21  ;;  %v13613_v18 = vadd.f32 %v6198_v63, %v13412_v4  ;;  %8539 = vpow2.f32 %v6842_v38  ;;  %v6791_v58 = vadd.f32 1.0, %v6790_v25 }
 0x568   :  { %v6651_v2 = vsel %vm6587_vm6, %v13368_v53, %v6647_v34  ;;  %v6648_v30 = vadd.f32 %v6636_v37, %v6584_v55  ;;  %v6776_v39 = vmul.f32 1.442695, %v6769_v52  ;;  %v6793_v36 = vand.u32 2147483647, %v13528_v29 }
 0x569   :  { %v13617_v13 = vadd.f32 0.001, %v6651_v2  ;;  %v6796_v53 = vadd.f32 1.0, %v13615_v40  ;;  %v7006_v3 = vsub.f32 0.0, %v7002_v60  ;;  %v7003_v47 = vand.u32 2147483647, %v13613_v18  ;;  %v6205_v2 = vpop.f32.mrf.mxu1 }
 0x56a   :  { %v6652_v19 = vsel %vm6588_vm11, %v13377_v16, %v6648_v30  ;;  %8541 = vpow2.f32 %v6776_v39  ;;  %v6792_v34 = vmul.f32 %v13528_v29, %v6791_v58  ;;  %v6751_v55 = vmax.f32 %v13388_v5, 0.0  ;;  %v6039_v29 = vpop.f32.mrf.mxu0 }
 0x56b   :  { %v13632_v4 = vsel %vm11830_vm1, %v13617_v13, %v6687_v56  ;;  %v13635_v11 = vadd.f32 0.001, %v6652_v19  ;;  %8543 = vlog2.f32 %v6796_v53  ;;  %v8536_v9 = vpop.eup %8535  ;;  %v7010_v25 = vmul.f32 1.442695, %v7006_v3  ;;  %v6210_v53 = vpop.f32.mrf.mxu1  ;;  %v16391_v3 = vld [vmem:[#allocation57_spill] sm:$0xff] }
 0x56c   :  { %v13638_v63 = vpop.eup %8537  ;;  %v6789_v56 = vmul.f32 0.6931472, %v8536_v9  ;;  %vm6794_vm8 = vcmp.lt.f32.partialorder %v6793_v36, 0.0004427343  ;;  %v7007_v52 = vsub.f32 0.0, %v7003_v47  ;;  %v13657_v60 = vadd.f32 %v6203_v61, %v13403_v12  ;;  %v16392_v47 = vld [vmem:[#allocation36_spill] sm:$0xff]  ;;  %v6041_v20 = vpop.f32.mrf.mxu0 }
 0x56d   :  { %v13651_v16 = vsel %vm11857_vm3, %v13635_v11, %v6688_v41  ;;  %v6637_v21 = vadd.f32 1.0, %v13638_v63  ;;  %8545 = vpow2.f32 %v7010_v25  ;;  %vm6755_vm2 = vcmp.ne.f32.partialorder %v13388_v5, %v13388_v5 }
 0x56e   :  { %v6795_v38 = vsel %vm6794_vm8, %v6792_v34, %v6789_v56  ;;  %v6799_v41 = vmul.f32 -0.5, %v13615_v40  ;;  %v7012_v30 = vmul.f32 1.442695, %v7007_v52  ;;  %v7004_v39 = vand.u32 2147483647, %v13657_v60  ;;  %v16393_v56 = vld [vmem:[#allocation19_spill] sm:$0xff] }
 0x56f   :  { %8547 = vlog2.f32 %v6637_v21  ;;  %v6815_v37 = vadd.f32 %v6795_v38, %v6751_v55  ;;  %v13667_v36 = vadd.f32 %v6205_v2, %v13415_v62  ;;  %v6040_v19 = vadd.f32 %v6039_v29, %v16391_v3  ;;  %v16394_v62 = vld [vmem:[#allocation41_spill] sm:$0xff] }
 0x570   :  { %8549 = vpow2.f32 %v7012_v30  ;;  %v7008_v61 = vsub.f32 0.0, %v7004_v39  ;;  %v5665_v34 = vadd.f32 %v16393_v56, %v16392_v47  ;;  %v6800_v55 = vadd.f32 1.0, %v6799_v41 }
 0x571   :  { %v13664_v58 = vsel %vm6755_vm2, %v13388_v5, %v6815_v37  ;;  %v7005_v9 = vand.u32 2147483647, %v13667_v36  ;;  %v6640_v5 = vmul.f32 -0.5, %v13638_v63  ;;  %v5681_v38 = vadd.f32 %v12979_v15, %v16394_v62 }
 0x572   :  { %v6835_v12 = vand.u32 2147483647, %v13664_v58  ;;  %v6802_v2 = vand.u32 2147483647, %v13615_v40  ;;  %v13681_v37 = vadd.f32 %v6210_v53, %v6040_v19  ;;  %v13686_v30 = vadd.f32 %v12985_v51, %v5665_v34 }
 0x573   :  { %v7014_v3 = vmul.f32 1.442695, %v7008_v61  ;;  %v7009_v47 = vsub.f32 0.0, %v7005_v9  ;;  %v13689_v41 = vadd.f32 %v13015_v22, %v5681_v38  ;;  %v6752_v15 = vmax.f32 %v13406_v27, 0.0 }
 0x574   :  { %v13672_v25 = vpop.eup %8539  ;;  %v6839_v21 = vsub.f32 0.0, %v6835_v12  ;;  %v6641_v62 = vadd.f32 1.0, %v6640_v5  ;;  %v6801_v19 = vmul.f32 %v13615_v40, %v6800_v55  ;;  %vm6803_vm10 = vcmp.lt.f32.partialorder %v6802_v2, 0.0004427343  ;;  %v6212_v5 = vpop.f32.mrf.mxu1 }
 0x575   :  { %v6850_v52 = vadd.f32 1.0, %v13672_v25  ;;  %v7016_v51 = vmul.f32 1.442695, %v7009_v47  ;;  %v7242_v61 = vand.u32 2147483647, %v13681_v37  ;;  %vm6756_vm6 = vcmp.ne.f32.partialorder %v13406_v27, %v13406_v27 }
 0x576   :  { %v6844_v39 = vmul.f32 1.442695, %v6839_v21  ;;  %v6643_v22 = vand.u32 2147483647, %v13638_v63  ;;  %v6753_v38 = vmax.f32 %v13449_v57, 0.0  ;;  %v6042_v55 = vadd.f32 %v6041_v20, %v12977_v32 }
 0x577   :  { %v13683_v29 = vpop.eup %8541  ;;  %8551 = vlog2.f32 %v6850_v52  ;;  %v6642_v2 = vmul.f32 %v13638_v63, %v6641_v62  ;;  %v7246_v47 = vsub.f32 0.0, %v7242_v61  ;;  %vm6589_vm0 = vcmp.ne.f32.partialorder %v13509_v0, %v13509_v0 }
 0x578   :  { %v8544_v56 = vpop.eup %8543  ;;  %v6805_v12 = vadd.f32 1.0, %v13683_v29  ;;  %8553 = vpow2.f32 %v6844_v39  ;;  %v6853_v39 = vmul.f32 -0.5, %v13672_v25  ;;  %vm6644_vm13 = vcmp.lt.f32.partialorder %v6643_v22, 0.0004427343 }
 0x579   :  { %v6798_v53 = vmul.f32 0.6931472, %v8544_v56  ;;  %v6822_v62 = vmax.f32 %v13564_v14, 0.0  ;;  %vm6826_vm11 = vcmp.ne.f32.partialorder %v13564_v14, %v13564_v14  ;;  %v6856_v22 = vand.u32 2147483647, %v13672_v25 }
 0x57a   :  { %8555 = vlog2.f32 %v6805_v12  ;;  %v13695_v9 = vpop.eup %8545  ;;  %vm6757_vm8 = vcmp.ne.f32.partialorder %v13449_v57, %v13449_v57  ;;  %vm6827_vm4 = vcmp.ne.f32.partialorder %v13664_v58, %v13664_v58 }
 0x57b   :  { %v6804_v34 = vsel %vm6803_vm10, %v6801_v19, %v6798_v53  ;;  %8557 = vpow2.f32 %v7014_v3  ;;  %v7018_v40 = vadd.f32 1.0, %v13695_v9  ;;  %v13708_v3 = vadd.f32 %v6212_v5, %v6042_v55  ;;  %v6046_v5 = vpop.f32.mrf.mxu0 }
 0x57c   :  { %v6816_v21 = vadd.f32 %v6804_v34, %v6752_v15  ;;  %v8548_v52 = vpop.eup %8547  ;;  %8559 = vpow2.f32 %v7016_v51  ;;  %v6585_v15 = vmax.f32 %v13509_v0, 0.0  ;;  %v6808_v53 = vmul.f32 -0.5, %v13683_v29 }
 0x57d   :  { %v6639_v56 = vmul.f32 0.6931472, %v8548_v52  ;;  %8561 = vlog2.f32 %v7018_v40  ;;  %v13714_v63 = vpop.eup %8549  ;;  %v6854_v51 = vadd.f32 1.0, %v6853_v39  ;;  %v6811_v52 = vand.u32 2147483647, %v13683_v29 }
 0x57e   :  { %v13706_v12 = vsel %vm6756_vm6, %v13406_v27, %v6816_v21  ;;  %v7250_v27 = vmul.f32 1.442695, %v7246_v47  ;;  %v7027_v34 = vadd.f32 1.0, %v13714_v63  ;;  %v7243_v21 = vand.u32 2147483647, %v13708_v3 }
 0x57f   :  { %v6836_v32 = vand.u32 2147483647, %v13706_v12  ;;  %v6645_v20 = vsel %vm6644_vm13, %v6642_v2, %v6639_v56  ;;  %v6809_v39 = vadd.f32 1.0, %v6808_v53  ;;  %v6990_v47 = vmax.f32 %v13572_v33, 0.0 }
 0x580   :  { %v6649_v19 = vadd.f32 %v6645_v20, %v6585_v15  ;;  %8563 = vpow2.f32 %v7250_v27  ;;  %v7247_v56 = vsub.f32 0.0, %v7243_v21  ;;  %v7021_v20 = vmul.f32 -0.5, %v13695_v9  ;;  %v6048_v21 = vpop.f32.mrf.mxu0 }
 0x581   :  { %v6840_v61 = vsub.f32 0.0, %v6836_v32  ;;  %8565 = vlog2.f32 %v7027_v34  ;;  %v6855_v32 = vmul.f32 %v13672_v25, %v6854_v51  ;;  %vm6857_vm2 = vcmp.lt.f32.partialorder %v6856_v22, 0.0004427343 }
 0x582   :  { %v6653_v40 = vsel %vm6589_vm0, %v13509_v0, %v6649_v19  ;;  %v13736_v0 = vadd.f32 %v6046_v5, %v12982_v7  ;;  %v7252_v51 = vmul.f32 1.442695, %v7247_v56  ;;  %vm13754_vm10 = vcmp.lt.f32.partialorder %v6811_v52, 0.0004427343 }
 0x583   :  { %v6846_v55 = vmul.f32 1.442695, %v6840_v61  ;;  %v13728_v2 = vadd.f32 0.001, %v6653_v40  ;;  %vm6994_vm6 = vcmp.ne.f32.partialorder %v13572_v33, %v13572_v33  ;;  %v7022_v22 = vadd.f32 1.0, %v7021_v20 }
 0x584   :  { %v8552_v15 = vpop.eup %8551  ;;  %v7024_v52 = vand.u32 2147483647, %v13695_v9  ;;  %v7030_v5 = vmul.f32 -0.5, %v13714_v63  ;;  %vm6995_vm13 = vcmp.ne.f32.partialorder %v13613_v18, %v13613_v18  ;;  %v7033_v1 = vand.u32 2147483647, %v13714_v63 }
 0x585   :  { %8567 = vpow2.f32 %v6846_v55  ;;  %v13738_v27 = vpop.eup %8553  ;;  %v13751_v25 = vsel %vm12052_vm15, %v13728_v2, %v6689_v35  ;;  %v6852_v53 = vmul.f32 0.6931472, %v8552_v15  ;;  %v6810_v35 = vmul.f32 %v13683_v29, %v6809_v39 }
 0x586   :  { %v6859_v61 = vadd.f32 1.0, %v13738_v27  ;;  %8569 = vpow2.f32 %v7252_v51  ;;  %v13772_v29 = vadd.f32 %v6048_v21, %v12987_v28  ;;  %vm7025_vm0 = vcmp.lt.f32.partialorder %v7024_v52, 0.0004427343  ;;  %v6217_v52 = vpop.f32.mrf.mxu1 }
 0x587   :  { %v8556_v7 = vpop.eup %8555  ;;  %v6858_v55 = vsel %vm6857_vm2, %v6855_v32, %v6852_v53  ;;  %v6992_v53 = vmax.f32 %v13657_v60, 0.0  ;;  %v6862_v34 = vmul.f32 -0.5, %v13738_v27  ;;  %vm6997_vm2 = vcmp.ne.f32.partialorder %v13667_v36, %v13667_v36 }
 0x588   :  { %v13759_v40 = vpop.eup %8557  ;;  %v6807_v19 = vmul.f32 0.6931472, %v8556_v7  ;;  %v6886_v15 = vadd.f32 %v6858_v55, %v6822_v62  ;;  %8571 = vlog2.f32 %v6859_v61  ;;  %v6823_v7 = vmax.f32 %v13664_v58, 0.0 }
 0x589   :  { %v13765_v56 = vpop.eup %8559  ;;  %v7036_v32 = vadd.f32 1.0, %v13759_v40  ;;  %v6865_v55 = vand.u32 2147483647, %v13738_v27 }
 0x58a   :  { %v6813_v59 = vsel %vm13754_vm10, %v6810_v35, %v6807_v19  ;;  %v8562_v62 = vpop.eup %8561  ;;  %v6890_v39 = vsel %vm6826_vm11, %v13564_v14, %v6886_v15  ;;  %v7045_v19 = vadd.f32 1.0, %v13765_v56  ;;  %v7023_v14 = vmul.f32 %v13695_v9, %v7022_v22 }
 0x58b   :  { %v6817_v20 = vadd.f32 %v6813_v59, %v6753_v38  ;;  %v13782_v51 = vadd.f32 0.001, %v6890_v39  ;;  %v7020_v61 = vmul.f32 0.6931472, %v8562_v62  ;;  %8573 = vlog2.f32 %v7036_v32 }
 0x58c   :  { %8575 = vlog2.f32 %v7045_v19  ;;  %v7031_v9 = vadd.f32 1.0, %v7030_v5  ;;  %v7039_v62 = vmul.f32 -0.5, %v13759_v40  ;;  %v7048_v39 = vmul.f32 -0.5, %v13765_v56 }
 0x58d   :  { %v13789_v28 = vsel %vm6757_vm8, %v13449_v57, %v6817_v20  ;;  %v13800_v59 = vsel %vm11773_vm12, %v13782_v51, %v6690_v31  ;;  %v13809_v46 = vpop.eup %8563  ;;  %v7026_v45 = vsel %vm7025_vm0, %v7023_v14, %v7020_v61  ;;  %v6863_v19 = vadd.f32 1.0, %v6862_v34  ;;  %v6219_v57 = vpop.f32.mrf.mxu1 }
 0x58e   :  { %v6837_v49 = vand.u32 2147483647, %v13789_v28  ;;  %v8566_v21 = vpop.eup %8565  ;;  %v7054_v35 = vadd.f32 %v7026_v45, %v6990_v47  ;;  %v7258_v22 = vadd.f32 1.0, %v13809_v46  ;;  %v7032_v47 = vmul.f32 %v13714_v63, %v7031_v9 }
 0x58f   :  { %v7029_v5 = vmul.f32 0.6931472, %v8566_v21  ;;  %vm7034_vm12 = vcmp.lt.f32.partialorder %v7033_v1, 0.0004427343  ;;  %v13832_v45 = vadd.f32 %v6217_v52, %v13736_v0  ;;  %vm13834_vm11 = vcmp.lt.f32.partialorder %v6865_v55, 0.0004427343 }
 0x590   :  { %v6841_v32 = vsub.f32 0.0, %v6837_v49  ;;  %v13825_v61 = vsel %vm6994_vm6, %v13572_v33, %v7054_v35  ;;  %8577 = vlog2.f32 %v7258_v22  ;;  %v7042_v63 = vand.u32 2147483647, %v13759_v40 }
 0x591   :  { %v7074_v33 = vand.u32 2147483647, %v13825_v61  ;;  %v7035_v21 = vsel %vm7034_vm12, %v7032_v47, %v7029_v5  ;;  %v16400_v35 = vmax.f32 %v13613_v18, 0.0  ;;  %v7049_v1 = vadd.f32 1.0, %v7048_v39 }
 0x592   :  { %v13819_v20 = vpop.eup %8567  ;;  %v6848_v49 = vmul.f32 1.442695, %v6841_v32  ;;  %v7040_v32 = vadd.f32 1.0, %v7039_v62  ;;  %v6864_v55 = vmul.f32 %v13738_v27, %v6863_v19  ;;  %vm6996_vm8 = vcmp.ne.f32.partialorder %v13657_v60, %v13657_v60 }
 0x593   :  { %v6868_v14 = vadd.f32 1.0, %v13819_v20  ;;  %v13840_v9 = vpop.eup %8569  ;;  %v7055_v22 = vadd.f32 %v7035_v21, %v16400_v35  ;;  %v7078_v52 = vsub.f32 0.0, %v7074_v33  ;;  %v7051_v5 = vand.u32 2147483647, %v13765_v56 }
 0x594   :  { %v7261_v62 = vmul.f32 -0.5, %v13809_v46  ;;  %v7267_v27 = vadd.f32 1.0, %v13840_v9  ;;  %vm13859_vm10 = vcmp.lt.f32.partialorder %v7042_v63, 0.0004427343  ;;  %v13864_v33 = vadd.f32 %v6219_v57, %v13772_v29 }
 0x595   :  { %8579 = vlog2.f32 %v6868_v14  ;;  %v8572_v0 = vpop.eup %8571  ;;  %v13852_v14 = vsel %vm6995_vm13, %v13613_v18, %v7055_v22  ;;  %v7082_v39 = vmul.f32 1.442695, %v7078_v52  ;;  %v7041_v35 = vmul.f32 %v13759_v40, %v7040_v32 }
 0x596   :  { %8581 = vpow2.f32 %v6848_v49  ;;  %v6861_v47 = vmul.f32 0.6931472, %v8572_v0  ;;  %v7075_v19 = vand.u32 2147483647, %v13852_v14  ;;  %v7050_v22 = vmul.f32 %v13765_v56, %v7049_v1 }
 0x597   :  { %8583 = vlog2.f32 %v7267_v27  ;;  %v6871_v31 = vmul.f32 -0.5, %v13819_v20  ;;  %vm7052_vm6 = vcmp.lt.f32.partialorder %v7051_v5, 0.0004427343  ;;  %v7262_v57 = vadd.f32 1.0, %v7261_v62  ;;  %v6053_v27 = vpop.f32.mrf.mxu0 }
 0x598   :  { %v8574_v21 = vpop.eup %8573  ;;  %v6867_v18 = vsel %vm13834_vm11, %v6864_v55, %v6861_v47  ;;  %8585 = vpow2.f32 %v7082_v39  ;;  %v7079_v63 = vsub.f32 0.0, %v7075_v19  ;;  %v7244_v32 = vand.u32 2147483647, %v13832_v45 }
 0x599   :  { %v8576_v0 = vpop.eup %8575  ;;  %v6887_v52 = vadd.f32 %v6867_v18, %v6823_v7  ;;  %v7038_v15 = vmul.f32 0.6931472, %v8574_v21  ;;  %v6874_v1 = vand.u32 2147483647, %v13819_v20  ;;  %v16403_v47 = vmax.f32 %v13667_v36, 0.0 }
 0x59a   :  { %v7047_v29 = vmul.f32 0.6931472, %v8576_v0  ;;  %v7084_v34 = vmul.f32 1.442695, %v7079_v63  ;;  %v7248_v39 = vsub.f32 0.0, %v7244_v32  ;;  %v6872_v18 = vadd.f32 1.0, %v6871_v31 }
 0x59b   :  { %v6891_v40 = vsel %vm6827_vm4, %v13664_v58, %v6887_v52  ;;  %v7044_v56 = vsel %vm13859_vm10, %v7041_v35, %v7038_v15  ;;  %v7264_v58 = vand.u32 2147483647, %v13809_v46  ;;  %v16404_v15 = vsel %vm11709_vm7, %v13617_v13, %v13523_v50 }
 0x59c   :  { %v13880_v7 = vadd.f32 0.001, %v6891_v40  ;;  %v7056_v55 = vadd.f32 %v7044_v56, %v6992_v53  ;;  %v7053_v5 = vsel %vm7052_vm6, %v7050_v22, %v7047_v29  ;;  %8587 = vpow2.f32 %v7084_v34  ;;  %v16405_v53 = vld [vmem:[#allocation48_spill] sm:$0xff] }
 0x59d   :  { %v7057_v62 = vadd.f32 %v7053_v5, %v16403_v47  ;;  %v8578_v19 = vpop.eup %8577  ;;  %vm16406_vm0 = vnez %v16405_v53  ;;  %v7270_v50 = vmul.f32 -0.5, %v13840_v9  ;;  %v7245_v13 = vand.u32 2147483647, %v13864_v33 }
 0x59e   :  { %v13896_v49 = vsel %vm11830_vm1, %v13880_v7, %v16404_v15  ;;  %v7167_v21 = vsel %vm16406_vm0, %v13880_v7, %v13632_v4  ;;  %v13906_v35 = vsel %vm6996_vm8, %v13657_v60, %v7056_v55  ;;  %vm13917_vm7 = vcmp.lt.f32.partialorder %v6874_v1, 0.0004427343 }
 0x59f   :  { %v7076_v23 = vand.u32 2147483647, %v13906_v35  ;;  %v13913_v43 = vsel %vm6997_vm2, %v13667_v36, %v7057_v62  ;;  %v7260_v60 = vmul.f32 0.6931472, %v8578_v19  ;;  %v7263_v0 = vmul.f32 %v13809_v46, %v7262_v57  ;;  %v6055_v36 = vpop.f32.mrf.mxu0 }
 0x5a0   :  { %v7077_v22 = vand.u32 2147483647, %v13913_v43  ;;  %v6824_v63 = vmax.f32 %v13706_v12, 0.0  ;;  %vm7265_vm1 = vcmp.lt.f32.partialorder %v7264_v58, 0.0004427343  ;;  %v6873_v32 = vmul.f32 %v13819_v20, %v6872_v18 }
 0x5a1   :  { %v7080_v29 = vsub.f32 0.0, %v7076_v23  ;;  %v7254_v40 = vmul.f32 1.442695, %v7248_v39  ;;  %v7266_v55 = vsel %vm7265_vm1, %v7263_v0, %v7260_v60  ;;  %v7271_v62 = vadd.f32 1.0, %v7270_v50  ;;  %v6060_v18 = vpop.f32.mrf.mxu0 }
 0x5a2   :  { %v8580_v52 = vpop.eup %8579  ;;  %v7081_v1 = vsub.f32 0.0, %v7077_v22  ;;  %v7249_v19 = vsub.f32 0.0, %v7245_v13  ;;  %v16409_v58 = vmax.f32 %v13681_v37, 0.0  ;;  %vm7234_vm13 = vcmp.ne.f32.partialorder %v13681_v37, %v13681_v37 }
 0x5a3   :  { %v13924_v34 = vpop.eup %8581  ;;  %v6870_v56 = vmul.f32 0.6931472, %v8580_v52  ;;  %v7086_v47 = vmul.f32 1.442695, %v7080_v29  ;;  %8589 = vpow2.f32 %v7254_v40  ;;  %v7273_v20 = vand.u32 2147483647, %v13840_v9  ;;  %v6224_v29 = vpop.f32.mrf.mxu1 }
 0x5a4   :  { %v6877_v5 = vadd.f32 1.0, %v13924_v34  ;;  %v7088_v57 = vmul.f32 1.442695, %v7081_v1  ;;  %v7294_v15 = vadd.f32 %v7266_v55, %v16409_v58  ;;  %v8584_v39 = vpop.eup %8583  ;;  %vm6828_vm4 = vcmp.ne.f32.partialorder %v13706_v12, %v13706_v12  ;;  %v16410_v52 = vld [vmem:[#allocation65_spill] sm:$0xff] }
 0x5a5   :  { %v6876_v46 = vsel %vm13917_vm7, %v6873_v32, %v6870_v56  ;;  %v13935_v22 = vpop.eup %8585  ;;  %v7269_v13 = vmul.f32 0.6931472, %v8584_v39  ;;  %v6054_v0 = vadd.f32 %v6053_v27, %v13686_v30  ;;  %v7272_v56 = vmul.f32 %v13840_v9, %v7271_v62  ;;  %v16412_v9 = vld [vmem:[#allocation50_spill] sm:$0xff] }
 0x5a6   :  { %v6888_v23 = vadd.f32 %v6876_v46, %v6824_v63  ;;  %8591 = vlog2.f32 %v6877_v5  ;;  %v13940_v50 = vsel %vm7234_vm13, %v13681_v37, %v7294_v15  ;;  %v7090_v60 = vadd.f32 1.0, %v13935_v22  ;;  %v16415_v46 = vld [vmem:[#allocation71_spill] sm:$0xff] }
 0x5a7   :  { %8593 = vpow2.f32 %v7086_v47  ;;  %v13946_v63 = vadd.f32 %v6055_v36, %v16410_v52  ;;  %v7256_v32 = vmul.f32 1.442695, %v7249_v19  ;;  %v7314_v37 = vand.u32 2147483647, %v13940_v50 }
 0x5a8   :  { %v6892_v31 = vsel %vm6828_vm4, %v13706_v12, %v6888_v23  ;;  %8595 = vpow2.f32 %v7088_v57  ;;  %v7231_v1 = vmax.f32 %v13708_v3, 0.0  ;;  %vm7274_vm12 = vcmp.lt.f32.partialorder %v7273_v20, 0.0004427343  ;;  %v6062_v12 = vpop.f32.mrf.mxu0 }
 0x5a9   :  { %v13948_v40 = vadd.f32 0.001, %v6892_v31  ;;  %8597 = vlog2.f32 %v7090_v60  ;;  %v13953_v55 = vpop.eup %8587  ;;  %v16411_v30 = vsel %vm11806_vm14, %v13635_v11, %v13537_v48  ;;  %vm16413_vm11 = vnez %v16412_v9  ;;  %v16414_v48 = vld [vmem:[#allocation68_spill] sm:$0xff] }
 0x5aa   :  { %v7275_v5 = vsel %vm7274_vm12, %v7272_v56, %v7269_v13  ;;  %v13969_v47 = vadd.f32 %v6224_v29, %v6054_v0  ;;  %v6880_v62 = vmul.f32 -0.5, %v13924_v34  ;;  %v7099_v44 = vadd.f32 1.0, %v13953_v55  ;;  %v6067_v29 = vpop.f32.mrf.mxu0 }
 0x5ab   :  { %v13963_v27 = vsel %vm11857_vm3, %v13948_v40, %v16411_v30  ;;  %vm7235_vm14 = vcmp.ne.f32.partialorder %v13708_v3, %v13708_v3  ;;  %v13976_v11 = vadd.f32 %v6060_v18, %v16414_v48  ;;  %v7318_v10 = vsub.f32 0.0, %v7314_v37 }
 0x5ac   :  { %v7295_v19 = vadd.f32 %v7275_v5, %v7231_v1  ;;  %v13979_v57 = vadd.f32 %v6062_v12, %v16415_v46  ;;  %8599 = vpow2.f32 %v7256_v32  ;;  %v6825_v58 = vmax.f32 %v13789_v28, 0.0 }
 0x5ad   :  { %v7062_v15 = vmax.f32 %v13825_v61, 0.0  ;;  %8601 = vlog2.f32 %v7099_v44  ;;  %v7232_v39 = vmax.f32 %v13832_v45, 0.0  ;;  %v7093_v23 = vmul.f32 -0.5, %v13935_v22 }
 0x5ae   :  { %v7322_v20 = vmul.f32 1.442695, %v7318_v10  ;;  %v13986_v13 = vsel %vm7235_vm14, %v13708_v3, %v7295_v19  ;;  %v7482_v18 = vand.u32 2147483647, %v13969_v47  ;;  %vm6829_vm3 = vcmp.ne.f32.partialorder %v13789_v28, %v13789_v28 }
 0x5af   :  { %v6881_v31 = vadd.f32 1.0, %v6880_v62  ;;  %v7063_v60 = vmax.f32 %v13852_v14, 0.0  ;;  %v7102_v0 = vmul.f32 -0.5, %v13953_v55  ;;  %v7315_v52 = vand.u32 2147483647, %v13986_v13 }
 0x5b0   :  { %v6883_v56 = vand.u32 2147483647, %v13924_v34  ;;  %8603 = vpow2.f32 %v7322_v20  ;;  %v7486_v3 = vsub.f32 0.0, %v7482_v18  ;;  %v13996_v37 = vpop.eup %8589  ;;  %v7096_v1 = vand.u32 2147483647, %v13935_v22 }
 0x5b1   :  { %v7319_v5 = vsub.f32 0.0, %v7315_v52  ;;  %v7094_v44 = vadd.f32 1.0, %v7093_v23  ;;  %v7105_v48 = vand.u32 2147483647, %v13953_v55  ;;  %v7276_v10 = vadd.f32 1.0, %v13996_v37  ;;  %v6226_v52 = vpop.f32.mrf.mxu1 }
 0x5b2   :  { %v14004_v19 = vadd.f32 %v6067_v29, %v13689_v41  ;;  %v6882_v18 = vmul.f32 %v13924_v34, %v6881_v31  ;;  %vm7066_vm8 = vcmp.ne.f32.partialorder %v13825_v61, %v13825_v61  ;;  %v7103_v32 = vadd.f32 1.0, %v7102_v0 }
 0x5b3   :  { %v8592_v62 = vpop.eup %8591  ;;  %v7324_v36 = vmul.f32 1.442695, %v7319_v5  ;;  %vm6884_vm2 = vcmp.lt.f32.partialorder %v6883_v56, 0.0004427343  ;;  %8605 = vlog2.f32 %v7276_v10  ;;  %v7490_v30 = vmul.f32 1.442695, %v7486_v3 }
 0x5b4   :  { %v14006_v46 = vpop.eup %8593  ;;  %v6879_v20 = vmul.f32 0.6931472, %v8592_v62  ;;  %vm14014_vm10 = vcmp.lt.f32.partialorder %v7096_v1, 0.0004427343  ;;  %v7302_v34 = vmax.f32 %v13940_v50, 0.0  ;;  %v7095_v0 = vmul.f32 %v13935_v22, %v7094_v44 }
 0x5b5   :  { %v7108_v23 = vadd.f32 1.0, %v14006_v46  ;;  %v14012_v12 = vpop.eup %8595  ;;  %8607 = vpow2.f32 %v7324_v36  ;;  %vm7067_vm6 = vcmp.ne.f32.partialorder %v13852_v14, %v13852_v14  ;;  %v7104_v3 = vmul.f32 %v13953_v55, %v7103_v32  ;;  %v6231_v36 = vpop.f32.mrf.mxu1 }
 0x5b6   :  { %v6885_v41 = vsel %vm6884_vm2, %v6882_v18, %v6879_v20  ;;  %v8598_v31 = vpop.eup %8597  ;;  %vm14024_vm7 = vcmp.lt.f32.partialorder %v7105_v48, 0.0004427343  ;;  %v7117_v10 = vadd.f32 1.0, %v14012_v12  ;;  %v7279_v44 = vmul.f32 -0.5, %v13996_v37 }
 0x5b7   :  { %v6889_v62 = vadd.f32 %v6885_v41, %v6825_v58  ;;  %8609 = vlog2.f32 %v7108_v23  ;;  %v7092_v5 = vmul.f32 0.6931472, %v8598_v31  ;;  %v7111_v58 = vmul.f32 -0.5, %v14006_v46 }
 0x5b8   :  { %8611 = vpow2.f32 %v7490_v30  ;;  %v14042_v48 = vadd.f32 %v6226_v52, %v13946_v63  ;;  %v7282_v23 = vand.u32 2147483647, %v13996_v37  ;;  %v14049_v30 = vadd.f32 %v6231_v36, %v13976_v11 }
 0x5b9   :  { %v6893_v22 = vsel %vm6829_vm3, %v13789_v28, %v6889_v62  ;;  %v14035_v20 = vpop.eup %8599  ;;  %v7098_v32 = vsel %vm14014_vm10, %v7095_v0, %v7092_v5  ;;  %8613 = vlog2.f32 %v7117_v10  ;;  %v16420_v29 = vsel %vm12015_vm5, %v13728_v2, %v13566_v17  ;;  %v6233_v2 = vpop.f32.mrf.mxu1 }
 0x5ba   :  { %v14037_v55 = vadd.f32 0.001, %v6893_v22  ;;  %v8602_v18 = vpop.eup %8601  ;;  %v7126_v28 = vadd.f32 %v7098_v32, %v7062_v15  ;;  %v7285_v41 = vadd.f32 1.0, %v14035_v20  ;;  %v16421_v15 = vld [vmem:[#allocation64_spill] sm:$0xff]  ;;  %v7114_v62 = vand.u32 2147483647, %v14006_v46 }
 0x5bb   :  { %vm16422_vm1 = vnez %v16421_v15  ;;  %v7101_v31 = vmul.f32 0.6931472, %v8602_v18  ;;  %v7112_v11 = vadd.f32 1.0, %v7111_v58  ;;  %v7280_v17 = vadd.f32 1.0, %v7279_v44 }
 0x5bc   :  { %v14059_v63 = vsel %vm12052_vm15, %v14037_v55, %v16420_v29  ;;  %v7169_v52 = vsel %vm16422_vm1, %v14037_v55, %v13751_v25  ;;  %v7130_v6 = vsel %vm7066_vm8, %v13825_v61, %v7126_v28  ;;  %8615 = vlog2.f32 %v7285_v41  ;;  %v16449_v55 = vld [vmem:[#allocation6_spill] sm:$0xff] }
 0x5bd   :  { %v8604_v54 = vpop.eup %8603  ;;  %v14070_v0 = vadd.f32 0.001, %v7130_v6  ;;  %v7107_v5 = vsel %vm14024_vm7, %v7104_v3, %v7101_v31  ;;  %v7120_v10 = vmul.f32 -0.5, %v14012_v12  ;;  %v7123_v36 = vand.u32 2147483647, %v14012_v12 }
 0x5be   :  { %v7127_v22 = vadd.f32 %v7107_v5, %v7063_v60  ;;  %v7330_v32 = vadd.f32 1.0, %v8604_v54  ;;  %vm7236_vm5 = vcmp.ne.f32.partialorder %v13832_v45, %v13832_v45  ;;  %v7288_v61 = vmul.f32 -0.5, %v14035_v20  ;;  %v16424_v60 = vld [vmem:[#allocation27_spill] sm:$0xff] }
 0x5bf   :  { %v7483_v58 = vand.u32 2147483647, %v14042_v48  ;;  %v16423_v1 = vsel %vm11919_vm9, %v13782_v51, %v13598_v42  ;;  %vm16425_vm15 = vnez %v16424_v60  ;;  %vm14096_vm13 = vcmp.lt.f32.partialorder %v7282_v23, 0.0004427343 }
 0x5c0   :  { %v14094_v44 = vsel %vm16425_vm15, %v14070_v0, %v16423_v1  ;;  %v14101_v28 = vadd.f32 %v6233_v2, %v13979_v57  ;;  %v7131_v41 = vsel %vm7067_vm6, %v13852_v14, %v7127_v22  ;;  %vm7068_vm4 = vcmp.ne.f32.partialorder %v13906_v35, %v13906_v35  ;;  %v8606_v23 = vpop.eup %8605  ;;  %v16441_v14 = vld [vmem:[#allocation51_spill] sm:$0xff] }
 0x5c1   :  { %v7113_v42 = vmul.f32 %v14006_v46, %v7112_v11  ;;  %vm14110_vm12 = vcmp.lt.f32.partialorder %v7114_v62, 0.0004427343  ;;  %8617 = vlog2.f32 %v7330_v32  ;;  %v14114_v29 = vadd.f32 0.001, %v7131_v41 }
 0x5c2   :  { %v7121_v57 = vadd.f32 1.0, %v7120_v10  ;;  %v7333_v31 = vmul.f32 -0.5, %v8604_v54  ;;  %v7281_v6 = vmul.f32 %v13996_v37, %v7280_v17  ;;  %v14117_v2 = vpop.eup %8607  ;;  %vm14119_vm14 = vcmp.lt.f32.partialorder %v7123_v36, 0.0004427343  ;;  %v16432_v37 = vld [vmem:[#allocation10_spill] sm:$0xff] }
 0x5c3   :  { %v7278_v5 = vmul.f32 0.6931472, %v8606_v23  ;;  %v7289_v46 = vadd.f32 1.0, %v7288_v61  ;;  %v7487_v62 = vsub.f32 0.0, %v7483_v58  ;;  %vm16433_vm3 = vnez %v16432_v37 }
 0x5c4   :  { %v8610_v11 = vpop.eup %8609  ;;  %v14135_v17 = vsel %vm16433_vm3, %v14114_v29, %v7167_v21  ;;  %vm7069_vm8 = vcmp.ne.f32.partialorder %v13913_v43, %v13913_v43  ;;  %v7339_v10 = vadd.f32 1.0, %v14117_v2  ;;  %v7484_v36 = vand.u32 2147483647, %v14049_v30 }
 0x5c5   :  { %v7110_v32 = vmul.f32 0.6931472, %v8610_v11  ;;  %v7336_v61 = vand.u32 2147483647, %v8604_v54  ;;  %v7284_v58 = vsel %vm14096_vm13, %v7281_v6, %v7278_v5  ;;  %v7291_v1 = vand.u32 2147483647, %v14035_v20  ;;  %v14144_v4 = vpop.eup %8611 }
 0x5c6   :  { %v7122_v7 = vmul.f32 %v14012_v12, %v7121_v57  ;;  %v7334_v21 = vadd.f32 1.0, %v7333_v31  ;;  %8619 = vlog2.f32 %v7339_v10  ;;  %v7296_v41 = vadd.f32 %v7284_v58, %v7232_v39  ;;  %v8614_v23 = vpop.eup %8613 }
 0x5c7   :  { %v7116_v22 = vsel %vm14110_vm12, %v7113_v42, %v7110_v32  ;;  %v7290_v11 = vmul.f32 %v14035_v20, %v7289_v46  ;;  %v7498_v18 = vadd.f32 1.0, %v14144_v4  ;;  %v7492_v6 = vmul.f32 1.442695, %v7487_v62 }
 0x5c8   :  { %v16434_v5 = vmax.f32 %v13906_v35, 0.0  ;;  %v7119_v3 = vmul.f32 0.6931472, %v8614_v23  ;;  %v14159_v12 = vsel %vm7236_vm5, %v13832_v45, %v7296_v41  ;;  %vm7237_vm2 = vcmp.ne.f32.partialorder %v13864_v33, %v13864_v33 }
 0x5c9   :  { %v7488_v39 = vsub.f32 0.0, %v7484_v36  ;;  %vm14163_vm10 = vcmp.lt.f32.partialorder %v7336_v61, 0.0004427343  ;;  %v7316_v20 = vand.u32 2147483647, %v14159_v12  ;;  %8621 = vlog2.f32 %v7498_v18  ;;  %v8616_v57 = vpop.eup %8615 }
 0x5ca   :  { %v7128_v56 = vadd.f32 %v7116_v22, %v16434_v5  ;;  %vm14168_vm6 = vcmp.lt.f32.partialorder %v7291_v1, 0.0004427343  ;;  %v7125_v31 = vsel %vm14119_vm14, %v7122_v7, %v7119_v3  ;;  %v7335_v46 = vmul.f32 %v8604_v54, %v7334_v21 }
 0x5cb   :  { %v7342_v62 = vmul.f32 -0.5, %v14117_v2  ;;  %v16439_v10 = vmax.f32 %v13913_v43, 0.0  ;;  %vm7306_vm7 = vcmp.ne.f32.partialorder %v13940_v50, %v13940_v50  ;;  %v7320_v32 = vsub.f32 0.0, %v7316_v20 }
 0x5cc   :  { %v7132_v45 = vsel %vm7068_vm4, %v13906_v35, %v7128_v56  ;;  %v7287_v61 = vmul.f32 0.6931472, %v8616_v57  ;;  %v7345_v58 = vand.u32 2147483647, %v14117_v2  ;;  %v7501_v35 = vmul.f32 -0.5, %v14144_v4  ;;  %v16446_v57 = vld [vmem:[#allocation43_spill] sm:$0xff] }
 0x5cd   :  { %v14179_v22 = vadd.f32 0.001, %v7132_v45  ;;  %v7129_v36 = vadd.f32 %v7125_v31, %v16439_v10  ;;  %8623 = vpow2.f32 %v7492_v6  ;;  %v7494_v56 = vmul.f32 1.442695, %v7488_v39  ;;  %v16447_v45 = vld [vmem:[#allocation69_spill] sm:$0xff] }
 0x5ce   :  { %v16440_v3 = vsel %vm16413_vm11, %v13948_v40, %v13651_v16  ;;  %vm16442_vm5 = vnez %v16441_v14  ;;  %v7326_v21 = vmul.f32 1.442695, %v7320_v32  ;;  %v8618_v41 = vpop.eup %8617  ;;  %v7293_v18 = vsel %vm14168_vm6, %v7290_v11, %v7287_v61  ;;  %v16444_v11 = vld [vmem:[#allocation61_spill] sm:$0xff] }
 0x5cf   :  { %v14199_v1 = vsel %vm16442_vm5, %v14179_v22, %v16440_v3  ;;  %v7133_v7 = vsel %vm7069_vm8, %v13913_v43, %v7129_v36  ;;  %8625 = vpow2.f32 %v7494_v56  ;;  %v7485_v16 = vand.u32 2147483647, %v14101_v28  ;;  %v16448_v36 = vld [vmem:[#allocation60_spill] sm:$0xff] }
 0x5d0   :  { %v14205_v23 = vadd.f32 0.001, %v7133_v7  ;;  %v7332_v40 = vmul.f32 0.6931472, %v8618_v41  ;;  %v7343_v6 = vadd.f32 1.0, %v7342_v62  ;;  %8627 = vpow2.f32 %v7326_v21  ;;  %v6069_v7 = vpop.f32.mrf.mxu0  ;;  %v16450_v41 = vld [vmem:[#allocation17_spill] sm:$0xff] }
 0x5d1   :  { %v16443_v5 = vmax.f32 %v13864_v33, 0.0  ;;  %vm16445_vm13 = vnez %v16444_v11  ;;  %v7489_v51 = vsub.f32 0.0, %v7485_v16  ;;  %v6946_v31 = vmul.f32 %v16447_v45, %v16446_v57 }
 0x5d2   :  { %v14224_v20 = vsel %vm16445_vm13, %v14205_v23, %v7169_v52  ;;  %v7338_v62 = vsel %vm14163_vm10, %v7335_v46, %v7332_v40  ;;  %v7186_v25 = vmul.f32 %v16447_v45, %v16448_v36  ;;  %v7426_v52 = vmul.f32 %v16447_v45, %v16449_v55  ;;  %v6074_v55 = vpop.f32.mrf.mxu0 }
 0x5d3   :  { %v7297_v39 = vadd.f32 %v7293_v18, %v16443_v5  ;;  %v7366_v32 = vadd.f32 %v7338_v62, %v7302_v34  ;;  %v7303_v61 = vmax.f32 %v13986_v13, 0.0  ;;  %v7502_v46 = vadd.f32 1.0, %v7501_v35  ;;  %v8620_v56 = vpop.eup %8619 }
 0x5d4   :  { %v7344_v3 = vmul.f32 %v14117_v2, %v7343_v6  ;;  %v6950_v21 = vmul.f32 0.992, %v6946_v31  ;;  %v7666_v18 = vmul.f32 %v16447_v45, %v16450_v41  ;;  %v7341_v34 = vmul.f32 0.6931472, %v8620_v56 }
 0x5d5   :  { %v14234_v10 = vsel %vm7237_vm2, %v13864_v33, %v7297_v39  ;;  %v7496_v33 = vmul.f32 1.442695, %v7489_v51  ;;  %v7370_v16 = vsel %vm7306_vm7, %v13940_v50, %v7366_v32  ;;  %v7504_v5 = vand.u32 2147483647, %v14144_v4 }
 0x5d6   :  { %v7317_v42 = vand.u32 2147483647, %v14234_v10  ;;  %v14252_v39 = vadd.f32 0.001, %v7370_v16  ;;  %vm7346_vm4 = vcmp.lt.f32.partialorder %v7345_v58, 0.0004427343  ;;  %v8622_v35 = vpop.eup %8621  ;;  %v7503_v57 = vmul.f32 %v14144_v4, %v7502_v46  ;;  %v6238_v4 = vpop.f32.mrf.mxu1 }
 0x5d7   :  { %8629 = vpow2.f32 %v7496_v33  ;;  %v7190_v2 = vmul.f32 0.992, %v7186_v25  ;;  %v7347_v6 = vsel %vm7346_vm4, %v7344_v3, %v7341_v34  ;;  %v6954_v45 = vadd.f32 0.001, %v6950_v21  ;;  %v16453_v58 = vld [vmem:[#allocation24_spill] sm:$0xff]  ;;  %v16456_v3 = vld [vmem:[#allocation18_spill] sm:$0xff] }
 0x5d8   :  { %v7321_v40 = vsub.f32 0.0, %v7317_v42  ;;  %v16451_v50 = vsel %vm11919_vm9, %v14070_v0, %v13800_v59  ;;  %vm16454_vm12 = vnez %v16453_v58  ;;  %v7367_v36 = vadd.f32 %v7347_v6, %v7303_v61  ;;  %v16455_v59 = vld [vmem:[#allocation75_spill] sm:$0xff]  ;;  %v16459_v6 = vld [vmem:[#allocation45_spill] sm:$0xff] }
 0x5d9   :  { %v14263_v31 = vsel %vm16425_vm15, %v14252_v39, %v16451_v50  ;;  %v7500_v25 = vmul.f32 0.6931472, %v8622_v35  ;;  %vm7307_vm14 = vcmp.ne.f32.partialorder %v13986_v13, %v13986_v13  ;;  %vm7505_vm8 = vcmp.lt.f32.partialorder %v7504_v5, 0.0004427343 }
 0x5da   :  { %v7328_v51 = vmul.f32 1.442695, %v7321_v40  ;;  %16452 = vst [vmem:[#allocation57_spill] sm:$0xff] %v14263_v31  ;;  %v6962_v0 = vadd.f32 %v6954_v45, %v16455_v59  ;;  %v14272_v32 = vpop.eup %8623  ;;  %v7371_v42 = vsel %vm7307_vm14, %v13986_v13, %v7367_v36  ;;  %v7194_v56 = vadd.f32 0.001, %v7190_v2  ;;  %v6076_v13 = vpop.f32.mrf.mxu0  ;;  %v16461_v45 = vld [vmem:[#allocation25_spill] sm:$0xff] }
 0x5db   :  { %v7506_v46 = vsel %vm7505_vm8, %v7503_v57, %v7500_v25  ;;  %v14276_v33 = vadd.f32 0.001, %v7371_v42  ;;  %v16457_v61 = vmax.f32 %v13969_v47, 0.0  ;;  %v7507_v41 = vadd.f32 1.0, %v14272_v32  ;;  %v16464_v36 = vld [vmem:[#allocation8_spill] sm:$0xff]  ;;  %v16465_v25 = vld [vmem:[#allocation54_spill] sm:$0xff] }
 0x5dc   :  { %8631 = vpow2.f32 %v7328_v51  ;;  %v14282_v16 = vadd.f32 %v6238_v4, %v14004_v19  ;;  %v14284_v34 = vpop.eup %8625  ;;  %vm7474_vm2 = vcmp.ne.f32.partialorder %v13969_v47, %v13969_v47  ;;  %v7202_v40 = vadd.f32 %v7194_v56, %v6962_v0  ;;  %v16467_v59 = vld [vmem:[#allocation5_spill] sm:$0xff]  ;;  %v16468_v56 = vld [vmem:[#allocation74_spill] sm:$0xff] }
 0x5dd   :  { %8633 = vrcp.f32 %v16456_v3  ;;  %v7534_v21 = vadd.f32 %v7506_v46, %v16457_v61  ;;  %v7430_v5 = vmul.f32 0.992, %v7426_v52  ;;  %v14288_v2 = vpop.eup %8627  ;;  %v16458_v35 = vsel %vm16406_vm0, %v14114_v29, %v13896_v49  ;;  %v16462_v29 = vld [vmem:[#allocation21_spill] sm:$0xff] }
 0x5de   :  { %v14298_v19 = vsel %vm16433_vm3, %v14276_v33, %v16458_v35  ;;  %vm16460_vm10 = vnez %v16459_v6  ;;  %8635 = vlog2.f32 %v7507_v41  ;;  %v7348_v52 = vadd.f32 1.0, %v14288_v2 }
 0x5df   :  { %v14305_v57 = vsel %vm7474_vm2, %v13969_v47, %v7534_v21  ;;  %v14309_v50 = vadd.f32 %v6069_v7, %v16461_v45  ;;  %v6974_v49 = vmul.f32 6.0, %v6962_v0  ;;  %vm16463_vm6 = vnez %v16462_v29  ;;  %v16469_v47 = vld [vmem:[#allocation76_spill] sm:$0xff] }
 0x5e0   :  { %v16466_v4 = vsel %vm16463_vm6, %v16464_v36, %v16465_v25  ;;  %v7554_v46 = vand.u32 2147483647, %v14305_v57  ;;  %v14319_v3 = vadd.f32 %v6074_v55, %v16468_v56  ;;  %v14322_v61 = vadd.f32 %v6076_v13, %v16469_v47  ;;  %v16471_v36 = vld [vmem:[#allocation53_spill] sm:$0xff] }
 0x5e1   :  { %v7942_v42 = vsub.f32 %v16467_v59, %v16466_v4  ;;  %v7722_v21 = vand.u32 2147483647, %v14282_v16  ;;  %8637 = vlog2.f32 %v7348_v52  ;;  %v7516_v41 = vadd.f32 1.0, %v14284_v34 }
 0x5e2   :  { %v7558_v35 = vsub.f32 0.0, %v7554_v46  ;;  %v7510_v45 = vmul.f32 -0.5, %v14272_v32  ;;  %v7434_v25 = vadd.f32 0.001, %v7430_v5  ;;  %v14330_v55 = vadd.f32 -3.0, %v6974_v49 }
 0x5e3   :  { %8639 = vlog2.f32 %v7516_v41  ;;  %v7214_v13 = vmul.f32 6.0, %v7202_v40  ;;  %v7670_v4 = vmul.f32 0.992, %v7666_v18  ;;  %v7513_v56 = vand.u32 2147483647, %v14272_v32 }
 0x5e4   :  { %16470 = vst [vmem:[#allocation36_spill] sm:$0xff] %v14330_v55  ;;  %v14332_v59 = vpop.eup %8629  ;;  %v7562_v52 = vmul.f32 1.442695, %v7558_v35  ;;  %v7442_v47 = vadd.f32 %v7434_v25, %v7202_v40  ;;  %v7726_v51 = vsub.f32 0.0, %v7722_v21  ;;  %v7351_v62 = vmul.f32 -0.5, %v14288_v2  ;;  %v16473_v40 = vld [vmem:[#allocation80_spill] sm:$0xff] }
 0x5e5   :  { %v7354_v46 = vand.u32 2147483647, %v14288_v2  ;;  %v7525_v43 = vadd.f32 1.0, %v14332_v59  ;;  %v6986_v5 = vsub.f32 %v14330_v55, %v16471_v36  ;;  %v7511_v49 = vadd.f32 1.0, %v7510_v45 }
 0x5e6   :  { %8641 = vpow2.f32 %v7562_v52  ;;  %v14340_v41 = vadd.f32 -3.0, %v7214_v13  ;;  %v7454_v18 = vmul.f32 6.0, %v7442_v47  ;;  %v7304_v35 = vmax.f32 %v14159_v12, 0.0 }
 0x5e7   :  { %8643 = vlog2.f32 %v7525_v43  ;;  %v7162_v21 = vsel %vm11919_vm9, %v6986_v5, %v16473_v40  ;;  %v7674_v25 = vadd.f32 0.001, %v7670_v4  ;;  %vm7475_vm7 = vcmp.ne.f32.partialorder %v14042_v48, %v14042_v48 }
 0x5e8   :  { %16472 = vst [vmem:[#allocation19_spill] sm:$0xff] %v14340_v41  ;;  %vm14353_vm4 = vcmp.lt.f32.partialorder %v7513_v56, 0.0004427343  ;;  %v7519_v13 = vmul.f32 -0.5, %v14284_v34  ;;  %v7226_v43 = vsub.f32 %v14340_v41, %v14330_v55  ;;  %v7352_v52 = vadd.f32 1.0, %v7351_v62 }
 0x5e9   :  { %v14342_v54 = vpop.eup %8631  ;;  %v14360_v38 = vadd.f32 -3.0, %v7454_v18  ;;  %v7682_v4 = vadd.f32 %v7674_v25, %v7442_v47  ;;  %v7730_v5 = vmul.f32 1.442695, %v7726_v51  ;;  %vm14362_vm14 = vcmp.lt.f32.partialorder %v7354_v46, 0.0004427343 }
 0x5ea   :  { %v14348_v0 = vpop.eup %8633  ;;  %v7357_v7 = vadd.f32 1.0, %v14342_v54  ;;  %v7512_v56 = vmul.f32 %v14272_v32, %v7511_v49  ;;  %v7402_v36 = vsel %vm16425_vm15, %v7226_v43, %v7162_v21  ;;  %vm7308_vm8 = vcmp.ne.f32.partialorder %v14159_v12, %v14159_v12  ;;  %v16479_v32 = vld [vmem:[#allocation49_spill] sm:$0xff]  ;;  %v16480_v49 = vld [vmem:[#allocation40_spill] sm:$0xff] }
 0x5eb   :  { %16476 = vst [vmem:[#allocation41_spill] sm:$0xff] %v14360_v38  ;;  %v8636_v8 = vpop.eup %8635  ;;  %v7466_v62 = vsub.f32 %v14360_v38, %v14340_v41  ;;  %v7694_v18 = vmul.f32 6.0, %v7682_v4  ;;  %v14374_v51 = vmul.f32 %v14348_v0, %v7942_v42  ;;  %v7520_v46 = vadd.f32 1.0, %v7519_v13  ;;  %v16482_v13 = vld [vmem:[#allocation20_spill] sm:$0xff] }
 0x5ec   :  { %8645 = vlog2.f32 %v7357_v7  ;;  %v7509_v47 = vmul.f32 0.6931472, %v8636_v8  ;;  %v7522_v7 = vand.u32 2147483647, %v14284_v34  ;;  %v6947_v25 = vmul.f32 %v16480_v49, %v16479_v32  ;;  %v16483_v32 = vld [vmem:[#allocation44_spill] sm:$0xff] }
 0x5ed   :  { %8647 = vpow2.f32 %v7730_v5  ;;  %v7353_v21 = vmul.f32 %v14288_v2, %v7352_v52  ;;  %v7528_v43 = vmul.f32 -0.5, %v14332_v59  ;;  %v7642_v60 = vsel %vm16454_vm12, %v7466_v62, %v7402_v36 }
 0x5ee   :  { %v14383_v41 = vadd.f32 -3.0, %v7694_v18  ;;  %v8638_v4 = vpop.eup %8637  ;;  %v7515_v42 = vsel %vm14353_vm4, %v7512_v56, %v7509_v47  ;;  %v6951_v8 = vmul.f32 0.992, %v6947_v25  ;;  %v7187_v5 = vmul.f32 %v16480_v49, %v16482_v13 }
 0x5ef   :  { %v7427_v2 = vmul.f32 %v16480_v49, %v16483_v32  ;;  %v7350_v52 = vmul.f32 0.6931472, %v8638_v4  ;;  %v16484_v55 = vmax.f32 %v14042_v48, 0.0  ;;  %v7360_v18 = vmul.f32 -0.5, %v14342_v54  ;;  %v16487_v32 = vld [vmem:[#allocation63_spill] sm:$0xff] }
 0x5f0   :  { %16481 = vst [vmem:[#allocation65_spill] sm:$0xff] %v14383_v41  ;;  %v7706_v62 = vsub.f32 %v14383_v41, %v14360_v38  ;;  %v7898_v45 = vsub.f32 3.0, %v14383_v41  ;;  %v8640_v56 = vpop.eup %8639  ;;  %v7521_v47 = vmul.f32 %v14284_v34, %v7520_v46  ;;  %vm14400_vm4 = vcmp.lt.f32.partialorder %v7522_v7, 0.0004427343  ;;  %v16623_v9 = vld [vmem:[#allocation19_spill] sm:$0xff] }
 0x5f1   :  { %v7535_v36 = vadd.f32 %v7515_v42, %v16484_v55  ;;  %v6955_v13 = vadd.f32 0.001, %v6951_v8  ;;  %v7356_v4 = vsel %vm14362_vm14, %v7353_v21, %v7350_v52  ;;  %v7518_v42 = vmul.f32 0.6931472, %v8640_v56 }
 0x5f2   :  { %vm16488_vm2 = vnez %v16487_v32  ;;  %v7368_v38 = vadd.f32 %v7356_v4, %v7304_v35  ;;  %v7529_v46 = vadd.f32 1.0, %v7528_v43  ;;  %v7531_v7 = vand.u32 2147483647, %v14332_v59 }
 0x5f3   :  { %v14410_v55 = vsel %vm7475_vm7, %v14042_v48, %v7535_v36  ;;  %v7882_v41 = vsel %vm16488_vm2, %v7706_v62, %v7642_v60  ;;  %v14416_v8 = vpop.eup %8641  ;;  %v7305_v40 = vmax.f32 %v14234_v10, 0.0  ;;  %v7524_v21 = vsel %vm14400_vm4, %v7521_v47, %v7518_v42  ;;  %v16490_v60 = vld [vmem:[#allocation81_spill] sm:$0xff] }
 0x5f4   :  { %v7555_v34 = vand.u32 2147483647, %v14410_v55  ;;  %v14425_v48 = vsel %vm16463_vm6, %v7898_v45, %v7882_v41  ;;  %v6963_v35 = vadd.f32 %v6955_v13, %v16490_v60  ;;  %v8644_v52 = vpop.eup %8643  ;;  %v7372_v43 = vsel %vm7308_vm8, %v14159_v12, %v7368_v38 }
 0x5f5   :  { %16489 = vst [vmem:[#allocation50_spill] sm:$0xff] %v14425_v48  ;;  %v7361_v36 = vadd.f32 1.0, %v7360_v18  ;;  %v7363_v62 = vand.u32 2147483647, %v14342_v54  ;;  %v7570_v56 = vadd.f32 1.0, %v14416_v8  ;;  %v16491_v4 = vmax.f32 %v14049_v30, 0.0 }
 0x5f6   :  { %v14434_v47 = vadd.f32 0.001, %v7372_v43  ;;  %v7559_v25 = vsub.f32 0.0, %v7555_v34  ;;  %v7527_v45 = vmul.f32 0.6931472, %v8644_v52  ;;  %v7530_v13 = vmul.f32 %v14332_v59, %v7529_v46  ;;  %v16496_v59 = vld [vmem:[#allocation70_spill] sm:$0xff] }
 0x5f7   :  { %v7536_v41 = vadd.f32 %v7524_v21, %v16491_v4  ;;  %8649 = vlog2.f32 %v7570_v56  ;;  %vm14439_vm14 = vcmp.lt.f32.partialorder %v7531_v7, 0.0004427343  ;;  %v14445_v38 = vmul.f32 %v14348_v0, %v14425_v48 }
 0x5f8   :  { %v16494_v18 = vsel %vm16413_vm11, %v14179_v22, %v13963_v27  ;;  %vm16497_vm8 = vnez %v16496_v59  ;;  %v7564_v7 = vmul.f32 1.442695, %v7559_v25  ;;  %vm16498_vm4 = vcmp.ne.f32.partialorder %v14049_v30, %v14049_v30  ;;  %v6240_v25 = vpop.f32.mrf.mxu1 }
 0x5f9   :  { %v8646_v12 = vpop.eup %8645  ;;  %v14455_v34 = vsel %vm16442_vm5, %v14434_v47, %v16494_v18  ;;  %v14465_v0 = vsel %vm16498_vm4, %v14049_v30, %v7536_v41  ;;  %v7362_v22 = vmul.f32 %v14342_v54, %v7361_v36  ;;  %vm7364_vm7 = vcmp.lt.f32.partialorder %v7363_v62, 0.0004427343 }
 0x5fa   :  { %16495 = vst [vmem:[#allocation68_spill] sm:$0xff] %v14455_v34  ;;  %v14467_v21 = vpop.eup %8647  ;;  %v7359_v27 = vmul.f32 0.6931472, %v8646_v12  ;;  %v7191_v60 = vmul.f32 0.992, %v7187_v5  ;;  %8651 = vpow2.f32 %v7564_v7  ;;  %v7533_v43 = vsel %vm14439_vm14, %v7530_v13, %v7527_v45 }
 0x5fb   :  { %v7556_v52 = vand.u32 2147483647, %v14465_v0  ;;  %v7738_v56 = vadd.f32 1.0, %v14467_v21  ;;  %vm7309_vm4 = vcmp.ne.f32.partialorder %v14234_v10, %v14234_v10  ;;  %v7573_v4 = vmul.f32 -0.5, %v14416_v8 }
 0x5fc   :  { %v7365_v30 = vsel %vm7364_vm7, %v7362_v22, %v7359_v27  ;;  %v16499_v41 = vmax.f32 %v14101_v28, 0.0  ;;  %v7431_v62 = vmul.f32 0.992, %v7427_v2  ;;  %v7542_v12 = vmax.f32 %v14305_v57, 0.0 }
 0x5fd   :  { %v7369_v36 = vadd.f32 %v7365_v30, %v7305_v40  ;;  %v7560_v5 = vsub.f32 0.0, %v7556_v52  ;;  %8653 = vlog2.f32 %v7738_v56  ;;  %vm16500_vm14 = vcmp.ne.f32.partialorder %v14101_v28, %v14101_v28 }
 0x5fe   :  { %v7537_v54 = vadd.f32 %v7533_v43, %v16499_v41  ;;  %v14488_v42 = vadd.f32 %v6240_v25, %v14309_v50  ;;  %v7576_v40 = vand.u32 2147483647, %v14416_v8  ;;  %v7195_v27 = vadd.f32 0.001, %v7191_v60  ;;  %v16503_v60 = vld [vmem:[#allocation73_spill] sm:$0xff]  ;;  %v16506_v41 = vld [vmem:[#allocation31_spill] sm:$0xff] }
 0x5ff   :  { %v7373_v18 = vsel %vm7309_vm4, %v14234_v10, %v7369_v36  ;;  %v7566_v7 = vmul.f32 1.442695, %v7560_v5  ;;  %v7574_v22 = vadd.f32 1.0, %v7573_v4  ;;  %v7741_v43 = vmul.f32 -0.5, %v14467_v21  ;;  %v16505_v4 = vld [vmem:[#allocation32_spill] sm:$0xff]  ;;  %v16511_v25 = vld [vmem:[#allocation82_spill] sm:$0xff] }
 0x600   :  { %v14484_v45 = vsel %vm16500_vm14, %v14101_v28, %v7537_v54  ;;  %v14492_v2 = vadd.f32 0.001, %v7373_v18  ;;  %v6975_v28 = vmul.f32 6.0, %v6963_v35  ;;  %v7203_v56 = vadd.f32 %v7195_v27, %v6963_v35  ;;  %v16508_v5 = vld [vmem:[#allocation52_spill] sm:$0xff] }
 0x601   :  { %v7557_v52 = vand.u32 2147483647, %v14484_v45  ;;  %8655 = vpow2.f32 %v7566_v7  ;;  %v7435_v30 = vadd.f32 0.001, %v7431_v62  ;;  %v16501_v10 = vsel %vm16422_vm1, %v14205_v23, %v14059_v63 }
 0x602   :  { %v14504_v50 = vsel %vm16445_vm13, %v14492_v2, %v16501_v10  ;;  %vm16504_vm7 = vnez %v16503_v60  ;;  %v7631_v54 = vsel %vm16460_vm10, %v16506_v41, %v16505_v4  ;;  %v14516_v63 = vadd.f32 -3.0, %v6975_v28 }
 0x603   :  { %16502 = vst [vmem:[#allocation71_spill] sm:$0xff] %v14504_v50  ;;  %v7561_v35 = vsub.f32 0.0, %v7557_v52  ;;  %v7215_v23 = vmul.f32 6.0, %v7203_v56  ;;  %v7443_v36 = vadd.f32 %v7435_v30, %v7203_v56  ;;  %v7667_v62 = vmul.f32 %v16480_v49, %v16508_v5  ;;  %v16513_v5 = vld [vmem:[#allocation42_spill] sm:$0xff] }
 0x604   :  { %16507 = vst [vmem:[#allocation64_spill] sm:$0xff] %v14516_v63  ;;  %v7575_v18 = vmul.f32 %v14416_v8, %v7574_v22  ;;  %vm14521_vm14 = vcmp.lt.f32.partialorder %v7576_v40, 0.0004427343  ;;  %v7723_v52 = vand.u32 2147483647, %v14488_v42  ;;  %v8650_v10 = vpop.eup %8649  ;;  %v6987_v4 = vsub.f32 %v14516_v63, %v16511_v25  ;;  %v16514_v8 = vld [vmem:[#allocation7_spill] sm:$0xff] }
 0x605   :  { %v7568_v27 = vmul.f32 1.442695, %v7561_v35  ;;  %v14528_v28 = vadd.f32 -3.0, %v7215_v23  ;;  %v7455_v41 = vmul.f32 6.0, %v7443_v36  ;;  %v7671_v56 = vmul.f32 0.992, %v7667_v62 }
 0x606   :  { %v7572_v30 = vmul.f32 0.6931472, %v8650_v10  ;;  %v7727_v49 = vsub.f32 0.0, %v7723_v52  ;;  %vm16515_vm4 = vnez %v16514_v8  ;;  %v7742_v22 = vadd.f32 1.0, %v7741_v43  ;;  %v16516_v35 = vld [vmem:[#allocation84_spill] sm:$0xff] }
 0x607   :  { %16512 = vst [vmem:[#allocation51_spill] sm:$0xff] %v14528_v28  ;;  %8657 = vpow2.f32 %v7568_v27  ;;  %v14533_v40 = vsel %vm16515_vm4, %v16513_v5, %v7631_v54  ;;  %v7163_v46 = vsel %vm16406_vm0, %v6987_v4, %v16516_v35  ;;  %v7227_v13 = vsub.f32 %v14528_v28, %v14516_v63  ;;  %v14542_v25 = vpop.eup %8651 }
 0x608   :  { %v14540_v23 = vadd.f32 -3.0, %v7455_v41  ;;  %v7578_v62 = vsel %vm14521_vm14, %v7575_v18, %v7572_v30  ;;  %v14549_v54 = vsub.f32 1.0, %v14374_v51  ;;  %v7675_v43 = vadd.f32 0.001, %v7671_v56  ;;  %v16519_v41 = vld [vmem:[#allocation33_spill] sm:$0xff] }
 0x609   :  { %v7732_v27 = vmul.f32 1.442695, %v7727_v49  ;;  %v7606_v52 = vadd.f32 %v7578_v62, %v7542_v12  ;;  %v7579_v10 = vadd.f32 1.0, %v14542_v25  ;;  %v7744_v4 = vand.u32 2147483647, %v14467_v21  ;;  %v16521_v49 = vld [vmem:[#allocation9_spill] sm:$0xff] }
 0x60a   :  { %16517 = vst [vmem:[#allocation43_spill] sm:$0xff] %v14540_v23  ;;  %16518 = vst [vmem:[#allocation69_spill] sm:$0xff] %v14549_v54  ;;  %v7895_v5 = vsub.f32 3.0, %v16519_v41  ;;  %v8654_v35 = vpop.eup %8653  ;;  %v7403_v7 = vsel %vm16433_vm3, %v7227_v13, %v7163_v46  ;;  %v7467_v18 = vsub.f32 %v14540_v23, %v14528_v28  ;;  %v7683_v30 = vadd.f32 %v7675_v43, %v7443_v36  ;;  %v16535_v28 = vld [vmem:[#allocation14_spill] sm:$0xff] }
 0x60b   :  { %8659 = vpow2.f32 %v7732_v27  ;;  %vm16520_vm14 = vcmp.ne.f32.partialorder %v14305_v57, %v14305_v57  ;;  %v7743_v56 = vmul.f32 %v14467_v21, %v7742_v22  ;;  %vm14565_vm15 = vcmp.ge.f32.partialorder %v16521_v49, %v16519_v41  ;;  %v16526_v22 = vld [vmem:[#allocation15_spill] sm:$0xff] }
 0x60c   :  { %v7610_v12 = vsel %vm16520_vm14, %v14305_v57, %v7606_v52  ;;  %8661 = vlog2.f32 %v7579_v10  ;;  %v16522_v62 = vmov 0  ;;  %v7740_v13 = vmul.f32 0.6931472, %v8654_v35 }
 0x60d   :  { %v16523_v62 = vsel %vm14565_vm15, 4294967295, %v16522_v62  ;;  %v14569_v46 = vadd.f32 0.001, %v7610_v12  ;;  %v7643_v36 = vsel %vm16460_vm10, %v7467_v18, %v7403_v7  ;;  %v7695_v43 = vmul.f32 6.0, %v7683_v30 }
 0x60e   :  { %16524 = vst [vmem:[#allocation60_spill] sm:$0xff] %v16523_v62  ;;  %vm7745_vm3 = vcmp.lt.f32.partialorder %v7744_v4, 0.0004427343  ;;  %v14575_v57 = vmul.f32 %v14374_v51, %v14374_v51  ;;  %v7907_v21 = vsel %vm14565_vm15, %v16519_v41, %v14533_v40  ;;  %v7911_v27 = vsel %vm14565_vm15, %v7895_v5, %v16526_v22  ;;  %v8656_v52 = vpop.eup %8655  ;;  %v16540_v62 = vld [vmem:[#allocation39_spill] sm:$0xff] }
 0x60f   :  { %16525 = vst [vmem:[#allocation6_spill] sm:$0xff] %v14569_v46  ;;  %v16527_v4 = vsel %vm16454_vm12, %v14252_v39, %v14094_v44  ;;  %v7746_v40 = vsel %vm7745_vm3, %v7743_v56, %v7740_v13  ;;  %v14598_v41 = vadd.f32 -3.0, %v7695_v43  ;;  %v7582_v5 = vmul.f32 -0.5, %v14542_v25 }
 0x610   :  { %v14596_v35 = vsel %vm16488_vm2, %v14569_v46, %v16527_v4  ;;  %v7588_v7 = vadd.f32 1.0, %v8656_v52  ;;  %v16530_v18 = vmax.f32 %v14282_v16, 0.0  ;;  %v14605_v12 = vmul.f32 %v14549_v54, %v14374_v51 }
 0x611   :  { %16528 = vst [vmem:[#allocation17_spill] sm:$0xff] %v14596_v35  ;;  %16529 = vst [vmem:[#allocation24_spill] sm:$0xff] %v14598_v41  ;;  %v7585_v44 = vand.u32 2147483647, %v14542_v25  ;;  %v7707_v39 = vsub.f32 %v14598_v41, %v14540_v23  ;;  %v7899_v22 = vsub.f32 3.0, %v14598_v41  ;;  %8663 = vrcp.f32 %v7911_v27  ;;  %v16534_v41 = vld [vmem:[#allocation34_spill] sm:$0xff] }
 0x612   :  { %v7774_v30 = vadd.f32 %v7746_v40, %v16530_v18  ;;  %v7543_v56 = vmax.f32 %v14410_v55, 0.0  ;;  %8665 = vlog2.f32 %v7588_v7  ;;  %vm16531_vm3 = vcmp.ne.f32.partialorder %v14282_v16, %v14282_v16  ;;  %v16533_v7 = vld [vmem:[#allocation62_spill] sm:$0xff]  ;;  %v16626_v58 = vld [vmem:[#allocation43_spill] sm:$0xff] }
 0x613   :  { %v7591_v51 = vmul.f32 -0.5, %v8656_v52  ;;  %v7883_v18 = vsel %vm16515_vm4, %v7707_v39, %v7643_v36  ;;  %v7583_v10 = vadd.f32 1.0, %v7582_v5  ;;  %v6948_v23 = vmul.f32 %v16534_v41, %v16533_v7  ;;  %v6245_v36 = vpop.f32.mrf.mxu1  ;;  %v16539_v7 = vld [vmem:[#allocation55_spill] sm:$0xff] }
 0x614   :  { %v14617_v43 = vsel %vm16531_vm3, %v14282_v16, %v7774_v30  ;;  %v8658_v27 = vpop.eup %8657  ;;  %v14625_v13 = vsel %vm14565_vm15, %v7899_v22, %v7883_v18  ;;  %v7188_v16 = vmul.f32 %v16534_v41, %v16535_v28  ;;  %vm14631_vm14 = vcmp.lt.f32.partialorder %v7585_v44, 0.0004427343  ;;  %v16538_v22 = vld [vmem:[#allocation16_spill] sm:$0xff] }
 0x615   :  { %v7794_v40 = vand.u32 2147483647, %v14617_v43  ;;  %16532 = vst [vmem:[#allocation75_spill] sm:$0xff] %v14625_v13  ;;  %v7597_v4 = vadd.f32 1.0, %v8658_v27  ;;  %v7600_v37 = vmul.f32 -0.5, %v8658_v27  ;;  %v7428_v18 = vmul.f32 %v16534_v41, %v16538_v22 }
 0x616   :  { %v6952_v5 = vmul.f32 0.992, %v6948_v23  ;;  %v7192_v39 = vmul.f32 0.992, %v7188_v16  ;;  %v7632_v28 = vsel %vm16497_vm8, %v16540_v62, %v16539_v7  ;;  %v7592_v44 = vadd.f32 1.0, %v7591_v51  ;;  %v16541_v23 = vld [vmem:[#allocation29_spill] sm:$0xff] }
 0x617   :  { %v7798_v63 = vsub.f32 0.0, %v7794_v40  ;;  %v7594_v53 = vand.u32 2147483647, %v8656_v52  ;;  %8667 = vlog2.f32 %v7597_v4  ;;  %v7584_v40 = vmul.f32 %v14542_v25, %v7583_v10 }
 0x618   :  { %v14643_v11 = vpop.eup %8659  ;;  %v6956_v54 = vadd.f32 0.001, %v6952_v5  ;;  %v7432_v29 = vmul.f32 0.992, %v7428_v18  ;;  %v7668_v16 = vmul.f32 %v16534_v41, %v16541_v23  ;;  %v7601_v22 = vadd.f32 1.0, %v7600_v37  ;;  %v16549_v18 = vld [vmem:[#allocation37_spill] sm:$0xff] }
 0x619   :  { %v7802_v48 = vmul.f32 1.442695, %v7798_v63  ;;  %v8662_v35 = vpop.eup %8661  ;;  %v7747_v32 = vadd.f32 1.0, %v14643_v11  ;;  %v14650_v62 = vadd.f32 %v6245_v36, %v14319_v3  ;;  %v7603_v4 = vand.u32 2147483647, %v8658_v27  ;;  %v16542_v63 = vld [vmem:[#allocation85_spill] sm:$0xff] }
 0x61a   :  { %v7581_v51 = vmul.f32 0.6931472, %v8662_v35  ;;  %v6964_v7 = vadd.f32 %v6956_v54, %v16542_v63  ;;  %v7196_v31 = vadd.f32 0.001, %v7192_v39  ;;  %v7593_v46 = vmul.f32 %v8656_v52, %v7592_v44 }
 0x61b   :  { %8669 = vpow2.f32 %v7802_v48  ;;  %vm14653_vm3 = vcmp.lt.f32.partialorder %v7594_v53, 0.0004427343  ;;  %v7943_v10 = vsub.f32 %v16521_v49, %v7907_v21  ;;  %v7436_v35 = vadd.f32 0.001, %v7432_v29 }
 0x61c   :  { %8671 = vlog2.f32 %v7747_v32  ;;  %v7587_v37 = vsel %vm14631_vm14, %v7584_v40, %v7581_v51  ;;  %v6976_v3 = vmul.f32 6.0, %v6964_v7  ;;  %v7204_v48 = vadd.f32 %v7196_v31, %v6964_v7 }
 0x61d   :  { %v7607_v41 = vadd.f32 %v7587_v37, %v7543_v56  ;;  %v7602_v54 = vmul.f32 %v8658_v27, %v7601_v22  ;;  %v7750_v52 = vmul.f32 -0.5, %v14643_v11  ;;  %v7672_v53 = vmul.f32 0.992, %v7668_v16  ;;  %v16548_v27 = vld [vmem:[#allocation28_spill] sm:$0xff] }
 0x61e   :  { %v8664_v36 = vpop.eup %8663  ;;  %vm14663_vm0 = vcmp.lt.f32.partialorder %v7603_v4, 0.0004427343  ;;  %v14667_v32 = vadd.f32 -3.0, %v6976_v3  ;;  %v7216_v49 = vmul.f32 6.0, %v7204_v48  ;;  %v7444_v21 = vadd.f32 %v7436_v35, %v7204_v48 }
 0x61f   :  { %v7724_v30 = vand.u32 2147483647, %v14650_v62  ;;  %v8666_v39 = vpop.eup %8665  ;;  %vm16547_vm14 = vcmp.ne.f32.partialorder %v14410_v55, %v14410_v55  ;;  %v14675_v29 = vmul.f32 %v8664_v36, %v14625_v13  ;;  %v14677_v56 = vmul.f32 %v8664_v36, %v7943_v10 }
 0x620   :  { %v7611_v31 = vsel %vm16547_vm14, %v14410_v55, %v7607_v41  ;;  %vm16550_vm15 = vnez %v16549_v18  ;;  %v7590_v23 = vmul.f32 0.6931472, %v8666_v39  ;;  %v6988_v16 = vsub.f32 %v14667_v32, %v13243_v26 }
 0x621   :  { %v14682_v44 = vsel %vm16550_vm15, %v16548_v27, %v7632_v28  ;;  %v14684_v40 = vadd.f32 0.001, %v7611_v31  ;;  %v14688_v22 = vadd.f32 -3.0, %v7216_v49  ;;  %vm7549_vm14 = vcmp.ne.f32.partialorder %v14484_v45, %v14484_v45 }
 0x622   :  { %v14693_v55 = vsub.f32 1.0, %v14677_v56  ;;  %v14696_v51 = vmul.f32 2.0, %v14675_v29  ;;  %v7456_v4 = vmul.f32 6.0, %v7444_v21  ;;  %v7676_v28 = vadd.f32 0.001, %v7672_v53 }
 0x623   :  { %v16552_v7 = vsel %vm16460_vm10, %v14276_v33, %v14135_v17  ;;  %v7596_v37 = vsel %vm14653_vm3, %v7593_v46, %v7590_v23  ;;  %v7164_v3 = vsel %vm16413_vm11, %v6988_v16, %v13293_v24  ;;  %v16553_v48 = vmax.f32 %v14465_v0, 0.0 }
 0x624   :  { %16551 = vst [vmem:[#allocation18_spill] sm:$0xff] %v14696_v51  ;;  %v14710_v10 = vsel %vm16515_vm4, %v14684_v40, %v16552_v7  ;;  %v7753_v41 = vand.u32 2147483647, %v14643_v11  ;;  %v14722_v17 = vmul.f32 %v14693_v55, %v14677_v56  ;;  %v7228_v33 = vsub.f32 %v14688_v22, %v14667_v32  ;;  %v8668_v53 = vpop.eup %8667  ;;  %v16557_v7 = vld [vmem:[#allocation38_spill] sm:$0xff] }
 0x625   :  { %v7608_v35 = vadd.f32 %v7596_v37, %v16553_v48  ;;  %v7751_v36 = vadd.f32 1.0, %v7750_v52  ;;  %v14726_v25 = vadd.f32 -3.0, %v7456_v4  ;;  %v7684_v46 = vadd.f32 %v7676_v28, %v7444_v21 }
 0x626   :  { %v7728_v49 = vsub.f32 0.0, %v7724_v30  ;;  %vm16554_vm3 = vcmp.ne.f32.partialorder %v14465_v0, %v14465_v0  ;;  %v7599_v39 = vmul.f32 0.6931472, %v8668_v53  ;;  %v14734_v31 = vmul.f32 %v14696_v51, %v14722_v17 }
 0x627   :  { %v7612_v24 = vsel %vm16554_vm3, %v14465_v0, %v7608_v35  ;;  %v7404_v27 = vsel %vm16442_vm5, %v7228_v33, %v7164_v3  ;;  %v7468_v21 = vsub.f32 %v14726_v25, %v14688_v22  ;;  %v7696_v30 = vmul.f32 6.0, %v7684_v46 }
 0x628   :  { %16555 = vst [vmem:[#allocation45_spill] sm:$0xff] %v14734_v31  ;;  %v14738_v23 = vpop.eup %8669  ;;  %v14740_v52 = vadd.f32 0.001, %v7612_v24  ;;  %v7734_v16 = vmul.f32 1.442695, %v7728_v49  ;;  %v7605_v0 = vsel %vm14663_vm0, %v7602_v54, %v7599_v39  ;;  %v7711_v28 = vmax.f32 %v14488_v42, 0.0 }
 0x629   :  { %v7810_v4 = vadd.f32 1.0, %v14738_v23  ;;  %v7896_v37 = vsub.f32 3.0, %v16557_v7  ;;  %v8672_v48 = vpop.eup %8671  ;;  %v16558_v35 = vsel %vm16497_vm8, %v14434_v47, %v14199_v1  ;;  %v16560_v5 = vmax.f32 %v14484_v45, 0.0  ;;  %v16561_v24 = vld [vmem:[#allocation12_spill] sm:$0xff] }
 0x62a   :  { %16556 = vst [vmem:[#allocation25_spill] sm:$0xff] %v14740_v52  ;;  %v14761_v54 = vsel %vm16550_vm15, %v14740_v52, %v16558_v35  ;;  %v7644_v53 = vsel %vm16497_vm8, %v7468_v21, %v7404_v27  ;;  %v7749_v46 = vmul.f32 0.6931472, %v8672_v48  ;;  %v7752_v49 = vmul.f32 %v14643_v11, %v7751_v36 }
 0x62b   :  { %16559 = vst [vmem:[#allocation8_spill] sm:$0xff] %v14761_v54  ;;  %v7609_v33 = vadd.f32 %v7605_v0, %v16560_v5  ;;  %8673 = vlog2.f32 %v7810_v4  ;;  %vm7754_vm0 = vcmp.lt.f32.partialorder %v7753_v41, 0.0004427343  ;;  %v14772_v47 = vadd.f32 -3.0, %v7696_v30  ;;  %v16565_v30 = vld [vmem:[#allocation46_spill] sm:$0xff]  ;;  %v6247_v0 = vpop.f32.mrf.mxu1  ;;  %v16584_v54 = vld [vmem:[#allocation67_spill] sm:$0xff] }
 0x62c   :  { %8675 = vpow2.f32 %v7734_v16  ;;  %vm14776_vm3 = vcmp.ge.f32.partialorder %v16561_v24, %v16557_v7  ;;  %v16562_v39 = vmov 0  ;;  %vm7715_vm4 = vcmp.ne.f32.partialorder %v14488_v42, %v14488_v42 }
 0x62d   :  { %v7613_v1 = vsel %vm7549_vm14, %v14484_v45, %v7609_v33  ;;  %v16563_v39 = vsel %vm14776_vm3, 4294967295, %v16562_v39  ;;  %v7755_v11 = vsel %vm7754_vm0, %v7752_v49, %v7749_v46  ;;  %v7908_v45 = vsel %vm14776_vm3, %v16557_v7, %v14682_v44  ;;  %v16570_v33 = vld [vmem:[#allocation22_spill] sm:$0xff] }
 0x62e   :  { %v14780_v27 = vadd.f32 0.001, %v7613_v1  ;;  %v7775_v41 = vadd.f32 %v7755_v11, %v7711_v28  ;;  %v7708_v36 = vsub.f32 %v14772_v47, %v14726_v25  ;;  %v7900_v21 = vsub.f32 3.0, %v14772_v47  ;;  %v16567_v28 = vld [vmem:[#allocation72_spill] sm:$0xff] }
 0x62f   :  { %v7912_v16 = vsel %vm14776_vm3, %v7896_v37, %v16565_v30  ;;  %v16566_v44 = vsel %vm16504_vm7, %v14492_v2, %v14224_v20  ;;  %vm16568_vm14 = vnez %v16567_v28  ;;  %v7813_v48 = vmul.f32 -0.5, %v14738_v23  ;;  %v16571_v20 = vld [vmem:[#allocation83_spill] sm:$0xff] }
 0x630   :  { %16564 = vst [vmem:[#allocation54_spill] sm:$0xff] %v14780_v27  ;;  %v14806_v7 = vsel %vm16568_vm14, %v14780_v27, %v16566_v44  ;;  %8677 = vrcp.f32 %v7912_v16  ;;  %v14811_v37 = vmul.f32 %v14575_v57, %v14445_v38  ;;  %v14814_v35 = vsel %vm7715_vm4, %v14488_v42, %v7775_v41  ;;  %v16573_v41 = vld [vmem:[#allocation77_spill] sm:$0xff]  ;;  %v16575_v16 = vld [vmem:[#allocation11_spill] sm:$0xff] }
 0x631   :  { %16569 = vst [vmem:[#allocation5_spill] sm:$0xff] %v14806_v7  ;;  %v7884_v5 = vsel %vm16550_vm15, %v7708_v36, %v7644_v53  ;;  %v6949_v2 = vmul.f32 %v16571_v20, %v16570_v33  ;;  %v14821_v46 = vmul.f32 2.0, %v14445_v38  ;;  %v7795_v49 = vand.u32 2147483647, %v14814_v35  ;;  %v16574_v53 = vld [vmem:[#allocation78_spill] sm:$0xff]  ;;  %v16576_v44 = vld [vmem:[#allocation47_spill] sm:$0xff] }
 0x632   :  { %v14826_v1 = vsel %vm14776_vm3, %v7900_v21, %v7884_v5  ;;  %v14829_v11 = vadd.f32 %v6247_v0, %v14322_v61  ;;  %v7189_v30 = vmul.f32 %v16571_v20, %v16573_v41  ;;  %v7429_v36 = vmul.f32 %v16571_v20, %v16574_v53  ;;  %v16577_v5 = vld [vmem:[#allocation79_spill] sm:$0xff]  ;;  %v16578_v41 = vld [vmem:[#allocation26_spill] sm:$0xff] }
 0x633   :  { %16572 = vst [vmem:[#allocation74_spill] sm:$0xff] %v14826_v1  ;;  %v6953_v42 = vmul.f32 0.992, %v6949_v2  ;;  %v7633_v33 = vsel %vm16504_vm7, %v16576_v44, %v16575_v16  ;;  %v7782_v4 = vmax.f32 %v14617_v43, 0.0  ;;  %v7814_v3 = vadd.f32 1.0, %v7813_v48 }
 0x634   :  { %v7799_v21 = vsub.f32 0.0, %v7795_v49  ;;  %v7669_v61 = vmul.f32 %v16571_v20, %v16577_v5  ;;  %v7816_v0 = vand.u32 2147483647, %v14738_v23  ;;  %v7193_v63 = vmul.f32 0.992, %v7189_v30  ;;  %v16579_v49 = vld [vmem:[#allocation30_spill] sm:$0xff] }
 0x635   :  { %v6957_v2 = vadd.f32 0.001, %v6953_v42  ;;  %v14846_v53 = vsel %vm16568_vm14, %v16578_v41, %v7633_v33  ;;  %v14850_v7 = vmul.f32 %v14821_v46, %v14605_v12  ;;  %v7433_v44 = vmul.f32 0.992, %v7429_v36  ;;  %v16580_v5 = vld [vmem:[#allocation66_spill] sm:$0xff] }
 0x636   :  { %v7804_v16 = vmul.f32 1.442695, %v7799_v21  ;;  %v7725_v48 = vand.u32 2147483647, %v14829_v11  ;;  %v7197_v20 = vadd.f32 0.001, %v7193_v63  ;;  %v7815_v33 = vmul.f32 %v14738_v23, %v7814_v3 }
 0x637   :  { %v6965_v50 = vadd.f32 %v6957_v2, %v16579_v49  ;;  %v7897_v27 = vsub.f32 3.0, %v16580_v5  ;;  %v16581_v42 = vld [vmem:[#allocation58_spill] sm:$0xff]  ;;  %v16582_v30 = vmov 0  ;;  %v7673_v49 = vmul.f32 0.992, %v7669_v61 }
 0x638   :  { %vm14857_vm4 = vcmp.ge.f32.partialorder %v16581_v42, %v16580_v5  ;;  %8679 = vpow2.f32 %v7804_v16  ;;  %v7729_v41 = vsub.f32 0.0, %v7725_v48  ;;  %v8674_v21 = vpop.eup %8673  ;;  %v7437_v31 = vadd.f32 0.001, %v7433_v44  ;;  %v16586_v44 = vld [vmem:[#allocation86_spill] sm:$0xff] }
 0x639   :  { %v16583_v30 = vsel %vm14857_vm4, 4294967295, %v16582_v30  ;;  %v7909_v36 = vsel %vm14857_vm4, %v16580_v5, %v14846_v53  ;;  %v6977_v2 = vmul.f32 6.0, %v6965_v50  ;;  %v7205_v63 = vadd.f32 %v7197_v20, %v6965_v50  ;;  %v14869_v52 = vpop.eup %8675 }
 0x63a   :  { %v7913_v34 = vsel %vm14857_vm4, %v7897_v27, %v16584_v54  ;;  %v7812_v13 = vmul.f32 0.6931472, %v8674_v21  ;;  %v7736_v23 = vmul.f32 1.442695, %v7729_v41  ;;  %vm7817_vm0 = vcmp.lt.f32.partialorder %v7816_v0, 0.0004427343 }
 0x63b   :  { %8681 = vrcp.f32 %v7913_v34  ;;  %v7756_v3 = vadd.f32 1.0, %v14869_v52  ;;  %v7944_v16 = vsub.f32 %v16561_v24, %v7908_v45  ;;  %v14873_v53 = vadd.f32 -3.0, %v6977_v2 }
 0x63c   :  { %v7818_v48 = vsel %vm7817_vm0, %v7815_v33, %v7812_v13  ;;  %v7217_v50 = vmul.f32 6.0, %v7205_v63  ;;  %v7445_v61 = vadd.f32 %v7437_v31, %v7205_v63  ;;  %8683 = vpow2.f32 %v7736_v23  ;;  %v16590_v63 = vld [vmem:[#allocation87_spill] sm:$0xff] }
 0x63d   :  { %v8678_v20 = vpop.eup %8677  ;;  %vm7786_vm3 = vcmp.ne.f32.partialorder %v14617_v43, %v14617_v43  ;;  %v7846_v54 = vadd.f32 %v7818_v48, %v7782_v4  ;;  %8685 = vlog2.f32 %v7756_v3  ;;  %v7677_v27 = vadd.f32 0.001, %v7673_v49  ;;  %v16592_v48 = vld [vmem:[#allocation57_spill] sm:$0xff] }
 0x63e   :  { %v14878_v34 = vmul.f32 %v8678_v20, %v14826_v1  ;;  %v7948_v0 = vmul.f32 %v8678_v20, %v7944_v16  ;;  %v6989_v24 = vsub.f32 %v14873_v53, %v16586_v44  ;;  %v14882_v45 = vadd.f32 -3.0, %v7217_v50  ;;  %v16591_v16 = vld [vmem:[#allocation6_spill] sm:$0xff]  ;;  %v16625_v1 = vld [vmem:[#allocation41_spill] sm:$0xff] }
 0x63f   :  { %v7850_v13 = vsel %vm7786_vm3, %v14617_v43, %v7846_v54  ;;  %v7759_v31 = vmul.f32 -0.5, %v14869_v52  ;;  %v7457_v5 = vmul.f32 6.0, %v7445_v61  ;;  %v7685_v33 = vadd.f32 %v7677_v27, %v7445_v61  ;;  %v16595_v54 = vld [vmem:[#allocation17_spill] sm:$0xff] }
 0x640   :  { %16585 = vst [vmem:[#allocation76_spill] sm:$0xff] %v14878_v34  ;;  %v7854_v41 = vadd.f32 0.001, %v7850_v13  ;;  %v14886_v21 = vsub.f32 1.0, %v7948_v0  ;;  %v14888_v4 = vmul.f32 %v7948_v0, %v7948_v0  ;;  %v14891_v2 = vmul.f32 2.0, %v14878_v34 }
 0x641   :  { %v7165_v49 = vsel %vm16422_vm1, %v6989_v24, %v16590_v63  ;;  %v7229_v23 = vsub.f32 %v14882_v45, %v14873_v53  ;;  %v14898_v43 = vadd.f32 -3.0, %v7457_v5  ;;  %v7697_v3 = vmul.f32 6.0, %v7685_v33 }
 0x642   :  { %16587 = vst [vmem:[#allocation80_spill] sm:$0xff] %v14886_v21  ;;  %16588 = vst [vmem:[#allocation49_spill] sm:$0xff] %v14888_v4  ;;  %v16593_v50 = vsel %vm16454_vm12, %v16591_v16, %v16592_v48  ;;  %v7922_v13 = vsel %vm16463_vm6, %v7854_v41, %v16595_v54  ;;  %v14911_v24 = vmul.f32 %v14886_v21, %v7948_v0  ;;  %v16599_v16 = vld [vmem:[#allocation69_spill] sm:$0xff] }
 0x643   :  { %16589 = vst [vmem:[#allocation40_spill] sm:$0xff] %v14891_v2  ;;  %v7890_v20 = vsel %vm16488_vm2, %v7854_v41, %v16593_v50  ;;  %v14915_v5 = vmul.f32 %v14888_v4, %v14878_v34  ;;  %v7966_v63 = vmul.f32 %v14605_v12, %v7922_v13  ;;  %v8030_v48 = vmul.f32 %v16599_v16, %v7922_v13 }
 0x644   :  { %16597 = vst [vmem:[#allocation20_spill] sm:$0xff] %v14911_v24  ;;  %v7926_v33 = vsel %vm16463_vm6, 1.0, %v7890_v20  ;;  %v7405_v50 = vsel %vm16445_vm13, %v7229_v23, %v7165_v49  ;;  %v14926_v0 = vmul.f32 %v14891_v2, %v14911_v24  ;;  %v7469_v54 = vsub.f32 %v14898_v43, %v14882_v45 }
 0x645   :  { %16598 = vst [vmem:[#allocation44_spill] sm:$0xff] %v14915_v5  ;;  %v7978_v51 = vadd.f32 %v7926_v33, %v7922_v13  ;;  %v8018_v41 = vmul.f32 %v14575_v57, %v7926_v33  ;;  %v8680_v34 = vpop.eup %8679  ;;  %v7970_v20 = vadd.f32 %v7966_v63, %v14811_v37  ;;  %v8034_v5 = vmul.f32 %v8030_v48, %v16599_v16 }
 0x646   :  { %16601 = vst [vmem:[#allocation81_spill] sm:$0xff] %v14926_v0  ;;  %v14932_v4 = vadd.f32 -3.0, %v7697_v3  ;;  %v7945_v21 = vsub.f32 %v16581_v42, %v7909_v36  ;;  %v7819_v23 = vadd.f32 1.0, %v8680_v34  ;;  %v7762_v13 = vand.u32 2147483647, %v14869_v52  ;;  %v16602_v0 = vld [vmem:[#allocation50_spill] sm:$0xff] }
 0x647   :  { %v7986_v49 = vsub.f32 %v7978_v51, %v14821_v46  ;;  %v8026_v57 = vadd.f32 %v14850_v7, %v8018_v41  ;;  %v14939_v2 = vmul.f32 %v7970_v20, %v16602_v0  ;;  %v7760_v24 = vadd.f32 1.0, %v7759_v31 }
 0x648   :  { %v8682_v33 = vpop.eup %8681  ;;  %v7645_v37 = vsel %vm16504_vm7, %v7469_v54, %v7405_v50  ;;  %v7709_v3 = vsub.f32 %v14932_v4, %v14898_v43  ;;  %8687 = vlog2.f32 %v7819_v23  ;;  %v7822_v7 = vmul.f32 -0.5, %v8680_v34 }
 0x649   :  { %v7990_v42 = vmul.f32 %v7986_v49, %v14605_v12  ;;  %v14946_v36 = vadd.f32 %v8034_v5, %v8026_v57  ;;  %v14948_v51 = vpop.eup %8683  ;;  %v7901_v63 = vsub.f32 3.0, %v14932_v4  ;;  %v7949_v31 = vmul.f32 %v8682_v33, %v7945_v21 }
 0x64a   :  { %v7885_v46 = vsel %vm16568_vm14, %v7709_v3, %v7645_v37  ;;  %v8686_v16 = vpop.eup %8685  ;;  %v7712_v50 = vmax.f32 %v14650_v62, 0.0  ;;  %vm7763_vm3 = vcmp.lt.f32.partialorder %v7762_v13, 0.0004427343  ;;  %v7765_v12 = vadd.f32 1.0, %v14948_v51 }
 0x64b   :  { %v7994_v48 = vadd.f32 %v7990_v42, %v14445_v38  ;;  %v7758_v5 = vmul.f32 0.6931472, %v8686_v16  ;;  %v7761_v41 = vmul.f32 %v14869_v52, %v7760_v24  ;;  %v14959_v0 = vsel %vm14857_vm4, %v7901_v63, %v7885_v46  ;;  %v16608_v16 = vld [vmem:[#allocation56_spill] sm:$0xff] }
 0x64c   :  { %16603 = vst [vmem:[#allocation70_spill] sm:$0xff] %v14959_v0  ;;  %v14961_v54 = vsub.f32 1.0, %v7949_v31  ;;  %v7825_v20 = vand.u32 2147483647, %v8680_v34  ;;  %v14964_v21 = vmul.f32 %v8682_v33, %v14959_v0  ;;  %v14966_v49 = vmul.f32 %v7949_v31, %v7949_v31  ;;  %v16618_v0 = vld [vmem:[#allocation27_spill] sm:$0xff] }
 0x64d   :  { %8689 = vrcp.f32 %v7994_v48  ;;  %v7823_v57 = vadd.f32 1.0, %v7822_v7  ;;  %v7764_v23 = vsel %vm7763_vm3, %v7761_v41, %v7758_v5  ;;  %vm7716_vm0 = vcmp.ne.f32.partialorder %v14650_v62, %v14650_v62  ;;  %v16609_v48 = vld [vmem:[#allocation53_spill] sm:$0xff]  ;;  %v16611_v5 = vld [vmem:[#allocation59_spill] sm:$0xff]  ;;  %v16612_v41 = vld [vmem:[#allocation82_spill] sm:$0xff] }
 0x64e   :  { %16604 = vst [vmem:[#allocation73_spill] sm:$0xff] %v14964_v21  ;;  %8691 = vlog2.f32 %v7765_v12  ;;  %v7776_v13 = vadd.f32 %v7764_v23, %v7712_v50  ;;  %v14969_v37 = vmul.f32 %v14961_v54, %v7949_v31  ;;  %v14973_v52 = vmul.f32 %v14966_v49, %v14964_v21  ;;  %v16615_v23 = vld [vmem:[#allocation13_spill] sm:$0xff] }
 0x64f   :  { %v14976_v24 = vmul.f32 2.0, %v14964_v21  ;;  %v7783_v33 = vmax.f32 %v14814_v35, 0.0  ;;  %vm14981_vm4 = vcmp.lt.f32.partialorder %v7825_v20, 0.0004427343  ;;  %v7824_v46 = vmul.f32 %v8680_v34, %v7823_v57  ;;  %v16613_v20 = vld [vmem:[#allocation48_spill] sm:$0xff]  ;;  %v16616_v34 = vld [vmem:[#allocation23_spill] sm:$0xff] }
 0x650   :  { %v14986_v42 = vsel %vm7716_vm0, %v14650_v62, %v7776_v13  ;;  %v7768_v31 = vmul.f32 -0.5, %v14948_v51  ;;  %v7158_v12 = vsel %vm11919_vm9, %v16609_v48, %v16608_v16  ;;  %vm16614_vm3 = vnez %v16613_v20  ;;  %v16617_v21 = vld [vmem:[#allocation36_spill] sm:$0xff] }
 0x651   :  { %v14990_v7 = vmul.f32 %v14976_v24, %v14969_v37  ;;  %v7796_v63 = vand.u32 2147483647, %v14986_v42  ;;  %v7159_v62 = vsel %vm16614_vm3, %v16612_v41, %v16611_v5  ;;  %v7160_v13 = vsel %vm16413_vm11, %v13243_v26, %v16615_v23  ;;  %v16620_v48 = vld [vmem:[#allocation64_spill] sm:$0xff]  ;;  %v16628_v41 = vld [vmem:[#allocation65_spill] sm:$0xff] }
 0x652   :  { %v7161_v57 = vsel %vm16422_vm1, %v16586_v44, %v16616_v34  ;;  %vm16619_vm0 = vnez %v16618_v0  ;;  %v7400_v5 = vsel %vm16442_vm5, %v14667_v32, %v7160_v13  ;;  %v16624_v44 = vld [vmem:[#allocation51_spill] sm:$0xff]  ;;  %vm16627_vm11 = vnez %v16514_v8  ;;  %v16630_v23 = vld [vmem:[#allocation60_spill] sm:$0xff] }
 0x653   :  { %16607 = vst [vmem:[#allocation32_spill] sm:$0xff] %v14990_v7  ;;  %v7398_v50 = vsel %vm16619_vm0, %v16617_v21, %v7158_v12  ;;  %v7800_v16 = vsub.f32 0.0, %v7796_v63  ;;  %v16621_v7 = vld [vmem:[#allocation10_spill] sm:$0xff]  ;;  %v7401_v26 = vsel %vm16445_vm13, %v14873_v53, %v7161_v57  ;;  %v7640_v21 = vsel %vm16497_vm8, %v14688_v22, %v7400_v5 }
 0x654   :  { %vm16622_vm9 = vnez %v16621_v7  ;;  %v7638_v15 = vsel %vm16454_vm12, %v16623_v9, %v7398_v50  ;;  %v7641_v14 = vsel %vm16504_vm7, %v14882_v45, %v7401_v26  ;;  %v15045_v12 = vsel %vm16550_vm15, %v14726_v25, %v7640_v21 }
 0x655   :  { %v7399_v20 = vsel %vm16622_vm9, %v16620_v48, %v7159_v62  ;;  %v8688_v32 = vpop.eup %8687  ;;  %v7806_v7 = vmul.f32 1.442695, %v7800_v16  ;;  %v7878_v53 = vsel %vm16488_vm2, %v16625_v1, %v7638_v15  ;;  %v15050_v45 = vsel %vm16568_vm14, %v14898_v43, %v7641_v14  ;;  %v16629_v62 = vld [vmem:[#allocation24_spill] sm:$0xff] }
 0x656   :  { %v7639_v0 = vsel %vm16460_vm10, %v16624_v44, %v7399_v20  ;;  %v7821_v22 = vmul.f32 0.6931472, %v8688_v32  ;;  %v7914_v61 = vsel %vm16463_vm6, %v16628_v41, %v7878_v53  ;;  %vm16631_vm1 = vnez %v16630_v23  ;;  %v8715_v20 = vld [vmem:[%s15240_s1] sm:$0xff] }
 0x657   :  { %v15040_v63 = vsel %vm16627_vm11, %v16626_v58, %v7639_v0  ;;  %8693 = vpow2.f32 %v7806_v7  ;;  %v7769_v34 = vadd.f32 1.0, %v7768_v31  ;;  %vm16632_vm5 = vnez %v16563_v39 }
 0x658   :  { %v7915_v13 = vsel %vm16631_vm1, %v16629_v62, %v15040_v63  ;;  %v7916_v25 = vsel %vm16632_vm5, %v14772_v47, %v15045_v12  ;;  %vm16633_vm13 = vnez %v16583_v30  ;;  %v7827_v27 = vsel %vm14981_vm4, %v7824_v46, %v7821_v22  ;;  %v16637_v22 = vld [vmem:[#allocation18_spill] sm:$0xff]  ;;  %v16642_v63 = vld [vmem:[#allocation25_spill] sm:$0xff]  ;;  %v16643_v62 = vld [vmem:[#allocation68_spill] sm:$0xff] }
 0x659   :  { %v7917_v43 = vsel %vm16633_vm13, %v14932_v4, %v15050_v45  ;;  %v7771_v57 = vand.u32 2147483647, %v14948_v51  ;;  %v8014_v50 = vmul.f32 %v14445_v38, %v14445_v38  ;;  %v7847_v31 = vadd.f32 %v7827_v27, %v7783_v33 }
 0x65a   :  { %v8690_v16 = vpop.eup %8689  ;;  %v7959_v48 = vmul.f32 %v14677_v56, %v14677_v56  ;;  %vm1458_vm12 = vcmp.ge.f32.partialorder %v8715_v20, -3.0  ;;  %vm1462_vm6 = vcmp.le.f32.partialorder %v8715_v20, 3.0  ;;  %vm7787_vm2 = vcmp.ne.f32.partialorder %v14814_v35, %v14814_v35 }
 0x65b   :  { %v8692_v5 = vpop.eup %8691  ;;  %v8006_v3 = vmul.f32 %v8690_v16, %v14939_v2  ;;  %v8042_v46 = vmul.f32 %v14946_v36, %v8014_v50  ;;  %v8046_v38 = vmul.f32 %v8690_v16, %v8690_v16  ;;  %v7851_v33 = vsel %vm7787_vm2, %v14814_v35, %v7847_v31  ;;  %vm15084_vm3 = vmand %vm1458_vm12, %vm1462_vm6 }
 0x65c   :  { %v7713_v26 = vmax.f32 %v14829_v11, 0.0  ;;  %v7767_v56 = vmul.f32 0.6931472, %v8692_v5  ;;  %v7770_v9 = vmul.f32 %v14948_v51, %v7769_v34  ;;  %v7855_v15 = vadd.f32 0.001, %v7851_v33 }
 0x65d   :  { %vm7772_vm4 = vcmp.lt.f32.partialorder %v7771_v57, 0.0004427343  ;;  %v8010_v2 = vadd.f32 %v8006_v3, %v7914_v61  ;;  %v8050_v0 = vmul.f32 %v8046_v38, %v8042_v46  ;;  %v7963_v21 = vmul.f32 %v7959_v48, %v14675_v29  ;;  %v16638_v61 = vld [vmem:[#allocation45_spill] sm:$0xff]  ;;  %v16639_v57 = vld [vmem:[#allocation75_spill] sm:$0xff] }
 0x65e   :  { %vm7717_vm0 = vcmp.ne.f32.partialorder %v14829_v11, %v14829_v11  ;;  %v7773_v36 = vsel %vm7772_vm4, %v7770_v9, %v7767_v56  ;;  %v16636_v35 = vsel %vm16460_vm10, %v14684_v40, %v14298_v19  ;;  %v7923_v14 = vsel %vm16631_vm1, %v7855_v15, %v14710_v10  ;;  %v8716_v9 = vld [vmem:[%s15240_s1 + $0x8] sm:$0xff] }
 0x65f   :  { %v7891_v51 = vsel %vm16627_vm11, %v7855_v15, %v16636_v35  ;;  %v7777_v32 = vadd.f32 %v7773_v36, %v7713_v26  ;;  %8695 = vlog2.f32 %v8050_v0  ;;  %v7967_v1 = vmul.f32 %v14722_v17, %v7923_v14 }
 0x660   :  { %v7927_v7 = vsel %vm16631_vm1, 1.0, %v7891_v51  ;;  %v8031_v53 = vmul.f32 %v14693_v55, %v7923_v14  ;;  %v8062_v6 = vsel %vm15084_vm3, %v8010_v2, %v8715_v20  ;;  %vm1459_vm10 = vcmp.ge.f32.partialorder %v8716_v9, -3.0 }
 0x661   :  { %v7979_v19 = vadd.f32 %v7927_v7, %v7923_v14  ;;  %v8019_v40 = vmul.f32 %v7959_v48, %v7927_v7  ;;  %v15108_v8 = vsel %vm7717_vm0, %v14829_v11, %v7777_v32  ;;  %8066 = vst [vmem:[%s15251_s12] sm:$0xff] %v8062_v6  ;;  %v7971_v10 = vadd.f32 %v7967_v1, %v7963_v21 }
 0x662   :  { %v8035_v58 = vmul.f32 %v8031_v53, %v14693_v55  ;;  %v7797_v27 = vand.u32 2147483647, %v15108_v8  ;;  %vm1463_vm9 = vcmp.le.f32.partialorder %v8716_v9, 3.0  ;;  %v8015_v15 = vmul.f32 %v14675_v29, %v14675_v29 }
 0x663   :  { %v7987_v41 = vsub.f32 %v7979_v19, %v16637_v22  ;;  %v8027_v34 = vadd.f32 %v16638_v61, %v8019_v40  ;;  %v7975_v50 = vmul.f32 %v7971_v10, %v16639_v57  ;;  %v7784_v0 = vmax.f32 %v14986_v42, 0.0  ;;  %vm15131_vm12 = vmand %vm1459_vm10, %vm1463_vm9  ;;  %v16645_v22 = vld [vmem:[#allocation8_spill] sm:$0xff] }
 0x664   :  { %v8694_v16 = vpop.eup %8693  ;;  %v7801_v48 = vsub.f32 0.0, %v7797_v27  ;;  %vm7788_vm6 = vcmp.ne.f32.partialorder %v14986_v42, %v14986_v42  ;;  %v16644_v23 = vsel %vm16497_vm8, %v16642_v63, %v16643_v62  ;;  %v16646_v61 = vld [vmem:[#allocation20_spill] sm:$0xff]  ;;  %vm7789_vm8 = vcmp.ne.f32.partialorder %v15108_v8, %v15108_v8  ;;  %v16654_v63 = vld [vmem:[#allocation54_spill] sm:$0xff]  ;;  %v16655_v62 = vld [vmem:[#allocation71_spill] sm:$0xff] }
 0x665   :  { %v7991_v31 = vmul.f32 %v7987_v41, %v14722_v17  ;;  %v8039_v11 = vadd.f32 %v8035_v58, %v8027_v34  ;;  %v7828_v20 = vadd.f32 1.0, %v8694_v16  ;;  %v7831_v38 = vmul.f32 -0.5, %v8694_v16  ;;  %v16647_v27 = vld [vmem:[#allocation80_spill] sm:$0xff] }
 0x666   :  { %v7808_v3 = vmul.f32 1.442695, %v7801_v48  ;;  %v7834_v56 = vand.u32 2147483647, %v8694_v16  ;;  %v8094_v44 = vlaneseq }
 0x667   :  { %v7995_v5 = vadd.f32 %v7991_v31, %v14675_v29  ;;  %8697 = vlog2.f32 %v7828_v20  ;;  %v7832_v26 = vadd.f32 1.0, %v7831_v38  ;;  %v8043_v14 = vmul.f32 %v8039_v11, %v8015_v15  ;;  %v16649_v11 = vld [vmem:[#allocation44_spill] sm:$0xff]  ;;  %v16652_v38 = vld [vmem:[#allocation74_spill] sm:$0xff] }
 0x668   :  { %vm7835_vm11 = vcmp.lt.f32.partialorder %v7834_v56, 0.0004427343  ;;  %v16650_v20 = vld [vmem:[#allocation40_spill] sm:$0xff] }
 0x669   :  { %8699 = vrcp.f32 %v7995_v5  ;;  %v7833_v36 = vmul.f32 %v8694_v16, %v7832_v26  ;;  %v16648_v16 = vld [vmem:[#allocation49_spill] sm:$0xff]  ;;  %v16653_v15 = vld [vmem:[#allocation76_spill] sm:$0xff] }
 0x66a   :  { %8701 = vpow2.f32 %v7808_v3  ;;  %v16651_v3 = vld [vmem:[#allocation81_spill] sm:$0xff] }
 0x66c   :  { %v8696_v55 = vpop.eup %8695 }
 0x66d   :  { %v15120_v46 = vmul.f32 0.6931472, %v8696_v55 }
 0x66f   :  { %v8070_v33 = vsel %vm15084_vm3, %v15120_v46, 0.0 }
 0x674   :  { %v8698_v17 = vpop.eup %8697 }
 0x675   :  { %v7830_v21 = vmul.f32 0.6931472, %v8698_v17 }
 0x676   :  { %v8700_v2 = vpop.eup %8699 }
 0x677   :  { %v8702_v35 = vpop.eup %8701  ;;  %v8007_v51 = vmul.f32 %v8700_v2, %v7975_v50  ;;  %v8047_v32 = vmul.f32 %v8700_v2, %v8700_v2  ;;  %v7836_v7 = vsel %vm7835_vm11, %v7833_v36, %v7830_v21  ;;  %v8016_v2 = vmul.f32 %v16653_v15, %v16653_v15 }
 0x678   :  { %v7837_v1 = vadd.f32 1.0, %v8702_v35  ;;  %v7848_v6 = vadd.f32 %v7836_v7, %v7784_v0  ;;  %v7840_v31 = vmul.f32 -0.5, %v8702_v35  ;;  %v7843_v0 = vand.u32 2147483647, %v8702_v35 }
 0x679   :  { %v8011_v29 = vadd.f32 %v8007_v51, %v7915_v13  ;;  %v8051_v19 = vmul.f32 %v8047_v32, %v8043_v14 }
 0x67a   :  { %8703 = vlog2.f32 %v7837_v1  ;;  %v7852_v40 = vsel %vm7788_vm6, %v14986_v42, %v7848_v6  ;;  %v7785_v1 = vmax.f32 %v15108_v8, 0.0 }
 0x67b   :  { %8705 = vlog2.f32 %v8051_v19  ;;  %v8063_v10 = vsel %vm15131_vm12, %v8011_v29, %v8716_v9  ;;  %v7856_v58 = vadd.f32 0.001, %v7852_v40  ;;  %v7841_v9 = vadd.f32 1.0, %v7840_v31 }
 0x67c   :  { %8067 = vst [vmem:[%s15251_s12 + $0x8] sm:$0xff] %v8063_v10 }
 0x67d   :  { %v7892_v13 = vsel %vm16550_vm15, %v7856_v58, %v16644_v23  ;;  %v7924_v42 = vsel %vm16632_vm5, %v7856_v58, %v16645_v22  ;;  %v7842_v7 = vmul.f32 %v8702_v35, %v7841_v9  ;;  %vm7844_vm15 = vcmp.lt.f32.partialorder %v7843_v0, 0.0004427343 }
 0x67e   :  { %v7928_v41 = vsel %vm16632_vm5, 1.0, %v7892_v13  ;;  %v7968_v34 = vmul.f32 %v16646_v61, %v7924_v42  ;;  %v8032_v57 = vmul.f32 %v16647_v27, %v7924_v42  ;;  %v16656_v35 = vsel %vm16504_vm7, %v16654_v63, %v16655_v62  ;;  %v16657_v13 = vld [vmem:[#allocation5_spill] sm:$0xff] }
 0x67f   :  { %v7980_v50 = vadd.f32 %v7928_v41, %v7924_v42  ;;  %v8020_v59 = vmul.f32 %v16648_v16, %v7928_v41 }
 0x680   :  { %v7972_v48 = vadd.f32 %v7968_v34, %v16649_v11  ;;  %v8036_v18 = vmul.f32 %v8032_v57, %v16647_v27  ;;  %v16658_v27 = vld [vmem:[#allocation32_spill] sm:$0xff]  ;;  %v16660_v11 = vld [vmem:[#allocation73_spill] sm:$0xff] }
 0x681   :  { %v7988_v5 = vsub.f32 %v7980_v50, %v16650_v20  ;;  %v8028_v55 = vadd.f32 %v16651_v3, %v8020_v59  ;;  %v8717_v50 = vld [vmem:[%s15240_s1 + $0x10] sm:$0xff] }
 0x682   :  { %v7976_v26 = vmul.f32 %v7972_v48, %v16652_v38  ;;  %vm1460_vm7 = vcmp.ge.f32.partialorder %v8717_v50, -3.0  ;;  %v16659_v59 = vld [vmem:[#allocation70_spill] sm:$0xff]  ;;  %v8718_v38 = vld [vmem:[%s15240_s1 + $0x18] sm:$0xff] }
 0x683   :  { %v7992_v56 = vmul.f32 %v7988_v5, %v16646_v61  ;;  %v8040_v17 = vadd.f32 %v8036_v18, %v8028_v55  ;;  %vm1461_vm2 = vcmp.ge.f32.partialorder %v8718_v38, -3.0  ;;  %vm1465_vm4 = vcmp.le.f32.partialorder %v8718_v38, 3.0 }
 0x684   :  { %vm1469_vm5 = vmand %vm1461_vm2, %vm1465_vm4 }
 0x685   :  { %v7996_v21 = vadd.f32 %v7992_v56, %v16653_v15  ;;  %v8044_v36 = vmul.f32 %v8040_v17, %v8016_v2 }
 0x687   :  { %v8704_v51 = vpop.eup %8703  ;;  %8707 = vrcp.f32 %v7996_v21 }
 0x688   :  { %v8706_v14 = vpop.eup %8705  ;;  %v7839_v32 = vmul.f32 0.6931472, %v8704_v51 }
 0x689   :  { %v8057_v6 = vmul.f32 0.6931472, %v8706_v14 }
 0x68a   :  { %v7845_v29 = vsel %vm7844_vm15, %v7842_v7, %v7839_v32  ;;  %v8743_v7 = vmov 1966171168  }
 0x68b   :  { %v7849_v19 = vadd.f32 %v7845_v29, %v7785_v1  ;;  %v8071_v40 = vsel %vm15131_vm12, %v8057_v6, 0.0  ;;  %v8092_v1 = vunpack.c.l.s4 %v8743_v7 }
 0x68d   :  { %v7853_v10 = vsel %vm7789_vm8, %v15108_v8, %v7849_v19  ;;  %v8093_v29 = vunpack.c.0.s8 %v8092_v1  ;;  %v8095_v19 = vshrl.u32 %v8094_v44, 7 }
 0x68e   :  { %v7857_v58 = vadd.f32 0.001, %v7853_v10 }
 0x68f   :  { %v8096_v62 = vsub.s32 %v8093_v29, %v8095_v19 }
 0x690   :  { %v7893_v23 = vsel %vm16568_vm14, %v7857_v58, %v16656_v35  ;;  %v7925_v22 = vsel %vm16633_vm13, %v7857_v58, %v16657_v13  ;;  %vm1464_vm14 = vcmp.le.f32.partialorder %v8717_v50, 3.0 }
 0x691   :  { %v7929_v53 = vsel %vm16633_vm13, 1.0, %v7893_v23  ;;  %v7969_v42 = vmul.f32 %v14969_v37, %v7925_v22  ;;  %v8033_v8 = vmul.f32 %v14961_v54, %v7925_v22  ;;  %vm15204_vm1 = vmand %vm1460_vm7, %vm1464_vm14  ;;  %vm8108_vm13 = vcmp.lt.s32.totalorder %v8094_v44, 256 }
 0x692   :  { %v7981_v41 = vadd.f32 %v7929_v53, %v7925_v22  ;;  %v8021_v60 = vmul.f32 %v14966_v49, %v7929_v53  ;;  %v8017_v49 = vmul.f32 %v16660_v11, %v16660_v11 }
 0x693   :  { %v7973_v61 = vadd.f32 %v7969_v42, %v14973_v52  ;;  %v8037_v34 = vmul.f32 %v8033_v8, %v14961_v54 }
 0x694   :  { %v7989_v28 = vsub.f32 %v7981_v41, %v14976_v24  ;;  %v8029_v57 = vadd.f32 %v16658_v27, %v8021_v60  ;;  %v8708_v16 = vpop.eup %8707 }
 0x695   :  { %v7977_v31 = vmul.f32 %v7973_v61, %v16659_v59  ;;  %v8008_v48 = vmul.f32 %v8708_v16, %v7976_v26  ;;  %v8048_v18 = vmul.f32 %v8708_v16, %v8708_v16 }
 0x696   :  { %v7993_v52 = vmul.f32 %v7989_v28, %v14969_v37  ;;  %v8041_v54 = vadd.f32 %v8037_v34, %v8029_v57 }
 0x697   :  { %v8012_v5 = vadd.f32 %v8008_v48, %v7916_v25  ;;  %v8052_v55 = vmul.f32 %v8048_v18, %v8044_v36 }
 0x698   :  { %v7997_v20 = vadd.f32 %v7993_v52, %v16660_v11  ;;  %v8045_v3 = vmul.f32 %v8041_v54, %v8017_v49 }
 0x699   :  { %v8064_v37 = vsel %vm15204_vm1, %v8012_v5, %v8717_v50 }
 0x69a   :  { %8709 = vrcp.f32 %v7997_v20  ;;  %8068 = vst [vmem:[%s15251_s12 + $0x10] sm:$0xff] %v8064_v37 }
 0x69b   :  { %8711 = vlog2.f32 %v8052_v55 }
 0x6a7   :  { %v8710_v39 = vpop.eup %8709 }
 0x6a8   :  { %v8712_v47 = vpop.eup %8711  ;;  %v8009_v12 = vmul.f32 %v8710_v39, %v7977_v31  ;;  %v8049_v25 = vmul.f32 %v8710_v39, %v8710_v39 }
 0x6a9   :  { %v8059_v26 = vmul.f32 0.6931472, %v8712_v47 }
 0x6aa   :  { %v8013_v56 = vadd.f32 %v8009_v12, %v7917_v43  ;;  %v8053_v17 = vmul.f32 %v8049_v25, %v8045_v3 }
 0x6ab   :  { %v8072_v9 = vsel %vm15204_vm1, %v8059_v26, 0.0 }
 0x6ac   :  { %8713 = vlog2.f32 %v8053_v17  ;;  %v8065_v15 = vsel %vm1469_vm5, %v8013_v56, %v8718_v38  ;;  %v8074_v2 = vadd.f32 %v8072_v9, %v8070_v33 }
 0x6ad   :  { %8069 = vst [vmem:[%s15251_s12 + $0x18] sm:$0xff] %v8065_v15  ;;  %s8744_s12 = smov [#allocation2]  }
 0x6ae   :  { %v8075_v30 = vrot.slane %v8074_v2, 4  ;;  %s8119_s7 = sshll.u32 %s8744_s12, 4  ;;  %s8120_s7 = int_to_ptr.vmem [resolvable:$true] %s8119_s7 }
 0x6af   :  { %s8719_s29 = scalar_lea.vmem %s8120_s7, 32  ;;  %p8724_p1 = scmp.lt.s32.totalorder %s8120_s7, %s8120_s7 }
 0x6b0   :  { %v8076_v21 = vadd.f32 %v8075_v30, %v8074_v2  ;;  %p8720_p0 = scmp.ne.s32.totalorder %s8120_s7, %s8719_s29  ;;  %p8725_p2 = scmp.lt.s32.totalorder %s8719_s29, %s8719_s29 }
 0x6b2   :  { %v8077_v43 = vrot.slane %v8076_v21, 2  ;;  %p8726_p3 = por %p8725_p2, %p8724_p1 }
 0x6b4   :  { %v8078_v14 = vadd.f32 %v8077_v43, %v8076_v21  ;;  %p8727_p4 = pnand %p8726_p3, %p8720_p0 }
 0x6b6   :  { %v8079_v46 = vrot.slane %v8078_v14, 1 }
 0x6b8   :  { %v8080_v58 = vadd.f32 %v8079_v46, %v8078_v14 }
 0x6b9   :  { %v8714_v0 = vpop.eup %8713 }
 0x6ba   :  { %v8061_v4 = vmul.f32 0.6931472, %v8714_v0 }
 0x6bc   :  { %v8073_v45 = vsel %vm1469_vm5, %v8061_v4, 0.0 }
 0x6bd   :  { %v8081_v36 = vadd.f32 %v8073_v45, %v8071_v40 }
 0x6bf   :  { %v8082_v51 = vrot.slane %v8081_v36, 4 }
 0x6c1   :  { %v8083_v32 = vadd.f32 %v8082_v51, %v8081_v36 }
 0x6c3   :  { %v8084_v6 = vrot.slane %v8083_v32, 2 }
 0x6c5   :  { %v8085_v33 = vadd.f32 %v8084_v6, %v8083_v32 }
 0x6c7   :  { %v8086_v10 = vrot.slane %v8085_v33, 1 }
 0x6c9   :  { %v8087_v63 = vadd.f32 %v8086_v10, %v8085_v33 }
 0x6cb   :  { %v8090_v35 = vcombine.low %v8080_v58, %v8087_v63 }
 0x6cd   :  { %v8097_v23 = vrot.slane %v8090_v35, %v8096_v62 }
 0x6cf   :  { %v8104_v40 = vrot.slane %v8097_v23, %v8096_v62 }
 0x6d1   :  { %8110 = vst.msk [vmem:[#allocation2] sm:$0x3] %vm8108_vm13, %v8104_v40 }
 0x6d2   :  { %8730 = shalt.err (!%p8727_p4)
}
 0x6d3   :  { %8122 = dma.vmem_to_hbm [thread:$0]  %s8120_s7, 32, %s15252_s13, [#allocation3]  }
 0x6d4   :  { %8739 = dma.done.wait [#allocation3], 32  }
 0x6d5   :  { %8740 = vsyncadd [#allocation3], 4294967264 }
 0x6d6   :  { %8128 = vsyncpa [#allocation3], 1 }

</bundles_post_ra>
